<compile_context>
chip_gen: v7x
topology: tpu7x:2x2x1
jax: 0.10.0
libtpu: 0.0.40
codegen_flags: <defaults>
</compile_context>

<pallas_src>
import functools

import jax
import jax.numpy as jnp
from jax.experimental import pallas as pl
from jax.experimental.pallas import tpu as pltpu

BN_EPS = 1e-5          # nn.BatchNorm2d default
LANE = 128             # TPU lane width; channel padding target
TH = 8                 # output rows per conv grid step (must be even)
TM_ELEM = 512          # rows per grid step for the elementwise epilogue


def _round_up(x, m):
    return ((x + m - 1) // m) * m


def _pad_last(a, target):
    pad = target - a.shape[-1]
    if pad == 0:
        return a
    return jnp.pad(a, [(0, 0)] * (a.ndim - 1) + [(0, pad)])


# ---------------------------------------------------------------------------
# Kernel 1: row-blocked 3x3 conv (dx-packed K=3*Cin_p matmuls) + bias,
# optional fused BN-apply+ReLU of the *previous* layer on the input, and
# fused per-batch BatchNorm batch statistics on the output.
# ---------------------------------------------------------------------------
def _conv3x3_bn_stats_kernel(main_ref, tail_ref, w_ref, b_ref, isc_ref, ish_ref,
                             y_ref, sum_ref, sq_ref, *,
                             th, w, h, apply_input_bn):
    j = pl.program_id(1)

    # Per-batch stats accumulators are revisited across the row-block axis only.
    @pl.when(j == 0)
    def _():
        sum_ref[...] = jnp.zeros_like(sum_ref)
        sq_ref[...] = jnp.zeros_like(sq_ref)

    # Assemble the (TH+2)-row halo block from the TH-row main block plus the
    # 2-row tail block (input rows read ~ (TH+2)/TH times instead of 3x).
    blk = jnp.concatenate([main_ref[...], tail_ref[...]], axis=0)  # (th+2, w+2, cin_p)

    if apply_input_bn:
        # Fused BatchNorm-apply + ReLU of the previous layer on the loaded
        # activation.  The spatial halo (and divisibility-padding rows) must be
        # re-zeroed AFTER the affine: relu(0*scale + shift) != 0 in general.
        z = jnp.maximum(
            blk.astype(jnp.float32) * isc_ref[...].reshape(1, 1, -1)
            + ish_ref[...].reshape(1, 1, -1), 0.0)
        row = j * th + jax.lax.broadcasted_iota(jnp.int32, z.shape, 0)
        col = jax.lax.broadcasted_iota(jnp.int32, z.shape, 1)
        interior = (row >= 1) & (row <= h) & (col >= 1) & (col <= w)
        blk = jnp.where(interior, z, 0.0).astype(blk.dtype)

    cin_p = blk.shape[-1]
    cout_p = y_ref.shape[-1]

    acc = jnp.zeros((th * w, cout_p), jnp.float32)
    for dy in range(3):
        slab = blk[dy:dy + th]                                      # (th, w+2, cin_p)
        # Pack the three dx taps along K -> one matmul with K = 3*Cin_p per dy.
        lhs = jnp.concatenate([slab[:, dx:dx + w, :] for dx in range(3)],
                              axis=-1)                              # (th, w, 3*cin_p)
        acc += jnp.dot(lhs.reshape(th * w, 3 * cin_p), w_ref[dy],
                       preferred_element_type=jnp.float32)

    y = acc + b_ref[...]                                            # (th*w, cout_p) f32
    y_ref[...] = y.astype(y_ref.dtype)

    # BN batch-stat reduction (rows past H are divisibility padding: excluded).
    n_valid = (h - j * th) * w
    q = jax.lax.broadcasted_iota(jnp.int32, y.shape, 0)
    yv = jnp.where(q < n_valid, y, 0.0)
    sum_ref[...] += jnp.sum(yv, axis=0, keepdims=True)
    sq_ref[...] += jnp.sum(yv * yv, axis=0, keepdims=True)


def conv3x3_bn_stats(x_pad, w_packed, bias, in_scale, in_shift, *,
                     n, h, w, cin_p, cout_p, th=TH, apply_input_bn=False):
    """x_pad: (N, Hp+2, W+2, Cin_p) zero-padded; w_packed: (3, 3*Cin_p, Cout_p);
    bias/in_scale/in_shift: (1, C).  Returns (y (N, Hp*W, Cout_p), per-batch
    channel sums (N,1,Cout_p), per-batch channel sum-of-squares (N,1,Cout_p))."""
    assert th % 2 == 0
    nb = pl.cdiv(h, th)
    wp2 = w + 2
    kernel = functools.partial(_conv3x3_bn_stats_kernel,
                               th=th, w=w, h=h, apply_input_bn=apply_input_bn)
    return pl.pallas_call(
        kernel,
        out_shape=(
            jax.ShapeDtypeStruct((n, nb * th * w, cout_p), jnp.float32),
            jax.ShapeDtypeStruct((n, 1, cout_p), jnp.float32),
            jax.ShapeDtypeStruct((n, 1, cout_p), jnp.float32),
        ),
        grid=(n, nb),
        in_specs=[
            # TH-row main halo block and 2-row tail block of the same array.
            pl.BlockSpec((None, th, wp2, cin_p), lambda i, j: (i, j, 0, 0)),
            pl.BlockSpec((None, 2, wp2, cin_p),
                         lambda i, j: (i, (j + 1) * (th // 2), 0, 0)),
            pl.BlockSpec((3, 3 * cin_p, cout_p), lambda i, j: (0, 0, 0)),
            pl.BlockSpec((1, cout_p), lambda i, j: (0, 0)),
            pl.BlockSpec((1, cin_p), lambda i, j: (0, 0)),
            pl.BlockSpec((1, cin_p), lambda i, j: (0, 0)),
        ],
        out_specs=(
            pl.BlockSpec((None, th * w, cout_p), lambda i, j: (i, j, 0)),
            pl.BlockSpec((None, 1, cout_p), lambda i, j: (i, 0, 0)),
            pl.BlockSpec((None, 1, cout_p), lambda i, j: (i, 0, 0)),
        ),
        compiler_params=pltpu.CompilerParams(
            # Stats are per-batch -> batch axis can run on both v7x TensorCores.
            dimension_semantics=("parallel", "arbitrary"),
            vmem_limit_bytes=32 * 1024 * 1024,
        ),
    )(x_pad, x_pad, w_packed, bias, in_scale, in_shift)


# ---------------------------------------------------------------------------
# Kernel 2: fused BN-apply + ReLU + channel log_softmax (final epilogue)
# ---------------------------------------------------------------------------
def _bn_relu_logsoftmax_kernel(y_ref, scale_ref, shift_ref, o_ref, *, n_valid):
    z = jnp.maximum(y_ref[...].astype(jnp.float32) * scale_ref[...]
                    + shift_ref[...], 0.0)
    lane = jax.lax.broadcasted_iota(jnp.int32, z.shape, 1)
    valid = lane < n_valid                       # mask out padded channels
    zm = jnp.where(valid, z, jnp.float32(-1e30))
    mx = jnp.max(zm, axis=-1, keepdims=True)
    s = jnp.sum(jnp.where(valid, jnp.exp(zm - mx), 0.0), axis=-1, keepdims=True)
    o_ref[...] = z - mx - jnp.log(s)


def bn_relu_logsoftmax(y, scale, shift, n_valid, *, tm=TM_ELEM):
    m, c = y.shape
    tm = min(tm, _round_up(m, 8))
    kernel = functools.partial(_bn_relu_logsoftmax_kernel, n_valid=n_valid)
    return pl.pallas_call(
        kernel,
        out_shape=jax.ShapeDtypeStruct((m, c), jnp.float32),
        grid=(pl.cdiv(m, tm),),
        in_specs=[pl.BlockSpec((tm, c), lambda i: (i, 0)),
                  pl.BlockSpec((1, c), lambda i: (0, 0)),
                  pl.BlockSpec((1, c), lambda i: (0, 0))],
        out_specs=pl.BlockSpec((tm, c), lambda i: (i, 0)),
        compiler_params=pltpu.CompilerParams(
            dimension_semantics=("parallel",),
            vmem_limit_bytes=32 * 1024 * 1024),
    )(y, scale, shift)


# ---------------------------------------------------------------------------
# Full forward of `Out` (DoubleConv + log_softmax over channels)
# ---------------------------------------------------------------------------
def out_forward(x_nchw, params, compute_dtype=jnp.float32):
    """params: [(conv_w (Cout,Cin,3,3), conv_b (Cout,), gamma (Cout,), beta (Cout,)), ...]
    compute_dtype: matmul operand dtype (bf16 supported on v5e/v6e/v7x)."""
    n, _, h, w = x_nchw.shape
    cnt = n * h * w
    nb = (h + TH - 1) // TH
    hp = nb * TH
    act = jnp.transpose(x_nchw, (0, 2, 3, 1)).astype(jnp.float32)     # NHWC
    n_layers = len(params)

    in_scale = in_shift = None
    out = None
    for li, (cw, cb, gamma, beta) in enumerate(params):
        co, ci = int(cw.shape[0]), int(cw.shape[1])
        cip = _round_up(ci, LANE)
        cop = _round_up(co, LANE)

        # Channel pad (lane-dense) + spatial halo (+ rows to a TH multiple).
        # NOTE: this jnp.pad is one extra HBM copy of the activation per layer.
        a = _pad_last(act, cip)
        x_pad = jnp.pad(a, ((0, 0), (1, hp + 1 - h), (1, 1), (0, 0)))

        # Weights packed with dx along K: (3, 3*Cin_p, Cout_p), K = dx*Cin_p+ci.
        w_hwio = jnp.transpose(cw, (2, 3, 1, 0)).astype(jnp.float32)  # (3,3,ci,co)
        w_hwio = jnp.pad(w_hwio, ((0, 0), (0, 0), (0, cip - ci), (0, cop - co)))
        w_packed = w_hwio.reshape(3, 3 * cip, cop)
        b_p = _pad_last(cb.reshape(1, co).astype(jnp.float32), cop)
        g_p = _pad_last(gamma.reshape(1, co).astype(jnp.float32), cop)
        be_p = _pad_last(beta.reshape(1, co).astype(jnp.float32), cop)

        if li == 0:
            in_scale = jnp.ones((1, cip), jnp.float32)   # unused (no fused BN)
            in_shift = jnp.zeros((1, cip), jnp.float32)

        y, s, sq = conv3x3_bn_stats(
            x_pad.astype(compute_dtype), w_packed.astype(compute_dtype), b_p,
            in_scale, in_shift,
            n=n, h=h, w=w, cin_p=cip, cout_p=cop, th=TH,
            apply_input_bn=(li > 0))

        # BatchNorm (training-mode batch statistics) -> per-channel affine.
        mean = jnp.sum(s, axis=0) / cnt                   # (1, cop)
        var = jnp.sum(sq, axis=0) / cnt - mean * mean
        invstd = jax.lax.rsqrt(var + BN_EPS)
        scale = g_p * invstd
        shift = be_p - mean * scale

        y4 = y.reshape(n, hp, w, cop)[:, :h]              # drop divisibility rows
        if li < n_layers - 1:
            # BN-apply + ReLU is fused into the NEXT conv's input path.
            act = y4
            in_scale, in_shift = scale, shift
        else:
            z = bn_relu_logsoftmax(y4.reshape(cnt, cop), scale, shift, n_valid=co)
            out = z[:, :co].reshape(n, h, w, co)
    return jnp.transpose(out, (0, 3, 1, 2))               # back to NCHW


# ---------------------------------------------------------------------------
# Pure-JAX reference (for correctness checking)
# ---------------------------------------------------------------------------
def reference_out(x_nchw, params):
    x = x_nchw.astype(jnp.float32)
    for (cw, cb, gamma, beta) in params:
        x = jax.lax.conv_general_dilated(
            x, cw, window_strides=(1, 1), padding=((1, 1), (1, 1)),
            dimension_numbers=("NCHW", "OIHW", "NCHW"))
        x = x + cb[None, :, None, None]
        mean = jnp.mean(x, axis=(0, 2, 3), keepdims=True)
        var = jnp.mean((x - mean) ** 2, axis=(0, 2, 3), keepdims=True)
        x = (x - mean) * jax.lax.rsqrt(var + BN_EPS)
        x = x * gamma[None, :, None, None] + beta[None, :, None, None]
        x = jnp.maximum(x, 0.0)
    return jax.nn.log_softmax(x, axis=1)


if __name__ == "__main__":
    key = jax.random.PRNGKey(0)
    in_channels, out_channels = 4, 8
    N, H, W = 2, 16, 16

    k_x, k_w1, k_b1, k_w2, k_b2 = jax.random.split(key, 5)
    x = jax.random.normal(k_x, (N, in_channels, H, W), dtype=jnp.float32)

    # nn.Conv2d / nn.BatchNorm2d shapes; a fresh BatchNorm2d has weight=1,
    # bias=0 and (training mode) normalizes with batch statistics.
    w1 = jax.random.normal(k_w1, (out_channels, in_channels, 3, 3), jnp.float32) * 0.1
    b1 = jax.random.normal(k_b1, (out_channels,), jnp.float32) * 0.1
    g1 = jnp.ones((out_channels,), jnp.float32)
    be1 = jnp.zeros((out_channels,), jnp.float32)

    w2 = jax.random.normal(k_w2, (out_channels, out_channels, 3, 3), jnp.float32) * 0.1
    b2 = jax.random.normal(k_b2, (out_channels,), jnp.float32) * 0.1
    g2 = jnp.ones((out_channels,), jnp.float32)
    be2 = jnp.zeros((out_channels,), jnp.float32)

    params = [(w1, b1, g1, be1), (w2, b2, g2, be2)]

    fwd = jax.jit(lambda xx: out_forward(xx, params))
    out = jax.block_until_ready(fwd(x))

    ref = jax.block_until_ready(reference_out(x, params))
    assert out.shape == (N, out_channels, H, W)
    assert jnp.allclose(out, ref, atol=1e-3, rtol=1e-3), "mismatch vs reference"

    print("KERNEL_OK")
</pallas_src>

<mosaic_0001>
module attributes {stable_mosaic.version = 11 : i64} {
  func.func @_conv3x3_bn_stats_kernel(%arg0: i32, %arg1: i32, %arg2: memref<1x8x18x128xf32, #tpu.memory_space<vmem>>, %arg3: memref<1x2x18x128xf32, #tpu.memory_space<vmem>>, %arg4: memref<3x384x128xf32, #tpu.memory_space<vmem>>, %arg5: memref<1x128xf32, #tpu.memory_space<vmem>>, %arg6: memref<1x128xf32, #tpu.memory_space<vmem>>, %arg7: memref<1x128xf32, #tpu.memory_space<vmem>>, %arg8: memref<1x128x128xf32, #tpu.memory_space<vmem>>, %arg9: memref<1x1x128xf32, #tpu.memory_space<vmem>>, %arg10: memref<1x1x128xf32, #tpu.memory_space<vmem>>) attributes {dimension_semantics = [#tpu.dimension_semantics<parallel>, #tpu.dimension_semantics<arbitrary>], iteration_bounds = array<i64: 2, 2>, scalar_prefetch = 0 : i64, scratch_operands = 0 : i64, tpu.core_type = #tpu.core_type<tc>, window_params = [{transform_indices = @transform_0, window_bounds = array<i64: 1, 8, 18, 128>}, {transform_indices = @transform_1, window_bounds = array<i64: 1, 2, 18, 128>}, {pipeline_mode = #tpu.pipeline_mode<synchronous>, transform_indices = @transform_2, window_bounds = array<i64: 3, 384, 128>}, {pipeline_mode = #tpu.pipeline_mode<synchronous>, transform_indices = @transform_3, window_bounds = array<i64: 1, 128>}, {pipeline_mode = #tpu.pipeline_mode<synchronous>, transform_indices = @transform_4, window_bounds = array<i64: 1, 128>}, {pipeline_mode = #tpu.pipeline_mode<synchronous>, transform_indices = @transform_5, window_bounds = array<i64: 1, 128>}, {transform_indices = @transform_6, window_bounds = array<i64: 1, 128, 128>}, {transform_indices = @transform_7, window_bounds = array<i64: 1, 1, 128>}, {transform_indices = @transform_8, window_bounds = array<i64: 1, 1, 128>}]} {
    %c0_i32 = arith.constant 0 : i32
    %0 = arith.cmpi eq, %arg1, %c0_i32 : i32
    %1 = arith.extui %0 : i1 to i32
    %c0_i32_0 = arith.constant 0 : i32
    %2 = arith.cmpi ne, %1, %c0_i32_0 : i32
    scf.if %2 {
      %cst_39 = arith.constant 0.000000e+00 : f32
      %70 = vector.broadcast %cst_39 : f32 to vector<1x128xf32>
      %c0_40 = arith.constant 0 : index
      %c0_41 = arith.constant 0 : index
      %c0_42 = arith.constant 0 : index
      %71 = vector.load %arg9[%c0_40, %c0_41, %c0_42] : memref<1x1x128xf32, #tpu.memory_space<vmem>>, vector<1x1x128xf32>
      %72 = vector.shape_cast %71 : vector<1x1x128xf32> to vector<1x128xf32>
      %73 = vector.shape_cast %70 : vector<1x128xf32> to vector<1x1x128xf32>
      tpu.vector_store %arg9[%c0_40, %c0_41, %c0_42], %73 {strides = array<i32>} : memref<1x1x128xf32, #tpu.memory_space<vmem>>, vector<1x1x128xf32>,
      %cst_43 = arith.constant 0.000000e+00 : f32
      %74 = vector.broadcast %cst_43 : f32 to vector<1x128xf32>
      %c0_44 = arith.constant 0 : index
      %c0_45 = arith.constant 0 : index
      %c0_46 = arith.constant 0 : index
      %75 = vector.load %arg10[%c0_44, %c0_45, %c0_46] : memref<1x1x128xf32, #tpu.memory_space<vmem>>, vector<1x1x128xf32>
      %76 = vector.shape_cast %75 : vector<1x1x128xf32> to vector<1x128xf32>
      %77 = vector.shape_cast %74 : vector<1x128xf32> to vector<1x1x128xf32>
      tpu.vector_store %arg10[%c0_44, %c0_45, %c0_46], %77 {strides = array<i32>} : memref<1x1x128xf32, #tpu.memory_space<vmem>>, vector<1x1x128xf32>,
    } else {
    }
    %c0 = arith.constant 0 : index
    %c0_1 = arith.constant 0 : index
    %c0_2 = arith.constant 0 : index
    %c0_3 = arith.constant 0 : index
    %3 = vector.load %arg2[%c0, %c0_1, %c0_2, %c0_3] : memref<1x8x18x128xf32, #tpu.memory_space<vmem>>, vector<1x8x18x128xf32>
    %4 = vector.shape_cast %3 : vector<1x8x18x128xf32> to vector<8x18x128xf32>
    %c0_4 = arith.constant 0 : index
    %c0_5 = arith.constant 0 : index
    %c0_6 = arith.constant 0 : index
    %c0_7 = arith.constant 0 : index
    %5 = vector.load %arg3[%c0_4, %c0_5, %c0_6, %c0_7] : memref<1x2x18x128xf32, #tpu.memory_space<vmem>>, vector<1x2x18x128xf32>
    %6 = vector.shape_cast %5 : vector<1x2x18x128xf32> to vector<2x18x128xf32>
    %7 = tpu.concatenate %4, %6 in 0 : vector<8x18x128xf32>, vector<2x18x128xf32> -> vector<10x18x128xf32>
    %cst = arith.constant 0.000000e+00 : f32
    %8 = vector.broadcast %cst : f32 to vector<128x128xf32>
    %9 = vector.extract_strided_slice %7 {offsets = [0, 0, 0], sizes = [8, 18, 128], strides = [1, 1, 1]} : vector<10x18x128xf32> to vector<8x18x128xf32>
    %10 = vector.extract_strided_slice %9 {offsets = [0, 0, 0], sizes = [8, 16, 128], strides = [1, 1, 1]} : vector<8x18x128xf32> to vector<8x16x128xf32>
    %11 = vector.extract_strided_slice %9 {offsets = [0, 1, 0], sizes = [8, 16, 128], strides = [1, 1, 1]} : vector<8x18x128xf32> to vector<8x16x128xf32>
    %12 = vector.extract_strided_slice %9 {offsets = [0, 2, 0], sizes = [8, 16, 128], strides = [1, 1, 1]} : vector<8x18x128xf32> to vector<8x16x128xf32>
    %13 = tpu.concatenate %10, %11, %12 in 2 : vector<8x16x128xf32>, vector<8x16x128xf32>, vector<8x16x128xf32> -> vector<8x16x384xf32>
    %14 = vector.shape_cast %13 : vector<8x16x384xf32> to vector<128x384xf32>
    %c0_8 = arith.constant 0 : index
    %c0_9 = arith.constant 0 : index
    %c0_10 = arith.constant 0 : index
    %15 = vector.load %arg4[%c0_8, %c0_9, %c0_10] : memref<3x384x128xf32, #tpu.memory_space<vmem>>, vector<1x384x128xf32>
    %16 = vector.shape_cast %15 : vector<1x384x128xf32> to vector<384x128xf32>
    %cst_11 = arith.constant dense<0.000000e+00> : vector<128x128xf32>
    %17 = tpu.matmul %14, %16, %cst_11 {dimension_numbers = #tpu.dot_dimension_numbers<[1], [0], [0], [1], [0, 0, 1, 1], [], []>} : vector<128x384xf32>, vector<384x128xf32>, vector<128x128xf32> -> vector<128x128xf32>
    %18 = arith.addf %8, %17 : vector<128x128xf32>
    %19 = vector.extract_strided_slice %7 {offsets = [1, 0, 0], sizes = [8, 18, 128], strides = [1, 1, 1]} : vector<10x18x128xf32> to vector<8x18x128xf32>
    %20 = vector.extract_strided_slice %19 {offsets = [0, 0, 0], sizes = [8, 16, 128], strides = [1, 1, 1]} : vector<8x18x128xf32> to vector<8x16x128xf32>
    %21 = vector.extract_strided_slice %19 {offsets = [0, 1, 0], sizes = [8, 16, 128], strides = [1, 1, 1]} : vector<8x18x128xf32> to vector<8x16x128xf32>
    %22 = vector.extract_strided_slice %19 {offsets = [0, 2, 0], sizes = [8, 16, 128], strides = [1, 1, 1]} : vector<8x18x128xf32> to vector<8x16x128xf32>
    %23 = tpu.concatenate %20, %21, %22 in 2 : vector<8x16x128xf32>, vector<8x16x128xf32>, vector<8x16x128xf32> -> vector<8x16x384xf32>
    %24 = vector.shape_cast %23 : vector<8x16x384xf32> to vector<128x384xf32>
    %c1 = arith.constant 1 : index
    %c0_12 = arith.constant 0 : index
    %c0_13 = arith.constant 0 : index
    %25 = vector.load %arg4[%c1, %c0_12, %c0_13] : memref<3x384x128xf32, #tpu.memory_space<vmem>>, vector<1x384x128xf32>
    %26 = vector.shape_cast %25 : vector<1x384x128xf32> to vector<384x128xf32>
    %cst_14 = arith.constant dense<0.000000e+00> : vector<128x128xf32>
    %27 = tpu.matmul %24, %26, %cst_14 {dimension_numbers = #tpu.dot_dimension_numbers<[1], [0], [0], [1], [0, 0, 1, 1], [], []>} : vector<128x384xf32>, vector<384x128xf32>, vector<128x128xf32> -> vector<128x128xf32>
    %28 = arith.addf %18, %27 : vector<128x128xf32>
    %29 = vector.extract_strided_slice %7 {offsets = [2, 0, 0], sizes = [8, 18, 128], strides = [1, 1, 1]} : vector<10x18x128xf32> to vector<8x18x128xf32>
    %30 = vector.extract_strided_slice %29 {offsets = [0, 0, 0], sizes = [8, 16, 128], strides = [1, 1, 1]} : vector<8x18x128xf32> to vector<8x16x128xf32>
    %31 = vector.extract_strided_slice %29 {offsets = [0, 1, 0], sizes = [8, 16, 128], strides = [1, 1, 1]} : vector<8x18x128xf32> to vector<8x16x128xf32>
    %32 = vector.extract_strided_slice %29 {offsets = [0, 2, 0], sizes = [8, 16, 128], strides = [1, 1, 1]} : vector<8x18x128xf32> to vector<8x16x128xf32>
    %33 = tpu.concatenate %30, %31, %32 in 2 : vector<8x16x128xf32>, vector<8x16x128xf32>, vector<8x16x128xf32> -> vector<8x16x384xf32>
    %34 = vector.shape_cast %33 : vector<8x16x384xf32> to vector<128x384xf32>
    %c2 = arith.constant 2 : index
    %c0_15 = arith.constant 0 : index
    %c0_16 = arith.constant 0 : index
    %35 = vector.load %arg4[%c2, %c0_15, %c0_16] : memref<3x384x128xf32, #tpu.memory_space<vmem>>, vector<1x384x128xf32>
    %36 = vector.shape_cast %35 : vector<1x384x128xf32> to vector<384x128xf32>
    %cst_17 = arith.constant dense<0.000000e+00> : vector<128x128xf32>
    %37 = tpu.matmul %34, %36, %cst_17 {dimension_numbers = #tpu.dot_dimension_numbers<[1], [0], [0], [1], [0, 0, 1, 1], [], []>} : vector<128x384xf32>, vector<384x128xf32>, vector<128x128xf32> -> vector<128x128xf32>
    %38 = arith.addf %28, %37 : vector<128x128xf32>
    %c0_18 = arith.constant 0 : index
    %c0_19 = arith.constant 0 : index
    %39 = vector.load %arg5[%c0_18, %c0_19] : memref<1x128xf32, #tpu.memory_space<vmem>>, vector<1x128xf32>
    %40 = vector.broadcast %39 : vector<1x128xf32> to vector<128x128xf32>
    %41 = arith.addf %38, %40 : vector<128x128xf32>
    %c0_20 = arith.constant 0 : index
    %c0_21 = arith.constant 0 : index
    %c0_22 = arith.constant 0 : index
    %42 = vector.load %arg8[%c0_20, %c0_21, %c0_22] : memref<1x128x128xf32, #tpu.memory_space<vmem>>, vector<1x128x128xf32>
    %43 = vector.shape_cast %42 : vector<1x128x128xf32> to vector<128x128xf32>
    %44 = vector.shape_cast %41 : vector<128x128xf32> to vector<1x128x128xf32>
    tpu.vector_store %arg8[%c0_20, %c0_21, %c0_22], %44 {strides = array<i32>} : memref<1x128x128xf32, #tpu.memory_space<vmem>>, vector<1x128x128xf32>,
    %c8_i32 = arith.constant 8 : i32
    %45 = arith.muli %arg1, %c8_i32 : i32
    %c16_i32 = arith.constant 16 : i32
    %46 = arith.subi %c16_i32, %45 : i32
    %c16_i32_23 = arith.constant 16 : i32
    %47 = arith.muli %46, %c16_i32_23 : i32
    %48 = tpu.iota {dimensions = array<i32: 0>} : vector<128x128xi32>
    %49 = vector.broadcast %47 : i32 to vector<128x128xi32>
    %50 = arith.cmpi slt, %48, %49 : vector<128x128xi32>
    %cst_24 = arith.constant 0.000000e+00 : f32
    %51 = vector.broadcast %cst_24 : f32 to vector<128x128xf32>
    %52 = arith.select %50, %41, %51 : vector<128x128xi1>, vector<128x128xf32>
    %c0_25 = arith.constant 0 : index
    %c0_26 = arith.constant 0 : index
    %c0_27 = arith.constant 0 : index
    %53 = vector.load %arg9[%c0_25, %c0_26, %c0_27] : memref<1x1x128xf32, #tpu.memory_space<vmem>>, vector<1x1x128xf32>
    %54 = vector.shape_cast %53 : vector<1x1x128xf32> to vector<1x128xf32>
    %cst_28 = arith.constant dense<0.000000e+00> : vector<128xf32>
    %55 = vector.multi_reduction <add>, %52, %cst_28 [0] : vector<128x128xf32> to vector<128xf32>
    %56 = vector.shape_cast %55 : vector<128xf32> to vector<1x128xf32>
    %57 = arith.addf %54, %56 : vector<1x128xf32>
    %c0_29 = arith.constant 0 : index
    %c0_30 = arith.constant 0 : index
    %c0_31 = arith.constant 0 : index
    %58 = vector.load %arg9[%c0_29, %c0_30, %c0_31] : memref<1x1x128xf32, #tpu.memory_space<vmem>>, vector<1x1x128xf32>
    %59 = vector.shape_cast %58 : vector<1x1x128xf32> to vector<1x128xf32>
    %60 = vector.shape_cast %57 : vector<1x128xf32> to vector<1x1x128xf32>
    tpu.vector_store %arg9[%c0_29, %c0_30, %c0_31], %60 {strides = array<i32>} : memref<1x1x128xf32, #tpu.memory_space<vmem>>, vector<1x1x128xf32>,
    %c0_32 = arith.constant 0 : index
    %c0_33 = arith.constant 0 : index
    %c0_34 = arith.constant 0 : index
    %61 = vector.load %arg10[%c0_32, %c0_33, %c0_34] : memref<1x1x128xf32, #tpu.memory_space<vmem>>, vector<1x1x128xf32>
    %62 = vector.shape_cast %61 : vector<1x1x128xf32> to vector<1x128xf32>
    %63 = arith.mulf %52, %52 : vector<128x128xf32>
    %cst_35 = arith.constant dense<0.000000e+00> : vector<128xf32>
    %64 = vector.multi_reduction <add>, %63, %cst_35 [0] : vector<128x128xf32> to vector<128xf32>
    %65 = vector.shape_cast %64 : vector<128xf32> to vector<1x128xf32>
    %66 = arith.addf %62, %65 : vector<1x128xf32>
    %c0_36 = arith.constant 0 : index
    %c0_37 = arith.constant 0 : index
    %c0_38 = arith.constant 0 : index
    %67 = vector.load %arg10[%c0_36, %c0_37, %c0_38] : memref<1x1x128xf32, #tpu.memory_space<vmem>>, vector<1x1x128xf32>
    %68 = vector.shape_cast %67 : vector<1x1x128xf32> to vector<1x128xf32>
    %69 = vector.shape_cast %66 : vector<1x128xf32> to vector<1x1x128xf32>
    tpu.vector_store %arg10[%c0_36, %c0_37, %c0_38], %69 {strides = array<i32>} : memref<1x1x128xf32, #tpu.memory_space<vmem>>, vector<1x1x128xf32>,
    return
  }
  func.func @transform_0(%arg0: i32, %arg1: i32) -> (i32, i32, i32, i32) {
    %c0_i32 = arith.constant 0 : i32
    %c0_i32_0 = arith.constant 0 : i32
    %c0_i32_1 = arith.constant 0 : i32
    return %arg0, %arg1, %c0_i32, %c0_i32_0 : i32, i32, i32, i32
  }
  func.func @transform_1(%arg0: i32, %arg1: i32) -> (i32, i32, i32, i32) {
    %c1_i32 = arith.constant 1 : i32
    %0 = arith.addi %arg1, %c1_i32 : i32
    %c4_i32 = arith.constant 4 : i32
    %1 = arith.muli %0, %c4_i32 : i32
    %c0_i32 = arith.constant 0 : i32
    %c0_i32_0 = arith.constant 0 : i32
    %c0_i32_1 = arith.constant 0 : i32
    return %arg0, %1, %c0_i32, %c0_i32_0 : i32, i32, i32, i32
  }
  func.func @transform_2(%arg0: i32, %arg1: i32) -> (i32, i32, i32) {
    %c0_i32 = arith.constant 0 : i32
    %c0_i32_0 = arith.constant 0 : i32
    %c0_i32_1 = arith.constant 0 : i32
    %c0_i32_2 = arith.constant 0 : i32
    return %c0_i32, %c0_i32_0, %c0_i32_1 : i32, i32, i32
  }
  func.func @transform_3(%arg0: i32, %arg1: i32) -> (i32, i32) {
    %c0_i32 = arith.constant 0 : i32
    %c0_i32_0 = arith.constant 0 : i32
    %c0_i32_1 = arith.constant 0 : i32
    return %c0_i32, %c0_i32_0 : i32, i32
  }
  func.func @transform_4(%arg0: i32, %arg1: i32) -> (i32, i32) {
    %c0_i32 = arith.constant 0 : i32
    %c0_i32_0 = arith.constant 0 : i32
    %c0_i32_1 = arith.constant 0 : i32
    return %c0_i32, %c0_i32_0 : i32, i32
  }
  func.func @transform_5(%arg0: i32, %arg1: i32) -> (i32, i32) {
    %c0_i32 = arith.constant 0 : i32
    %c0_i32_0 = arith.constant 0 : i32
    %c0_i32_1 = arith.constant 0 : i32
    return %c0_i32, %c0_i32_0 : i32, i32
  }
  func.func @transform_6(%arg0: i32, %arg1: i32) -> (i32, i32, i32) {
    %c0_i32 = arith.constant 0 : i32
    %c0_i32_0 = arith.constant 0 : i32
    return %arg0, %arg1, %c0_i32 : i32, i32, i32
  }
  func.func @transform_7(%arg0: i32, %arg1: i32) -> (i32, i32, i32) {
    %c0_i32 = arith.constant 0 : i32
    %c0_i32_0 = arith.constant 0 : i32
    %c0_i32_1 = arith.constant 0 : i32
    return %arg0, %c0_i32, %c0_i32_0 : i32, i32, i32
  }
  func.func @transform_8(%arg0: i32, %arg1: i32) -> (i32, i32, i32) {
    %c0_i32 = arith.constant 0 : i32
    %c0_i32_0 = arith.constant 0 : i32
    %c0_i32_1 = arith.constant 0 : i32
    return %arg0, %c0_i32, %c0_i32_0 : i32, i32, i32
  }
}

module attributes {stable_mosaic.version = 11 : i64} {
  func.func @_conv3x3_bn_stats_kernel(%arg0: i32, %arg1: i32, %arg2: memref<1x8x18x128xf32, #tpu.memory_space<vmem>>, %arg3: memref<1x2x18x128xf32, #tpu.memory_space<vmem>>, %arg4: memref<3x384x128xf32, #tpu.memory_space<vmem>>, %arg5: memref<1x128xf32, #tpu.memory_space<vmem>>, %arg6: memref<1x128xf32, #tpu.memory_space<vmem>>, %arg7: memref<1x128xf32, #tpu.memory_space<vmem>>, %arg8: memref<1x128x128xf32, #tpu.memory_space<vmem>>, %arg9: memref<1x1x128xf32, #tpu.memory_space<vmem>>, %arg10: memref<1x1x128xf32, #tpu.memory_space<vmem>>) attributes {dimension_semantics = [#tpu.dimension_semantics<parallel>, #tpu.dimension_semantics<arbitrary>], iteration_bounds = array<i64: 2, 2>, scalar_prefetch = 0 : i64, scratch_operands = 0 : i64, tpu.core_type = #tpu.core_type<tc>, window_params = [{transform_indices = @transform_0, window_bounds = array<i64: 1, 8, 18, 128>}, {transform_indices = @transform_1, window_bounds = array<i64: 1, 2, 18, 128>}, {pipeline_mode = #tpu.pipeline_mode<synchronous>, transform_indices = @transform_2, window_bounds = array<i64: 3, 384, 128>}, {pipeline_mode = #tpu.pipeline_mode<synchronous>, transform_indices = @transform_3, window_bounds = array<i64: 1, 128>}, {pipeline_mode = #tpu.pipeline_mode<synchronous>, transform_indices = @transform_4, window_bounds = array<i64: 1, 128>}, {pipeline_mode = #tpu.pipeline_mode<synchronous>, transform_indices = @transform_5, window_bounds = array<i64: 1, 128>}, {transform_indices = @transform_6, window_bounds = array<i64: 1, 128, 128>}, {transform_indices = @transform_7, window_bounds = array<i64: 1, 1, 128>}, {transform_indices = @transform_8, window_bounds = array<i64: 1, 1, 128>}]} {
    %c0_i32 = arith.constant 0 : i32
    %0 = arith.cmpi eq, %arg1, %c0_i32 : i32
    %1 = arith.extui %0 : i1 to i32
    %c0_i32_0 = arith.constant 0 : i32
    %2 = arith.cmpi ne, %1, %c0_i32_0 : i32
    scf.if %2 {
      %cst_49 = arith.constant 0.000000e+00 : f32
      %98 = vector.broadcast %cst_49 : f32 to vector<1x128xf32>
      %c0_50 = arith.constant 0 : index
      %c0_51 = arith.constant 0 : index
      %c0_52 = arith.constant 0 : index
      %99 = vector.load %arg9[%c0_50, %c0_51, %c0_52] : memref<1x1x128xf32, #tpu.memory_space<vmem>>, vector<1x1x128xf32>
      %100 = vector.shape_cast %99 : vector<1x1x128xf32> to vector<1x128xf32>
      %101 = vector.shape_cast %98 : vector<1x128xf32> to vector<1x1x128xf32>
      tpu.vector_store %arg9[%c0_50, %c0_51, %c0_52], %101 {strides = array<i32>} : memref<1x1x128xf32, #tpu.memory_space<vmem>>, vector<1x1x128xf32>,
      %cst_53 = arith.constant 0.000000e+00 : f32
      %102 = vector.broadcast %cst_53 : f32 to vector<1x128xf32>
      %c0_54 = arith.constant 0 : index
      %c0_55 = arith.constant 0 : index
      %c0_56 = arith.constant 0 : index
      %103 = vector.load %arg10[%c0_54, %c0_55, %c0_56] : memref<1x1x128xf32, #tpu.memory_space<vmem>>, vector<1x1x128xf32>
      %104 = vector.shape_cast %103 : vector<1x1x128xf32> to vector<1x128xf32>
      %105 = vector.shape_cast %102 : vector<1x128xf32> to vector<1x1x128xf32>
      tpu.vector_store %arg10[%c0_54, %c0_55, %c0_56], %105 {strides = array<i32>} : memref<1x1x128xf32, #tpu.memory_space<vmem>>, vector<1x1x128xf32>,
    } else {
    }
    %c0 = arith.constant 0 : index
    %c0_1 = arith.constant 0 : index
    %c0_2 = arith.constant 0 : index
    %c0_3 = arith.constant 0 : index
    %3 = vector.load %arg2[%c0, %c0_1, %c0_2, %c0_3] : memref<1x8x18x128xf32, #tpu.memory_space<vmem>>, vector<1x8x18x128xf32>
    %4 = vector.shape_cast %3 : vector<1x8x18x128xf32> to vector<8x18x128xf32>
    %c0_4 = arith.constant 0 : index
    %c0_5 = arith.constant 0 : index
    %c0_6 = arith.constant 0 : index
    %c0_7 = arith.constant 0 : index
    %5 = vector.load %arg3[%c0_4, %c0_5, %c0_6, %c0_7] : memref<1x2x18x128xf32, #tpu.memory_space<vmem>>, vector<1x2x18x128xf32>
    %6 = vector.shape_cast %5 : vector<1x2x18x128xf32> to vector<2x18x128xf32>
    %7 = tpu.concatenate %4, %6 in 0 : vector<8x18x128xf32>, vector<2x18x128xf32> -> vector<10x18x128xf32>
    %c0_8 = arith.constant 0 : index
    %c0_9 = arith.constant 0 : index
    %8 = vector.load %arg6[%c0_8, %c0_9] : memref<1x128xf32, #tpu.memory_space<vmem>>, vector<1x128xf32>
    %9 = vector.shape_cast %8 : vector<1x128xf32> to vector<1x1x128xf32>
    %10 = vector.broadcast %9 : vector<1x1x128xf32> to vector<10x18x128xf32>
    %11 = arith.mulf %7, %10 : vector<10x18x128xf32>
    %c0_10 = arith.constant 0 : index
    %c0_11 = arith.constant 0 : index
    %12 = vector.load %arg7[%c0_10, %c0_11] : memref<1x128xf32, #tpu.memory_space<vmem>>, vector<1x128xf32>
    %13 = vector.shape_cast %12 : vector<1x128xf32> to vector<1x1x128xf32>
    %14 = vector.broadcast %13 : vector<1x1x128xf32> to vector<10x18x128xf32>
    %15 = arith.addf %11, %14 : vector<10x18x128xf32>
    %cst = arith.constant 0.000000e+00 : f32
    %16 = vector.broadcast %cst : f32 to vector<10x18x128xf32>
    %17 = arith.maximumf %15, %16 : vector<10x18x128xf32>
    %c8_i32 = arith.constant 8 : i32
    %18 = arith.muli %arg1, %c8_i32 : i32
    %19 = tpu.iota {dimensions = array<i32: 0>} : vector<10x18x128xi32>
    %20 = vector.broadcast %18 : i32 to vector<10x18x128xi32>
    %21 = arith.addi %20, %19 : vector<10x18x128xi32>
    %22 = tpu.iota {dimensions = array<i32: 1>} : vector<10x18x128xi32>
    %c1_i32 = arith.constant 1 : i32
    %23 = vector.broadcast %c1_i32 : i32 to vector<10x18x128xi32>
    %24 = arith.cmpi sge, %21, %23 : vector<10x18x128xi32>
    %c16_i32 = arith.constant 16 : i32
    %25 = vector.broadcast %c16_i32 : i32 to vector<10x18x128xi32>
    %26 = arith.cmpi sle, %21, %25 : vector<10x18x128xi32>
    %27 = arith.andi %24, %26 : vector<10x18x128xi1>
    %c1_i32_12 = arith.constant 1 : i32
    %28 = vector.broadcast %c1_i32_12 : i32 to vector<10x18x128xi32>
    %29 = arith.cmpi sge, %22, %28 : vector<10x18x128xi32>
    %30 = arith.andi %27, %29 : vector<10x18x128xi1>
    %c16_i32_13 = arith.constant 16 : i32
    %31 = vector.broadcast %c16_i32_13 : i32 to vector<10x18x128xi32>
    %32 = arith.cmpi sle, %22, %31 : vector<10x18x128xi32>
    %33 = arith.andi %30, %32 : vector<10x18x128xi1>
    %cst_14 = arith.constant 0.000000e+00 : f32
    %34 = vector.broadcast %cst_14 : f32 to vector<10x18x128xf32>
    %35 = arith.select %33, %17, %34 : vector<10x18x128xi1>, vector<10x18x128xf32>
    %cst_15 = arith.constant 0.000000e+00 : f32
    %36 = vector.broadcast %cst_15 : f32 to vector<128x128xf32>
    %37 = vector.extract_strided_slice %35 {offsets = [0, 0, 0], sizes = [8, 18, 128], strides = [1, 1, 1]} : vector<10x18x128xf32> to vector<8x18x128xf32>
    %38 = vector.extract_strided_slice %37 {offsets = [0, 0, 0], sizes = [8, 16, 128], strides = [1, 1, 1]} : vector<8x18x128xf32> to vector<8x16x128xf32>
    %39 = vector.extract_strided_slice %37 {offsets = [0, 1, 0], sizes = [8, 16, 128], strides = [1, 1, 1]} : vector<8x18x128xf32> to vector<8x16x128xf32>
    %40 = vector.extract_strided_slice %37 {offsets = [0, 2, 0], sizes = [8, 16, 128], strides = [1, 1, 1]} : vector<8x18x128xf32> to vector<8x16x128xf32>
    %41 = tpu.concatenate %38, %39, %40 in 2 : vector<8x16x128xf32>, vector<8x16x128xf32>, vector<8x16x128xf32> -> vector<8x16x384xf32>
    %42 = vector.shape_cast %41 : vector<8x16x384xf32> to vector<128x384xf32>
    %c0_16 = arith.constant 0 : index
    %c0_17 = arith.constant 0 : index
    %c0_18 = arith.constant 0 : index
    %43 = vector.load %arg4[%c0_16, %c0_17, %c0_18] : memref<3x384x128xf32, #tpu.memory_space<vmem>>, vector<1x384x128xf32>
    %44 = vector.shape_cast %43 : vector<1x384x128xf32> to vector<384x128xf32>
    %cst_19 = arith.constant dense<0.000000e+00> : vector<128x128xf32>
    %45 = tpu.matmul %42, %44, %cst_19 {dimension_numbers = #tpu.dot_dimension_numbers<[1], [0], [0], [1], [0, 0, 1, 1], [], []>} : vector<128x384xf32>, vector<384x128xf32>, vector<128x128xf32> -> vector<128x128xf32>
    %46 = arith.addf %36, %45 : vector<128x128xf32>
    %47 = vector.extract_strided_slice %35 {offsets = [1, 0, 0], sizes = [8, 18, 128], strides = [1, 1, 1]} : vector<10x18x128xf32> to vector<8x18x128xf32>
    %48 = vector.extract_strided_slice %47 {offsets = [0, 0, 0], sizes = [8, 16, 128], strides = [1, 1, 1]} : vector<8x18x128xf32> to vector<8x16x128xf32>
    %49 = vector.extract_strided_slice %47 {offsets = [0, 1, 0], sizes = [8, 16, 128], strides = [1, 1, 1]} : vector<8x18x128xf32> to vector<8x16x128xf32>
    %50 = vector.extract_strided_slice %47 {offsets = [0, 2, 0], sizes = [8, 16, 128], strides = [1, 1, 1]} : vector<8x18x128xf32> to vector<8x16x128xf32>
    %51 = tpu.concatenate %48, %49, %50 in 2 : vector<8x16x128xf32>, vector<8x16x128xf32>, vector<8x16x128xf32> -> vector<8x16x384xf32>
    %52 = vector.shape_cast %51 : vector<8x16x384xf32> to vector<128x384xf32>
    %c1 = arith.constant 1 : index
    %c0_20 = arith.constant 0 : index
    %c0_21 = arith.constant 0 : index
    %53 = vector.load %arg4[%c1, %c0_20, %c0_21] : memref<3x384x128xf32, #tpu.memory_space<vmem>>, vector<1x384x128xf32>
    %54 = vector.shape_cast %53 : vector<1x384x128xf32> to vector<384x128xf32>
    %cst_22 = arith.constant dense<0.000000e+00> : vector<128x128xf32>
    %55 = tpu.matmul %52, %54, %cst_22 {dimension_numbers = #tpu.dot_dimension_numbers<[1], [0], [0], [1], [0, 0, 1, 1], [], []>} : vector<128x384xf32>, vector<384x128xf32>, vector<128x128xf32> -> vector<128x128xf32>
    %56 = arith.addf %46, %55 : vector<128x128xf32>
    %57 = vector.extract_strided_slice %35 {offsets = [2, 0, 0], sizes = [8, 18, 128], strides = [1, 1, 1]} : vector<10x18x128xf32> to vector<8x18x128xf32>
    %58 = vector.extract_strided_slice %57 {offsets = [0, 0, 0], sizes = [8, 16, 128], strides = [1, 1, 1]} : vector<8x18x128xf32> to vector<8x16x128xf32>
    %59 = vector.extract_strided_slice %57 {offsets = [0, 1, 0], sizes = [8, 16, 128], strides = [1, 1, 1]} : vector<8x18x128xf32> to vector<8x16x128xf32>
    %60 = vector.extract_strided_slice %57 {offsets = [0, 2, 0], sizes = [8, 16, 128], strides = [1, 1, 1]} : vector<8x18x128xf32> to vector<8x16x128xf32>
    %61 = tpu.concatenate %58, %59, %60 in 2 : vector<8x16x128xf32>, vector<8x16x128xf32>, vector<8x16x128xf32> -> vector<8x16x384xf32>
    %62 = vector.shape_cast %61 : vector<8x16x384xf32> to vector<128x384xf32>
    %c2 = arith.constant 2 : index
    %c0_23 = arith.constant 0 : index
    %c0_24 = arith.constant 0 : index
    %63 = vector.load %arg4[%c2, %c0_23, %c0_24] : memref<3x384x128xf32, #tpu.memory_space<vmem>>, vector<1x384x128xf32>
    %64 = vector.shape_cast %63 : vector<1x384x128xf32> to vector<384x128xf32>
    %cst_25 = arith.constant dense<0.000000e+00> : vector<128x128xf32>
    %65 = tpu.matmul %62, %64, %cst_25 {dimension_numbers = #tpu.dot_dimension_numbers<[1], [0], [0], [1], [0, 0, 1, 1], [], []>} : vector<128x384xf32>, vector<384x128xf32>, vector<128x128xf32> -> vector<128x128xf32>
    %66 = arith.addf %56, %65 : vector<128x128xf32>
    %c0_26 = arith.constant 0 : index
    %c0_27 = arith.constant 0 : index
    %67 = vector.load %arg5[%c0_26, %c0_27] : memref<1x128xf32, #tpu.memory_space<vmem>>, vector<1x128xf32>
    %68 = vector.broadcast %67 : vector<1x128xf32> to vector<128x128xf32>
    %69 = arith.addf %66, %68 : vector<128x128xf32>
    %c0_28 = arith.constant 0 : index
    %c0_29 = arith.constant 0 : index
    %c0_30 = arith.constant 0 : index
    %70 = vector.load %arg8[%c0_28, %c0_29, %c0_30] : memref<1x128x128xf32, #tpu.memory_space<vmem>>, vector<1x128x128xf32>
    %71 = vector.shape_cast %70 : vector<1x128x128xf32> to vector<128x128xf32>
    %72 = vector.shape_cast %69 : vector<128x128xf32> to vector<1x128x128xf32>
    tpu.vector_store %arg8[%c0_28, %c0_29, %c0_30], %72 {strides = array<i32>} : memref<1x128x128xf32, #tpu.memory_space<vmem>>, vector<1x128x128xf32>,
    %c8_i32_31 = arith.constant 8 : i32
    %73 = arith.muli %arg1, %c8_i32_31 : i32
    %c16_i32_32 = arith.constant 16 : i32
    %74 = arith.subi %c16_i32_32, %73 : i32
    %c16_i32_33 = arith.constant 16 : i32
    %75 = arith.muli %74, %c16_i32_33 : i32
    %76 = tpu.iota {dimensions = array<i32: 0>} : vector<128x128xi32>
    %77 = vector.broadcast %75 : i32 to vector<128x128xi32>
    %78 = arith.cmpi slt, %76, %77 : vector<128x128xi32>
    %cst_34 = arith.constant 0.000000e+00 : f32
    %79 = vector.broadcast %cst_34 : f32 to vector<128x128xf32>
    %80 = arith.select %78, %69, %79 : vector<128x128xi1>, vector<128x128xf32>
    %c0_35 = arith.constant 0 : index
    %c0_36 = arith.constant 0 : index
    %c0_37 = arith.constant 0 : index
    %81 = vector.load %arg9[%c0_35, %c0_36, %c0_37] : memref<1x1x128xf32, #tpu.memory_space<vmem>>, vector<1x1x128xf32>
    %82 = vector.shape_cast %81 : vector<1x1x128xf32> to vector<1x128xf32>
    %cst_38 = arith.constant dense<0.000000e+00> : vector<128xf32>
    %83 = vector.multi_reduction <add>, %80, %cst_38 [0] : vector<128x128xf32> to vector<128xf32>
    %84 = vector.shape_cast %83 : vector<128xf32> to vector<1x128xf32>
    %85 = arith.addf %82, %84 : vector<1x128xf32>
    %c0_39 = arith.constant 0 : index
    %c0_40 = arith.constant 0 : index
    %c0_41 = arith.constant 0 : index
    %86 = vector.load %arg9[%c0_39, %c0_40, %c0_41] : memref<1x1x128xf32, #tpu.memory_space<vmem>>, vector<1x1x128xf32>
    %87 = vector.shape_cast %86 : vector<1x1x128xf32> to vector<1x128xf32>
    %88 = vector.shape_cast %85 : vector<1x128xf32> to vector<1x1x128xf32>
    tpu.vector_store %arg9[%c0_39, %c0_40, %c0_41], %88 {strides = array<i32>} : memref<1x1x128xf32, #tpu.memory_space<vmem>>, vector<1x1x128xf32>,
    %c0_42 = arith.constant 0 : index
    %c0_43 = arith.constant 0 : index
    %c0_44 = arith.constant 0 : index
    %89 = vector.load %arg10[%c0_42, %c0_43, %c0_44] : memref<1x1x128xf32, #tpu.memory_space<vmem>>, vector<1x1x128xf32>
    %90 = vector.shape_cast %89 : vector<1x1x128xf32> to vector<1x128xf32>
    %91 = arith.mulf %80, %80 : vector<128x128xf32>
    %cst_45 = arith.constant dense<0.000000e+00> : vector<128xf32>
    %92 = vector.multi_reduction <add>, %91, %cst_45 [0] : vector<128x128xf32> to vector<128xf32>
    %93 = vector.shape_cast %92 : vector<128xf32> to vector<1x128xf32>
    %94 = arith.addf %90, %93 : vector<1x128xf32>
    %c0_46 = arith.constant 0 : index
    %c0_47 = arith.constant 0 : index
    %c0_48 = arith.constant 0 : index
    %95 = vector.load %arg10[%c0_46, %c0_47, %c0_48] : memref<1x1x128xf32, #tpu.memory_space<vmem>>, vector<1x1x128xf32>
    %96 = vector.shape_cast %95 : vector<1x1x128xf32> to vector<1x128xf32>
    %97 = vector.shape_cast %94 : vector<1x128xf32> to vector<1x1x128xf32>
    tpu.vector_store %arg10[%c0_46, %c0_47, %c0_48], %97 {strides = array<i32>} : memref<1x1x128xf32, #tpu.memory_space<vmem>>, vector<1x1x128xf32>,
    return
  }
  func.func @transform_0(%arg0: i32, %arg1: i32) -> (i32, i32, i32, i32) {
    %c0_i32 = arith.constant 0 : i32
    %c0_i32_0 = arith.constant 0 : i32
    %c0_i32_1 = arith.constant 0 : i32
    return %arg0, %arg1, %c0_i32, %c0_i32_0 : i32, i32, i32, i32
  }
  func.func @transform_1(%arg0: i32, %arg1: i32) -> (i32, i32, i32, i32) {
    %c1_i32 = arith.constant 1 : i32
    %0 = arith.addi %arg1, %c1_i32 : i32
    %c4_i32 = arith.constant 4 : i32
    %1 = arith.muli %0, %c4_i32 : i32
    %c0_i32 = arith.constant 0 : i32
    %c0_i32_0 = arith.constant 0 : i32
    %c0_i32_1 = arith.constant 0 : i32
    return %arg0, %1, %c0_i32, %c0_i32_0 : i32, i32, i32, i32
  }
  func.func @transform_2(%arg0: i32, %arg1: i32) -> (i32, i32, i32) {
    %c0_i32 = arith.constant 0 : i32
    %c0_i32_0 = arith.constant 0 : i32
    %c0_i32_1 = arith.constant 0 : i32
    %c0_i32_2 = arith.constant 0 : i32
    return %c0_i32, %c0_i32_0, %c0_i32_1 : i32, i32, i32
  }
  func.func @transform_3(%arg0: i32, %arg1: i32) -> (i32, i32) {
    %c0_i32 = arith.constant 0 : i32
    %c0_i32_0 = arith.constant 0 : i32
    %c0_i32_1 = arith.constant 0 : i32
    return %c0_i32, %c0_i32_0 : i32, i32
  }
  func.func @transform_4(%arg0: i32, %arg1: i32) -> (i32, i32) {
    %c0_i32 = arith.constant 0 : i32
    %c0_i32_0 = arith.constant 0 : i32
    %c0_i32_1 = arith.constant 0 : i32
    return %c0_i32, %c0_i32_0 : i32, i32
  }
  func.func @transform_5(%arg0: i32, %arg1: i32) -> (i32, i32) {
    %c0_i32 = arith.constant 0 : i32
    %c0_i32_0 = arith.constant 0 : i32
    %c0_i32_1 = arith.constant 0 : i32
    return %c0_i32, %c0_i32_0 : i32, i32
  }
  func.func @transform_6(%arg0: i32, %arg1: i32) -> (i32, i32, i32) {
    %c0_i32 = arith.constant 0 : i32
    %c0_i32_0 = arith.constant 0 : i32
    return %arg0, %arg1, %c0_i32 : i32, i32, i32
  }
  func.func @transform_7(%arg0: i32, %arg1: i32) -> (i32, i32, i32) {
    %c0_i32 = arith.constant 0 : i32
    %c0_i32_0 = arith.constant 0 : i32
    %c0_i32_1 = arith.constant 0 : i32
    return %arg0, %c0_i32, %c0_i32_0 : i32, i32, i32
  }
  func.func @transform_8(%arg0: i32, %arg1: i32) -> (i32, i32, i32) {
    %c0_i32 = arith.constant 0 : i32
    %c0_i32_0 = arith.constant 0 : i32
    %c0_i32_1 = arith.constant 0 : i32
    return %arg0, %c0_i32, %c0_i32_0 : i32, i32, i32
  }
}

module attributes {stable_mosaic.version = 11 : i64} {
  func.func @_bn_relu_logsoftmax_kernel(%arg0: i32, %arg1: memref<512x128xf32, #tpu.memory_space<vmem>>, %arg2: memref<1x128xf32, #tpu.memory_space<vmem>>, %arg3: memref<1x128xf32, #tpu.memory_space<vmem>>, %arg4: memref<512x128xf32, #tpu.memory_space<vmem>>) attributes {dimension_semantics = [#tpu.dimension_semantics<parallel>], iteration_bounds = array<i64: 1>, scalar_prefetch = 0 : i64, scratch_operands = 0 : i64, tpu.core_type = #tpu.core_type<tc>, window_params = [{transform_indices = @transform_0, window_bounds = array<i64: 512, 128>}, {pipeline_mode = #tpu.pipeline_mode<synchronous>, transform_indices = @transform_1, window_bounds = array<i64: 1, 128>}, {pipeline_mode = #tpu.pipeline_mode<synchronous>, transform_indices = @transform_2, window_bounds = array<i64: 1, 128>}, {transform_indices = @transform_3, window_bounds = array<i64: 512, 128>}]} {
    %c0 = arith.constant 0 : index
    %c0_0 = arith.constant 0 : index
    %0 = vector.load %arg1[%c0, %c0_0] : memref<512x128xf32, #tpu.memory_space<vmem>>, vector<512x128xf32>
    %c0_1 = arith.constant 0 : index
    %c0_2 = arith.constant 0 : index
    %1 = vector.load %arg2[%c0_1, %c0_2] : memref<1x128xf32, #tpu.memory_space<vmem>>, vector<1x128xf32>
    %2 = vector.broadcast %1 : vector<1x128xf32> to vector<512x128xf32>
    %3 = arith.mulf %0, %2 : vector<512x128xf32>
    %c0_3 = arith.constant 0 : index
    %c0_4 = arith.constant 0 : index
    %4 = vector.load %arg3[%c0_3, %c0_4] : memref<1x128xf32, #tpu.memory_space<vmem>>, vector<1x128xf32>
    %5 = vector.broadcast %4 : vector<1x128xf32> to vector<512x128xf32>
    %6 = arith.addf %3, %5 : vector<512x128xf32>
    %cst = arith.constant 0.000000e+00 : f32
    %7 = vector.broadcast %cst : f32 to vector<512x128xf32>
    %8 = arith.maximumf %6, %7 : vector<512x128xf32>
    %9 = tpu.iota {dimensions = array<i32: 1>} : vector<512x128xi32>
    %c8_i32 = arith.constant 8 : i32
    %10 = vector.broadcast %c8_i32 : i32 to vector<512x128xi32>
    %11 = arith.cmpi slt, %9, %10 : vector<512x128xi32>
    %cst_5 = arith.constant -1.000000e+30 : f32
    %12 = vector.broadcast %cst_5 : f32 to vector<512x128xf32>
    %13 = arith.select %11, %8, %12 : vector<512x128xi1>, vector<512x128xf32>
    %cst_6 = arith.constant dense<0xFF800000> : vector<512xf32>
    %14 = vector.multi_reduction <maximumf>, %13, %cst_6 [1] : vector<512x128xf32> to vector<512xf32>
    %15 = vector.shape_cast %14 : vector<512xf32> to vector<512x1xf32>
    %16 = vector.broadcast %15 : vector<512x1xf32> to vector<512x128xf32>
    %17 = arith.subf %13, %16 : vector<512x128xf32>
    %18 = math.exp %17 : vector<512x128xf32>
    %cst_7 = arith.constant 0.000000e+00 : f32
    %19 = vector.broadcast %cst_7 : f32 to vector<512x128xf32>
    %20 = arith.select %11, %18, %19 : vector<512x128xi1>, vector<512x128xf32>
    %cst_8 = arith.constant dense<0.000000e+00> : vector<512xf32>
    %21 = vector.multi_reduction <add>, %20, %cst_8 [1] : vector<512x128xf32> to vector<512xf32>
    %22 = vector.shape_cast %21 : vector<512xf32> to vector<512x1xf32>
    %23 = vector.broadcast %15 : vector<512x1xf32> to vector<512x128xf32>
    %24 = arith.subf %8, %23 : vector<512x128xf32>
    %25 = math.log %22 : vector<512x1xf32>
    %26 = vector.broadcast %25 : vector<512x1xf32> to vector<512x128xf32>
    %27 = arith.subf %24, %26 : vector<512x128xf32>
    %c0_9 = arith.constant 0 : index
    %c0_10 = arith.constant 0 : index
    %28 = vector.load %arg4[%c0_9, %c0_10] : memref<512x128xf32, #tpu.memory_space<vmem>>, vector<512x128xf32>
    tpu.vector_store %arg4[%c0_9, %c0_10], %27 {strides = array<i32>} : memref<512x128xf32, #tpu.memory_space<vmem>>, vector<512x128xf32>,
    return
  }
  func.func @transform_0(%arg0: i32) -> (i32, i32) {
    %c0_i32 = arith.constant 0 : i32
    %c0_i32_0 = arith.constant 0 : i32
    return %arg0, %c0_i32 : i32, i32
  }
  func.func @transform_1(%arg0: i32) -> (i32, i32) {
    %c0_i32 = arith.constant 0 : i32
    %c0_i32_0 = arith.constant 0 : i32
    %c0_i32_1 = arith.constant 0 : i32
    return %c0_i32, %c0_i32_0 : i32, i32
  }
  func.func @transform_2(%arg0: i32) -> (i32, i32) {
    %c0_i32 = arith.constant 0 : i32
    %c0_i32_0 = arith.constant 0 : i32
    %c0_i32_1 = arith.constant 0 : i32
    return %c0_i32, %c0_i32_0 : i32, i32
  }
  func.func @transform_3(%arg0: i32) -> (i32, i32) {
    %c0_i32 = arith.constant 0 : i32
    %c0_i32_0 = arith.constant 0 : i32
    return %arg0, %c0_i32 : i32, i32
  }
}

</mosaic_0001>

<bundles_post_ra>
// kernel: _lambda_.4
= control target key start
LH: loop header
LB: loop body
LE: loop exit
PB: predicated region body
PF: predicated region fallthrough
CT: control target
= control target key end

     0   :  { %s3343_s27 = smov 0   ;;  %s3345_s28 = smov 0   ;;  %s5231_s0 = inlined_call_operand.vmem [shape: f32[2,18,18,128], index: 0, kind: input, shape index: {}, may-alias: {0,1}]   ;;  %s5232_s1 = inlined_call_operand.vmem [shape: f32[2,18,18,128], index: 1, kind: input, shape index: {}, may-alias: {0,1}]   ;;  %s5233_s2 = inlined_call_operand.vmem [shape: f32[3,384,128], index: 2, kind: input, shape index: {}]   ;;  %s5234_s3 = inlined_call_operand.vmem [shape: f32[1,128], index: 3, kind: input, shape index: {}]   ;;  %s5235_s4 = inlined_call_operand.vmem [shape: f32[1,128], index: 4, kind: input, shape index: {}]   ;;  %s5236_s5 = inlined_call_operand.vmem [shape: f32[1,128], index: 5, kind: input, shape index: {}]   ;;  %s5237_s6 = inlined_call_operand.vmem [shape: f32[2,256,128], index: 6, kind: output, shape index: {0}]   ;;  %s5238_s7 = inlined_call_operand.vmem [shape: f32[2,1,128], index: 7, kind: output, shape index: {1}]   ;;  %s5239_s8 = inlined_call_operand.vmem [shape: f32[2,1,128], index: 8, kind: output, shape index: {2}]  }
   0x1   :  { %s3347_s29 = smov 0   ;;  %s3349_s30 = smov 0  }
   0x2   :  { %s3351_s9 = smov 0  }
   0x3 LB: > { %5314 = sst [smem:[#allocation2_spill]] %s3287_s29  ;;  %s28_s10 = sadd.s32 1, %s3287_s29  ;;  %s3295_s9 = sphi %s3351_s9, %s19_s9   ;;  %s3291_s30 = sphi %s3349_s30, %s5505_s30   ;;  %s3287_s29 = sphi %s3347_s29, %s5504_s29   ;;  %s3283_s28 = sphi %s3345_s28, %s5503_s28   ;;  %s3279_s27 = sphi %s3343_s27, %s5502_s27  }
   0x4   : > { %5315 = sst [smem:[#allocation3_spill]] %s3291_s30  ;;  %s31_s11 = sadd.s32 1, %s3291_s30 }
   0x5   : > { %p29_p0 = scmp.ge.s32.totalorder %s28_s10, 2  ;;  %p2249_p1 = scmp.ge.s32.totalorder %s3295_s9, 1 }
   0x6   : > { %p325_p2 = scmp.lt.s32.totalorder %s3295_s9, 5 }
   0x7   : > { %s5507_s10 = smov (%p29_p0, %s28_s10), 0  ;;  %s5509_s11 = smov (!%p29_p0, %s31_s11), %s3291_s30 }
   0x8   : > { %5316 = sst [smem:[#allocation4_spill]] %s5507_s10  ;;  %p326_p3 = pnand %p2249_p1, %p325_p2 }
   0x9   : > { %p33_p4 = scmp.ge.s32.totalorder %s5509_s11, 2 }
   0xa   : > { %329 = sbr.rel (%p326_p3) target bundleno = 481 (0x1e1), region = 44 }
   0xb   : > { %s5511_s11 = smov (%p33_p4, %s5509_s11), 0 }
   0xc   : > { %5317 = sst [smem:[#allocation5_spill]] %s5511_s11 }
  0x11   : > { %s3376_s12 = sshll.u32 %s3279_s27, 3  ;;  %p397_p5 = scmp.lt.s32.totalorder %s3283_s28, 1 }
  0x12   : > { %p399_p6 = scmp.lt.s32.totalorder %s3376_s12, 17  ;;  %s2418_s13 = sadd.s32 8, %s3376_s12 }
  0x13   : > { %s5513_s28 = smov (!%p397_p5, %s3283_s28), 1  ;;  %p417_p7 = scmp.lt.s32.totalorder %s2418_s13, 17 }
  0x14   : > { %s400_s14 = scalar_select %p399_p6, %s3376_s12, 17 }
  0x15   : > { %s3212_s15 = smul.u32 54, %s5513_s28  ;;  %s2255_s17 = sshll.u32 %s3279_s27, 4 }
  0x16   : > { %s3211_s16 = smul.u32 3, %s400_s14  ;;  %s5515_s13 = smov (!%p417_p7, %s2418_s13), 17 }
  0x17   : > { %s3213_s20 = smul.u32 3, %s5515_s13  ;;  %p430_p8 = scmp.lt.s32.totalorder %s2255_s17, 31 }
  0x18   : > { %s403_s18 = sadd.s32 %s3212_s15, %s3211_s16  ;;  %s3390_s11 = scalar_lea.vmem %s5238_s7, %s5513_s28 }
  0x19   : > { %s2251_s19 = sshll.u32 %s403_s18, 3  ;;  %s421_s24 = sadd.s32 %s3213_s20, %s3212_s15 }
  0x1a   : > { %s3385_s23 = scalar_lea.vmem %s5231_s0, %s2251_s19  ;;  %s2254_s10 = sshll.u32 %s421_s24, 3 }
  0x1b   : > { %s3395_s29 = scalar_lea.vmem %s5239_s8, %s5513_s28  ;;  %s3400_s18 = scalar_lea.vmem %s5232_s1, %s2254_s10 }
  0x1c   : > { %s2256_s19 = sshll.u32 %s5513_s28, 5  ;;  %s5517_s17 = smov (!%p430_p8, %s2255_s17), 31 }
  0x1d   : > { %s433_s21 = sadd.s32 %s2256_s19, %s5517_s17  ;;  %p2258_p9 = scmp.ne.s32.totalorder %s3279_s27, 0 }
  0x1e   : > { %s2257_s15 = sshll.u32 %s433_s21, 3  ;;  %v3297_v0 = vmov (!%p2258_p9), 0.0  }
  0x1f   : > { %s3405_s25 = scalar_lea.vmem %s5237_s6, %s2257_s15  ;;  %446 = sbr.rel (%p2258_p9) target bundleno = 38 (0x26), region = 48  ;;  %447 = vst [vmem:[%s3390_s11] sm:$0x1] (!%p2258_p9), %v3297_v0  ;;  %448 = vst [vmem:[%s3395_s29] sm:$0x1] (!%p2258_p9), %v3297_v0 }
  0x26 PF: > { %v2278_v1 = vld [vmem:[%s5233_s2 + $0x200] sm:$0xff]  ;;  %v2279_v2 = vld [vmem:[%s5233_s2 + $0x208] sm:$0xff]  ;;  %v2280_v10 = vld [vmem:[%s5233_s2 + $0x210] sm:$0xff]  ;;  %v594_v17 = vlaneseq  ;;  %v3471_v30 = vstv %s3376_s12  ;;  %vm5254_vm4 = vcmask 1046528   ;;  %vm5265_vm5 = vcmask 1045504  }
  0x27   : > { %v2294_v3 = vld [vmem:[%s5233_s2 + $0x280] sm:$0xff]  ;;  %v2923_v4 = vpack.c.bf16 %v2279_v2, %v2278_v1  ;;  %v2295_v5 = vld [vmem:[%s5233_s2 + $0x288] sm:$0xff]  ;;  %v2281_v11 = vld [vmem:[%s5233_s2 + $0x218] sm:$0xff]  ;;  %5318 = vst [vmem:[#allocation6_spill] sm:$0xff] %v3471_v30  ;;  %v585_v38 = vadd.s32 1, %v3471_v30  ;;  %v3495_v42 = vadd.s32 2, %v3471_v30 }
  0x28   : > { %v2262_v6 = vld [vmem:[%s5233_s2 + $0x180] sm:$0xff]  ;;  %v2263_v7 = vld [vmem:[%s5233_s2 + $0x188] sm:$0xff]  ;;  %v2955_v8 = vpack.c.bf16 %v2295_v5, %v2294_v3  ;;  %v2296_v12 = vld [vmem:[%s5233_s2 + $0x290] sm:$0xff]  ;;  %v2927_v13 = vpack.c.bf16 %v2281_v11, %v2280_v10  ;;  %v3479_v33 = vshrl.u32 %v594_v17, 7  ;;  %v3527_v51 = vadd.s32 3, %v3471_v30 }
  0x29   : > { %v2925_v9 = vpack.c.bf16 %v2263_v7, %v2262_v6  ;;  %2924 = vmatprep.subr.bf16.mxu0 %v2923_v4  ;;  %v2297_v14 = vld [vmem:[%s5233_s2 + $0x298] sm:$0xff]  ;;  %v2264_v15 = vld [vmem:[%s5233_s2 + $0x190] sm:$0xff]  ;;  %v2282_v20 = vld [vmem:[%s5233_s2 + $0x220] sm:$0xff]  ;;  %vm599_vm0 = vcmp.ge.s32.totalorder %v585_v38, 1  ;;  %v3556_v59 = vadd.s32 4, %v3471_v30  ;;  %vm609_vm1 = vcmp.le.s32.totalorder %v585_v38, 16 }
  0x2a   : > { %v2265_v16 = vld [vmem:[%s5233_s2 + $0x198] sm:$0xff]  ;;  %2956 = vmatprep.subr.bf16.mxu1 %v2955_v8  ;;  %v2959_v18 = vpack.c.bf16 %v2297_v14, %v2296_v12  ;;  %v2283_v21 = vld [vmem:[%s5233_s2 + $0x228] sm:$0xff]  ;;  %v2298_v22 = vld [vmem:[%s5233_s2 + $0x2a0] sm:$0xff]  ;;  %5319 = vst [vmem:[#allocation7_spill] sm:$0xff] %v3479_v33  ;;  %v3509_v46 = vadd.s32 16, %v3479_v33  ;;  %vm5242_vm2 = vcmp.ge.s32.totalorder %v3479_v33, 1 }
  0x2b   : > { %2926 = vmatpush3.bf16.msra.mxu0 %v2925_v9  ;;  %v2929_v19 = vpack.c.bf16 %v2265_v16, %v2264_v15  ;;  %2958 = vmatpush3.bf16.msra.mxu1 %v2955_v8  ;;  %v2931_v23 = vpack.c.bf16 %v2283_v21, %v2282_v20  ;;  %v2299_v24 = vld [vmem:[%s5233_s2 + $0x2a8] sm:$0xff]  ;;  %v2266_v25 = vld [vmem:[%s5233_s2 + $0x1a0] sm:$0xff]  ;;  %v2284_v28 = vld [vmem:[%s5233_s2 + $0x230] sm:$0xff]  ;;  %vm600_vm3 = vcmp.ge.s32.totalorder %v3495_v42, 1  ;;  %vm610_vm7 = vcmp.le.s32.totalorder %v3495_v42, 16 }
  0x2c   : > { %2928 = vmatprep.subr.bf16.mxu0 %v2927_v13  ;;  %v2267_v26 = vld [vmem:[%s5233_s2 + $0x1a8] sm:$0xff]  ;;  %2960 = vmatprep.subr.bf16.mxu1 %v2959_v18  ;;  %v2963_v27 = vpack.c.bf16 %v2299_v24, %v2298_v22  ;;  %v2285_v29 = vld [vmem:[%s5233_s2 + $0x238] sm:$0xff]  ;;  %v2300_v31 = vld [vmem:[%s5233_s2 + $0x2b0] sm:$0xff]  ;;  %5320 = vst [vmem:[#allocation8_spill] sm:$0xff] %v3509_v46  ;;  %vm5253_vm6 = vcmp.le.s32.totalorder %v3509_v46, 16  ;;  %v3605_v7 = vadd.s32 5, %v3471_v30 }
  0x2d   : > { %v2301_v32 = vld [vmem:[%s5233_s2 + $0x2b8] sm:$0xff]  ;;  %v2933_v34 = vpack.c.bf16 %v2267_v26, %v2266_v25  ;;  %v2935_v35 = vpack.c.bf16 %v2285_v29, %v2284_v28  ;;  %v2268_v36 = vld [vmem:[%s5233_s2 + $0x1b0] sm:$0xff]  ;;  %v2286_v40 = vld [vmem:[%s5233_s2 + $0x240] sm:$0xff]  ;;  %vm601_vm8 = vcmp.ge.s32.totalorder %v3527_v51, 1  ;;  %vm611_vm9 = vcmp.le.s32.totalorder %v3527_v51, 16 }
  0x2e   : > { %v2269_v37 = vld [vmem:[%s5233_s2 + $0x1b8] sm:$0xff]  ;;  %v2967_v39 = vpack.c.bf16 %v2301_v32, %v2300_v31  ;;  %v2287_v41 = vld [vmem:[%s5233_s2 + $0x248] sm:$0xff]  ;;  %v2302_v43 = vld [vmem:[%s5233_s2 + $0x2c0] sm:$0xff]  ;;  %v3619_v12 = vadd.s32 6, %v3471_v30  ;;  %v3622_v13 = vadd.s32 7, %v3471_v30  ;;  %v3641_v20 = vadd.s32 8, %v3471_v30 }
  0x2f   : > { %2930 = vmatpush3.bf16.msra.mxu0 %v2929_v19  ;;  %2962 = vmatpush3.bf16.msra.mxu1 %v2959_v18  ;;  %v2303_v44 = vld [vmem:[%s5233_s2 + $0x2c8] sm:$0xff]  ;;  %v3506_v45 = vld [vmem:[%s5233_s2 + $0x1c0] sm:$0xff]  ;;  %v2937_v47 = vpack.c.bf16 %v2269_v37, %v2268_v36  ;;  %v3519_v49 = vld [vmem:[%s5233_s2 + $0x250] sm:$0xff]  ;;  %v2939_v52 = vpack.c.bf16 %v2287_v41, %v2286_v40  ;;  %vm602_vm14 = vcmp.ge.s32.totalorder %v3556_v59, 1  ;;  %vm612_vm15 = vcmp.le.s32.totalorder %v3556_v59, 16 }
  0x30   : > { %2932 = vmatprep.subr.bf16.mxu0 %v2931_v23  ;;  %2964 = vmatprep.subr.bf16.mxu1 %v2963_v27  ;;  %v3514_v48 = vld [vmem:[%s5233_s2 + $0x1c8] sm:$0xff]  ;;  %v3524_v50 = vld [vmem:[%s5233_s2 + $0x258] sm:$0xff]  ;;  %v2304_v53 = vld [vmem:[%s5233_s2 + $0x2d0] sm:$0xff]  ;;  %v2971_v60 = vpack.c.bf16 %v2303_v44, %v2302_v43 }
  0x31   : > { %v2305_v54 = vld [vmem:[%s5233_s2 + $0x2d8] sm:$0xff]  ;;  %v3538_v55 = vld [vmem:[%s5233_s2 + $0x1d0] sm:$0xff]  ;;  %v3548_v57 = vld [vmem:[%s5233_s2 + $0x260] sm:$0xff]  ;;  %v2941_v8 = vpack.c.bf16 %v3514_v48, %v3506_v45  ;;  %v2943_v14 = vpack.c.bf16 %v3524_v50, %v3519_v49 }
  0x32   : > { %v3543_v56 = vld [vmem:[%s5233_s2 + $0x1d8] sm:$0xff]  ;;  %v3553_v58 = vld [vmem:[%s5233_s2 + $0x268] sm:$0xff]  ;;  %v2306_v61 = vld [vmem:[%s5233_s2 + $0x2e0] sm:$0xff]  ;;  %v2975_v21 = vpack.c.bf16 %v2305_v54, %v2304_v53 }
  0x33   : > { %2934 = vmatpush3.bf16.msra.mxu0 %v2933_v34  ;;  %2966 = vmatpush3.bf16.msra.mxu1 %v2963_v27  ;;  %v2307_v62 = vld [vmem:[%s5233_s2 + $0x2e8] sm:$0xff]  ;;  %v3567_v63 = vld [vmem:[%s5233_s2 + $0x1e0] sm:$0xff]  ;;  %v3579_v1 = vld [vmem:[%s5233_s2 + $0x270] sm:$0xff]  ;;  %v2945_v22 = vpack.c.bf16 %v3543_v56, %v3538_v55  ;;  %v2947_v23 = vpack.c.bf16 %v3553_v58, %v3548_v57  ;;  %v5327_v58 = vmov 0 }
  0x34   : > { %2936 = vmatprep.subr.bf16.mxu0 %v2935_v35  ;;  %2968 = vmatprep.subr.bf16.mxu1 %v2967_v39  ;;  %v3572_v0 = vld [vmem:[%s5233_s2 + $0x1e8] sm:$0xff]  ;;  %v3584_v2 = vld [vmem:[%s5233_s2 + $0x278] sm:$0xff]  ;;  %v2308_v3 = vld [vmem:[%s5233_s2 + $0x2f0] sm:$0xff]  ;;  %v3666_v28 = vpack.c.bf16 %v2307_v62, %v2306_v61 }
  0x35   : > { %v2309_v4 = vld [vmem:[%s5233_s2 + $0x2f8] sm:$0xff]  ;;  %v3595_v5 = vld [vmem:[%s5233_s2 + $0x1f0] sm:$0xff]  ;;  %v453_v10 = vld [vmem:[%s3385_s23 + $0x20] sm:$0xff]  ;;  %v2949_v29 = vpack.c.bf16 %v3572_v0, %v3567_v63  ;;  %v2951_v37 = vpack.c.bf16 %v3584_v2, %v3579_v1 }
  0x36   : > { %v3600_v6 = vld [vmem:[%s5233_s2 + $0x1f8] sm:$0xff]  ;;  %v3614_v11 = vld [vmem:[%s5235_s4] ss:$0 sm:$0xff]  ;;  %vm3635_vm10 = vmand %vm599_vm0, %vm609_vm1  ;;  %v3692_v38 = vpack.c.bf16 %v2309_v4, %v2308_v3 }
  0x37   : > { %2938 = vmatpush3.bf16.msra.mxu0 %v2937_v47  ;;  %v452_v9 = vld [vmem:[%s3385_s23 + $0x18] sm:$0xff]  ;;  %2970 = vmatpush3.bf16.msra.mxu1 %v2967_v39  ;;  %v490_v16 = vmul.f32 %v3614_v11, %v453_v10  ;;  %v3631_v17 = vld [vmem:[%s5236_s5] ss:$0 sm:$0xff]  ;;  %v454_v19 = vld [vmem:[%s3385_s23 + $0x28] sm:$0x3]  ;;  %v2953_v39 = vpack.c.bf16 %v3600_v6, %v3595_v5 }
  0x38   : > { %2940 = vmatprep.subr.bf16.mxu0 %v2939_v52  ;;  %v489_v15 = vmul.f32 %v3614_v11, %v452_v9  ;;  %2972 = vmatprep.subr.bf16.mxu1 %v2971_v60  ;;  %vm3651_vm11 = vmand %vm3635_vm10, %vm5242_vm2  ;;  %v491_v25 = vmul.f32 %v3614_v11, %v454_v19  ;;  %v3659_v26 = vld [vmem:[%s5233_s2 + $0x80] sm:$0xff]  ;;  %v3664_v27 = vld [vmem:[%s5233_s2 + $0x88] sm:$0xff] }
  0x39   : > { %v527_v32 = vadd.f32 %v3631_v17, %v490_v16  ;;  %vm3676_vm12 = vmand %vm3635_vm10, %vm5253_vm6  ;;  %v3683_v35 = vld [vmem:[%s5233_s2 + $0x380] sm:$0xff]  ;;  %v3688_v36 = vld [vmem:[%s5233_s2 + $0x388] sm:$0xff]  ;;  %v2987_v48 = vpack.c.bf16 %v3664_v27, %v3659_v26 }
  0x3a   : > { %v526_v31 = vadd.f32 %v3631_v17, %v489_v15  ;;  %v528_v40 = vadd.f32 %v3631_v17, %v491_v25  ;;  %v3700_v41 = vld [vmem:[%s5233_s2] sm:$0xff]  ;;  %v3705_v43 = vld [vmem:[%s5233_s2 + $0x8] sm:$0xff]  ;;  %v3051_v49 = vpack.c.bf16 %v3688_v36, %v3683_v35  ;;  %v455_v52 = vld [vmem:[%s3385_s23 + $0x30] sm:$0xff]  ;;  %v5352_v36 = vmov 0 }
  0x3b   : > { %2942 = vmatpush3.bf16.msra.mxu0 %v2941_v8  ;;  %v3710_v44 = vld [vmem:[%s5233_s2 + $0x300] sm:$0xff]  ;;  %2974 = vmatpush3.bf16.msra.mxu1 %v2971_v60  ;;  %v3714_v47 = vmax.f32 %v527_v32, 0.0  ;;  %v3723_v50 = vld [vmem:[%s5233_s2 + $0x308] sm:$0xff]  ;;  %v456_v53 = vld [vmem:[%s3385_s23 + $0x38] sm:$0xff]  ;;  %v492_v56 = vmul.f32 %v3614_v11, %v455_v52 }
  0x3c   : > { %2944 = vmatprep.subr.bf16.mxu0 %v2943_v14  ;;  %v3712_v45 = vmax.f32 %v526_v31, 0.0  ;;  %2976 = vmatprep.subr.bf16.mxu1 %v2975_v21  ;;  %v558_v54 = vmax.f32 %v528_v40, 0.0  ;;  %v493_v57 = vmul.f32 %v3614_v11, %v456_v53  ;;  %vm3735_vm13 = vmand %vm600_vm3, %vm610_vm7  ;;  %v457_v60 = vld [vmem:[%s3385_s23 + $0x40] sm:$0x3]  ;;  %v5330_v14 = vmov 0  ;;  %v3762_v15 = vld [vmem:[%s5233_s2 + $0x90] sm:$0xff] }
  0x3d   : > { %v5328_v58 = vsel %vm3735_vm13, 4294967295, %v5327_v58  ;;  %v698_v62 = vsel %vm3635_vm10, %v3714_v47, 0.0  ;;  %v494_v3 = vmul.f32 %v3614_v11, %v457_v60  ;;  %vm3755_vm0 = vmand %vm3735_vm13, %vm5242_vm2  ;;  %v3767_v16 = vld [vmem:[%s5233_s2 + $0x98] sm:$0xff]  ;;  %v3777_v32 = vld [vmem:[%s5233_s2 + $0x10] sm:$0xff]  ;;  %vm603_vm7 = vcmp.ge.s32.totalorder %v3605_v7, 1 }
  0x3e   : > { %5329 = vst [vmem:[#allocation9_spill] sm:$0xff] %v5328_v58  ;;  %v697_v61 = vsel %vm3651_vm11, %v3712_v45, 0.0  ;;  %v755_v8 = vrot.slane %v698_v62, 1  ;;  %v812_v10 = vrot.slane %v698_v62, 2  ;;  %v5331_v14 = vsel %vm3755_vm0, 4294967295, %v5330_v14  ;;  %v3782_v40 = vld [vmem:[%s5233_s2 + $0x18] sm:$0xff]  ;;  %vm3796_vm1 = vmand %vm3735_vm13, %vm5253_vm6 }
  0x3f   : > { %2946 = vmatpush3.bf16.msra.mxu0 %v2945_v22  ;;  %v754_v4 = vrot.slane %v697_v61, 1  ;;  %v811_v9 = vrot.slane %v697_v61, 2  ;;  %2978 = vmatpush3.bf16.msra.mxu1 %v2975_v21  ;;  %v699_v19 = vsel %vm3676_vm12, %v558_v54, 0.0  ;;  %v529_v22 = vadd.f32 %v3631_v17, %v492_v56  ;;  %v458_v21 = vld [vmem:[%s3385_s23 + $0x48] sm:$0xff]  ;;  %v459_v56 = vld [vmem:[%s3385_s23 + $0x50] sm:$0xff]  ;;  %vm3813_vm3 = vmand %vm601_vm8, %vm611_vm9 }
  0x40   : > { %2948 = vmatprep.subr.bf16.mxu0 %v2947_v23  ;;  %v530_v25 = vadd.f32 %v3631_v17, %v493_v57  ;;  %v531_v31 = vadd.f32 %v3631_v17, %v494_v3  ;;  %2980 = vmatprep.subr.bf16.mxu1 %v3666_v28  ;;  %v814_v52 = vrot.slane %v699_v19, 2  ;;  %v757_v53 = vrot.slane %v699_v19, 1  ;;  %v3858_v1 = vld [vmem:[%s5233_s2 + $0x390] sm:$0xff]  ;;  %v3863_v2 = vld [vmem:[%s5233_s2 + $0x398] sm:$0xff]  ;;  %vm3870_vm8 = vmand %vm3813_vm3, %vm5242_vm2 }
  0x41   : > { %v3787_v23 = vsel %vm5254_vm4, %v754_v4, %v755_v8  ;;  %v3790_v34 = vsel %vm5265_vm5, %v811_v9, %v812_v10  ;;  %v3803_v57 = vmax.f32 %v529_v22, 0.0  ;;  %v5336_v3 = vmov 0  ;;  %v460_v22 = vld [vmem:[%s3385_s23 + $0x58] sm:$0x3]  ;;  %v3882_v54 = vld [vmem:[%s5233_s2 + $0x28] sm:$0xff]  ;;  %v3890_v62 = vld [vmem:[%s5233_s2 + $0x310] sm:$0xff] }
  0x42   : > { %5332 = vst [vmem:[#allocation10_spill] sm:$0xff] %v3790_v34  ;;  %1040 = vmatprep.mubr.f32.mxu0 %v3787_v23  ;;  %2787 = vmatprep.mubr.f32.mxu1 %v3790_v34  ;;  %v3805_v60 = vmax.f32 %v530_v25, 0.0  ;;  %v561_v61 = vmax.f32 %v531_v31, 0.0  ;;  %v5337_v3 = vsel %vm3813_vm3, 4294967295, %v5336_v3  ;;  %vm613_vm12 = vcmp.le.s32.totalorder %v3605_v7, 16  ;;  %v3835_v25 = vld [vmem:[%s5233_s2 + $0xa0] sm:$0xff]  ;;  %vm3911_vm9 = vmand %vm3813_vm3, %vm5253_vm6 }
  0x43   : > { %5338 = vst [vmem:[#allocation12_spill] sm:$0xff] %v5337_v3  ;;  %2950 = vmatpush3.bf16.msra.mxu0 %v2949_v29  ;;  %v3823_v4 = vsel %vm5265_vm5, %v812_v10, %v814_v52  ;;  %v3826_v9 = vsel %vm5254_vm4, %v755_v8, %v757_v53  ;;  %v495_v19 = vmul.f32 %v3614_v11, %v458_v21  ;;  %v700_v63 = vsel %vm3755_vm0, %v3803_v57, 0.0  ;;  %v3877_v53 = vld [vmem:[%s5233_s2 + $0x20] sm:$0xff]  ;;  %v3895_v55 = vld [vmem:[%s5233_s2 + $0x318] sm:$0xff]  ;;  %v462_v6 = vld [vmem:[%s3385_s23 + $0x68] sm:$0xff] }
  0x44   : > { %5335 = vst [vmem:[#allocation11_spill] sm:$0xff] %v3805_v60  ;;  %5339 = vst [vmem:[#allocation13_spill] sm:$0xff] %v3823_v4  ;;  %2982 = vmatpush3.bf16.msra.mxu1 %v3666_v28  ;;  %2952 = vmatprep.subr.bf16.mxu0 %v2951_v37  ;;  %v701_v0 = vsel %vm3735_vm13, %v3805_v60, 0.0  ;;  %v702_v29 = vsel %vm3796_vm1, %v561_v61, 0.0  ;;  %v496_v8 = vmul.f32 %v3614_v11, %v459_v56  ;;  %v3853_v28 = vld [vmem:[%s5233_s2 + $0xa8] sm:$0xff]  ;;  %v816_v37 = vrot.slane %v700_v63, 2 }
  0x45   : > { %2984 = vmatprep.subr.bf16.mxu1 %v3692_v38  ;;  %v817_v10 = vrot.slane %v701_v0, 2  ;;  %v819_v31 = vrot.slane %v702_v29, 2  ;;  %v759_v21 = vrot.slane %v700_v63, 1  ;;  %v5340_v52 = vmov 0  ;;  %v461_v42 = vld [vmem:[%s3385_s23 + $0x60] sm:$0xff]  ;;  %vm3936_vm1 = vmand %vm602_vm14, %vm612_vm15  ;;  %v3952_v59 = vld [vmem:[%s5233_s2 + $0xb0] sm:$0xff] }
  0x46   : > { %v5341_v52 = vsel %vm3870_vm8, 4294967295, %v5340_v52  ;;  %v760_v56 = vrot.slane %v701_v0, 1  ;;  %v532_v61 = vadd.f32 %v3631_v17, %v495_v19  ;;  %v533_v63 = vadd.f32 %v3631_v17, %v496_v8  ;;  %v3957_v26 = vld [vmem:[%s5233_s2 + $0xb8] sm:$0xff]  ;;  %vm3996_vm14 = vmand %vm3936_vm1, %vm5242_vm2  ;;  %v465_v0 = vld [vmem:[%s3385_s23 + $0x80] sm:$0xff] }
  0x47   : > { %5342 = vst [vmem:[#allocation14_spill] sm:$0xff] %v5341_v52  ;;  %v497_v51 = vmul.f32 %v3614_v11, %v460_v22  ;;  %2954 = vmatpush3.bf16.msra.mxu0 %v2953_v39  ;;  %v3902_v19 = vsel %vm5265_vm5, %v816_v37, %v817_v10  ;;  %v3905_v22 = vsel %vm5265_vm5, %v817_v10, %v819_v31  ;;  %v5353_v36 = vsel %vm3996_vm14, 4294967295, %v5352_v36  ;;  %vm4014_vm15 = vmand %vm3936_vm1, %vm5253_vm6  ;;  %v4055_v7 = vld [vmem:[%s5233_s2 + $0xc0] sm:$0xff]  ;;  %v2349_v52 = vld [vmem:[%s5233_s2 + $0x338] sm:$0xff] }
  0x48   : > { %5343 = vst [vmem:[#allocation15_spill] sm:$0xff] %v3902_v19  ;;  %5344 = vst [vmem:[#allocation16_spill] sm:$0xff] %v3905_v22  ;;  %v3055_v5 = vpack.c.bf16 %v3863_v2, %v3858_v1  ;;  %2986 = vmatpush3.bf16.msra.mxu1 %v3692_v38  ;;  %3052 = vmatprep.subr.bf16.mxu0 %v3051_v49  ;;  %v3925_v39 = vsel %vm5254_vm4, %v759_v21, %v760_v56  ;;  %v3927_v37 = vmax.f32 %v532_v61, 0.0  ;;  %v5349_v1 = vmov 0  ;;  %v3976_v2 = vld [vmem:[%s5233_s2 + $0x30] sm:$0xff]  ;;  %v3981_v21 = vld [vmem:[%s5233_s2 + $0x38] sm:$0xff] }
  0x49   : > { %5347 = vst [vmem:[#allocation17_spill] sm:$0xff] %v3925_v39  ;;  %v3929_v10 = vmax.f32 %v533_v63, 0.0  ;;  %v534_v31 = vadd.f32 %v3631_v17, %v497_v51  ;;  %v5350_v1 = vsel %vm3936_vm1, 4294967295, %v5349_v1  ;;  %2988 = vmatprep.subr.bf16.mxu1 %v2987_v48  ;;  %v762_v38 = vrot.slane %v702_v29, 1  ;;  %v463_v51 = vld [vmem:[%s3385_s23 + $0x70] sm:$0x3] }
  0x4a   : > { %5348 = vst [vmem:[#allocation18_spill] sm:$0xff] %v3927_v37  ;;  %v498_v49 = vmul.f32 %v3614_v11, %v461_v42  ;;  %2310 = vmatmul.mubr.msk.f32.vlgmr.msra.gmra.mrb[0].mxu0 %vm3651_vm11, %v3712_v45  ;;  %v703_v27 = vsel %vm3870_vm8, %v3927_v37, 0.0  ;;  %v499_v29 = vmul.f32 %v3614_v11, %v462_v6  ;;  %v5351_v61 = vpack.c.bf16 %v3723_v50, %v3710_v44  ;;  %v450_v3 = vld [vmem:[%s3385_s23 + $0x8] sm:$0xff] }
  0x4b   : > { %v3970_v48 = vsel %vm3813_vm3, %v3929_v10, 0.0  ;;  %v564_v42 = vmax.f32 %v534_v31, 0.0  ;;  %2788 = vmatmul.mubr.f32.vlgmr.msra.gmra.mrb[0].mxu1 %v3823_v4  ;;  %v821_v63 = vrot.slane %v703_v27, 2  ;;  %v3989_v31 = vsel %vm5254_vm4, %v760_v56, %v762_v38  ;;  %5354 = vst [vmem:[#allocation19_spill] sm:$0xff] %v5353_v36  ;;  %1045 = vmatprep.mubr.f32.mxu0 %v3826_v9 }
  0x4c   : > { %3054 = vmatpush3.bf16.msra.mxu0 %v5351_v61  ;;  %v822_v6 = vrot.slane %v3970_v48, 2  ;;  %v535_v35 = vadd.f32 %v3631_v17, %v498_v49  ;;  %v5355_v44 = vpack.c.bf16 %v3705_v43, %v3700_v41  ;;  %v536_v56 = vadd.f32 %v3631_v17, %v499_v29  ;;  %v464_v43 = vld [vmem:[%s3385_s23 + $0x78] sm:$0xff]  ;;  %2790 = vmatprep.mubr.f32.mxu1 %v3902_v19 }
  0x4d   : > { %v4006_v50 = vsel %vm3911_vm9, %v564_v42, 0.0  ;;  %v500_v38 = vmul.f32 %v3614_v11, %v463_v51  ;;  %v5358_v51 = vpack.c.bf16 %v3767_v16, %v3762_v15  ;;  %vm4040_vm9 = vmand %vm603_vm7, %vm613_vm12  ;;  %v5360_v41 = vmov 0  ;;  %v466_v15 = vld [vmem:[%s3385_s23 + $0x88] sm:$0x3]  ;;  %3056 = vmatprep.subr.bf16.mxu0 %v3055_v5  ;;  %v2362_v5 = vld [vmem:[%s5233_s2 + $0x3a0] sm:$0xff] }
  0x4e   : > { %2990 = vmatpush3.bf16.msra.mxu1 %v5355_v44  ;;  %v4029_v42 = vsel %vm5265_vm5, %v821_v63, %v822_v6  ;;  %v824_v29 = vrot.slane %v4006_v50, 2  ;;  %v4032_v61 = vmax.f32 %v535_v35, 0.0  ;;  %v5361_v41 = vsel %vm4040_vm9, 4294967295, %v5360_v41  ;;  %2311 = vmatmul.mubr.msk.f32.gmra.mrb[2].mxu0 %vm3635_vm10, %v3714_v47  ;;  %v4060_v44 = vld [vmem:[%s5233_s2 + $0xc8] sm:$0xff] }
  0x4f   : > { %2992 = vmatprep.subr.bf16.mxu1 %v5358_v51  ;;  %5359 = vst [vmem:[#allocation20_spill] sm:$0xff] %v4029_v42  ;;  %5362 = vst [vmem:[#allocation21_spill] sm:$0xff] %v5361_v41  ;;  %v4048_v16 = vmax.f32 %v536_v56, 0.0  ;;  %v537_v35 = vadd.f32 %v3631_v17, %v500_v38  ;;  %v764_v63 = vrot.slane %v703_v27, 1  ;;  %2791 = vmatmul.mubr.f32.gmra.mrb[2].mxu1 %v3905_v22  ;;  %v2363_v51 = vld [vmem:[%s5233_s2 + $0x3a8] sm:$0xff]  ;;  %v4083_v22 = vld [vmem:[%s5233_s2 + $0x40] sm:$0xff] }
  0x50   : > { %1050 = vmatprep.mubr.f32.mxu0 %v3925_v39  ;;  %v4068_v27 = vsel %vm5265_vm5, %v822_v6, %v824_v29  ;;  %v4073_v56 = vsel %vm3996_vm14, %v4032_v61, 0.0  ;;  %v501_v38 = vmul.f32 %v3614_v11, %v464_v43  ;;  %v502_v8 = vmul.f32 %v3614_v11, %v465_v0  ;;  %v4088_v6 = vld [vmem:[%s5233_s2 + $0x48] sm:$0xff]  ;;  %2793 = vmatprep.mubr.f32.mxu1 %v4029_v42 }
  0x51   : > { %5363 = vst [vmem:[#allocation22_spill] sm:$0xff] %v4068_v27  ;;  %v5364_v43 = vpack.c.bf16 %v3782_v40, %v3777_v32  ;;  %v4097_v0 = vsel %vm3936_vm1, %v4048_v16, 0.0  ;;  %v826_v29 = vrot.slane %v4073_v56, 2  ;;  %v567_v19 = vmax.f32 %v537_v35, 0.0 }
  0x52   : > { %v5365_v4 = vrot.slane %v3970_v48, 1  ;;  %v5367_v39 = vpack.c.bf16 %v3853_v28, %v3835_v25  ;;  %v5368_v32 = vpack.c.bf16 %v3895_v55, %v3890_v62  ;;  %v827_v40 = vrot.slane %v4097_v0, 2  ;;  %v2347_v25 = vld [vmem:[%s5233_s2 + $0x328] sm:$0xff]  ;;  %v467_v28 = vld [vmem:[%s3385_s23 + $0x90] sm:$0xff]  ;;  %2312 = vmatmul.mubr.msk.f32.gmra.mrb[4].mxu0 %vm3755_vm0, %v3803_v57 }
  0x53   : > { %2994 = vmatpush3.bf16.msra.mxu1 %v5364_v43  ;;  %v538_v43 = vadd.f32 %v3631_v17, %v501_v38  ;;  %v539_v35 = vadd.f32 %v3631_v17, %v502_v8  ;;  %v503_v42 = vmul.f32 %v3614_v11, %v466_v15  ;;  %v4127_v55 = vsel %vm4014_vm15, %v567_v19, 0.0  ;;  %1055 = vmatprep.mubr.f32.mxu0 %v3989_v31  ;;  %vm4156_vm15 = vmand %vm4040_vm9, %vm5253_vm6  ;;  %v469_v15 = vld [vmem:[%s3385_s23 + $0xa0] sm:$0x3] }
  0x54   : > { %v4103_v34 = vsel %vm5254_vm4, %v764_v63, %v5365_v4  ;;  %2996 = vmatprep.subr.bf16.mxu1 %v5367_v39  ;;  %3058 = vmatpush3.bf16.msra.mxu0 %v5368_v32  ;;  %v2346_v4 = vld [vmem:[%s5233_s2 + $0x320] sm:$0xff]  ;;  %vm5369_vm7 = vcmp.ge.s32.totalorder %v3479_v33, 1  ;;  %v3003_v8 = vpack.c.bf16 %v4060_v44, %v4055_v7  ;;  %v3059_v39 = vpack.c.bf16 %v2363_v51, %v2362_v5  ;;  %v468_v63 = vld [vmem:[%s3385_s23 + $0x98] sm:$0xff] }
  0x55   : > { %5366 = vst [vmem:[#allocation23_spill] sm:$0xff] %v4103_v34  ;;  %vm4133_vm12 = vmand %vm4040_vm9, %vm5369_vm7  ;;  %2794 = vmatmul.mubr.f32.gmra.mrb[4].mxu1 %v4068_v27  ;;  %v4145_v19 = vsel %vm5265_vm5, %v826_v29, %v827_v40  ;;  %v829_v49 = vrot.slane %v4127_v55, 2  ;;  %v4148_v38 = vmax.f32 %v538_v43, 0.0  ;;  %v4150_v32 = vmax.f32 %v539_v35, 0.0 }
  0x56   : > { %5372 = vst [vmem:[#allocation24_spill] sm:$0xff] %v4145_v19  ;;  %v5375_v51 = vpack.c.bf16 %v3882_v54, %v3877_v53  ;;  %2796 = vmatprep.mubr.f32.mxu1 %v4145_v19  ;;  %v540_v7 = vadd.f32 %v3631_v17, %v503_v42  ;;  %v3061_v5 = vpack.c.bf16 %v2347_v25, %v2346_v4  ;;  %v767_v29 = vrot.slane %v4006_v50, 1  ;;  %v4181_v53 = vld [vmem:[%s5233_s2 + $0xd0] sm:$0xff] }
  0x57   : > { %v504_v43 = vmul.f32 %v3614_v11, %v467_v28  ;;  %vm5376_vm6 = vcmp.le.s32.totalorder %v3619_v12, 16  ;;  %vm5377_vm4 = vcmp.ge.s32.totalorder %v3619_v12, 1  ;;  %v4184_v54 = vsel %vm5265_vm5, %v827_v40, %v829_v49  ;;  %3060 = vmatprep.subr.bf16.mxu0 %v3059_v39  ;;  %v4203_v40 = vld [vmem:[%s5233_s2 + $0xd8] sm:$0xff]  ;;  %2313 = vmatmul.mubr.msk.f32.gmra.mrb[6].mxu0 %vm3735_vm13, %v3805_v60  ;;  %v471_v60 = vld [vmem:[%s3385_s23 + $0xb0] sm:$0xff] }
  0x58   : > { %2998 = vmatpush3.bf16.msra.mxu1 %v5375_v51  ;;  %vm4173_vm7 = vmand %vm5377_vm4, %vm5376_vm6  ;;  %5380 = vst [vmem:[#allocation25_spill] sm:$0xff] %v4184_v54  ;;  %v5381_v50 = vpack.c.bf16 %v3957_v26, %v3952_v59  ;;  %v4192_v12 = vsel %vm4133_vm12, %v4148_v38, 0.0  ;;  %v4197_v42 = vsel %vm4040_vm9, %v4150_v32, 0.0  ;;  %v505_v4 = vmul.f32 %v3614_v11, %v468_v63  ;;  %v4208_v59 = vld [vmem:[%s5233_s2 + $0x50] sm:$0xff]  ;;  %v4213_v26 = vld [vmem:[%s5233_s2 + $0x58] sm:$0xff]  ;;  %1060 = vmatprep.mubr.f32.mxu0 %v4103_v34 }
  0x59   : > { %v831_v25 = vrot.slane %v4192_v12, 2  ;;  %v832_v28 = vrot.slane %v4197_v42, 2  ;;  %v570_v39 = vmax.f32 %v540_v7, 0.0  ;;  %v5382_v63 = vrot.slane %v3970_v48, 1  ;;  %v470_v51 = vld [vmem:[%s3385_s23 + $0xa8] sm:$0xff]  ;;  %2797 = vmatmul.mubr.f32.gmra.mrb[6].mxu1 %v4184_v54  ;;  %3062 = vmatpush3.bf16.msra.mxu0 %v3061_v5  ;;  %v4440_v34 = vld [vmem:[%s5233_s2 + $0x78] sm:$0xff] }
  0x5a   : > { %3000 = vmatprep.subr.bf16.mxu1 %v5381_v50  ;;  %vm5383_vm4 = vcmask 1046528   ;;  %v541_v50 = vadd.f32 %v3631_v17, %v504_v43  ;;  %v542_v19 = vadd.f32 %v3631_v17, %v505_v4  ;;  %v506_v27 = vmul.f32 %v3614_v11, %v469_v15  ;;  %v472_v7 = vld [vmem:[%s3385_s23 + $0xb8] sm:$0x3]  ;;  %v5487_v48 = vld [vmem:[#allocation22_spill] sm:$0xff] }
  0x5b   : > { %v4223_v49 = vsel %vm5383_vm4, %v5382_v63, %v767_v29  ;;  %v769_v58 = vrot.slane %v4073_v56, 1  ;;  %vm5385_vm6 = vcmp.le.s32.totalorder %v3622_v13, 16  ;;  %vm5386_vm2 = vcmp.ge.s32.totalorder %v3622_v13, 1  ;;  %2314 = vmatmul.mubr.msk.f32.gmra.mrb[8].mxu0 %vm3870_vm8, %v3927_v37  ;;  %v4302_v63 = vld [vmem:[%s5233_s2 + $0xe8] sm:$0xff]  ;;  %v3256_v13 = vld [vmem:[%s5236_s5] ss:$0 sm:$0xff] }
  0x5c   : > { %5384 = vst [vmem:[#allocation26_spill] sm:$0xff] %v4223_v49  ;;  %vm4237_vm4 = vmand %vm5386_vm2, %vm5385_vm6  ;;  %v5389_v29 = vpack.c.bf16 %v3981_v21, %v3976_v2  ;;  %v4246_v43 = vsel %vm5265_vm5, %v831_v25, %v832_v28  ;;  %v4250_v56 = vsel %vm4156_vm15, %v570_v39, 0.0  ;;  %vm5391_vm13 = vcmp.ge.s32.totalorder %v3479_v33, 1  ;;  %v4297_v39 = vld [vmem:[%s5233_s2 + $0xe0] sm:$0xff]  ;;  %1065 = vmatprep.mubr.f32.mxu0 %v4223_v49  ;;  %v4343_v49 = vld [vmem:[%s5233_s2 + $0x68] sm:$0xff] }
  0x5d   : > { %5390 = vst [vmem:[#allocation27_spill] sm:$0xff] %v4246_v43  ;;  %vm4256_vm2 = vmand %vm4173_vm7, %vm5391_vm13  ;;  %v3007_v2 = vpack.c.bf16 %v4203_v40, %v4181_v53  ;;  %2799 = vmatprep.mubr.f32.mxu1 %v4246_v43  ;;  %v834_v15 = vrot.slane %v4250_v56, 2  ;;  %v4266_v44 = vmax.f32 %v541_v50, 0.0  ;;  %v4268_v5 = vmax.f32 %v542_v19, 0.0 }
  0x5e   : > { %3002 = vmatpush3.bf16.msra.mxu1 %v5389_v29  ;;  %v543_v4 = vadd.f32 %v3631_v17, %v506_v27  ;;  %vm5394_vm13 = vcmp.le.s32.totalorder %v3509_v46, 16  ;;  %v507_v40 = vmul.f32 %v3614_v11, %v470_v51  ;;  %v508_v19 = vmul.f32 %v3614_v11, %v471_v60  ;;  %v2364_v29 = vld [vmem:[%s5233_s2 + $0x3b0] sm:$0xff] }
  0x5f   : > { %3004 = vmatprep.subr.bf16.mxu1 %v3003_v8  ;;  %vm4275_vm15 = vmand %vm4173_vm7, %vm5394_vm13  ;;  %v5278_v8 = vrot.slane %v4097_v0, 1  ;;  %vm5397_vm6 = vcmp.ge.s32.totalorder %v3479_v33, 1  ;;  %v509_v25 = vmul.f32 %v3614_v11, %v472_v7  ;;  %vm5400_vm13 = vcmask 1045504   ;;  %2315 = vmatmul.mubr.msk.f32.gmra.mrb[10].mxu0 %vm3813_vm3, %v3929_v10 }
  0x60   : > { %vm4289_vm5 = vmand %vm4237_vm4, %vm5397_vm6  ;;  %v4305_v60 = vsel %vm5400_vm13, %v832_v28, %v834_v15  ;;  %v4311_v51 = vsel %vm4256_vm2, %v4266_v44, 0.0  ;;  %v4316_v50 = vsel %vm4173_vm7, %v4268_v5, 0.0  ;;  %v573_v7 = vmax.f32 %v543_v4, 0.0  ;;  %v2365_v28 = vld [vmem:[%s5233_s2 + $0x3b8] sm:$0xff]  ;;  %v4327_v15 = vld [vmem:[%s5233_s2 + $0x60] sm:$0xff] }
  0x61   : > { %5401 = vst [vmem:[#allocation28_spill] sm:$0xff] %v4305_v60  ;;  %2800 = vmatmul.mubr.f32.gmra.mrb[8].mxu1 %v4305_v60  ;;  %v836_v4 = vrot.slane %v4311_v51, 2  ;;  %v837_v21 = vrot.slane %v4316_v50, 2  ;;  %vm5402_vm8 = vcmask 1046528   ;;  %v544_v54 = vadd.f32 %v3631_v17, %v507_v40  ;;  %v2348_v60 = vld [vmem:[%s5233_s2 + $0x330] sm:$0xff] }
  0x62   : > { %v4337_v43 = vsel %vm5402_vm8, %v769_v58, %v5278_v8  ;;  %v5404_v58 = vpack.c.bf16 %v4088_v6, %v4083_v22  ;;  %v4356_v40 = vsel %vm4275_vm15, %v573_v7, 0.0  ;;  %v545_v8 = vadd.f32 %v3631_v17, %v508_v19  ;;  %v473_v6 = vld [vmem:[%s3400_s18] sm:$0xff] }
  0x63   : > { %5403 = vst [vmem:[#allocation29_spill] sm:$0xff] %v4337_v43  ;;  %v546_v37 = vadd.f32 %v3631_v17, %v509_v25  ;;  %vm5405_vm8 = vcmp.le.s32.totalorder %v3509_v46, 16  ;;  %v3011_v22 = vpack.c.bf16 %v4302_v63, %v4297_v39  ;;  %v4372_v53 = vsel %vm5400_vm13, %v836_v4, %v837_v21  ;;  %1070 = vmatprep.mubr.f32.mxu0 %v4337_v43  ;;  %v449_v43 = vld [vmem:[%s3385_s23] sm:$0xff] }
  0x64   : > { %3006 = vmatpush3.bf16.msra.mxu1 %v5404_v58  ;;  %vm4364_vm6 = vmand %vm4237_vm4, %vm5405_vm8  ;;  %5408 = vst [vmem:[#allocation30_spill] sm:$0xff] %v4372_v53  ;;  %v839_v19 = vrot.slane %v4356_v40, 2  ;;  %v4378_v25 = vmax.f32 %v544_v54, 0.0  ;;  %v3063_v7 = vpack.c.bf16 %v2365_v28, %v2364_v29  ;;  %v474_v58 = vld [vmem:[%s3400_s18 + $0x8] sm:$0xff]  ;;  %vm5409_vm15 = vcmp.le.s32.totalorder %v3641_v20, 16  ;;  %2802 = vmatprep.mubr.f32.mxu1 %v4372_v53 }
  0x65   : > { %3008 = vmatprep.subr.bf16.mxu1 %v3007_v2  ;;  %vm5410_vm8 = vcmp.ge.s32.totalorder %v3641_v20, 1  ;;  %v4391_v63 = vmax.f32 %v545_v8, 0.0  ;;  %v576_v2 = vmax.f32 %v546_v37, 0.0  ;;  %v3013_v54 = vpack.c.bf16 %v4343_v49, %v4327_v15  ;;  %v475_v8 = vld [vmem:[%s3400_s18 + $0x10] sm:$0x3]  ;;  %2316 = vmatmul.mubr.msk.f32.gmra.mrb[12].mxu0 %vm3996_vm14, %v4032_v61  ;;  %v5490_v15 = vld [vmem:[#allocation25_spill] sm:$0xff] }
  0x66   : > { %vm4385_vm0 = vmand %vm5410_vm8, %vm5409_vm15  ;;  %v3065_v29 = vpack.c.bf16 %v2349_v52, %v2348_v60  ;;  %v4396_v28 = vsel %vm5400_vm13, %v837_v21, %v839_v19  ;;  %v4401_v20 = vsel %vm4289_vm5, %v4378_v25, 0.0  ;;  %3064 = vmatprep.subr.bf16.mxu0 %v3063_v7  ;;  %v772_v4 = vrot.slane %v4127_v55, 1  ;;  %v892_v37 = vld [vmem:[%s5233_s2 + $0xf0] sm:$0xff]  ;;  %v893_v52 = vld [vmem:[%s5233_s2 + $0xf8] sm:$0xff] }
  0x67   : > { %5413 = vst [vmem:[#allocation31_spill] sm:$0xff] %v4396_v28  ;;  %v510_v53 = vmul.f32 %v3614_v11, %v473_v6  ;;  %2803 = vmatmul.mubr.f32.gmra.mrb[10].mxu1 %v4396_v28  ;;  %v4416_v49 = vsel %vm4237_vm4, %v4391_v63, 0.0  ;;  %v841_v55 = vrot.slane %v4401_v20, 2  ;;  %v4421_v21 = vsel %vm4364_vm6, %v576_v2, 0.0  ;;  %v4435_v6 = vld [vmem:[%s5233_s2 + $0x70] sm:$0xff] }
  0x68   : > { %3066 = vmatpush3.bf16.msra.mxu0 %v3065_v29  ;;  %v511_v60 = vmul.f32 %v3614_v11, %v474_v58  ;;  %vm5414_vm15 = vcmp.ge.s32.totalorder %v3479_v33, 1  ;;  %v5417_v19 = vpack.c.bf16 %v4213_v26, %v4208_v59  ;;  %v842_v7 = vrot.slane %v4416_v49, 2  ;;  %v2366_v59 = vld [vmem:[%s5233_s2 + $0x3c0] sm:$0xff] }
  0x69   : > { %vm4428_vm8 = vmand %vm4385_vm0, %vm5414_vm15  ;;  %v844_v58 = vrot.slane %v4421_v21, 2  ;;  %v5418_v2 = vrot.slane %v4097_v0, 1  ;;  %vm5419_vm6 = vcmask 1046528   ;;  %v547_v28 = vadd.f32 %v3631_v17, %v510_v53  ;;  %v2367_v53 = vld [vmem:[%s5233_s2 + $0x3c8] sm:$0xff] }
  0x6a   : > { %3010 = vmatpush3.bf16.msra.mxu1 %v5417_v19  ;;  %v548_v26 = vadd.f32 %v3631_v17, %v511_v60  ;;  %v512_v19 = vmul.f32 %v3614_v11, %v475_v8  ;;  %v3015_v36 = vpack.c.bf16 %v893_v52, %v892_v37  ;;  %v774_v0 = vrot.slane %v4192_v12, 1  ;;  %vm5421_vm15 = vmmov %vm5400_vm13 }
  0x6b   : > { %v4453_v29 = vsel %vm5419_vm6, %v5418_v2, %v772_v4  ;;  %3012 = vmatprep.subr.bf16.mxu1 %v3011_v22  ;;  %v2350_v4 = vld [vmem:[%s5233_s2 + $0x340] sm:$0xff]  ;;  %v2351_v22 = vld [vmem:[%s5233_s2 + $0x348] sm:$0xff]  ;;  %v4475_v2 = vsel %vm5400_vm13, %v841_v55, %v842_v7  ;;  %v4478_v8 = vsel %vm5421_vm15, %v842_v7, %v844_v58  ;;  %v4480_v12 = vmax.f32 %v547_v28, 0.0  ;;  %v2369_v55 = vld [vmem:[%s5233_s2 + $0x3d8] sm:$0xff] }
  0x6c   : > { %1075 = vmatprep.mubr.f32.mxu0 %v4453_v29  ;;  %5420 = vst [vmem:[#allocation32_spill] sm:$0xff] %v4475_v2  ;;  %5422 = vst [vmem:[#allocation33_spill] sm:$0xff] %v4478_v8  ;;  %v3017_v37 = vpack.c.bf16 %v4440_v34, %v4435_v6  ;;  %2805 = vmatprep.mubr.f32.mxu1 %v4475_v2  ;;  %v4485_v52 = vmax.f32 %v548_v26, 0.0  ;;  %v549_v60 = vadd.f32 %v3631_v17, %v512_v19  ;;  %v451_v26 = vld [vmem:[%s3385_s23 + $0x10] sm:$0x3]  ;;  %v5494_v39 = vld [vmem:[#allocation30_spill] sm:$0xff] }
  0x6d   : > { %vm5423_vm6 = vcmp.le.s32.totalorder %v3509_v46, 16  ;;  %v775_v28 = vrot.slane %v4197_v42, 1  ;;  %v486_v7 = vmul.f32 %v3614_v11, %v449_v43  ;;  %2806 = vmatmul.mubr.f32.gmra.mrb[12].mxu1 %v4478_v8  ;;  %v4502_v6 = vsel %vm4428_vm8, %v4480_v12, 0.0  ;;  %2317 = vmatmul.mubr.msk.f32.gmra.mrb[14].mxu0 %vm3936_vm1, %v4048_v16 }
  0x6e   : > { %vm4492_vm13 = vmand %vm4385_vm0, %vm5423_vm6  ;;  %v487_v34 = vmul.f32 %v3614_v11, %v450_v3  ;;  %vm5426_vm15 = vcmp.le.s32.totalorder %v3471_v30, 16  ;;  %vm5427_vm6 = vcmp.ge.s32.totalorder %v3471_v30, 1  ;;  %v3067_v43 = vpack.c.bf16 %v2367_v53, %v2366_v59  ;;  %3014 = vmatpush3.bf16.msra.mxu1 %v3013_v54 }
  0x6f   : > { %vm4512_vm14 = vmand %vm5427_vm6, %vm5426_vm15  ;;  %v3069_v58 = vpack.c.bf16 %v2351_v22, %v2350_v4  ;;  %v4520_v19 = vsel %vm4385_vm0, %v4485_v52, 0.0  ;;  %v920_v8 = vrot.slane %v4502_v6, 2  ;;  %v579_v3 = vmax.f32 %v549_v60, 0.0  ;;  %3016 = vmatprep.subr.bf16.mxu1 %v3015_v36 }
  0x70   : > { %vm5430_vm1 = vcmask 1046528   ;;  %v921_v30 = vrot.slane %v4520_v19, 2  ;;  %v523_v59 = vadd.f32 %v3631_v17, %v486_v7  ;;  %v4530_v54 = vadd.f32 %v3631_v17, %v487_v34  ;;  %3068 = vmatprep.subr.bf16.mxu0 %v3067_v43 }
  0x71   : > { %v4524_v2 = vsel %vm5430_vm1, %v774_v0, %v775_v28  ;;  %v777_v53 = vrot.slane %v4250_v56, 1  ;;  %v4535_v4 = vsel %vm4492_vm13, %v579_v3, 0.0  ;;  %vm5431_vm15 = vcmp.ge.s32.totalorder %v3479_v33, 1  ;;  %v2368_v56 = vld [vmem:[%s5233_s2 + $0x3d0] sm:$0xff]  ;;  %v895_v33 = vld [vmem:[%s5233_s2 + $0x108] sm:$0xff]  ;;  %3070 = vmatpush3.bf16.msra.mxu0 %v3069_v58  ;;  %v898_v0 = vld [vmem:[%s5233_s2 + $0x120] sm:$0xff] }
  0x72   : > { %1080 = vmatprep.mubr.f32.mxu0 %v4524_v2  ;;  %vm4541_vm1 = vmand %vm4512_vm14, %vm5431_vm15  ;;  %v488_v36 = vmul.f32 %v3614_v11, %v451_v26  ;;  %v779_v22 = vrot.slane %v4311_v51, 1  ;;  %v780_v60 = vrot.slane %v4316_v50, 1  ;;  %vm5434_vm13 = vcmask 1045504   ;;  %v2352_v51 = vld [vmem:[%s5233_s2 + $0x350] sm:$0xff]  ;;  %v2353_v50 = vld [vmem:[%s5233_s2 + $0x358] sm:$0xff]  ;;  %3018 = vmatpush3.bf16.msra.mxu1 %v3017_v37 }
  0x73   : > { %v4555_v7 = vsel %vm5434_vm13, %v920_v8, %v921_v30  ;;  %v923_v34 = vrot.slane %v4535_v4, 2  ;;  %v553_v43 = vmax.f32 %v523_v59, 0.0  ;;  %2318 = vmatmul.mubr.msk.f32.gmra.mrb[16].mxu0 %vm4133_vm12, %v4148_v38  ;;  %vm5436_vm6 = vcmask 1046528   ;;  %v894_v11 = vld [vmem:[%s5233_s2 + $0x100] sm:$0xff] }
  0x74   : > { %5435 = vst [vmem:[#allocation34_spill] sm:$0xff] %v4555_v7  ;;  %2808 = vmatprep.mubr.f32.mxu1 %v4555_v7  ;;  %v4570_v8 = vsel %vm5436_vm6, %v775_v28, %v777_v53  ;;  %v525_v26 = vadd.f32 %v3631_v17, %v488_v36  ;;  %vm5437_vm15 = vmmov %vm5436_vm6  ;;  %v782_v59 = vrot.slane %v4356_v40, 1  ;;  %v5440_v17 = vmax.f32 %v4530_v54, 0.0  ;;  %v2370_v36 = vld [vmem:[%s5233_s2 + $0x3e0] sm:$0xff] }
  0x75   : > { %v4574_v3 = vsel %vm5437_vm15, %v779_v22, %v780_v60  ;;  %v4584_v37 = vsel %vm5434_vm13, %v921_v30, %v923_v34  ;;  %v4588_v28 = vsel %vm4541_vm1, %v553_v43, 0.0  ;;  %1085 = vmatprep.mubr.f32.mxu0 %v4570_v8  ;;  %vm5442_vm6 = vcmp.le.s32.totalorder %v3509_v46, 16  ;;  %v2371_v22 = vld [vmem:[%s5233_s2 + $0x3e8] sm:$0xff]  ;;  %v896_v46 = vld [vmem:[%s5233_s2 + $0x110] sm:$0xff] }
  0x76   : > { %5438 = vst [vmem:[#allocation35_spill] sm:$0xff] %v4584_v37  ;;  %5439 = vst [vmem:[#allocation36_spill] sm:$0xff] %v4588_v28  ;;  %v4594_v40 = vsel %vm4512_vm14, %v5440_v17, 0.0  ;;  %v3071_v53 = vpack.c.bf16 %v2369_v55, %v2368_v56  ;;  %2809 = vmatmul.mubr.f32.gmra.mrb[14].mxu1 %v4584_v37  ;;  %v749_v58 = vrot.slane %v4588_v28, 1  ;;  %v555_v17 = vmax.f32 %v525_v26, 0.0  ;;  %v2354_v56 = vld [vmem:[%s5233_s2 + $0x360] sm:$0xff] }
  0x77   : > { %5441 = vst [vmem:[#allocation37_spill] sm:$0xff] %v4594_v40  ;;  %vm4601_vm15 = vmand %vm4512_vm14, %vm5442_vm6  ;;  %v750_v34 = vrot.slane %v4594_v40, 1  ;;  %v3073_v7 = vpack.c.bf16 %v2353_v50, %v2352_v51  ;;  %v2355_v55 = vld [vmem:[%s5233_s2 + $0x368] sm:$0xff]  ;;  %2319 = vmatmul.mubr.msk.f32.gmra.mrb[18].mxu0 %vm4040_vm9, %v4150_v32  ;;  %v3019_v37 = vpack.c.bf16 %v895_v33, %v894_v11  ;;  %v897_v51 = vld [vmem:[%s5233_s2 + $0x118] sm:$0xff]  ;;  %vm5445_vm13 = vcmask 1046528  }
  0x78   : > { %3072 = vmatprep.subr.bf16.mxu0 %v3071_v53  ;;  %v4632_v26 = vsel %vm4601_vm15, %v555_v17, 0.0  ;;  %1090 = vmatprep.mubr.f32.mxu0 %v4574_v3  ;;  %vm5446_vm6 = vmmov %vm5445_vm13  ;;  %v3075_v33 = vpack.c.bf16 %v2371_v22, %v2370_v36  ;;  %v784_v53 = vrot.slane %v4401_v20, 1  ;;  %v785_v28 = vrot.slane %v4416_v49, 1  ;;  %v2372_v30 = vld [vmem:[%s5233_s2 + $0x3f0] sm:$0xff]  ;;  %v2357_v49 = vld [vmem:[%s5233_s2 + $0x378] sm:$0xff] }
  0x79   : > { %v751_v50 = vsel %vm5445_vm13, %v749_v58, %v750_v34  ;;  %v4636_v40 = vsel %vm5446_vm6, %v780_v60, %v782_v59  ;;  %v752_v11 = vrot.slane %v4632_v26, 1  ;;  %3074 = vmatpush3.bf16.msra.mxu0 %v3073_v7  ;;  %v3077_v41 = vpack.c.bf16 %v2355_v55, %v2354_v56  ;;  %v2373_v58 = vld [vmem:[%s5233_s2 + $0x3f8] sm:$0xff]  ;;  %3020 = vmatprep.subr.bf16.mxu1 %v3019_v37  ;;  %v2356_v20 = vld [vmem:[%s5233_s2 + $0x370] sm:$0xff]  ;;  %vm5447_vm15 = vmmov %vm5446_vm6 }
  0x7a   : > { %1330 = vmatprep.mubr.f32.mxu1 %v751_v50  ;;  %v3023_v60 = vpack.c.bf16 %v897_v51, %v896_v46  ;;  %3076 = vmatprep.subr.bf16.mxu0 %v3075_v33  ;;  %v899_v46 = vld [vmem:[%s5233_s2 + $0x128] sm:$0xff]  ;;  %v787_v36 = vrot.slane %v4421_v21, 1  ;;  %v3081_v22 = vpack.c.bf16 %v2357_v49, %v2356_v20  ;;  %v5449_v56 = vmax.f32 %v4530_v54, 0.0  ;;  %v901_v21 = vld [vmem:[%s5233_s2 + $0x138] sm:$0xff]  ;;  %v904_v50 = vld [vmem:[%s5233_s2 + $0x150] sm:$0xff] }
  0x7b   : > { %2326 = vmatmul.mubr.msk.f32.vlgmr.msra.gmra.mrb[16].mxu1 %vm4541_vm1, %v553_v43  ;;  %v753_v7 = vsel %vm5447_vm15, %v750_v34, %v752_v11  ;;  %2320 = vmatmul.mubr.msk.f32.gmra.mrb[20].mxu0 %vm4256_vm2, %v4266_v44  ;;  %v3079_v43 = vpack.c.bf16 %v2373_v58, %v2372_v30  ;;  %vm5448_vm1 = vmmov %vm5446_vm6  ;;  %v2374_v34 = vld [vmem:[%s5233_s2 + $0x400] sm:$0xff]  ;;  %v2375_v17 = vld [vmem:[%s5233_s2 + $0x408] sm:$0xff]  ;;  %v3027_v55 = vpack.c.bf16 %v899_v46, %v898_v0 }
  0x7c   : > { %1335 = vmatprep.mubr.f32.mxu1 %v753_v7  ;;  %1095 = vmatprep.mubr.f32.mxu0 %v4636_v40  ;;  %v4667_v59 = vsel %vm5448_vm1, %v784_v53, %v785_v28  ;;  %v4691_v42 = vpack.c.bf16 %v2375_v17, %v2374_v34  ;;  %vm5453_vm13 = vmmov %vm5448_vm1  ;;  %v906_v33 = vld [vmem:[%s5233_s2 + $0x160] sm:$0xff]  ;;  %v907_v11 = vld [vmem:[%s5233_s2 + $0x168] sm:$0xff] }
  0x7d   : > { %3022 = vmatpush3.bf16.msra.mxu1 %v3019_v37  ;;  %3078 = vmatpush3.bf16.msra.mxu0 %v3077_v41  ;;  %v900_v41 = vld [vmem:[%s5233_s2 + $0x130] sm:$0xff]  ;;  %v914_v37 = vrot.slane %v4520_v19, 1  ;;  %v903_v19 = vld [vmem:[%s5233_s2 + $0x148] sm:$0xff]  ;;  %v5456_v30 = vld [vmem:[#allocation9_spill] sm:$0xff]  ;;  %v3043_v20 = vpack.c.bf16 %v907_v11, %v906_v33  ;;  %v809_v33 = vrot.slane %v4632_v26, 2 }
  0x7e   : > { %3024 = vmatprep.subr.bf16.mxu1 %v3023_v60  ;;  %3080 = vmatprep.subr.bf16.mxu0 %v3079_v43  ;;  %v3031_v51 = vpack.c.bf16 %v901_v21, %v900_v41  ;;  %v5455_v53 = vld [vmem:[#allocation11_spill] sm:$0xff]  ;;  %vm5457_vm6 = vnez %v5456_v30  ;;  %v2376_v58 = vld [vmem:[%s5233_s2 + $0x410] sm:$0xff]  ;;  %v909_v0 = vld [vmem:[%s5233_s2 + $0x178] sm:$0xff] }
  0x7f   : > { %2327 = vmatmul.mubr.msk.f32.gmra.mrb[18].mxu1 %vm4512_vm14, %v5449_v56  ;;  %2321 = vmatmul.mubr.msk.f32.gmra.mrb[22].mxu0 %vm4173_vm7, %v4268_v5  ;;  %vm5450_vm14 = vmmov %vm5448_vm1  ;;  %v5458_v49 = vld [vmem:[#allocation23_spill] sm:$0xff]  ;;  %v908_v7 = vld [vmem:[%s5233_s2 + $0x170] sm:$0xff] }
  0x80   : > { %1340 = vmatprep.mubr.f32.mxu1 %v3787_v23  ;;  %1100 = vmatprep.mubr.f32.mxu0 %v4667_v59  ;;  %v4694_v54 = vsel %vm5450_vm14, %v785_v28, %v787_v36  ;;  %v913_v23 = vrot.slane %v4502_v6, 1  ;;  %v902_v6 = vld [vmem:[%s5233_s2 + $0x140] sm:$0xff]  ;;  %v5452_v28 = vld [vmem:[#allocation17_spill] sm:$0xff]  ;;  %v2379_v34 = vld [vmem:[%s5233_s2 + $0x428] sm:$0xff]  ;;  %v3047_v17 = vpack.c.bf16 %v909_v0, %v908_v7  ;;  %vm5467_vm14 = vnez %v5350_v1 }
  0x81   : > { %3026 = vmatpush3.bf16.msra.mxu1 %v3023_v60  ;;  %3082 = vmatpush3.bf16.msra.mxu0 %v3081_v22  ;;  %v2377_v60 = vld [vmem:[%s5233_s2 + $0x418] sm:$0xff]  ;;  %v5459_v43 = vld [vmem:[#allocation18_spill] sm:$0xff]  ;;  %v2380_v21 = vld [vmem:[%s5233_s2 + $0x430] sm:$0xff] }
  0x82   : > { %3028 = vmatprep.subr.bf16.mxu1 %v3027_v55  ;;  %3084 = vmatprep.subr.bf16.mxu0 %v4691_v42  ;;  %v4768_v46 = vpack.c.bf16 %v2377_v60, %v2376_v58  ;;  %v5460_v36 = vld [vmem:[#allocation14_spill] sm:$0xff]  ;;  %v5469_v1 = vld [vmem:[#allocation36_spill] sm:$0xff]  ;;  %v5470_v62 = vld [vmem:[#allocation37_spill] sm:$0xff] }
  0x83   : > { %2328 = vmatmul.mubr.msk.f32.gmra.mrb[20].mxu1 %vm3651_vm11, %v3712_v45  ;;  %2322 = vmatmul.mubr.msk.f32.gmra.mrb[24].mxu0 %vm4289_vm5, %v4378_v25  ;;  %vm5451_vm11 = vmmov %vm5448_vm1  ;;  %v916_v45 = vrot.slane %v4535_v4, 1  ;;  %v905_v4 = vld [vmem:[%s5233_s2 + $0x158] sm:$0xff]  ;;  %vm5461_vm15 = vnez %v5460_v36  ;;  %v2378_v22 = vld [vmem:[%s5233_s2 + $0x420] sm:$0xff] }
  0x84   : > { %1345 = vmatprep.mubr.f32.mxu1 %v3826_v9  ;;  %1105 = vmatprep.mubr.f32.mxu0 %v4694_v54  ;;  %v4714_v24 = vsel %vm5451_vm11, %v913_v23, %v914_v37  ;;  %v3035_v9 = vpack.c.bf16 %v903_v19, %v902_v6  ;;  %v5462_v56 = vld [vmem:[#allocation26_spill] sm:$0xff]  ;;  %v5465_v23 = vld [vmem:[#allocation19_spill] sm:$0xff]  ;;  %v2384_v19 = vld [vmem:[%s5233_s2 + $0x450] sm:$0xff] }
  0x85   : > { %3030 = vmatpush3.bf16.msra.mxu1 %v3027_v55  ;;  %v4732_v18 = vsel %vm5453_vm13, %v914_v37, %v916_v45  ;;  %v4786_v55 = vpack.c.bf16 %v2379_v34, %v2378_v22  ;;  %vm5466_vm1 = vnez %v5465_v23  ;;  %v2382_v37 = vld [vmem:[%s5233_s2 + $0x440] sm:$0xff]  ;;  %v2385_v45 = vld [vmem:[%s5233_s2 + $0x458] sm:$0xff]  ;;  %v478_v58 = vld [vmem:[%s3400_s18 + $0x28] sm:$0x3] }
  0x86   : > { %3032 = vmatprep.subr.bf16.mxu1 %v3031_v51  ;;  %v5471_v11 = vld [vmem:[#allocation6_spill] sm:$0xff]  ;;  %v5482_v36 = vld [vmem:[#allocation15_spill] sm:$0xff] }
  0x87   : > { %2329 = vmatmul.mubr.msk.f32.gmra.mrb[22].mxu1 %vm3635_vm10, %v3714_v47  ;;  %2323 = vmatmul.mubr.msk.f32.gmra.mrb[26].mxu0 %vm4237_vm4, %v4391_v63  ;;  %vm5454_vm10 = vnez %v5331_v14  ;;  %v3039_v47 = vpack.c.bf16 %v905_v4, %v904_v50  ;;  %v2381_v14 = vld [vmem:[%s5233_s2 + $0x438] sm:$0xff]  ;;  %v5476_v7 = vld [vmem:[#allocation10_spill] sm:$0xff] }
  0x88   : > { %1350 = vmatprep.mubr.f32.mxu1 %v5452_v28  ;;  %1110 = vmatprep.mubr.f32.mxu0 %v4714_v24 }
  0x89   : > { %3034 = vmatpush3.bf16.msra.mxu1 %v3031_v51  ;;  %v2383_v51 = vld [vmem:[%s5233_s2 + $0x448] sm:$0xff] }
  0x8a   : > { %3036 = vmatprep.subr.bf16.mxu1 %v3035_v9  ;;  %v4823_v6 = vpack.c.bf16 %v2383_v51, %v2382_v37  ;;  %v5498_v37 = vld [vmem:[#allocation34_spill] sm:$0xff] }
  0x8b   : > { %2330 = vmatmul.mubr.msk.f32.gmra.mrb[24].mxu1 %vm5454_vm10, %v3803_v57  ;;  %2324 = vmatmul.mubr.msk.f32.gmra.mrb[28].mxu0 %vm4428_vm8, %v4480_v12 }
  0x8c   : > { %1355 = vmatprep.mubr.f32.mxu1 %v3989_v31  ;;  %1115 = vmatprep.mubr.f32.mxu0 %v4732_v18 }
  0x8d   : > { %3038 = vmatpush3.bf16.msra.mxu1 %v3035_v9  ;;  %v4841_v9 = vpack.c.bf16 %v2385_v45, %v2384_v19  ;;  %v5500_v19 = vld [vmem:[#allocation35_spill] sm:$0xff] }
  0x8e   : > { %3040 = vmatprep.subr.bf16.mxu1 %v3039_v47 }
  0x8f   : > { %2331 = vmatmul.mubr.msk.f32.gmra.mrb[26].mxu1 %vm5457_vm6, %v5455_v53  ;;  %2325 = vmatmul.mubr.msk.f32.gmra.mrb[30].mxu0 %vm4385_vm0, %v4485_v52 }
  0x90   : > { %1360 = vmatprep.mubr.f32.mxu1 %v5458_v49  ;;  %1686 = vmatprep.mubr.f32.mxu0 %v5452_v28  ;;  %v2386_v28 = vld [vmem:[%s5233_s2 + $0x460] sm:$0xff] }
  0x91   : > { %3042 = vmatpush3.bf16.msra.mxu1 %v3039_v47  ;;  %v2388_v47 = vld [vmem:[%s5233_s2 + $0x470] sm:$0xff] }
  0x92   : > { %3044 = vmatprep.subr.bf16.mxu1 %v3043_v20 }
  0x93   : > { %2332 = vmatmul.mubr.msk.f32.gmra.mrb[28].mxu1 %vm5461_vm15, %v5459_v43  ;;  %2390 = vmatmul.mubr.msk.f32.vlgmr.msra.gmra.mrb[32].mxu0 %vm5454_vm10, %v3803_v57  ;;  %v5464_v57 = vld [vmem:[#allocation29_spill] sm:$0xff] }
  0x94   : > { %1365 = vmatprep.mubr.f32.mxu1 %v5462_v56  ;;  %3086 = vmatpush3.bf16.msra.mxu0 %v4691_v42 }
  0x95   : > { %1691 = vmatprep.mubr.f32.mxu0 %v3989_v31  ;;  %3088 = vmatprep.subr.bf16.mxu0 %v4768_v46  ;;  %v4804_v31 = vpack.c.bf16 %v2381_v14, %v2380_v21  ;;  %v5489_v21 = vld [vmem:[#allocation24_spill] sm:$0xff] }
  0x96   : > { %3046 = vmatpush3.bf16.msra.mxu1 %v3043_v20  ;;  %v5496_v14 = vld [vmem:[#allocation32_spill] sm:$0xff] }
  0x97   : > { %2333 = vmatmul.mubr.msk.f32.gmra.mrb[30].mxu1 %vm3813_vm3, %v3929_v10  ;;  %3048 = vmatprep.subr.bf16.mxu1 %v3047_v17 }
  0x98   : > { %1370 = vmatprep.mubr.f32.mxu1 %v5464_v57  ;;  %2391 = vmatmul.mubr.msk.f32.gmra.mrb[34].mxu0 %vm5457_vm6, %v5455_v53  ;;  %v593_v53 = vadd.s32 9, %v5471_v11 }
  0x99   : > { %1696 = vmatprep.mubr.f32.mxu0 %v5458_v49  ;;  %3090 = vmatpush3.bf16.msra.mxu0 %v4768_v46 }
  0x9a   : > { %3092 = vmatprep.subr.bf16.mxu0 %v4786_v55  ;;  %3050 = vmatpush3.bf16.msra.mxu1 %v3047_v17  ;;  %vm617_vm11 = vcmp.le.s32.totalorder %v593_v53, 16 }
  0x9b   : > { %2334 = vmatmul.mubr.msk.f32.gmra.mrb[32].mxu1 %vm5466_vm1, %v4032_v61  ;;  %3115 = vmatprep.subr.bf16.mxu1 %v4691_v42 }
  0x9c   : > { %1375 = vmatprep.mubr.f32.mxu1 %v4453_v29  ;;  %2392 = vmatmul.mubr.msk.f32.gmra.mrb[36].mxu0 %vm5461_vm15, %v5459_v43  ;;  %v5477_v43 = vld [vmem:[#allocation7_spill] sm:$0xff] }
  0x9d   : > { %1701 = vmatprep.mubr.f32.mxu0 %v5462_v56  ;;  %3094 = vmatpush3.bf16.msra.mxu0 %v4786_v55  ;;  %v5486_v56 = vld [vmem:[#allocation20_spill] sm:$0xff] }
  0x9e   : > { %3096 = vmatprep.subr.bf16.mxu0 %v4804_v31 }
  0x9f   : > { %2335 = vmatmul.mubr.msk.f32.gmra.mrb[34].mxu1 %vm5467_vm14, %v4048_v16 }
  0xa0   : > { %1380 = vmatprep.mubr.f32.mxu1 %v4524_v2  ;;  %2393 = vmatmul.mubr.msk.f32.gmra.mrb[38].mxu0 %vm3813_vm3, %v3929_v10  ;;  %v2387_v10 = vld [vmem:[%s5233_s2 + $0x468] sm:$0xff]  ;;  %vm5472_vm3 = vcmask 1045504  }
  0xa1   : > { %1706 = vmatprep.mubr.f32.mxu0 %v5464_v57  ;;  %3098 = vmatpush3.bf16.msra.mxu0 %v4804_v31  ;;  %v4859_v50 = vpack.c.bf16 %v2387_v10, %v2386_v28  ;;  %v5497_v57 = vld [vmem:[#allocation33_spill] sm:$0xff] }
  0xa2   : > { %3100 = vmatprep.subr.bf16.mxu0 %v4823_v6 }
  0xa3   : > { %2336 = vmatmul.mubr.msk.f32.gmra.mrb[36].mxu1 %vm4133_vm12, %v4148_v38 }
  0xa4   : > { %1385 = vmatprep.mubr.f32.mxu1 %v4570_v8  ;;  %2394 = vmatmul.mubr.msk.f32.gmra.mrb[40].mxu0 %vm5466_vm1, %v4032_v61  ;;  %v2389_v61 = vld [vmem:[%s5233_s2 + $0x478] sm:$0xff] }
  0xa5   : > { %1711 = vmatprep.mubr.f32.mxu0 %v4453_v29  ;;  %3102 = vmatpush3.bf16.msra.mxu0 %v4823_v6  ;;  %v4877_v29 = vpack.c.bf16 %v2389_v61, %v2388_v47 }
  0xa6   : > { %3104 = vmatprep.subr.bf16.mxu0 %v4841_v9 }
  0xa7   : > { %2337 = vmatmul.mubr.msk.f32.gmra.mrb[38].mxu1 %vm4040_vm9, %v4150_v32 }
  0xa8   : > { %1390 = vmatprep.mubr.f32.mxu1 %v4574_v3  ;;  %2395 = vmatmul.mubr.msk.f32.gmra.mrb[42].mxu0 %vm5467_vm14, %v4048_v16  ;;  %v806_v16 = vrot.slane %v5469_v1, 2 }
  0xa9   : > { %1716 = vmatprep.mubr.f32.mxu0 %v4524_v2  ;;  %3106 = vmatpush3.bf16.msra.mxu0 %v4841_v9  ;;  %v476_v2 = vld [vmem:[%s3400_s18 + $0x18] sm:$0xff] }
  0xaa   : > { %3108 = vmatprep.subr.bf16.mxu0 %v4859_v50 }
  0xab   : > { %2338 = vmatmul.mubr.msk.f32.gmra.mrb[40].mxu1 %vm4256_vm2, %v4266_v44 }
  0xac   : > { %1395 = vmatprep.mubr.f32.mxu1 %v4636_v40  ;;  %2396 = vmatmul.mubr.msk.f32.gmra.mrb[44].mxu0 %vm4133_vm12, %v4148_v38  ;;  %v807_v38 = vrot.slane %v5470_v62, 2  ;;  %vm607_vm12 = vcmp.ge.s32.totalorder %v593_v53, 1 }
  0xad   : > { %1721 = vmatprep.mubr.f32.mxu0 %v4570_v8  ;;  %3110 = vmatpush3.bf16.msra.mxu0 %v4859_v50  ;;  %v477_v8 = vld [vmem:[%s3400_s18 + $0x20] sm:$0xff]  ;;  %s1967_s18 = ssub.s32 16, %s3376_s12 }
  0xae   : > { %3112 = vmatprep.subr.bf16.mxu0 %v4877_v29  ;;  %v808_v26 = vsel %vm5472_vm3, %v806_v16, %v807_v38  ;;  %s2407_s26 = sshll.u32 %s1967_s18, 4 }
  0xaf   : > { %2339 = vmatmul.mubr.msk.f32.gmra.mrb[42].mxu1 %vm4173_vm7, %v4268_v5 }
  0xb0   : > { %1400 = vmatprep.mubr.f32.mxu1 %v4667_v59  ;;  %2397 = vmatmul.mubr.msk.f32.gmra.mrb[46].mxu0 %vm4040_vm9, %v4150_v32  ;;  %v3255_v32 = vld [vmem:[%s5235_s4] ss:$0 sm:$0xff]  ;;  %vm5473_vm9 = vmmov %vm5472_vm3 }
  0xb1   : > { %1726 = vmatprep.mubr.f32.mxu0 %v4574_v3  ;;  %3114 = vmatpush3.bf16.msra.mxu0 %v4877_v29  ;;  %v513_v3 = vmul.f32 %v3255_v32, %v476_v2  ;;  %v514_v30 = vmul.f32 %v3255_v32, %v477_v8  ;;  %v810_v60 = vsel %vm5473_vm9, %v807_v38, %v809_v33 }
  0xb2   : > { %v515_v20 = vmul.f32 %v3255_v32, %v478_v58 }
  0xb3   : > { %2340 = vmatmul.mubr.msk.f32.gmra.mrb[44].mxu1 %vm4289_vm5, %v4378_v25 }
  0xb4   : > { %1405 = vmatprep.mubr.f32.mxu1 %v4694_v54  ;;  %2398 = vmatmul.mubr.msk.f32.gmra.mrb[48].mxu0 %vm4256_vm2, %v4266_v44  ;;  %v550_v44 = vadd.f32 %v3256_v13, %v513_v3  ;;  %vm4928_vm2 = vmand %vm607_vm12, %vm617_vm11  ;;  %v552_v0 = vadd.f32 %v3256_v13, %v515_v20 }
  0xb5   : > { %1731 = vmatprep.mubr.f32.mxu0 %v4636_v40  ;;  %v551_v40 = vadd.f32 %v3256_v13, %v514_v30 }
  0xb6   : > { %v580_v35 = vmax.f32 %v550_v44, 0.0  ;;  %v582_v22 = vmax.f32 %v552_v0, 0.0 }
  0xb7   : > { %2341 = vmatmul.mubr.msk.f32.gmra.mrb[46].mxu1 %vm4237_vm4, %v4391_v63 }
  0xb8   : > { %2843 = vmatprep.mubr.f32.mxu1 %v808_v26  ;;  %2399 = vmatmul.mubr.msk.f32.gmra.mrb[50].mxu0 %vm4173_vm7, %v4268_v5  ;;  %v581_v5 = vmax.f32 %v551_v40, 0.0  ;;  %vm5478_vm7 = vcmp.ge.s32.totalorder %v5477_v43, 1 }
  0xb9   : > { %1736 = vmatprep.mubr.f32.mxu0 %v4667_v59  ;;  %vm4942_vm13 = vmand %vm4928_vm2, %vm5478_vm7 }
  0xba   : > { %v721_v27 = vsel %vm4942_vm13, %v580_v35, 0.0 }
  0xbb   : > { %2844 = vmatmul.mubr.f32.vlgmr.msra.gmra.mrb[0].mxu1 %v810_v60  ;;  %v1559_v34 = vrot.slane %v721_v27, 1 }
  0xbc   : > { %3123 = vmatpush3.bf16.msra.mxu1 %v4691_v42  ;;  %2846 = vmatprep.mubr.f32.mxu1 %v5476_v7  ;;  %v5481_v42 = vld [vmem:[#allocation13_spill] sm:$0xff] }
  0xbd   : > { %3116 = vmatprep.subr.bf16.mxu1 %v4768_v46  ;;  %2400 = vmatmul.mubr.msk.f32.gmra.mrb[52].mxu0 %vm4289_vm5, %v4378_v25  ;;  %v722_v25 = vsel %vm4928_vm2, %v581_v5, 0.0 }
  0xbe   : > { %1741 = vmatprep.mubr.f32.mxu0 %v4694_v54  ;;  %v5483_v54 = vld [vmem:[#allocation8_spill] sm:$0xff]  ;;  %v1560_v17 = vrot.slane %v722_v25, 1  ;;  %v1567_v23 = vrot.slane %v722_v25, 2 }
  0xbf   : > { %2847 = vmatmul.mubr.f32.gmra.mrb[2].mxu1 %v5481_v42  ;;  %vm5484_vm5 = vcmp.le.s32.totalorder %v5483_v54, 16 }
  0xc0   : > { %3124 = vmatpush3.bf16.msra.mxu1 %v4768_v46  ;;  %2849 = vmatprep.mubr.f32.mxu1 %v5482_v36  ;;  %vm693_vm10 = vmand %vm4928_vm2, %vm5484_vm5  ;;  %v5485_v46 = vld [vmem:[#allocation16_spill] sm:$0xff] }
  0xc1   : > { %3117 = vmatprep.subr.bf16.mxu1 %v4786_v55  ;;  %2401 = vmatmul.mubr.msk.f32.gmra.mrb[54].mxu0 %vm4237_vm4, %v4391_v63  ;;  %v723_v41 = vsel %vm693_vm10, %v582_v22, 0.0  ;;  %vm5488_vm4 = vcmask 1046528  }
  0xc2   : > { %1746 = vmatprep.mubr.f32.mxu0 %v4714_v24  ;;  %v1561_v63 = vsel %vm5488_vm4, %v1559_v34, %v1560_v17  ;;  %v1562_v24 = vrot.slane %v723_v41, 1  ;;  %v1569_v51 = vrot.slane %v723_v41, 2 }
  0xc3   : > { %2850 = vmatmul.mubr.f32.gmra.mrb[4].mxu1 %v5485_v46 }
  0xc4   : > { %3125 = vmatpush3.bf16.msra.mxu1 %v4786_v55  ;;  %2852 = vmatprep.mubr.f32.mxu1 %v5486_v56  ;;  %v5493_v55 = vld [vmem:[#allocation28_spill] sm:$0xff] }
  0xc5   : > { %3118 = vmatprep.subr.bf16.mxu1 %v4804_v31  ;;  %2402 = vmatmul.mubr.msk.f32.gmra.mrb[56].mxu0 %vm4428_vm8, %v4480_v12  ;;  %vm5491_vm8 = vmmov %vm5488_vm4 }
  0xc6   : > { %1751 = vmatprep.mubr.f32.mxu0 %v4732_v18  ;;  %v1563_v12 = vsel %vm5491_vm8, %v1560_v17, %v1562_v24  ;;  %v5492_v18 = vld [vmem:[#allocation27_spill] sm:$0xff] }
  0xc7   : > { %2853 = vmatmul.mubr.f32.gmra.mrb[6].mxu1 %v5487_v48 }
  0xc8   : > { %3126 = vmatpush3.bf16.msra.mxu1 %v4804_v31  ;;  %2855 = vmatprep.mubr.f32.mxu1 %v5489_v21  ;;  %v1566_v31 = vrot.slane %v721_v27, 2 }
  0xc9   : > { %3119 = vmatprep.subr.bf16.mxu1 %v4823_v6  ;;  %2403 = vmatmul.mubr.msk.f32.gmra.mrb[58].mxu0 %vm4385_vm0, %v4485_v52  ;;  %v5495_v52 = vld [vmem:[#allocation31_spill] sm:$0xff]  ;;  %vm5499_vm0 = vmmov %vm5472_vm3 }
  0xca   : > { %1756 = vmatprep.mubr.f32.mxu0 %v1561_v63  ;;  %vm5501_vm6 = vmmov %vm5499_vm0 }
  0xcb   : > { %2856 = vmatmul.mubr.f32.gmra.mrb[8].mxu1 %v5490_v15  ;;  %v1570_v45 = vsel %vm5501_vm6, %v1567_v23, %v1569_v51 }
  0xcc   : > { %3127 = vmatpush3.bf16.msra.mxu1 %v4823_v6  ;;  %2858 = vmatprep.mubr.f32.mxu1 %v5492_v18  ;;  %v1568_v6 = vsel %vm5499_vm0, %v1566_v31, %v1567_v23 }
  0xcd   : > { %3120 = vmatprep.subr.bf16.mxu1 %v4841_v9  ;;  %2404 = vmatmul.mubr.msk.f32.gmra.mrb[60].mxu0 %vm4942_vm13, %v580_v35 }
  0xce   : > { %1761 = vmatprep.mubr.f32.mxu0 %v1563_v12 }
  0xcf   : > { %2859 = vmatmul.mubr.f32.gmra.mrb[10].mxu1 %v5493_v55 }
  0xd0   : > { %3128 = vmatpush3.bf16.msra.mxu1 %v4841_v9  ;;  %2861 = vmatprep.mubr.f32.mxu1 %v5494_v39 }
  0xd1   : > { %3121 = vmatprep.subr.bf16.mxu1 %v4859_v50  ;;  %2405 = vmatmul.mubr.msk.f32.gmra.mrb[62].mxu0 %vm4928_vm2, %v581_v5 }
  0xd2   : > { %2899 = vmatprep.mubr.f32.mxu0 %v5482_v36 }
  0xd3   : > { %2862 = vmatmul.mubr.f32.gmra.mrb[12].mxu1 %v5495_v52 }
  0xd4   : > { %3129 = vmatpush3.bf16.msra.mxu1 %v4859_v50  ;;  %2864 = vmatprep.mubr.f32.mxu1 %v5496_v14 }
  0xd5   : > { %3122 = vmatprep.subr.bf16.mxu1 %v4877_v29  ;;  %2900 = vmatmul.mubr.f32.vlgmr.msra.gmra.mrb[64].mxu0 %v5485_v46 }
  0xd6   : > { %2902 = vmatprep.mubr.f32.mxu0 %v5486_v56 }
  0xd7   : > { %2865 = vmatmul.mubr.f32.gmra.mrb[14].mxu1 %v5497_v57 }
  0xd8   : > { %3130 = vmatpush3.bf16.msra.mxu1 %v4877_v29  ;;  %2911 = vmatprep.mubr.f32.mxu1 %v5494_v39 }
  0xd9   : > { %2903 = vmatmul.mubr.f32.gmra.mrb[66].mxu0 %v5487_v48 }
  0xda   : > { %2905 = vmatprep.mubr.f32.mxu0 %v5489_v21 }
  0xdb   : > { %2912 = vmatmul.mubr.f32.vlgmr.msra.gmra.mrb[8].mxu1 %v5495_v52 }
  0xdc   : > { %2914 = vmatprep.mubr.f32.mxu1 %v5496_v14 }
  0xdd   : > { %2906 = vmatmul.mubr.f32.gmra.mrb[68].mxu0 %v5490_v15 }
  0xde   : > { %2908 = vmatprep.mubr.f32.mxu0 %v5492_v18 }
  0xdf   : > { %2915 = vmatmul.mubr.f32.gmra.mrb[10].mxu1 %v5497_v57 }
  0xe0   : > { %2917 = vmatprep.mubr.f32.mxu1 %v5498_v37 }
  0xe1   : > { %2909 = vmatmul.mubr.f32.gmra.mrb[70].mxu0 %v5493_v55 }
  0xe3   : > { %2918 = vmatmul.mubr.f32.gmra.mrb[12].mxu1 %v5500_v19 }
  0xe4   : > { %2920 = vmatprep.mubr.f32.mxu1 %v1568_v6 }
  0xe7   : > { %2921 = vmatmul.mubr.f32.gmra.mrb[14].mxu1 %v1570_v45 }
 0x11d   : > { %v2451_v9 = vpop.f32.mrb[0].mxu0 }
 0x11e   : > { %v2452_v28 = vpop.f32.mrb[1].mxu0 }
 0x11f   : > { %v2453_v10 = vadd.f32 %v2452_v28, %v2451_v9 }
 0x121   : > { %v2454_v50 = vpop.f32.mrb[2].mxu0 }
 0x122   : > { %v2455_v4 = vpop.f32.mrb[3].mxu0 }
 0x123   : > { %v2456_v47 = vadd.f32 %v2455_v4, %v2454_v50 }
 0x125   : > { %v2457_v61 = vpop.f32.mrb[4].mxu0 }
 0x126   : > { %v2458_v29 = vpop.f32.mrb[5].mxu0 }
 0x127   : > { %v2459_v1 = vadd.f32 %v2458_v29, %v2457_v61 }
 0x12a   : > { %v2460_v16 = vpop.f32.mrb[6].mxu0 }
 0x12b   : > { %v2461_v62 = vpop.f32.mrb[7].mxu0 }
 0x12c   : > { %v2462_v38 = vadd.f32 %v2461_v62, %v2460_v16 }
 0x12e   : > { %v2463_v2 = vpop.f32.mrb[8].mxu0 }
 0x12f   : > { %v2464_v8 = vpop.f32.mrb[9].mxu0 }
 0x130   : > { %v2465_v33 = vadd.f32 %v2464_v8, %v2463_v2 }
 0x132   : > { %v2466_v11 = vpop.f32.mrb[10].mxu0 }
 0x133   : > { %v2467_v53 = vpop.f32.mrb[11].mxu0 }
 0x134   : > { %v2468_v32 = vadd.f32 %v2467_v53, %v2466_v11 }
 0x138   : > { %v2469_v3 = vpop.f32.mrb[12].mxu0 }
 0x139   : > { %v2470_v30 = vpop.f32.mrb[13].mxu0 }
 0x13a   : > { %v2471_v26 = vadd.f32 %v2470_v30, %v2469_v3 }
 0x140   : > { %v2472_v58 = vpop.f32.mrb[14].mxu0 }
 0x141   : > { %v2473_v60 = vpop.f32.mrb[15].mxu0 }
 0x142   : > { %v5014_v13 = vadd.f32 %v2473_v60, %v2472_v58 }
 0x146   : > { %v2475_v44 = vpop.f32.mrb[16].mxu0 }
 0x147   : > { %v2476_v40 = vpop.f32.mrb[17].mxu0 }
 0x148   : > { %v5016_v20 = vadd.f32 %v2476_v40, %v2475_v44 }
 0x14a   : > { %v2478_v49 = vpop.f32.mrb[18].mxu0 }
 0x14b   : > { %v2479_v7 = vpop.f32.mrb[19].mxu0 }
 0x14c   : > { %v5018_v35 = vadd.f32 %v2479_v7, %v2478_v49 }
 0x14e   : > { %v2563_v5 = vpop.f32.mrb[16].mxu1  ;;  %v2481_v59 = vpop.f32.mrb[20].mxu0 }
 0x14f   : > { %v2564_v0 = vpop.f32.mrb[17].mxu1  ;;  %v2482_v36 = vpop.f32.mrb[21].mxu0 }
 0x150   : > { %v2565_v42 = vadd.f32 %v2564_v0, %v2563_v5  ;;  %v5020_v27 = vadd.f32 %v2482_v36, %v2481_v59 }
 0x152   : > { %v2566_v25 = vpop.f32.mrb[18].mxu1  ;;  %v5022_v22 = vadd.f32 %v2565_v42, %v2453_v10  ;;  %v2484_v34 = vpop.f32.mrb[22].mxu0 }
 0x153   : > { %v2567_v46 = vpop.f32.mrb[19].mxu1  ;;  %v2485_v56 = vpop.f32.mrb[23].mxu0 }
 0x154   : > { %v2568_v17 = vadd.f32 %v2567_v46, %v2566_v25  ;;  %v5024_v41 = vadd.f32 %v2485_v56, %v2484_v34 }
 0x156   : > { %v2569_v48 = vpop.f32.mrb[20].mxu1  ;;  %v5026_v63 = vadd.f32 %v2568_v17, %v2456_v47  ;;  %v2487_v21 = vpop.f32.mrb[24].mxu0 }
 0x157   : > { %v2570_v24 = vpop.f32.mrb[21].mxu1  ;;  %v2488_v12 = vpop.f32.mrb[25].mxu0 }
 0x158   : > { %v2571_v15 = vadd.f32 %v2570_v24, %v2569_v48  ;;  %v5028_v18 = vadd.f32 %v2488_v12, %v2487_v21 }
 0x15a   : > { %v2572_v55 = vpop.f32.mrb[22].mxu1  ;;  %v5030_v39 = vadd.f32 %v2571_v15, %v2459_v1  ;;  %v2490_v14 = vpop.f32.mrb[26].mxu0 }
 0x15b   : > { %v2573_v52 = vpop.f32.mrb[23].mxu1  ;;  %v2491_v31 = vpop.f32.mrb[27].mxu0 }
 0x15c   : > { %v2574_v57 = vadd.f32 %v2573_v52, %v2572_v55  ;;  %v5032_v23 = vadd.f32 %v2491_v31, %v2490_v14 }
 0x15e   : > { %v2575_v37 = vpop.f32.mrb[24].mxu1  ;;  %v5034_v51 = vadd.f32 %v2574_v57, %v2462_v38  ;;  %v2493_v19 = vpop.f32.mrb[28].mxu0 }
 0x15f   : > { %v2576_v6 = vpop.f32.mrb[25].mxu1  ;;  %v2494_v9 = vpop.f32.mrb[29].mxu0 }
 0x160   : > { %v2577_v45 = vadd.f32 %v2576_v6, %v2575_v37  ;;  %v5036_v28 = vadd.f32 %v2494_v9, %v2493_v19 }
 0x162   : > { %v2578_v10 = vpop.f32.mrb[26].mxu1  ;;  %v5038_v50 = vadd.f32 %v2577_v45, %v2465_v33  ;;  %v2496_v47 = vpop.f32.mrb[30].mxu0 }
 0x163   : > { %v2579_v4 = vpop.f32.mrb[27].mxu1  ;;  %v2497_v29 = vpop.f32.mrb[31].mxu0 }
 0x164   : > { %v2580_v61 = vadd.f32 %v2579_v4, %v2578_v10  ;;  %v5040_v1 = vadd.f32 %v2497_v29, %v2496_v47 }
 0x166   : > { %v2581_v16 = vpop.f32.mrb[28].mxu1  ;;  %v5042_v62 = vadd.f32 %v2580_v61, %v2468_v32  ;;  %v2675_v2 = vpop.f32.mrb[32].mxu0 }
 0x167   : > { %v2582_v38 = vpop.f32.mrb[29].mxu1  ;;  %v2676_v11 = vpop.f32.mrb[33].mxu0 }
 0x168   : > { %v2583_v8 = vadd.f32 %v2582_v38, %v2581_v16  ;;  %v5044_v53 = vadd.f32 %v2676_v11, %v2675_v2 }
 0x16a   : > { %v2584_v3 = vpop.f32.mrb[30].mxu1  ;;  %v5046_v30 = vadd.f32 %v2583_v8, %v2471_v26 }
 0x16b   : > { %v2585_v33 = vpop.f32.mrb[31].mxu1  ;;  %v2678_v58 = vpop.f32.mrb[34].mxu0 }
 0x16c   : > { %v2586_v60 = vadd.f32 %v2585_v33, %v2584_v3  ;;  %v2679_v44 = vpop.f32.mrb[35].mxu0 }
 0x16d   : > { %v5048_v40 = vadd.f32 %v2679_v44, %v2678_v58 }
 0x16e   : > { %v2587_v49 = vpop.f32.mrb[32].mxu1  ;;  %v5051_v7 = vadd.f32 %v2586_v60, %v5014_v13 }
 0x16f   : > { %v2588_v32 = vpop.f32.mrb[33].mxu1  ;;  %v2681_v5 = vpop.f32.mrb[36].mxu0 }
 0x170   : > { %v2589_v0 = vadd.f32 %v2588_v32, %v2587_v49  ;;  %v2682_v59 = vpop.f32.mrb[37].mxu0 }
 0x171   : > { %v5053_v42 = vadd.f32 %v2682_v59, %v2681_v5 }
 0x172   : > { %v3166_v36 = vadd.f32 %v2589_v0, %v5016_v20  ;;  %v2590_v26 = vpop.f32.mrb[34].mxu1 }
 0x173   : > { %v2591_v25 = vpop.f32.mrb[35].mxu1  ;;  %v2684_v46 = vpop.f32.mrb[38].mxu0 }
 0x174   : > { %v2592_v34 = vadd.f32 %v2591_v25, %v2590_v26  ;;  %v2685_v17 = vpop.f32.mrb[39].mxu0 }
 0x175   : > { %v2686_v56 = vadd.f32 %v2685_v17, %v2684_v46 }
 0x176   : > { %v3163_v48 = vadd.f32 %v2592_v34, %v5018_v35  ;;  %v2593_v24 = vpop.f32.mrb[36].mxu1 }
 0x177   : > { %v2594_v21 = vpop.f32.mrb[37].mxu1  ;;  %v2687_v13 = vpop.f32.mrb[40].mxu0 }
 0x178   : > { %v2595_v15 = vadd.f32 %v2594_v21, %v2593_v24  ;;  %v2688_v12 = vpop.f32.mrb[41].mxu0 }
 0x179   : > { %v5057_v55 = vadd.f32 %v2688_v12, %v2687_v13 }
 0x17a   : > { %v3172_v52 = vadd.f32 %v2595_v15, %v5020_v27  ;;  %v2596_v14 = vpop.f32.mrb[38].mxu1 }
 0x17b   : > { %v2597_v57 = vpop.f32.mrb[39].mxu1  ;;  %v2690_v20 = vpop.f32.mrb[42].mxu0 }
 0x17c   : > { %v2598_v31 = vadd.f32 %v2597_v57, %v2596_v14  ;;  %v2691_v37 = vpop.f32.mrb[43].mxu0 }
 0x17d   : > { %v2692_v6 = vadd.f32 %v2691_v37, %v2690_v20 }
 0x17e   : > { %v3169_v19 = vadd.f32 %v2598_v31, %v5024_v41  ;;  %v2599_v45 = vpop.f32.mrb[40].mxu1 }
 0x17f   : > { %v2600_v9 = vpop.f32.mrb[41].mxu1  ;;  %v2693_v35 = vpop.f32.mrb[44].mxu0 }
 0x180   : > { %v2601_v10 = vadd.f32 %v2600_v9, %v2599_v45  ;;  %v2694_v4 = vpop.f32.mrb[45].mxu0 }
 0x181   : > { %v5061_v47 = vadd.f32 %v2694_v4, %v2693_v35 }
 0x182   : > { %v3178_v61 = vadd.f32 %v2601_v10, %v5028_v18  ;;  %v2602_v29 = vpop.f32.mrb[42].mxu1 }
 0x183   : > { %v2603_v16 = vpop.f32.mrb[43].mxu1  ;;  %v2696_v27 = vpop.f32.mrb[46].mxu0 }
 0x184   : > { %v2604_v38 = vadd.f32 %v2603_v16, %v2602_v29  ;;  %v2697_v2 = vpop.f32.mrb[47].mxu0 }
 0x185   : > { %v2698_v8 = vadd.f32 %v2697_v2, %v2696_v27 }
 0x186   : > { %v3175_v11 = vadd.f32 %v2604_v38, %v5032_v23  ;;  %v2605_v3 = vpop.f32.mrb[44].mxu1 }
 0x187   : > { %v2606_v33 = vpop.f32.mrb[45].mxu1  ;;  %v2699_v41 = vpop.f32.mrb[48].mxu0 }
 0x188   : > { %v2607_v58 = vadd.f32 %v2606_v33, %v2605_v3  ;;  %v2700_v60 = vpop.f32.mrb[49].mxu0 }
 0x189   : > { %v2701_v44 = vadd.f32 %v2700_v60, %v2699_v41  ;;  %v5102_v60 = vstv %s2407_s26 }
 0x18a   : > { %v3184_v49 = vadd.f32 %v2607_v58, %v5036_v28  ;;  %v2608_v32 = vpop.f32.mrb[46].mxu1  ;;  %vm1983_vm1 = vcmp.lt.s32.totalorder %v5477_v43, %v5102_v60  ;;  %vm1985_vm14 = vcmp.lt.s32.totalorder %v5483_v54, %v5102_v60 }
 0x18b   : > { %v2609_v5 = vpop.f32.mrb[47].mxu1  ;;  %v2702_v0 = vpop.f32.mrb[50].mxu0  ;;  %v5066_v18 = vadd.f32 %v3166_v36, %v2701_v44 }
 0x18c   : > { %v2610_v59 = vadd.f32 %v2609_v5, %v2608_v32  ;;  %v2703_v26 = vpop.f32.mrb[51].mxu0 }
 0x18d   : > { %v2704_v25 = vadd.f32 %v2703_v26, %v2702_v0 }
 0x18e   : > { %v3181_v46 = vadd.f32 %v2610_v59, %v5040_v1  ;;  %v2845_v34 = vpop.f32.mrb[0].mxu1 }
 0x18f   : > { %v3132_v23 = vadd.f32 %v5026_v63, %v2845_v34  ;;  %v1477_v17 = vpop.f32.mrb[1].mxu1  ;;  %v5070_v24 = vadd.f32 %v3163_v48, %v2704_v25 }
 0x190   : > { %v3136_v21 = vadd.f32 %v5022_v22, %v1477_v17  ;;  %v2705_v13 = vpop.f32.mrb[52].mxu0 }
 0x191   : > { %v2706_v28 = vpop.f32.mrb[53].mxu0  ;;  %v3133_v15 = vadd.f32 %v3132_v23, %v5048_v40 }
 0x192   : > { %v2848_v12 = vpop.f32.mrb[2].mxu1  ;;  %v2707_v36 = vadd.f32 %v2706_v28, %v2705_v13  ;;  %v3137_v14 = vadd.f32 %v3136_v21, %v5044_v53 }
 0x193   : > { %v3140_v57 = vadd.f32 %v5034_v51, %v2848_v12  ;;  %v1487_v20 = vpop.f32.mrb[3].mxu1 }
 0x194   : > { %v3144_v1 = vadd.f32 %v5030_v39, %v1487_v20  ;;  %v2708_v31 = vpop.f32.mrb[54].mxu0  ;;  %v5077_v63 = vadd.f32 %v3172_v52, %v2707_v36 }
 0x195   : > { %v2709_v48 = vpop.f32.mrb[55].mxu0  ;;  %v3141_v37 = vadd.f32 %v3140_v57, %v2686_v56 }
 0x196   : > { %v2851_v45 = vpop.f32.mrb[4].mxu1  ;;  %v2710_v22 = vadd.f32 %v2709_v48, %v2708_v31  ;;  %v3145_v9 = vadd.f32 %v3144_v1, %v5053_v42 }
 0x197   : > { %v3148_v40 = vadd.f32 %v5042_v62, %v2851_v45  ;;  %v1497_v35 = vpop.f32.mrb[5].mxu1 }
 0x198   : > { %v3152_v10 = vadd.f32 %v5038_v50, %v1497_v35  ;;  %v2711_v53 = vpop.f32.mrb[56].mxu0  ;;  %v5082_v4 = vadd.f32 %v3169_v19, %v2710_v22 }
 0x199   : > { %v2712_v51 = vpop.f32.mrb[57].mxu0  ;;  %v3149_v29 = vadd.f32 %v3148_v40, %v2692_v6 }
 0x19a   : > { %v2854_v39 = vpop.f32.mrb[6].mxu1  ;;  %v2713_v52 = vadd.f32 %v2712_v51, %v2711_v53  ;;  %v5085_v16 = vadd.f32 %v3152_v10, %v5057_v55 }
 0x19b   : > { %v3156_v56 = vadd.f32 %v5051_v7, %v2854_v39  ;;  %v1507_v27 = vpop.f32.mrb[7].mxu1 }
 0x19c   : > { %v3160_v42 = vadd.f32 %v5046_v30, %v1507_v27  ;;  %v2714_v62 = vpop.f32.mrb[58].mxu0  ;;  %v5089_v38 = vadd.f32 %v3178_v61, %v2713_v52 }
 0x19d   : > { %v2715_v50 = vpop.f32.mrb[59].mxu0  ;;  %v5091_v2 = vadd.f32 %v3156_v56, %v2698_v8  ;;  %v596_v8 = vadd.s32 8, %v5477_v43 }
 0x19e   : > { %v2716_v19 = vadd.f32 %v2715_v50, %v2714_v62  ;;  %v5094_v6 = vadd.f32 %v3160_v42, %v5061_v47  ;;  %v5107_v47 = vld [vmem:[%s5234_s3] ss:$0 sm:$0xff]  ;;  %v1973_v62 = vadd.s32 56, %v5477_v43 }
 0x19f   : > { %vm1984_vm15 = vcmp.lt.s32.totalorder %v596_v8, %v5102_v60 }
 0x1a0   : > { %v2717_v3 = vpop.f32.mrb[60].mxu0  ;;  %v5096_v33 = vadd.f32 %v3175_v11, %v2716_v19  ;;  %vm1990_vm11 = vcmp.lt.s32.totalorder %v1973_v62, %v5102_v60 }
 0x1a1   : > { %v2718_v55 = vpop.f32.mrb[61].mxu0 }
 0x1a2   : > { %v2719_v41 = vadd.f32 %v2718_v55, %v2717_v3 }
 0x1a4   : > { %v2720_v7 = vpop.f32.mrb[62].mxu0  ;;  %v5099_v58 = vadd.f32 %v3184_v49, %v2719_v41  ;;  %v1972_v41 = vadd.s32 48, %v5477_v43 }
 0x1a5   : > { %v2721_v30 = vpop.f32.mrb[63].mxu0 }
 0x1a6   : > { %v2722_v61 = vadd.f32 %v2721_v30, %v2720_v7  ;;  %v1975_v7 = vadd.s32 72, %v5477_v43  ;;  %vm1989_vm2 = vcmp.lt.s32.totalorder %v1972_v41, %v5102_v60 }
 0x1a8   : > { %v2901_v44 = vpop.f32.mrb[64].mxu0  ;;  %v5109_v11 = vadd.f32 %v3181_v46, %v2722_v61  ;;  %v1969_v46 = vadd.s32 24, %v5477_v43  ;;  %vm1992_vm13 = vcmp.lt.s32.totalorder %v1975_v7, %v5102_v60 }
 0x1a9   : > { %v3134_v32 = vadd.f32 %v3133_v15, %v2901_v44  ;;  %v1833_v5 = vpop.f32.mrb[65].mxu0  ;;  %v1971_v15 = vadd.s32 40, %v5477_v43 }
 0x1aa   : > { %v3138_v49 = vadd.f32 %v3137_v14, %v1833_v5  ;;  %vm1986_vm3 = vcmp.lt.s32.totalorder %v1969_v46, %v5102_v60 }
 0x1ab   : > { %v1936_v0 = vadd.f32 %v3134_v32, %v5107_v47  ;;  %vm1988_vm9 = vcmp.lt.s32.totalorder %v1971_v15, %v5102_v60  ;;  %v1974_v32 = vadd.s32 64, %v5477_v43 }
 0x1ac   : > { %v1935_v59 = vadd.f32 %v3138_v49, %v5107_v47  ;;  %v2904_v26 = vpop.f32.mrb[66].mxu0 }
 0x1ad   : > { %1952 = vst [vmem:[%s3405_s25 + $0x8] sm:$0xff] %v1936_v0  ;;  %v2000_v25 = vsel %vm1984_vm15, %v1936_v0, 0.0  ;;  %v3142_v34 = vadd.f32 %v3141_v37, %v2904_v26  ;;  %v1843_v23 = vpop.f32.mrb[67].mxu0  ;;  %v1970_v37 = vadd.s32 32, %v5477_v43  ;;  %vm1991_vm7 = vcmp.lt.s32.totalorder %v1974_v32, %v5102_v60 }
 0x1ae   : > { %v2041_v17 = vmul.f32 %v2000_v25, %v2000_v25  ;;  %v2913_v21 = vpop.f32.mrb[8].mxu1  ;;  %1951 = vst [vmem:[%s3405_s25] sm:$0xff] %v1935_v59  ;;  %v1999_v13 = vsel %vm1983_vm1, %v1935_v59, 0.0  ;;  %v3146_v28 = vadd.f32 %v3145_v9, %v1843_v23 }
 0x1af   : > { %v3165_v12 = vadd.f32 %v5070_v24, %v2913_v21  ;;  %v2016_v36 = vadd.f32 %v2000_v25, %v1999_v13  ;;  %v2040_v14 = vmul.f32 %v1999_v13, %v1999_v13  ;;  %v1873_v57 = vpop.f32.mrb[9].mxu1  ;;  %v1938_v20 = vadd.f32 %v3142_v34, %v5107_v47 }
 0x1b0   : > { %v3168_v1 = vadd.f32 %v5066_v18, %v1873_v57  ;;  %v1937_v31 = vadd.f32 %v3146_v28, %v5107_v47  ;;  %v2907_v48 = vpop.f32.mrb[68].mxu0  ;;  %vm1987_vm12 = vcmp.lt.s32.totalorder %v1970_v37, %v5102_v60 }
 0x1b1   : > { %v5128_v45 = vadd.f32 %v3165_v12, %v5107_v47  ;;  %v2056_v22 = vadd.f32 %v2041_v17, %v2040_v14  ;;  %1954 = vst [vmem:[%s3405_s25 + $0x18] sm:$0xff] %v1938_v20  ;;  %v3150_v24 = vadd.f32 %v3149_v29, %v2907_v48  ;;  %v1853_v9 = vpop.f32.mrb[69].mxu0  ;;  %v2002_v52 = vsel %vm1986_vm3, %v1938_v20, 0.0 }
 0x1b2   : > { %v5133_v40 = vadd.f32 %v3168_v1, %v5107_v47  ;;  %v2916_v35 = vpop.f32.mrb[10].mxu1  ;;  %1953 = vst [vmem:[%s3405_s25 + $0x10] sm:$0xff] %v1937_v31  ;;  %v2001_v18 = vsel %vm1985_vm14, %v1937_v31, 0.0  ;;  %v3154_v10 = vadd.f32 %v5085_v16, %v1853_v9  ;;  %v2043_v30 = vmul.f32 %v2002_v52, %v2002_v52 }
 0x1b3   : > { %1960 = vst [vmem:[%s3405_s25 + $0x48] sm:$0xff] %v5128_v45  ;;  %v3171_v53 = vadd.f32 %v5082_v4, %v2916_v35  ;;  %v2017_v51 = vadd.f32 %v2016_v36, %v2001_v18  ;;  %v2042_v39 = vmul.f32 %v2001_v18, %v2001_v18  ;;  %v1883_v29 = vpop.f32.mrb[11].mxu1  ;;  %v1940_v54 = vadd.f32 %v3150_v24, %v5107_v47 }
 0x1b4   : > { %1959 = vst [vmem:[%s3405_s25 + $0x40] sm:$0xff] %v5133_v40  ;;  %v3174_v56 = vadd.f32 %v5077_v63, %v1883_v29  ;;  %v2910_v16 = vpop.f32.mrb[70].mxu0  ;;  %v1939_v42 = vadd.f32 %v3154_v10, %v5107_v47  ;;  %v2007_v31 = vsel %vm1991_vm7, %v5133_v40, 0.0  ;;  %v1978_v48 = vadd.s32 96, %v5477_v43 }
 0x1b5   : > { %v5150_v4 = vadd.f32 %v3171_v53, %v5107_v47  ;;  %v2057_v27 = vadd.f32 %v2056_v22, %v2042_v39  ;;  %v1863_v50 = vpop.f32.mrb[71].mxu0  ;;  %1956 = vst [vmem:[%s3405_s25 + $0x28] sm:$0xff] %v1940_v54  ;;  %v2018_v3 = vadd.f32 %v2017_v51, %v2002_v52  ;;  %v3158_v55 = vadd.f32 %v5091_v2, %v2910_v16 }
 0x1b6   : > { %v5155_v19 = vadd.f32 %v3174_v56, %v5107_v47  ;;  %v2919_v63 = vpop.f32.mrb[12].mxu1  ;;  %1955 = vst [vmem:[%s3405_s25 + $0x20] sm:$0xff] %v1939_v42  ;;  %v2003_v8 = vsel %vm1987_vm12, %v1939_v42, 0.0  ;;  %v2004_v2 = vsel %vm1988_vm9, %v1940_v54, 0.0  ;;  %v3162_v34 = vadd.f32 %v5094_v6, %v1863_v50 }
 0x1b7   : > { %1962 = vst [vmem:[%s3405_s25 + $0x58] sm:$0xff] %v5150_v4  ;;  %v3177_v61 = vadd.f32 %v5096_v33, %v2919_v63  ;;  %v1893_v44 = vpop.f32.mrb[13].mxu1  ;;  %v2019_v5 = vadd.f32 %v2018_v3, %v2003_v8  ;;  %v2044_v49 = vmul.f32 %v2003_v8, %v2003_v8  ;;  %v2058_v59 = vadd.f32 %v2057_v27, %v2043_v30 }
 0x1b8   : > { %1961 = vst [vmem:[%s3405_s25 + $0x50] sm:$0xff] %v5155_v19  ;;  %v3180_v33 = vadd.f32 %v5089_v38, %v1893_v44  ;;  %v1942_v26 = vadd.f32 %v3158_v55, %v5107_v47  ;;  %v2045_v23 = vmul.f32 %v2004_v2, %v2004_v2  ;;  %v1941_v28 = vadd.f32 %v3162_v34, %v5107_v47 }
 0x1b9   : > { %v1948_v0 = vadd.f32 %v3177_v61, %v5107_v47  ;;  %v2020_v46 = vadd.f32 %v2019_v5, %v2004_v2  ;;  %v2059_v17 = vadd.f32 %v2058_v59, %v2044_v49  ;;  %v1976_v6 = vadd.s32 80, %v5477_v43 }
 0x1ba   : > { %v2922_v25 = vpop.f32.mrb[14].mxu1  ;;  %v1947_v21 = vadd.f32 %v3180_v33, %v5107_v47  ;;  %1958 = vst [vmem:[%s3405_s25 + $0x38] sm:$0xff] %v1942_v26  ;;  %v2006_v14 = vsel %vm1990_vm11, %v1942_v26, 0.0  ;;  %1957 = vst [vmem:[%s3405_s25 + $0x30] sm:$0xff] %v1941_v28  ;;  %v2008_v9 = vsel %vm1992_vm13, %v5128_v45, 0.0  ;;  %v2048_v35 = vmul.f32 %v2007_v31, %v2007_v31 }
 0x1bb   : > { %1964 = vst [vmem:[%s3405_s25 + $0x68] sm:$0xff] %v1948_v0  ;;  %v3183_v13 = vadd.f32 %v5109_v11, %v2922_v25  ;;  %v1903_v38 = vpop.f32.mrb[15].mxu1  ;;  %v2060_v36 = vadd.f32 %v2059_v17, %v2045_v23  ;;  %v2005_v11 = vsel %vm1989_vm2, %v1941_v28, 0.0  ;;  %vm1993_vm5 = vcmp.lt.s32.totalorder %v1976_v6, %v5102_v60  ;;  %v2015_v17 = vld [vmem:[%s3390_s11] sm:$0x1] }
 0x1bc   : > { %v3186_v15 = vadd.f32 %v5099_v58, %v1903_v38  ;;  %1963 = vst [vmem:[%s3405_s25 + $0x60] sm:$0xff] %v1947_v21  ;;  %v1977_v58 = vadd.s32 88, %v5477_v43  ;;  %v2021_v20 = vadd.f32 %v2020_v46, %v2005_v11  ;;  %v2046_v1 = vmul.f32 %v2005_v11, %v2005_v11  ;;  %v2039_v38 = vld [vmem:[%s3395_s29] sm:$0x1] }
 0x1bd   : > { %v1950_v12 = vadd.f32 %v3183_v13, %v5107_v47  ;;  %v2047_v37 = vmul.f32 %v2006_v14, %v2006_v14  ;;  %v2009_v53 = vsel %vm1993_vm5, %v5155_v19, 0.0  ;;  %vm1995_vm4 = vcmp.lt.s32.totalorder %v1978_v48, %v5102_v60 }
 0x1be   : > { %v1949_v57 = vadd.f32 %v3186_v15, %v5107_v47  ;;  %v2022_v22 = vadd.f32 %v2021_v20, %v2006_v14  ;;  %v2061_v24 = vadd.f32 %v2060_v36, %v2046_v1  ;;  %v1979_v47 = vadd.s32 104, %v5477_v43 }
 0x1bf   : > { %1966 = vst [vmem:[%s3405_s25 + $0x78] sm:$0xff] %v1950_v12  ;;  %vm1994_vm10 = vcmp.lt.s32.totalorder %v1977_v58, %v5102_v60  ;;  %v2049_v40 = vmul.f32 %v2008_v9, %v2008_v9  ;;  %v1980_v29 = vadd.s32 112, %v5477_v43  ;;  %v2050_v45 = vmul.f32 %v2009_v53, %v2009_v53 }
 0x1c0   : > { %1965 = vst [vmem:[%s3405_s25 + $0x70] sm:$0xff] %v1949_v57  ;;  %v2023_v18 = vadd.f32 %v2022_v22, %v2007_v31  ;;  %v2062_v10 = vadd.f32 %v2061_v24, %v2047_v37  ;;  %v2010_v52 = vsel %vm1994_vm10, %v5150_v4, 0.0  ;;  %vm1996_vm8 = vcmp.lt.s32.totalorder %v1979_v47, %v5102_v60 }
 0x1c1   : > { %v1981_v56 = vadd.s32 120, %v5477_v43  ;;  %v2011_v27 = vsel %vm1995_vm4, %v1947_v21, 0.0  ;;  %v2051_v42 = vmul.f32 %v2010_v52, %v2010_v52  ;;  %vm1997_vm0 = vcmp.lt.s32.totalorder %v1980_v29, %v5102_v60 }
 0x1c2   : > { %v2024_v51 = vadd.f32 %v2023_v18, %v2008_v9  ;;  %v2063_v39 = vadd.f32 %v2062_v10, %v2048_v35  ;;  %v2012_v19 = vsel %vm1996_vm8, %v1948_v0, 0.0  ;;  %v2052_v63 = vmul.f32 %v2011_v27, %v2011_v27 }
 0x1c3   : > { %vm1998_vm6 = vcmp.lt.s32.totalorder %v1981_v56, %v5102_v60  ;;  %v2013_v4 = vsel %vm1997_vm0, %v1949_v57, 0.0  ;;  %v2053_v41 = vmul.f32 %v2012_v19, %v2012_v19 }
 0x1c4   : > { %v2064_v54 = vadd.f32 %v2063_v39, %v2049_v40  ;;  %v2025_v16 = vadd.f32 %v2024_v51, %v2009_v53  ;;  %v2014_v61 = vsel %vm1998_vm6, %v1950_v12, 0.0  ;;  %v2054_v8 = vmul.f32 %v2013_v4, %v2013_v4 }
 0x1c5   : > { %v2055_v32 = vmul.f32 %v2014_v61, %v2014_v61 }
 0x1c6   : > { %v2026_v62 = vadd.f32 %v2025_v16, %v2010_v52  ;;  %v2065_v50 = vadd.f32 %v2064_v54, %v2050_v45 }
 0x1c8   : > { %v2027_v3 = vadd.f32 %v2026_v62, %v2011_v27  ;;  %v2066_v55 = vadd.f32 %v2065_v50, %v2051_v42 }
 0x1ca   : > { %v2028_v7 = vadd.f32 %v2027_v3, %v2012_v19  ;;  %v2067_v30 = vadd.f32 %v2066_v55, %v2052_v63 }
 0x1cc   : > { %v2029_v43 = vadd.f32 %v2028_v7, %v2013_v4  ;;  %v2068_v44 = vadd.f32 %v2067_v30, %v2053_v41 }
 0x1ce   : > { %v2030_v2 = vadd.f32 %v2029_v43, %v2014_v61  ;;  %v2069_v5 = vadd.f32 %v2068_v44, %v2054_v8 }
 0x1d0   : > { %v2031_v49 = vrot.slane %v2030_v2, 4  ;;  %v2070_v0 = vadd.f32 %v2069_v5, %v2055_v32 }
 0x1d2   : > { %v2032_v59 = vadd.f32 %v2031_v49, %v2030_v2  ;;  %v2071_v60 = vrot.slane %v2070_v0, 4 }
 0x1d4   : > { %v2033_v33 = vrot.slane %v2032_v59, 2  ;;  %v2072_v26 = vadd.f32 %v2071_v60, %v2070_v0 }
 0x1d6   : > { %v2034_v25 = vadd.f32 %v2033_v33, %v2032_v59  ;;  %v2073_v34 = vrot.slane %v2072_v26, 2 }
 0x1d8   : > { %v2035_v46 = vrot.slane %v2034_v25, 1  ;;  %v2074_v23 = vadd.f32 %v2073_v34, %v2072_v26 }
 0x1da   : > { %v2036_v21 = vadd.f32 %v2035_v46, %v2034_v25  ;;  %v2075_v13 = vrot.slane %v2074_v23, 1 }
 0x1dc   : > { %v2037_v28 = vadd.f32 %v2036_v21, %v2015_v17  ;;  %v2076_v15 = vadd.f32 %v2075_v13, %v2074_v23 }
 0x1de   : > { %2038 = vst [vmem:[%s3390_s11] sm:$0x1] %v2037_v28  ;;  %v2077_v6 = vadd.f32 %v2076_v15, %v2039_v38 }
 0x1e0   : > { %2078 = vst [vmem:[%s3395_s29] sm:$0x1] %v2077_v6 }
 0x1e1 PF: > { %s19_s9 = sadd.s32 1, %s3295_s9   ;;  %s5502_s27 = sld [smem:[#allocation2_spill]] }
 0x1e2   : > { %p16_p10 = scmp.ge.s32.totalorder %s19_s9, 6   ;;  %s5503_s28 = sld [smem:[#allocation3_spill]] }
 0x1e3   : > { %s5504_s29 = sld [smem:[#allocation4_spill]]  ;;  %s5505_s30 = sld [smem:[#allocation5_spill]] }
 0x1e4   :  { %18 = sbr.rel (!%p16_p10) target bundleno = 3 (0x3), region = 107 }

// kernel: _lambda_.3
= control target key start
LH: loop header
LB: loop body
LE: loop exit
PB: predicated region body
PF: predicated region fallthrough
CT: control target
= control target key end

     0   :  { %s3051_s27 = smov 0   ;;  %s3053_s28 = smov 0   ;;  %s4212_s0 = inlined_call_operand.vmem [shape: f32[2,18,18,128], index: 0, kind: input, shape index: {}, may-alias: {0,1}]   ;;  %s4213_s1 = inlined_call_operand.vmem [shape: f32[2,18,18,128], index: 1, kind: input, shape index: {}, may-alias: {0,1}]   ;;  %s4214_s2 = inlined_call_operand.vmem [shape: f32[3,384,128], index: 2, kind: input, shape index: {}]   ;;  %s4215_s3 = inlined_call_operand.vmem [shape: f32[1,128], index: 3, kind: input, shape index: {}]   ;;  %s4216_s4 = inlined_call_operand.vmem [shape: f32[1,128], index: 4, kind: input, shape index: {}]   ;;  %s4217_s5 = inlined_call_operand.vmem [shape: f32[1,128], index: 5, kind: input, shape index: {}]   ;;  %s4218_s6 = inlined_call_operand.vmem [shape: f32[2,256,128], index: 6, kind: output, shape index: {0}]   ;;  %s4219_s7 = inlined_call_operand.vmem [shape: f32[2,1,128], index: 7, kind: output, shape index: {1}]   ;;  %s4220_s8 = inlined_call_operand.vmem [shape: f32[2,1,128], index: 8, kind: output, shape index: {2}]  }
   0x1   :  { %s3055_s29 = smov 0   ;;  %s3057_s30 = smov 0  }
   0x2   :  { %s3059_s4 = smov 0  }
   0x3 LB: > { %s28_s5 = sadd.s32 1, %s2995_s29  ;;  %s31_s9 = sadd.s32 1, %s2999_s30  ;;  %s3003_s4 = sphi %s3059_s4, %s19_s4   ;;  %s2999_s30 = sphi %s3057_s30, %s4268_s30   ;;  %s2995_s29 = sphi %s3055_s29, %s4267_s29   ;;  %s2991_s28 = sphi %s3053_s28, %s4266_s28   ;;  %s2987_s27 = sphi %s3051_s27, %s4265_s27  }
   0x4   : > { %p29_p0 = scmp.ge.s32.totalorder %s28_s5, 2  ;;  %p2009_p1 = scmp.ge.s32.totalorder %s3003_s4, 1 }
   0x5   : > { %p325_p2 = scmp.lt.s32.totalorder %s3003_s4, 5 }
   0x6   : > { %s4270_s5 = smov (%p29_p0, %s28_s5), 0  ;;  %s4272_s9 = smov (!%p29_p0, %s31_s9), %s2999_s30 }
   0x7   : > { %4241 = sst [smem:[#allocation2_spill]] %s4270_s5  ;;  %p326_p3 = pnand %p2009_p1, %p325_p2 }
   0x8   : > { %p33_p4 = scmp.ge.s32.totalorder %s4272_s9, 2 }
   0x9   : > { %329 = sbr.rel (%p326_p3) target bundleno = 469 (0x1d5), region = 44 }
   0xa   : > { %s4274_s9 = smov (%p33_p4, %s4272_s9), 0 }
   0xb   : > { %4242 = sst [smem:[#allocation3_spill]] %s4274_s9 }
  0x10   : > { %s3084_s10 = sshll.u32 %s2987_s27, 3  ;;  %p397_p5 = scmp.lt.s32.totalorder %s2991_s28, 1 }
  0x11   : > { %p399_p6 = scmp.lt.s32.totalorder %s3084_s10, 17  ;;  %s2128_s11 = sadd.s32 8, %s3084_s10 }
  0x12   : > { %s4276_s28 = smov (!%p397_p5, %s2991_s28), 1  ;;  %p417_p7 = scmp.lt.s32.totalorder %s2128_s11, 17 }
  0x13   : > { %s400_s12 = scalar_select %p399_p6, %s3084_s10, 17 }
  0x14   : > { %s2922_s13 = smul.u32 54, %s4276_s28  ;;  %s2015_s15 = sshll.u32 %s2987_s27, 4 }
  0x15   : > { %s2921_s14 = smul.u32 3, %s400_s12  ;;  %s4278_s11 = smov (!%p417_p7, %s2128_s11), 17 }
  0x16   : > { %s2923_s18 = smul.u32 3, %s4278_s11  ;;  %p430_p8 = scmp.lt.s32.totalorder %s2015_s15, 31 }
  0x17   : > { %s403_s16 = sadd.s32 %s2922_s13, %s2921_s14  ;;  %s3098_s25 = scalar_lea.vmem %s4219_s7, %s4276_s28 }
  0x18   : > { %s2011_s17 = sshll.u32 %s403_s16, 3  ;;  %s421_s22 = sadd.s32 %s2923_s18, %s2922_s13 }
  0x19   : > { %s3093_s21 = scalar_lea.vmem %s4212_s0, %s2011_s17  ;;  %s2014_s26 = sshll.u32 %s421_s22, 3 }
  0x1a   : > { %s3103_s5 = scalar_lea.vmem %s4220_s8, %s4276_s28  ;;  %s3108_s16 = scalar_lea.vmem %s4213_s1, %s2014_s26 }
  0x1b   : > { %s2016_s17 = sshll.u32 %s4276_s28, 5  ;;  %s4280_s15 = smov (!%p430_p8, %s2015_s15), 31 }
  0x1c   : > { %s433_s19 = sadd.s32 %s2016_s17, %s4280_s15  ;;  %p2018_p9 = scmp.ne.s32.totalorder %s2987_s27, 0 }
  0x1d   : > { %s2017_s13 = sshll.u32 %s433_s19, 3  ;;  %v3005_v0 = vmov (!%p2018_p9), 0.0  }
  0x1e   : > { %s3113_s23 = scalar_lea.vmem %s4218_s6, %s2017_s13  ;;  %446 = sbr.rel (%p2018_p9) target bundleno = 37 (0x25), region = 48  ;;  %447 = vst [vmem:[%s3098_s25] sm:$0x1] (!%p2018_p9), %v3005_v0  ;;  %448 = vst [vmem:[%s3103_s5] sm:$0x1] (!%p2018_p9), %v3005_v0 }
  0x25 PF: > { %v2035_v1 = vld [vmem:[%s4214_s2 + $0x200] sm:$0xff]  ;;  %v2036_v2 = vld [vmem:[%s4214_s2 + $0x208] sm:$0xff]  ;;  %v2037_v10 = vld [vmem:[%s4214_s2 + $0x210] sm:$0xff]  ;;  %vm503_vm0 = vcmask 1046528   ;;  %vm560_vm1 = vcmask 1045504  }
  0x26   : > { %v2051_v3 = vld [vmem:[%s4214_s2 + $0x280] sm:$0xff]  ;;  %v2633_v4 = vpack.c.bf16 %v2036_v2, %v2035_v1  ;;  %v2052_v5 = vld [vmem:[%s4214_s2 + $0x288] sm:$0xff]  ;;  %v2038_v11 = vld [vmem:[%s4214_s2 + $0x218] sm:$0xff] }
  0x27   : > { %v2019_v6 = vld [vmem:[%s4214_s2 + $0x180] sm:$0xff]  ;;  %v2020_v7 = vld [vmem:[%s4214_s2 + $0x188] sm:$0xff]  ;;  %v2665_v8 = vpack.c.bf16 %v2052_v5, %v2051_v3  ;;  %v2053_v12 = vld [vmem:[%s4214_s2 + $0x290] sm:$0xff]  ;;  %v2637_v13 = vpack.c.bf16 %v2038_v11, %v2037_v10 }
  0x28   : > { %v2635_v9 = vpack.c.bf16 %v2020_v7, %v2019_v6  ;;  %2634 = vmatprep.subr.bf16.mxu0 %v2633_v4  ;;  %v2054_v14 = vld [vmem:[%s4214_s2 + $0x298] sm:$0xff]  ;;  %v2021_v15 = vld [vmem:[%s4214_s2 + $0x190] sm:$0xff]  ;;  %v2039_v19 = vld [vmem:[%s4214_s2 + $0x220] sm:$0xff] }
  0x29   : > { %v2022_v16 = vld [vmem:[%s4214_s2 + $0x198] sm:$0xff]  ;;  %2666 = vmatprep.subr.bf16.mxu1 %v2665_v8  ;;  %v2669_v17 = vpack.c.bf16 %v2054_v14, %v2053_v12  ;;  %v2040_v20 = vld [vmem:[%s4214_s2 + $0x228] sm:$0xff]  ;;  %v2055_v21 = vld [vmem:[%s4214_s2 + $0x2a0] sm:$0xff] }
  0x2a   : > { %2636 = vmatpush3.bf16.msra.mxu0 %v2635_v9  ;;  %v2639_v18 = vpack.c.bf16 %v2022_v16, %v2021_v15  ;;  %2668 = vmatpush3.bf16.msra.mxu1 %v2665_v8  ;;  %v2641_v22 = vpack.c.bf16 %v2040_v20, %v2039_v19  ;;  %v2056_v23 = vld [vmem:[%s4214_s2 + $0x2a8] sm:$0xff]  ;;  %v2023_v24 = vld [vmem:[%s4214_s2 + $0x1a0] sm:$0xff]  ;;  %v2041_v27 = vld [vmem:[%s4214_s2 + $0x230] sm:$0xff] }
  0x2b   : > { %2638 = vmatprep.subr.bf16.mxu0 %v2637_v13  ;;  %v2024_v25 = vld [vmem:[%s4214_s2 + $0x1a8] sm:$0xff]  ;;  %2670 = vmatprep.subr.bf16.mxu1 %v2669_v17  ;;  %v2673_v26 = vpack.c.bf16 %v2056_v23, %v2055_v21  ;;  %v2042_v28 = vld [vmem:[%s4214_s2 + $0x238] sm:$0xff]  ;;  %v2057_v29 = vld [vmem:[%s4214_s2 + $0x2b0] sm:$0xff] }
  0x2c   : > { %v2058_v30 = vld [vmem:[%s4214_s2 + $0x2b8] sm:$0xff]  ;;  %v2643_v31 = vpack.c.bf16 %v2024_v25, %v2023_v24  ;;  %v2645_v32 = vpack.c.bf16 %v2042_v28, %v2041_v27  ;;  %v2025_v33 = vld [vmem:[%s4214_s2 + $0x1b0] sm:$0xff]  ;;  %v2043_v36 = vld [vmem:[%s4214_s2 + $0x240] sm:$0xff] }
  0x2d   : > { %v2026_v34 = vld [vmem:[%s4214_s2 + $0x1b8] sm:$0xff]  ;;  %v2677_v35 = vpack.c.bf16 %v2058_v30, %v2057_v29  ;;  %v2044_v37 = vld [vmem:[%s4214_s2 + $0x248] sm:$0xff]  ;;  %v2059_v38 = vld [vmem:[%s4214_s2 + $0x2c0] sm:$0xff] }
  0x2e   : > { %2640 = vmatpush3.bf16.msra.mxu0 %v2639_v18  ;;  %2672 = vmatpush3.bf16.msra.mxu1 %v2669_v17  ;;  %v2060_v39 = vld [vmem:[%s4214_s2 + $0x2c8] sm:$0xff]  ;;  %v2647_v40 = vpack.c.bf16 %v2026_v34, %v2025_v33  ;;  %v2027_v41 = vld [vmem:[%s4214_s2 + $0x1c0] sm:$0xff]  ;;  %v2649_v42 = vpack.c.bf16 %v2044_v37, %v2043_v36  ;;  %v2045_v44 = vld [vmem:[%s4214_s2 + $0x250] sm:$0xff] }
  0x2f   : > { %2642 = vmatprep.subr.bf16.mxu0 %v2641_v22  ;;  %2674 = vmatprep.subr.bf16.mxu1 %v2673_v26  ;;  %v2028_v43 = vld [vmem:[%s4214_s2 + $0x1c8] sm:$0xff]  ;;  %v2046_v45 = vld [vmem:[%s4214_s2 + $0x258] sm:$0xff]  ;;  %v2681_v46 = vpack.c.bf16 %v2060_v39, %v2059_v38  ;;  %v2061_v47 = vld [vmem:[%s4214_s2 + $0x2d0] sm:$0xff] }
  0x30   : > { %v2062_v48 = vld [vmem:[%s4214_s2 + $0x2d8] sm:$0xff]  ;;  %v2651_v49 = vpack.c.bf16 %v2028_v43, %v2027_v41  ;;  %v2653_v50 = vpack.c.bf16 %v2046_v45, %v2045_v44  ;;  %v3224_v52 = vld [vmem:[%s3093_s21 + $0x20] sm:$0xff]  ;;  %v2029_v53 = vld [vmem:[%s4214_s2 + $0x1d0] sm:$0xff] }
  0x31   : > { %v3221_v51 = vld [vmem:[%s3093_s21 + $0x18] sm:$0xff]  ;;  %v510_v56 = vrot.slane %v3224_v52, 1  ;;  %v567_v58 = vrot.slane %v3224_v52, 2  ;;  %v2685_v59 = vpack.c.bf16 %v2062_v48, %v2061_v47  ;;  %v2047_v60 = vld [vmem:[%s4214_s2 + $0x260] sm:$0xff]  ;;  %v2048_v61 = vld [vmem:[%s4214_s2 + $0x268] sm:$0xff] }
  0x32   : > { %2644 = vmatpush3.bf16.msra.mxu0 %v2643_v31  ;;  %2676 = vmatpush3.bf16.msra.mxu1 %v2673_v26  ;;  %v2030_v54 = vld [vmem:[%s4214_s2 + $0x1d8] sm:$0xff]  ;;  %v509_v55 = vrot.slane %v3221_v51, 1  ;;  %v566_v57 = vrot.slane %v3221_v51, 2  ;;  %v2063_v62 = vld [vmem:[%s4214_s2 + $0x2e0] sm:$0xff]  ;;  %v2064_v63 = vld [vmem:[%s4214_s2 + $0x2e8] sm:$0xff]  ;;  %v2657_v3 = vpack.c.bf16 %v2048_v61, %v2047_v60 }
  0x33   : > { %2646 = vmatprep.subr.bf16.mxu0 %v2645_v32  ;;  %2678 = vmatprep.subr.bf16.mxu1 %v2677_v35  ;;  %v2655_v2 = vpack.c.bf16 %v2030_v54, %v2029_v53  ;;  %v2031_v4 = vld [vmem:[%s4214_s2 + $0x1e0] sm:$0xff]  ;;  %v2032_v5 = vld [vmem:[%s4214_s2 + $0x1e8] sm:$0xff]  ;;  %v2689_v6 = vpack.c.bf16 %v2064_v63, %v2063_v62  ;;  %v2049_v7 = vld [vmem:[%s4214_s2 + $0x270] sm:$0xff] }
  0x34   : > { %v3251_v0 = vsel %vm503_vm0, %v509_v55, %v510_v56  ;;  %v3256_v1 = vsel %vm560_vm1, %v566_v57, %v567_v58  ;;  %v2050_v8 = vld [vmem:[%s4214_s2 + $0x278] sm:$0xff]  ;;  %v2065_v9 = vld [vmem:[%s4214_s2 + $0x2f0] sm:$0xff]  ;;  %v2659_v11 = vpack.c.bf16 %v2032_v5, %v2031_v4  ;;  %v454_v16 = vld [vmem:[%s3093_s21 + $0x28] sm:$0x3] }
  0x35   : > { %795 = vmatprep.mubr.f32.mxu0 %v3251_v0  ;;  %2497 = vmatprep.mubr.f32.mxu1 %v3256_v1  ;;  %v2066_v10 = vld [vmem:[%s4214_s2 + $0x2f8] sm:$0xff]  ;;  %v2661_v12 = vpack.c.bf16 %v2050_v8, %v2049_v7  ;;  %v2033_v13 = vld [vmem:[%s4214_s2 + $0x1f0] sm:$0xff]  ;;  %v2083_v17 = vld [vmem:[%s4214_s2 + $0x380] sm:$0xff]  ;;  %v569_v24 = vrot.slane %v454_v16, 2  ;;  %v512_v32 = vrot.slane %v454_v16, 1 }
  0x36   : > { %2648 = vmatpush3.bf16.msra.mxu0 %v2647_v40  ;;  %2680 = vmatpush3.bf16.msra.mxu1 %v2677_v35  ;;  %v2034_v14 = vld [vmem:[%s4214_s2 + $0x1f8] sm:$0xff]  ;;  %v2693_v15 = vpack.c.bf16 %v2066_v10, %v2065_v9  ;;  %v2084_v18 = vld [vmem:[%s4214_s2 + $0x388] sm:$0xff]  ;;  %v633_v19 = vld [vmem:[%s4214_s2 + $0x80] sm:$0xff] }
  0x37   : > { %2650 = vmatprep.subr.bf16.mxu0 %v2649_v42  ;;  %2682 = vmatprep.subr.bf16.mxu1 %v2681_v46  ;;  %v634_v20 = vld [vmem:[%s4214_s2 + $0x88] sm:$0xff]  ;;  %v2663_v21 = vpack.c.bf16 %v2034_v14, %v2033_v13  ;;  %v3298_v22 = vld [vmem:[%s3093_s21 + $0x30] sm:$0xff]  ;;  %v3301_v23 = vld [vmem:[%s3093_s21 + $0x38] sm:$0xff]  ;;  %v2761_v25 = vpack.c.bf16 %v2084_v18, %v2083_v17  ;;  %v3342_v43 = vsel %vm560_vm1, %v567_v58, %v569_v24 }
  0x38   : > { %v2067_v26 = vld [vmem:[%s4214_s2 + $0x300] sm:$0xff]  ;;  %v2068_v27 = vld [vmem:[%s4214_s2 + $0x308] sm:$0xff]  ;;  %v2697_v29 = vpack.c.bf16 %v634_v20, %v633_v19  ;;  %v635_v33 = vld [vmem:[%s4214_s2 + $0x90] sm:$0xff]  ;;  %v571_v34 = vrot.slane %v3298_v22, 2  ;;  %v572_v35 = vrot.slane %v3301_v23, 2  ;;  %v514_v47 = vrot.slane %v3298_v22, 1 }
  0x39   : > { %v3310_v28 = vld [vmem:[%s3093_s21 + $0x40] sm:$0x3]  ;;  %v618_v31 = vld [vmem:[%s4214_s2 + $0x8] sm:$0xff]  ;;  %v636_v36 = vld [vmem:[%s4214_s2 + $0x98] sm:$0xff]  ;;  %v2763_v39 = vpack.c.bf16 %v2068_v27, %v2067_v26  ;;  %v515_v48 = vrot.slane %v3301_v23, 1 }
  0x3a   : > { %2652 = vmatpush3.bf16.msra.mxu0 %v2651_v49  ;;  %2684 = vmatpush3.bf16.msra.mxu1 %v2681_v46  ;;  %v617_v30 = vld [vmem:[%s4214_s2] sm:$0xff]  ;;  %v3327_v37 = vld [vmem:[%s3093_s21 + $0x48] sm:$0xff]  ;;  %v3330_v38 = vld [vmem:[%s3093_s21 + $0x50] sm:$0xff]  ;;  %v574_v40 = vrot.slane %v3310_v28, 2  ;;  %v2701_v53 = vpack.c.bf16 %v636_v36, %v635_v33 }
  0x3b   : > { %2654 = vmatprep.subr.bf16.mxu0 %v2653_v50  ;;  %2686 = vmatprep.subr.bf16.mxu1 %v2685_v59  ;;  %v2085_v41 = vld [vmem:[%s4214_s2 + $0x390] sm:$0xff]  ;;  %v2086_v42 = vld [vmem:[%s4214_s2 + $0x398] sm:$0xff]  ;;  %v2699_v44 = vpack.c.bf16 %v618_v31, %v617_v30  ;;  %v3358_v50 = vsel %vm503_vm0, %v510_v56, %v512_v32  ;;  %v576_v54 = vrot.slane %v3327_v37, 2  ;;  %v577_v55 = vrot.slane %v3330_v38, 2  ;;  %v637_v57 = vld [vmem:[%s4214_s2 + $0xa0] sm:$0xff] }
  0x3c   : > { %v619_v45 = vld [vmem:[%s4214_s2 + $0x10] sm:$0xff]  ;;  %v620_v46 = vld [vmem:[%s4214_s2 + $0x18] sm:$0xff]  ;;  %v638_v58 = vld [vmem:[%s4214_s2 + $0xa8] sm:$0xff]  ;;  %v3373_v56 = vsel %vm560_vm1, %v571_v34, %v572_v35  ;;  %v2765_v60 = vpack.c.bf16 %v2086_v42, %v2085_v41  ;;  %v3397_v7 = vsel %vm503_vm0, %v514_v47, %v515_v48 }
  0x3d   : > { %v3353_v49 = vld [vmem:[%s3093_s21 + $0x58] sm:$0x3]  ;;  %v3379_v62 = vld [vmem:[%s3093_s21 + $0x60] sm:$0xff]  ;;  %v3382_v63 = vld [vmem:[%s3093_s21 + $0x68] sm:$0xff]  ;;  %v2705_v9 = vpack.c.bf16 %v638_v58, %v637_v57  ;;  %v3411_v13 = vsel %vm560_vm1, %v576_v54, %v577_v55 }
  0x3e   : > { %2656 = vmatpush3.bf16.msra.mxu0 %v2655_v2  ;;  %2688 = vmatpush3.bf16.msra.mxu1 %v2685_v59  ;;  %v2069_v59 = vld [vmem:[%s4214_s2 + $0x310] sm:$0xff]  ;;  %v2070_v61 = vld [vmem:[%s4214_s2 + $0x318] sm:$0xff]  ;;  %v3386_v2 = vsel %vm560_vm1, %v572_v35, %v574_v40  ;;  %v2087_v4 = vld [vmem:[%s4214_s2 + $0x3a0] sm:$0xff]  ;;  %v579_v8 = vrot.slane %v3353_v49, 2  ;;  %4243 = vst [vmem:[#allocation4_spill] sm:$0xff] %v3411_v13  ;;  %v582_v16 = vrot.slane %v3382_v63, 2 }
  0x3f   : > { %2658 = vmatprep.subr.bf16.mxu0 %v2657_v3  ;;  %2690 = vmatprep.subr.bf16.mxu1 %v2689_v6  ;;  %v517_v3 = vrot.slane %v3310_v28, 1  ;;  %v2088_v5 = vld [vmem:[%s4214_s2 + $0x3a8] sm:$0xff]  ;;  %v621_v10 = vld [vmem:[%s4214_s2 + $0x20] sm:$0xff]  ;;  %v2767_v14 = vpack.c.bf16 %v2070_v61, %v2069_v59  ;;  %v639_v17 = vld [vmem:[%s4214_s2 + $0xb0] sm:$0xff]  ;;  %v519_v28 = vrot.slane %v3327_v37, 1 }
  0x40   : > { %v3419_v18 = vld [vmem:[%s3093_s21 + $0x78] sm:$0xff]  ;;  %v3422_v19 = vld [vmem:[%s3093_s21 + $0x80] sm:$0xff]  ;;  %v2089_v30 = vld [vmem:[%s4214_s2 + $0x3b0] sm:$0xff]  ;;  %v3450_v32 = vsel %vm560_vm1, %v577_v55, %v579_v8 }
  0x41   : > { %v640_v20 = vld [vmem:[%s4214_s2 + $0xb8] sm:$0xff]  ;;  %v2071_v24 = vld [vmem:[%s4214_s2 + $0x320] sm:$0xff]  ;;  %v3437_v26 = vsel %vm503_vm0, %v515_v48, %v517_v3  ;;  %4244 = vst [vmem:[#allocation5_spill] sm:$0xff] %v3450_v32  ;;  %v3455_v34 = vld [vmem:[%s4214_s2 + $0x30] sm:$0xff]  ;;  %v586_v36 = vrot.slane %v3419_v18, 2  ;;  %v522_v3 = vrot.slane %v3353_v49, 1 }
  0x42   : > { %2660 = vmatpush3.bf16.msra.mxu0 %v2659_v11  ;;  %2692 = vmatpush3.bf16.msra.mxu1 %v2689_v6  ;;  %v2703_v6 = vpack.c.bf16 %v620_v46, %v619_v45  ;;  %v622_v11 = vld [vmem:[%s4214_s2 + $0x28] sm:$0xff]  ;;  %v2090_v31 = vld [vmem:[%s4214_s2 + $0x3b8] sm:$0xff]  ;;  %v2709_v42 = vpack.c.bf16 %v640_v20, %v639_v17  ;;  %v3481_v47 = vld [vmem:[%s3093_s21 + $0x90] sm:$0xff] }
  0x43   : > { %2662 = vmatprep.subr.bf16.mxu0 %v2661_v12  ;;  %2694 = vmatprep.subr.bf16.mxu1 %v2693_v15  ;;  %v3407_v12 = vld [vmem:[%s3093_s21 + $0x70] sm:$0x3]  ;;  %v2707_v33 = vpack.c.bf16 %v622_v11, %v621_v10  ;;  %v3460_v35 = vld [vmem:[%s4214_s2 + $0x38] sm:$0xff]  ;;  %v3465_v40 = vld [vmem:[%s3093_s21 + $0x88] sm:$0x3]  ;;  %v2773_v55 = vpack.c.bf16 %v2090_v31, %v2089_v30 }
  0x44   : > { %v584_v27 = vrot.slane %v3407_v12, 2  ;;  %v3478_v45 = vld [vmem:[%s4214_s2 + $0xc8] sm:$0xff]  ;;  %v3487_v48 = vld [vmem:[%s4214_s2 + $0x40] sm:$0xff]  ;;  %v3495_v54 = vld [vmem:[%s3093_s21 + $0x98] sm:$0xff]  ;;  %v589_v61 = vrot.slane %v3465_v40, 2  ;;  %v2711_v8 = vpack.c.bf16 %v3460_v35, %v3455_v34 }
  0x45   : > { %v2073_v57 = vld [vmem:[%s4214_s2 + $0x330] sm:$0xff]  ;;  %v2074_v58 = vld [vmem:[%s4214_s2 + $0x338] sm:$0xff]  ;;  %v3533_v10 = vld [vmem:[%s3093_s21 + $0xa0] sm:$0x3]  ;;  %v592_v17 = vrot.slane %v3495_v54, 2 }
  0x46   : > { %2664 = vmatpush3.bf16.msra.mxu0 %v2663_v21  ;;  %2696 = vmatpush3.bf16.msra.mxu1 %v2693_v15  ;;  %v581_v15 = vrot.slane %v3379_v62, 2  ;;  %v2769_v21 = vpack.c.bf16 %v2088_v5, %v2087_v4  ;;  %v3506_v59 = vsel %vm560_vm1, %v582_v16, %v584_v27  ;;  %v2091_v4 = vld [vmem:[%s4214_s2 + $0x3c0] sm:$0xff]  ;;  %v2092_v5 = vld [vmem:[%s4214_s2 + $0x3c8] sm:$0xff]  ;;  %v3538_v11 = vld [vmem:[%s4214_s2 + $0xd0] sm:$0xff] }
  0x47   : > { %2762 = vmatprep.subr.bf16.mxu0 %v2761_v25  ;;  %2698 = vmatprep.subr.bf16.mxu1 %v2697_v29  ;;  %v2072_v25 = vld [vmem:[%s4214_s2 + $0x328] sm:$0xff]  ;;  %v520_v29 = vrot.slane %v3330_v38, 1  ;;  %4246 = vst [vmem:[#allocation7_spill] sm:$0xff] %v3506_v59  ;;  %v644_v20 = vld [vmem:[%s4214_s2 + $0xd8] sm:$0xff]  ;;  %v3559_v30 = vld [vmem:[%s3093_s21 + $0xb0] sm:$0xff]  ;;  %v2777_v31 = vpack.c.bf16 %v2092_v5, %v2091_v4 }
  0x48   : > { %v3468_v41 = vsel %vm560_vm1, %v581_v15, %v582_v16  ;;  %v2771_v46 = vpack.c.bf16 %v2072_v25, %v2071_v24  ;;  %v591_v16 = vrot.slane %v3481_v47, 2  ;;  %v2775_v24 = vpack.c.bf16 %v2074_v58, %v2073_v57  ;;  %v3553_v25 = vld [vmem:[%s3093_s21 + $0x8] sm:$0xff]  ;;  %v3597_v57 = vld [vmem:[%s3093_s21 + $0xb8] sm:$0x3] }
  0x49   : > { %796 = vmatmul.mubr.f32.vlgmr.msra.gmra.mrb[0].mxu0 %v3221_v51  ;;  %2498 = vmatmul.mubr.f32.vlgmr.msra.gmra.mrb[0].mxu1 %v3342_v43  ;;  %4245 = vst [vmem:[#allocation6_spill] sm:$0xff] %v3468_v41  ;;  %v2076_v34 = vld [vmem:[%s4214_s2 + $0x348] sm:$0xff]  ;;  %v562_v35 = vrot.slane %v3553_v25, 2  ;;  %v597_v5 = vrot.slane %v3559_v30, 2 }
  0x4a   : > { %2764 = vmatpush3.bf16.msra.mxu0 %v2763_v39  ;;  %2700 = vmatpush3.bf16.msra.mxu1 %v2699_v44  ;;  %v587_v39 = vrot.slane %v3422_v19, 2  ;;  %v3473_v44 = vld [vmem:[%s4214_s2 + $0xc0] sm:$0xff] }
  0x4b   : > { %800 = vmatprep.mubr.f32.mxu0 %v3358_v50  ;;  %2500 = vmatprep.mubr.f32.mxu1 %v3373_v56 }
  0x4c   : > { %2702 = vmatprep.subr.bf16.mxu1 %v2701_v53  ;;  %2766 = vmatprep.subr.bf16.mxu0 %v2765_v60  ;;  %v3492_v53 = vld [vmem:[%s4214_s2 + $0x48] sm:$0xff]  ;;  %v3511_v60 = vsel %vm503_vm0, %v519_v28, %v520_v29  ;;  %v3528_v49 = vsel %vm560_vm1, %v586_v36, %v587_v39  ;;  %v524_v28 = vrot.slane %v3379_v62, 1  ;;  %v3571_v36 = vsel %vm560_vm1, %v587_v39, %v589_v61 }
  0x4d   : > { %801 = vmatmul.mubr.f32.gmra.mrb[2].mxu0 %v3224_v52  ;;  %2501 = vmatmul.mubr.f32.gmra.mrb[2].mxu1 %v3386_v2  ;;  %4247 = vst [vmem:[#allocation8_spill] sm:$0xff] %v3528_v49  ;;  %4248 = vst [vmem:[#allocation9_spill] sm:$0xff] %v3571_v36  ;;  %v594_v39 = vrot.slane %v3533_v10, 2 }
  0x4e   : > { %805 = vmatprep.mubr.f32.mxu0 %v3397_v7  ;;  %2704 = vmatpush3.bf16.msra.mxu1 %v2703_v6  ;;  %v3522_v6 = vld [vmem:[%s3093_s21 + $0x10] sm:$0x3] }
  0x4f   : > { %2503 = vmatprep.mubr.f32.mxu1 %v3411_v13  ;;  %2706 = vmatprep.subr.bf16.mxu1 %v2705_v9  ;;  %v2713_v9 = vpack.c.bf16 %v3478_v45, %v3473_v44  ;;  %v564_v15 = vrot.slane %v3522_v6, 2  ;;  %v3578_v44 = vsel %vm503_vm0, %v520_v29, %v522_v3  ;;  %v525_v45 = vrot.slane %v3382_v63, 1  ;;  %v627_v29 = vld [vmem:[%s4214_s2 + $0x50] sm:$0xff] }
  0x50   : > { %2768 = vmatpush3.bf16.msra.mxu0 %v2767_v14  ;;  %v3541_v14 = vld [vmem:[%s3093_s21] sm:$0xff]  ;;  %v3606_v3 = vsel %vm560_vm1, %v591_v16, %v592_v17 }
  0x51   : > { %806 = vmatmul.mubr.f32.gmra.mrb[4].mxu0 %v3298_v22  ;;  %2770 = vmatprep.subr.bf16.mxu0 %v2769_v21  ;;  %v3550_v21 = vld [vmem:[%s3093_s21 + $0xa8] sm:$0xff]  ;;  %v561_v27 = vrot.slane %v3541_v14, 2  ;;  %v3603_v61 = vsel %vm560_vm1, %v562_v35, %v564_v15  ;;  %4249 = vst [vmem:[#allocation10_spill] sm:$0xff] %v3606_v3 }
  0x52   : > { %2504 = vmatmul.mubr.f32.gmra.mrb[4].mxu1 %v3450_v32  ;;  %810 = vmatprep.mubr.f32.mxu0 %v3437_v26  ;;  %v596_v4 = vrot.slane %v3550_v21, 2 }
  0x53   : > { %2708 = vmatpush3.bf16.msra.mxu1 %v2707_v33  ;;  %2506 = vmatprep.mubr.f32.mxu1 %v3468_v41  ;;  %v2075_v33 = vld [vmem:[%s4214_s2 + $0x340] sm:$0xff]  ;;  %v3600_v58 = vsel %vm560_vm1, %v561_v27, %v562_v35  ;;  %v2077_v27 = vld [vmem:[%s4214_s2 + $0x350] sm:$0xff]  ;;  %v2078_v35 = vld [vmem:[%s4214_s2 + $0x358] sm:$0xff] }
  0x54   : > { %2710 = vmatprep.subr.bf16.mxu1 %v2709_v42  ;;  %2772 = vmatpush3.bf16.msra.mxu0 %v2771_v46  ;;  %v2715_v42 = vpack.c.bf16 %v3492_v53, %v3487_v48  ;;  %v2093_v46 = vld [vmem:[%s4214_s2 + $0x3d0] sm:$0xff]  ;;  %v2717_v48 = vpack.c.bf16 %v644_v20, %v3538_v11  ;;  %v628_v53 = vld [vmem:[%s4214_s2 + $0x58] sm:$0xff]  ;;  %v646_v11 = vld [vmem:[%s4214_s2 + $0xe8] sm:$0xff]  ;;  %v2779_v15 = vpack.c.bf16 %v2076_v34, %v2075_v33  ;;  %v527_v33 = vrot.slane %v3407_v12, 1 }
  0x55   : > { %811 = vmatmul.mubr.f32.gmra.mrb[6].mxu0 %v3301_v23  ;;  %2774 = vmatprep.subr.bf16.mxu0 %v2773_v55  ;;  %v2094_v55 = vld [vmem:[%s4214_s2 + $0x3d8] sm:$0xff]  ;;  %v3617_v20 = vld [vmem:[%s3108_s16] sm:$0xff]  ;;  %v2096_v34 = vld [vmem:[%s4214_s2 + $0x3e8] sm:$0xff] }
  0x56   : > { %2507 = vmatmul.mubr.f32.gmra.mrb[6].mxu1 %v3506_v59  ;;  %815 = vmatprep.mubr.f32.mxu0 %v3511_v60  ;;  %v2781_v16 = vpack.c.bf16 %v2094_v55, %v2093_v46  ;;  %v3643_v46 = vsel %vm560_vm1, %v592_v17, %v594_v39  ;;  %v2719_v55 = vpack.c.bf16 %v628_v53, %v627_v29  ;;  %v629_v12 = vld [vmem:[%s4214_s2 + $0x60] sm:$0xff]  ;;  %v3658_v39 = vld [vmem:[%s3108_s16 + $0x10] sm:$0x3]  ;;  %v648_v53 = vld [vmem:[%s4214_s2 + $0xf8] sm:$0xff] }
  0x57   : > { %2712 = vmatpush3.bf16.msra.mxu1 %v2711_v8  ;;  %2509 = vmatprep.mubr.f32.mxu1 %v3528_v49  ;;  %v645_v8 = vld [vmem:[%s4214_s2 + $0xe0] sm:$0xff]  ;;  %4250 = vst [vmem:[#allocation11_spill] sm:$0xff] %v3643_v46  ;;  %v630_v49 = vld [vmem:[%s4214_s2 + $0x68] sm:$0xff]  ;;  %v647_v29 = vld [vmem:[%s4214_s2 + $0xf0] sm:$0xff]  ;;  %v3676_v59 = vsel %vm503_vm0, %v525_v45, %v527_v33  ;;  %v678_v33 = vrot.slane %v3658_v39, 2 }
  0x58   : > { %2714 = vmatprep.subr.bf16.mxu1 %v2713_v9  ;;  %2776 = vmatpush3.bf16.msra.mxu0 %v2775_v24  ;;  %v3621_v9 = vld [vmem:[%s3108_s16 + $0x8] sm:$0xff]  ;;  %v3632_v24 = vsel %vm503_vm0, %v524_v28, %v525_v45  ;;  %v599_v28 = vrot.slane %v3597_v57, 2  ;;  %v2723_v45 = vpack.c.bf16 %v630_v49, %v629_v12  ;;  %v631_v41 = vld [vmem:[%s4214_s2 + $0x70] sm:$0xff]  ;;  %v649_v49 = vld [vmem:[%s4214_s2 + $0x100] sm:$0xff] }
  0x59   : > { %816 = vmatmul.mubr.f32.gmra.mrb[8].mxu0 %v3327_v37  ;;  %2778 = vmatprep.subr.bf16.mxu0 %v2777_v31  ;;  %v2095_v31 = vld [vmem:[%s4214_s2 + $0x3e0] sm:$0xff]  ;;  %v676_v17 = vrot.slane %v3621_v9, 2  ;;  %v2081_v12 = vld [vmem:[%s4214_s2 + $0x370] sm:$0xff] }
  0x5a   : > { %2510 = vmatmul.mubr.f32.gmra.mrb[8].mxu1 %v3571_v36  ;;  %820 = vmatprep.mubr.f32.mxu0 %v3578_v44  ;;  %v2721_v36 = vpack.c.bf16 %v646_v11, %v645_v8  ;;  %v2783_v8 = vpack.c.bf16 %v2078_v35, %v2077_v27  ;;  %v2080_v11 = vld [vmem:[%s4214_s2 + $0x368] sm:$0xff]  ;;  %v2097_v27 = vld [vmem:[%s4214_s2 + $0x3f0] sm:$0xff]  ;;  %v2098_v35 = vld [vmem:[%s4214_s2 + $0x3f8] sm:$0xff] }
  0x5b   : > { %2716 = vmatpush3.bf16.msra.mxu1 %v2715_v42  ;;  %2512 = vmatprep.mubr.f32.mxu1 %v3606_v3  ;;  %v3653_v42 = vsel %vm560_vm1, %v596_v4, %v597_v5  ;;  %v675_v3 = vrot.slane %v3617_v20, 2  ;;  %v2079_v4 = vld [vmem:[%s4214_s2 + $0x360] sm:$0xff] }
  0x5c   : > { %2718 = vmatprep.subr.bf16.mxu1 %v2717_v48  ;;  %4251 = vst [vmem:[#allocation12_spill] sm:$0xff] %v3653_v42  ;;  %2780 = vmatpush3.bf16.msra.mxu0 %v2779_v15  ;;  %v2785_v48 = vpack.c.bf16 %v2096_v34, %v2095_v31  ;;  %v529_v15 = vrot.slane %v3419_v18, 1  ;;  %v3688_v31 = vsel %vm560_vm1, %v597_v5, %v599_v28  ;;  %v505_v5 = vrot.slane %v3553_v25, 1 }
  0x5d   : > { %821 = vmatmul.mubr.f32.gmra.mrb[10].mxu0 %v3330_v38  ;;  %2782 = vmatprep.subr.bf16.mxu0 %v2781_v16  ;;  %v530_v16 = vrot.slane %v3422_v19, 1  ;;  %4252 = vst [vmem:[#allocation13_spill] sm:$0xff] %v3688_v31  ;;  %v2725_v34 = vpack.c.bf16 %v648_v53, %v647_v29  ;;  %v2789_v28 = vpack.c.bf16 %v2098_v35, %v2097_v27  ;;  %v2082_v29 = vld [vmem:[%s4214_s2 + $0x378] sm:$0xff]  ;;  %v2099_v53 = vld [vmem:[%s4214_s2 + $0x400] sm:$0xff]  ;;  %v532_v27 = vrot.slane %v3465_v40, 1 }
  0x5e   : > { %2513 = vmatmul.mubr.f32.gmra.mrb[10].mxu1 %v3643_v46  ;;  %825 = vmatprep.mubr.f32.mxu0 %v3632_v24  ;;  %v3692_v46 = vsel %vm560_vm1, %v675_v3, %v676_v17  ;;  %v650_v3 = vld [vmem:[%s4214_s2 + $0x108] sm:$0xff]  ;;  %v2791_v13 = vpack.c.bf16 %v2082_v29, %v2081_v12  ;;  %v659_v29 = vld [vmem:[%s4214_s2 + $0x150] sm:$0xff] }
  0x5f   : > { %2720 = vmatpush3.bf16.msra.mxu1 %v2719_v55  ;;  %2515 = vmatprep.mubr.f32.mxu1 %v3653_v42  ;;  %v632_v55 = vld [vmem:[%s4214_s2 + $0x78] sm:$0xff]  ;;  %v504_v42 = vrot.slane %v3541_v14, 1  ;;  %v2729_v32 = vpack.c.bf16 %v650_v3, %v649_v49  ;;  %v540_v49 = vrot.slane %v3559_v30, 1 }
  0x60   : > { %2722 = vmatprep.subr.bf16.mxu1 %v2721_v36  ;;  %2784 = vmatpush3.bf16.msra.mxu0 %v2783_v8  ;;  %v2787_v36 = vpack.c.bf16 %v2080_v11, %v2079_v4  ;;  %v2100_v8 = vld [vmem:[%s4214_s2 + $0x408] sm:$0xff]  ;;  %v2727_v4 = vpack.c.bf16 %v632_v55, %v631_v41  ;;  %v3728_v11 = vsel %vm503_vm0, %v529_v15, %v530_v16  ;;  %v652_v41 = vld [vmem:[%s4214_s2 + $0x118] sm:$0xff]  ;;  %v535_v15 = vrot.slane %v3495_v54, 1 }
  0x61   : > { %826 = vmatmul.mubr.f32.gmra.mrb[12].mxu0 %v3379_v62  ;;  %2786 = vmatprep.subr.bf16.mxu0 %v2785_v48  ;;  %v3725_v48 = vsel %vm560_vm1, %v676_v17, %v678_v33  ;;  %v506_v35 = vsel %vm503_vm0, %v504_v42, %v505_v5  ;;  %v651_v17 = vld [vmem:[%s4214_s2 + $0x110] sm:$0xff]  ;;  %v3740_v40 = vpack.c.bf16 %v2100_v8, %v2099_v53  ;;  %v534_v42 = vrot.slane %v3481_v47, 1 }
  0x62   : > { %2516 = vmatmul.mubr.f32.gmra.mrb[12].mxu1 %v3688_v31  ;;  %830 = vmatprep.mubr.f32.mxu0 %v3676_v59  ;;  %v507_v31 = vrot.slane %v3522_v6, 1  ;;  %v3745_v6 = vsel %vm503_vm0, %v530_v16, %v532_v27  ;;  %v2733_v33 = vpack.c.bf16 %v652_v41, %v651_v17  ;;  %v654_v16 = vld [vmem:[%s4214_s2 + $0x128] sm:$0xff]  ;;  %v669_v53 = vrot.slane %v3621_v9, 1  ;;  %v663_v41 = vld [vmem:[%s4214_s2 + $0x170] sm:$0xff] }
  0x63   : > { %2724 = vmatpush3.bf16.msra.mxu1 %v2723_v45  ;;  %2518 = vmatprep.mubr.f32.mxu1 %v3692_v46 }
  0x64   : > { %2726 = vmatprep.subr.bf16.mxu1 %v2725_v34  ;;  %2788 = vmatpush3.bf16.msra.mxu0 %v2787_v36  ;;  %v508_v45 = vsel %vm503_vm0, %v505_v5, %v507_v31  ;;  %v653_v34 = vld [vmem:[%s4214_s2 + $0x120] sm:$0xff]  ;;  %v3761_v31 = vsel %vm503_vm0, %v534_v42, %v535_v15  ;;  %v655_v5 = vld [vmem:[%s4214_s2 + $0x130] sm:$0xff]  ;;  %v664_v42 = vld [vmem:[%s4214_s2 + $0x178] sm:$0xff] }
  0x65   : > { %831 = vmatmul.mubr.f32.gmra.mrb[14].mxu0 %v3382_v63  ;;  %2790 = vmatprep.subr.bf16.mxu0 %v2789_v28  ;;  %v2737_v55 = vpack.c.bf16 %v654_v16, %v653_v34  ;;  %v542_v28 = vrot.slane %v3597_v57, 1  ;;  %v668_v57 = vrot.slane %v3617_v20, 1  ;;  %v2103_v16 = vld [vmem:[%s4214_s2 + $0x420] sm:$0xff] }
  0x66   : > { %2519 = vmatmul.mubr.f32.gmra.mrb[14].mxu1 %v3725_v48  ;;  %835 = vmatprep.mubr.f32.mxu0 %v3728_v11 }
  0x67   : > { %2728 = vmatpush3.bf16.msra.mxu1 %v2727_v4  ;;  %1085 = vmatprep.mubr.f32.mxu1 %v506_v35  ;;  %v662_v4 = vld [vmem:[%s4214_s2 + $0x168] sm:$0xff]  ;;  %v3819_v27 = vsel %vm503_vm0, %v668_v57, %v669_v53  ;;  %v671_v35 = vrot.slane %v3658_v39, 1 }
  0x68   : > { %2730 = vmatprep.subr.bf16.mxu1 %v2729_v32  ;;  %2792 = vmatpush3.bf16.msra.mxu0 %v2791_v13  ;;  %v537_v13 = vrot.slane %v3533_v10, 1  ;;  %v539_v10 = vrot.slane %v3550_v21, 1 }
  0x69   : > { %836 = vmatmul.mubr.f32.gmra.mrb[16].mxu0 %v3419_v18  ;;  %2794 = vmatprep.subr.bf16.mxu0 %v3740_v40  ;;  %v3833_v39 = vsel %vm503_vm0, %v669_v53, %v671_v35 }
  0x6a   : > { %1086 = vmatmul.mubr.f32.vlgmr.msra.gmra.mrb[16].mxu1 %v3541_v14  ;;  %840 = vmatprep.mubr.f32.mxu0 %v3745_v6  ;;  %v656_v14 = vld [vmem:[%s4214_s2 + $0x138] sm:$0xff]  ;;  %v3790_v3 = vsel %vm503_vm0, %v539_v10, %v540_v49  ;;  %v2112_v10 = vld [vmem:[%s4214_s2 + $0x468] sm:$0xff] }
  0x6b   : > { %1090 = vmatprep.mubr.f32.mxu1 %v508_v45  ;;  %2732 = vmatpush3.bf16.msra.mxu1 %v2729_v32  ;;  %v3775_v32 = vsel %vm503_vm0, %v535_v15, %v537_v13  ;;  %v2741_v36 = vpack.c.bf16 %v656_v14, %v655_v5  ;;  %v2757_v15 = vpack.c.bf16 %v664_v42, %v663_v41  ;;  %v2101_v45 = vld [vmem:[%s4214_s2 + $0x410] sm:$0xff]  ;;  %v2104_v13 = vld [vmem:[%s4214_s2 + $0x428] sm:$0xff]  ;;  %v2110_v14 = vld [vmem:[%s4214_s2 + $0x458] sm:$0xff] }
  0x6c   : > { %2734 = vmatprep.subr.bf16.mxu1 %v2733_v33  ;;  %v2108_v5 = vld [vmem:[%s4214_s2 + $0x448] sm:$0xff] }
  0x6d   : > { %841 = vmatmul.mubr.f32.gmra.mrb[18].mxu0 %v3422_v19 }
  0x6e   : > { %1091 = vmatmul.mubr.f32.gmra.mrb[18].mxu1 %v3553_v25  ;;  %845 = vmatprep.mubr.f32.mxu0 %v3761_v31  ;;  %v657_v25 = vld [vmem:[%s4214_s2 + $0x140] sm:$0xff] }
  0x6f   : > { %1095 = vmatprep.mubr.f32.mxu1 %v3251_v0  ;;  %2736 = vmatpush3.bf16.msra.mxu1 %v2733_v33  ;;  %v658_v0 = vld [vmem:[%s4214_s2 + $0x148] sm:$0xff]  ;;  %v2102_v33 = vld [vmem:[%s4214_s2 + $0x418] sm:$0xff] }
  0x70   : > { %2738 = vmatprep.subr.bf16.mxu1 %v2737_v55  ;;  %v2745_v12 = vpack.c.bf16 %v658_v0, %v657_v25  ;;  %v3849_v34 = vpack.c.bf16 %v2102_v33, %v2101_v45 }
  0x71   : > { %846 = vmatmul.mubr.f32.gmra.mrb[20].mxu0 %v3481_v47 }
  0x72   : > { %1096 = vmatmul.mubr.f32.gmra.mrb[20].mxu1 %v3221_v51  ;;  %850 = vmatprep.mubr.f32.mxu0 %v3775_v32  ;;  %v660_v51 = vld [vmem:[%s4214_s2 + $0x158] sm:$0xff] }
  0x73   : > { %1100 = vmatprep.mubr.f32.mxu1 %v3358_v50  ;;  %2740 = vmatpush3.bf16.msra.mxu1 %v2737_v55  ;;  %v3804_v50 = vsel %vm503_vm0, %v540_v49, %v542_v28  ;;  %v2749_v8 = vpack.c.bf16 %v660_v51, %v659_v29  ;;  %v2106_v55 = vld [vmem:[%s4214_s2 + $0x438] sm:$0xff] }
  0x74   : > { %2742 = vmatprep.subr.bf16.mxu1 %v2741_v36  ;;  %v2114_v49 = vld [vmem:[%s4214_s2 + $0x478] sm:$0xff] }
  0x75   : > { %851 = vmatmul.mubr.f32.gmra.mrb[22].mxu0 %v3495_v54 }
  0x76   : > { %1101 = vmatmul.mubr.f32.gmra.mrb[22].mxu1 %v3224_v52  ;;  %855 = vmatprep.mubr.f32.mxu0 %v3790_v3  ;;  %v661_v52 = vld [vmem:[%s4214_s2 + $0x160] sm:$0xff] }
  0x77   : > { %1105 = vmatprep.mubr.f32.mxu1 %v3397_v7  ;;  %2744 = vmatpush3.bf16.msra.mxu1 %v2741_v36  ;;  %v2753_v17 = vpack.c.bf16 %v662_v4, %v661_v52 }
  0x78   : > { %2746 = vmatprep.subr.bf16.mxu1 %v2745_v12 }
  0x79   : > { %856 = vmatmul.mubr.f32.gmra.mrb[24].mxu0 %v3550_v21 }
  0x7a   : > { %1106 = vmatmul.mubr.f32.gmra.mrb[24].mxu1 %v3298_v22  ;;  %860 = vmatprep.mubr.f32.mxu0 %v3804_v50 }
  0x7b   : > { %1110 = vmatprep.mubr.f32.mxu1 %v3437_v26  ;;  %2748 = vmatpush3.bf16.msra.mxu1 %v2745_v12 }
  0x7c   : > { %2750 = vmatprep.subr.bf16.mxu1 %v2749_v8 }
  0x7d   : > { %861 = vmatmul.mubr.f32.gmra.mrb[26].mxu0 %v3559_v30 }
  0x7e   : > { %1111 = vmatmul.mubr.f32.gmra.mrb[26].mxu1 %v3301_v23  ;;  %865 = vmatprep.mubr.f32.mxu0 %v3819_v27 }
  0x7f   : > { %1115 = vmatprep.mubr.f32.mxu1 %v3511_v60  ;;  %2752 = vmatpush3.bf16.msra.mxu1 %v2749_v8 }
  0x80   : > { %2754 = vmatprep.subr.bf16.mxu1 %v2753_v17 }
  0x81   : > { %866 = vmatmul.mubr.f32.gmra.mrb[28].mxu0 %v3617_v20 }
  0x82   : > { %1116 = vmatmul.mubr.f32.gmra.mrb[28].mxu1 %v3327_v37  ;;  %870 = vmatprep.mubr.f32.mxu0 %v3833_v39 }
  0x83   : > { %1120 = vmatprep.mubr.f32.mxu1 %v3578_v44  ;;  %2756 = vmatpush3.bf16.msra.mxu1 %v2753_v17 }
  0x84   : > { %2758 = vmatprep.subr.bf16.mxu1 %v2757_v15 }
  0x85   : > { %871 = vmatmul.mubr.f32.gmra.mrb[30].mxu0 %v3621_v9 }
  0x86   : > { %1121 = vmatmul.mubr.f32.gmra.mrb[30].mxu1 %v3330_v38  ;;  %1441 = vmatprep.mubr.f32.mxu0 %v3397_v7  ;;  %v3864_v7 = vpack.c.bf16 %v2104_v13, %v2103_v16 }
  0x87   : > { %1125 = vmatprep.mubr.f32.mxu1 %v3632_v24  ;;  %2760 = vmatpush3.bf16.msra.mxu1 %v2757_v15 }
  0x88   : > { %2825 = vmatprep.subr.bf16.mxu1 %v3740_v40 }
  0x89   : > { %1442 = vmatmul.mubr.f32.vlgmr.msra.gmra.mrb[32].mxu0 %v3298_v22  ;;  %v2105_v22 = vld [vmem:[%s4214_s2 + $0x430] sm:$0xff] }
  0x8a   : > { %1126 = vmatmul.mubr.f32.gmra.mrb[32].mxu1 %v3379_v62  ;;  %2796 = vmatpush3.bf16.msra.mxu0 %v3740_v40 }
  0x8b   : > { %1130 = vmatprep.mubr.f32.mxu1 %v3676_v59  ;;  %1446 = vmatprep.mubr.f32.mxu0 %v3437_v26  ;;  %v3878_v26 = vpack.c.bf16 %v2106_v55, %v2105_v22 }
  0x8c   : > { %2798 = vmatprep.subr.bf16.mxu0 %v3849_v34 }
  0x8d   : > { %1447 = vmatmul.mubr.f32.gmra.mrb[34].mxu0 %v3301_v23  ;;  %v2107_v23 = vld [vmem:[%s4214_s2 + $0x440] sm:$0xff] }
  0x8e   : > { %1131 = vmatmul.mubr.f32.gmra.mrb[34].mxu1 %v3382_v63  ;;  %1451 = vmatprep.mubr.f32.mxu0 %v3511_v60  ;;  %v3892_v60 = vpack.c.bf16 %v2108_v5, %v2107_v23 }
  0x8f   : > { %1135 = vmatprep.mubr.f32.mxu1 %v3728_v11  ;;  %2800 = vmatpush3.bf16.msra.mxu0 %v3849_v34 }
  0x90   : > { %2802 = vmatprep.subr.bf16.mxu0 %v3864_v7 }
  0x91   : > { %1452 = vmatmul.mubr.f32.gmra.mrb[36].mxu0 %v3327_v37  ;;  %v2109_v37 = vld [vmem:[%s4214_s2 + $0x450] sm:$0xff] }
  0x92   : > { %1136 = vmatmul.mubr.f32.gmra.mrb[36].mxu1 %v3419_v18  ;;  %1456 = vmatprep.mubr.f32.mxu0 %v3578_v44  ;;  %v3906_v44 = vpack.c.bf16 %v2110_v14, %v2109_v37 }
  0x93   : > { %1140 = vmatprep.mubr.f32.mxu1 %v3745_v6  ;;  %2804 = vmatpush3.bf16.msra.mxu0 %v3864_v7 }
  0x94   : > { %2806 = vmatprep.subr.bf16.mxu0 %v3878_v26 }
  0x95   : > { %1457 = vmatmul.mubr.f32.gmra.mrb[38].mxu0 %v3330_v38  ;;  %v2111_v38 = vld [vmem:[%s4214_s2 + $0x460] sm:$0xff] }
  0x96   : > { %1141 = vmatmul.mubr.f32.gmra.mrb[38].mxu1 %v3422_v19  ;;  %1461 = vmatprep.mubr.f32.mxu0 %v3632_v24  ;;  %v3920_v24 = vpack.c.bf16 %v2112_v10, %v2111_v38 }
  0x97   : > { %1145 = vmatprep.mubr.f32.mxu1 %v3761_v31  ;;  %2808 = vmatpush3.bf16.msra.mxu0 %v3878_v26 }
  0x98   : > { %2810 = vmatprep.subr.bf16.mxu0 %v3892_v60 }
  0x99   : > { %1462 = vmatmul.mubr.f32.gmra.mrb[40].mxu0 %v3379_v62  ;;  %v2113_v62 = vld [vmem:[%s4214_s2 + $0x470] sm:$0xff] }
  0x9a   : > { %1146 = vmatmul.mubr.f32.gmra.mrb[40].mxu1 %v3481_v47  ;;  %1466 = vmatprep.mubr.f32.mxu0 %v3676_v59  ;;  %v3934_v59 = vpack.c.bf16 %v2114_v49, %v2113_v62 }
  0x9b   : > { %1150 = vmatprep.mubr.f32.mxu1 %v3775_v32  ;;  %2812 = vmatpush3.bf16.msra.mxu0 %v3892_v60 }
  0x9c   : > { %2814 = vmatprep.subr.bf16.mxu0 %v3906_v44 }
  0x9d   : > { %1467 = vmatmul.mubr.f32.gmra.mrb[42].mxu0 %v3382_v63  ;;  %v477_v63 = vld [vmem:[%s3108_s16 + $0x20] sm:$0xff] }
  0x9e   : > { %1151 = vmatmul.mubr.f32.gmra.mrb[42].mxu1 %v3495_v54  ;;  %1471 = vmatprep.mubr.f32.mxu0 %v3728_v11  ;;  %v1322_v25 = vrot.slane %v477_v63, 2 }
  0x9f   : > { %1155 = vmatprep.mubr.f32.mxu1 %v3790_v3  ;;  %2816 = vmatpush3.bf16.msra.mxu0 %v3906_v44 }
  0xa0   : > { %2818 = vmatprep.subr.bf16.mxu0 %v3920_v24 }
  0xa1   : > { %1472 = vmatmul.mubr.f32.gmra.mrb[44].mxu0 %v3419_v18  ;;  %v4254_v18 = vld [vmem:[#allocation5_spill] sm:$0xff] }
  0xa2   : > { %1156 = vmatmul.mubr.f32.gmra.mrb[44].mxu1 %v3550_v21  ;;  %1476 = vmatprep.mubr.f32.mxu0 %v3745_v6 }
  0xa3   : > { %1160 = vmatprep.mubr.f32.mxu1 %v3804_v50  ;;  %2820 = vmatpush3.bf16.msra.mxu0 %v3920_v24 }
  0xa4   : > { %2822 = vmatprep.subr.bf16.mxu0 %v3934_v59 }
  0xa5   : > { %1477 = vmatmul.mubr.f32.gmra.mrb[46].mxu0 %v3422_v19  ;;  %v4255_v19 = vld [vmem:[#allocation6_spill] sm:$0xff] }
  0xa6   : > { %1161 = vmatmul.mubr.f32.gmra.mrb[46].mxu1 %v3559_v30  ;;  %1481 = vmatprep.mubr.f32.mxu0 %v3761_v31  ;;  %v4260_v31 = vld [vmem:[#allocation11_spill] sm:$0xff] }
  0xa7   : > { %2553 = vmatprep.mubr.f32.mxu1 %v3600_v58  ;;  %2824 = vmatpush3.bf16.msra.mxu0 %v3934_v59  ;;  %v4256_v58 = vld [vmem:[#allocation7_spill] sm:$0xff] }
  0xa9   : > { %1482 = vmatmul.mubr.f32.gmra.mrb[48].mxu0 %v3481_v47 }
  0xaa   : > { %2554 = vmatmul.mubr.f32.vlgmr.msra.gmra.mrb[0].mxu1 %v3603_v61  ;;  %1486 = vmatprep.mubr.f32.mxu0 %v3775_v32  ;;  %v4261_v32 = vld [vmem:[#allocation12_spill] sm:$0xff] }
  0xab   : > { %2833 = vmatpush3.bf16.msra.mxu1 %v3740_v40  ;;  %2556 = vmatprep.mubr.f32.mxu1 %v3256_v1  ;;  %v4253_v1 = vld [vmem:[#allocation4_spill] sm:$0xff]  ;;  %v4258_v40 = vld [vmem:[#allocation9_spill] sm:$0xff] }
  0xac   : > { %2826 = vmatprep.subr.bf16.mxu1 %v3849_v34 }
  0xad   : > { %1487 = vmatmul.mubr.f32.gmra.mrb[50].mxu0 %v3495_v54  ;;  %v1315_v54 = vrot.slane %v477_v63, 1 }
  0xae   : > { %2557 = vmatmul.mubr.f32.gmra.mrb[2].mxu1 %v3342_v43  ;;  %1491 = vmatprep.mubr.f32.mxu0 %v3790_v3  ;;  %v476_v43 = vld [vmem:[%s3108_s16 + $0x18] sm:$0xff] }
  0xaf   : > { %2834 = vmatpush3.bf16.msra.mxu1 %v3849_v34  ;;  %2559 = vmatprep.mubr.f32.mxu1 %v3373_v56  ;;  %v1314_v47 = vrot.slane %v476_v43, 1  ;;  %v1321_v36 = vrot.slane %v476_v43, 2 }
  0xb0   : > { %2827 = vmatprep.subr.bf16.mxu1 %v3864_v7 }
  0xb1   : > { %1492 = vmatmul.mubr.f32.gmra.mrb[52].mxu0 %v3550_v21  ;;  %v478_v21 = vld [vmem:[%s3108_s16 + $0x28] sm:$0x3]  ;;  %v1316_v61 = vsel %vm503_vm0, %v1314_v47, %v1315_v54  ;;  %v1323_v0 = vsel %vm560_vm1, %v1321_v36, %v1322_v25  ;;  %s1723_s16 = ssub.s32 16, %s3084_s10 }
  0xb2   : > { %2560 = vmatmul.mubr.f32.gmra.mrb[4].mxu1 %v3386_v2  ;;  %1496 = vmatprep.mubr.f32.mxu0 %v3804_v50  ;;  %v1317_v11 = vrot.slane %v478_v21, 1  ;;  %s2117_s19 = sshll.u32 %s1723_s16, 4 }
  0xb3   : > { %2835 = vmatpush3.bf16.msra.mxu1 %v3864_v7  ;;  %2562 = vmatprep.mubr.f32.mxu1 %v4253_v1 }
  0xb4   : > { %2828 = vmatprep.subr.bf16.mxu1 %v3878_v26  ;;  %v1318_v6 = vsel %vm503_vm0, %v1315_v54, %v1317_v11 }
  0xb5   : > { %1497 = vmatmul.mubr.f32.gmra.mrb[54].mxu0 %v3559_v30  ;;  %v4257_v30 = vld [vmem:[#allocation8_spill] sm:$0xff] }
  0xb6   : > { %2563 = vmatmul.mubr.f32.gmra.mrb[6].mxu1 %v4254_v18  ;;  %1501 = vmatprep.mubr.f32.mxu0 %v3819_v27 }
  0xb7   : > { %2836 = vmatpush3.bf16.msra.mxu1 %v3878_v26  ;;  %2565 = vmatprep.mubr.f32.mxu1 %v4255_v19 }
  0xb8   : > { %2829 = vmatprep.subr.bf16.mxu1 %v3892_v60 }
  0xb9   : > { %1502 = vmatmul.mubr.f32.gmra.mrb[56].mxu0 %v3617_v20  ;;  %v4259_v20 = vld [vmem:[#allocation10_spill] sm:$0xff] }
  0xba   : > { %2566 = vmatmul.mubr.f32.gmra.mrb[8].mxu1 %v4256_v58  ;;  %1506 = vmatprep.mubr.f32.mxu0 %v3833_v39 }
  0xbb   : > { %2837 = vmatpush3.bf16.msra.mxu1 %v3892_v60  ;;  %2568 = vmatprep.mubr.f32.mxu1 %v4257_v30 }
  0xbc   : > { %2830 = vmatprep.subr.bf16.mxu1 %v3906_v44 }
  0xbd   : > { %1507 = vmatmul.mubr.f32.gmra.mrb[58].mxu0 %v3621_v9  ;;  %v4262_v9 = vld [vmem:[#allocation13_spill] sm:$0xff] }
  0xbe   : > { %2569 = vmatmul.mubr.f32.gmra.mrb[10].mxu1 %v4258_v40  ;;  %1511 = vmatprep.mubr.f32.mxu0 %v1316_v61 }
  0xbf   : > { %2838 = vmatpush3.bf16.msra.mxu1 %v3906_v44  ;;  %2571 = vmatprep.mubr.f32.mxu1 %v4259_v20 }
  0xc0   : > { %2831 = vmatprep.subr.bf16.mxu1 %v3920_v24 }
  0xc1   : > { %1512 = vmatmul.mubr.f32.gmra.mrb[60].mxu0 %v476_v43 }
  0xc2   : > { %2572 = vmatmul.mubr.f32.gmra.mrb[12].mxu1 %v4260_v31  ;;  %1516 = vmatprep.mubr.f32.mxu0 %v1318_v6 }
  0xc3   : > { %2839 = vmatpush3.bf16.msra.mxu1 %v3920_v24  ;;  %2574 = vmatprep.mubr.f32.mxu1 %v4261_v32 }
  0xc4   : > { %2832 = vmatprep.subr.bf16.mxu1 %v3934_v59 }
  0xc5   : > { %1517 = vmatmul.mubr.f32.gmra.mrb[62].mxu0 %v477_v63 }
  0xc6   : > { %2575 = vmatmul.mubr.f32.gmra.mrb[14].mxu1 %v4262_v9  ;;  %2609 = vmatprep.mubr.f32.mxu0 %v3373_v56  ;;  %v1324_v56 = vrot.slane %v478_v21, 2 }
  0xc7   : > { %2840 = vmatpush3.bf16.msra.mxu1 %v3934_v59  ;;  %2621 = vmatprep.mubr.f32.mxu1 %v4259_v20 }
  0xc9   : > { %2610 = vmatmul.mubr.f32.vlgmr.msra.gmra.mrb[64].mxu0 %v3386_v2  ;;  %v1325_v2 = vsel %vm560_vm1, %v1322_v25, %v1324_v56 }
  0xca   : > { %2622 = vmatmul.mubr.f32.vlgmr.msra.gmra.mrb[8].mxu1 %v4260_v31  ;;  %2612 = vmatprep.mubr.f32.mxu0 %v4253_v1 }
  0xcb   : > { %2624 = vmatprep.mubr.f32.mxu1 %v4261_v32 }
  0xcd   : > { %2613 = vmatmul.mubr.f32.gmra.mrb[66].mxu0 %v4254_v18 }
  0xce   : > { %2625 = vmatmul.mubr.f32.gmra.mrb[10].mxu1 %v4262_v9  ;;  %2615 = vmatprep.mubr.f32.mxu0 %v4255_v19 }
  0xcf   : > { %2627 = vmatprep.mubr.f32.mxu1 %v3692_v46 }
  0xd1   : > { %2616 = vmatmul.mubr.f32.gmra.mrb[68].mxu0 %v4256_v58 }
  0xd2   : > { %2628 = vmatmul.mubr.f32.gmra.mrb[12].mxu1 %v3725_v48  ;;  %2618 = vmatprep.mubr.f32.mxu0 %v4257_v30 }
  0xd3   : > { %2630 = vmatprep.mubr.f32.mxu1 %v1323_v0 }
  0xd5   : > { %2619 = vmatmul.mubr.f32.gmra.mrb[70].mxu0 %v4258_v40 }
  0xd6   : > { %2631 = vmatmul.mubr.f32.gmra.mrb[14].mxu1 %v1325_v2 }
 0x11c   : > { %v2161_v3 = vpop.f32.mrb[0].mxu0 }
 0x11d   : > { %v2162_v28 = vpop.f32.mrb[1].mxu0 }
 0x11e   : > { %v2163_v12 = vadd.f32 %v2162_v28, %v2161_v3 }
 0x120   : > { %v2164_v29 = vpop.f32.mrb[2].mxu0 }
 0x121   : > { %v2165_v46 = vpop.f32.mrb[3].mxu0 }
 0x122   : > { %v2166_v51 = vadd.f32 %v2165_v46, %v2164_v29 }
 0x124   : > { %v2167_v50 = vpop.f32.mrb[4].mxu0 }
 0x125   : > { %v2168_v57 = vpop.f32.mrb[5].mxu0 }
 0x126   : > { %v2169_v53 = vadd.f32 %v2168_v57, %v2167_v50 }
 0x128   : > { %v2170_v8 = vpop.f32.mrb[6].mxu0 }
 0x129   : > { %v2171_v52 = vpop.f32.mrb[7].mxu0 }
 0x12a   : > { %v2172_v48 = vadd.f32 %v2171_v52, %v2170_v8 }
 0x12c   : > { %v2173_v4 = vpop.f32.mrb[8].mxu0 }
 0x12d   : > { %v2174_v27 = vpop.f32.mrb[9].mxu0 }
 0x12e   : > { %v2175_v35 = vadd.f32 %v2174_v27, %v2173_v4 }
 0x130   : > { %v2176_v17 = vpop.f32.mrb[10].mxu0 }
 0x131   : > { %v2177_v41 = vpop.f32.mrb[11].mxu0 }
 0x132   : > { %v2178_v42 = vadd.f32 %v2177_v41, %v2176_v17 }
 0x134   : > { %v2179_v39 = vpop.f32.mrb[12].mxu0 }
 0x135   : > { %v2180_v15 = vpop.f32.mrb[13].mxu0 }
 0x136   : > { %v2181_v45 = vadd.f32 %v2180_v15, %v2179_v39 }
 0x138   : > { %v2182_v33 = vpop.f32.mrb[14].mxu0 }
 0x139   : > { %v2183_v34 = vpop.f32.mrb[15].mxu0 }
 0x13a   : > { %v2184_v16 = vadd.f32 %v2183_v34, %v2182_v33 }
 0x13c   : > { %v2185_v13 = vpop.f32.mrb[16].mxu0 }
 0x13d   : > { %v2273_v7 = vpop.f32.mrb[16].mxu1  ;;  %v2186_v22 = vpop.f32.mrb[17].mxu0 }
 0x13e   : > { %v2187_v55 = vadd.f32 %v2186_v22, %v2185_v13  ;;  %v2274_v26 = vpop.f32.mrb[17].mxu1 }
 0x13f   : > { %v2275_v23 = vadd.f32 %v2274_v26, %v2273_v7 }
 0x140   : > { %v2188_v5 = vpop.f32.mrb[18].mxu0 }
 0x141   : > { %v2276_v60 = vpop.f32.mrb[18].mxu1  ;;  %v2189_v37 = vpop.f32.mrb[19].mxu0  ;;  %v4009_v14 = vadd.f32 %v2275_v23, %v2163_v12 }
 0x142   : > { %v2190_v44 = vadd.f32 %v2189_v37, %v2188_v5  ;;  %v2277_v38 = vpop.f32.mrb[19].mxu1 }
 0x143   : > { %v2278_v10 = vadd.f32 %v2277_v38, %v2276_v60 }
 0x144   : > { %v2191_v24 = vpop.f32.mrb[20].mxu0 }
 0x145   : > { %v2279_v62 = vpop.f32.mrb[20].mxu1  ;;  %v2192_v49 = vpop.f32.mrb[21].mxu0  ;;  %v4011_v59 = vadd.f32 %v2278_v10, %v2166_v51 }
 0x146   : > { %v2193_v1 = vadd.f32 %v2192_v49, %v2191_v24  ;;  %v2280_v43 = vpop.f32.mrb[21].mxu1 }
 0x147   : > { %v2281_v63 = vadd.f32 %v2280_v43, %v2279_v62 }
 0x148   : > { %v2194_v18 = vpop.f32.mrb[22].mxu0 }
 0x149   : > { %v2282_v19 = vpop.f32.mrb[22].mxu1  ;;  %v2195_v47 = vpop.f32.mrb[23].mxu0  ;;  %v4013_v54 = vadd.f32 %v2281_v63, %v2169_v53 }
 0x14a   : > { %v2196_v21 = vadd.f32 %v2195_v47, %v2194_v18  ;;  %v2283_v58 = vpop.f32.mrb[23].mxu1 }
 0x14b   : > { %v2284_v30 = vadd.f32 %v2283_v58, %v2282_v19 }
 0x14c   : > { %v2197_v61 = vpop.f32.mrb[24].mxu0 }
 0x14d   : > { %v2285_v11 = vpop.f32.mrb[24].mxu1  ;;  %v2198_v40 = vpop.f32.mrb[25].mxu0  ;;  %v4015_v20 = vadd.f32 %v2284_v30, %v2172_v48 }
 0x14e   : > { %v2199_v6 = vadd.f32 %v2198_v40, %v2197_v61  ;;  %v2286_v31 = vpop.f32.mrb[25].mxu1 }
 0x14f   : > { %v2287_v32 = vadd.f32 %v2286_v31, %v2285_v11 }
 0x150   : > { %v2200_v9 = vpop.f32.mrb[26].mxu0 }
 0x151   : > { %v2288_v36 = vpop.f32.mrb[26].mxu1  ;;  %v2201_v25 = vpop.f32.mrb[27].mxu0  ;;  %v4017_v56 = vadd.f32 %v2287_v32, %v2175_v35 }
 0x152   : > { %v2202_v0 = vadd.f32 %v2201_v25, %v2200_v9  ;;  %v2289_v2 = vpop.f32.mrb[27].mxu1 }
 0x153   : > { %v2290_v3 = vadd.f32 %v2289_v2, %v2288_v36 }
 0x154   : > { %v2203_v28 = vpop.f32.mrb[28].mxu0 }
 0x155   : > { %v2291_v12 = vpop.f32.mrb[28].mxu1  ;;  %v2204_v29 = vpop.f32.mrb[29].mxu0  ;;  %v4019_v46 = vadd.f32 %v2290_v3, %v2178_v42 }
 0x156   : > { %v2205_v51 = vadd.f32 %v2204_v29, %v2203_v28  ;;  %v2292_v50 = vpop.f32.mrb[29].mxu1 }
 0x157   : > { %v2293_v57 = vadd.f32 %v2292_v50, %v2291_v12 }
 0x158   : > { %v2206_v53 = vpop.f32.mrb[30].mxu0 }
 0x159   : > { %v2294_v8 = vpop.f32.mrb[30].mxu1  ;;  %v2207_v52 = vpop.f32.mrb[31].mxu0  ;;  %v4021_v48 = vadd.f32 %v2293_v57, %v2181_v45 }
 0x15a   : > { %v2208_v4 = vadd.f32 %v2207_v52, %v2206_v53  ;;  %v2295_v27 = vpop.f32.mrb[31].mxu1 }
 0x15b   : > { %v2296_v35 = vadd.f32 %v2295_v27, %v2294_v8 }
 0x15c   : > { %v2385_v17 = vpop.f32.mrb[32].mxu0 }
 0x15d   : > { %v2297_v41 = vpop.f32.mrb[32].mxu1  ;;  %v2386_v39 = vpop.f32.mrb[33].mxu0  ;;  %v4023_v15 = vadd.f32 %v2296_v35, %v2184_v16 }
 0x15e   : > { %v2298_v33 = vpop.f32.mrb[33].mxu1  ;;  %v4025_v34 = vadd.f32 %v2386_v39, %v2385_v17 }
 0x15f   : > { %v2299_v42 = vadd.f32 %v2298_v33, %v2297_v41 }
 0x160   : > { %v2388_v13 = vpop.f32.mrb[34].mxu0 }
 0x161   : > { %v2876_v7 = vadd.f32 %v2299_v42, %v2187_v55  ;;  %v2300_v22 = vpop.f32.mrb[34].mxu1  ;;  %v2389_v26 = vpop.f32.mrb[35].mxu0 }
 0x162   : > { %v2301_v23 = vpop.f32.mrb[35].mxu1  ;;  %v2390_v5 = vadd.f32 %v2389_v26, %v2388_v13 }
 0x163   : > { %v2302_v45 = vadd.f32 %v2301_v23, %v2300_v22 }
 0x164   : > { %v2391_v60 = vpop.f32.mrb[36].mxu0 }
 0x165   : > { %v2873_v37 = vadd.f32 %v2302_v45, %v2190_v44  ;;  %v2303_v38 = vpop.f32.mrb[36].mxu1  ;;  %v2392_v10 = vpop.f32.mrb[37].mxu0 }
 0x166   : > { %v2304_v24 = vpop.f32.mrb[37].mxu1  ;;  %v2393_v62 = vadd.f32 %v2392_v10, %v2391_v60 }
 0x167   : > { %v2305_v49 = vadd.f32 %v2304_v24, %v2303_v38 }
 0x168   : > { %v2394_v16 = vpop.f32.mrb[38].mxu0 }
 0x169   : > { %v4027_v43 = vadd.f32 %v2305_v49, %v2193_v1  ;;  %v2306_v63 = vpop.f32.mrb[38].mxu1  ;;  %v2395_v18 = vpop.f32.mrb[39].mxu0 }
 0x16a   : > { %v2307_v19 = vpop.f32.mrb[39].mxu1  ;;  %v2396_v47 = vadd.f32 %v2395_v18, %v2394_v16 }
 0x16b   : > { %v2308_v55 = vadd.f32 %v2307_v19, %v2306_v63 }
 0x16c   : > { %v2397_v58 = vpop.f32.mrb[40].mxu0 }
 0x16d   : > { %v4029_v30 = vadd.f32 %v2308_v55, %v2196_v21  ;;  %v2309_v61 = vpop.f32.mrb[40].mxu1  ;;  %v2398_v11 = vpop.f32.mrb[41].mxu0 }
 0x16e   : > { %v2310_v40 = vpop.f32.mrb[41].mxu1  ;;  %v2399_v44 = vadd.f32 %v2398_v11, %v2397_v58 }
 0x16f   : > { %v2311_v31 = vadd.f32 %v2310_v40, %v2309_v61 }
 0x170   : > { %v2400_v32 = vpop.f32.mrb[42].mxu0 }
 0x171   : > { %v4031_v9 = vadd.f32 %v2311_v31, %v2199_v6  ;;  %v2312_v36 = vpop.f32.mrb[42].mxu1  ;;  %v2401_v25 = vpop.f32.mrb[43].mxu0 }
 0x172   : > { %v2313_v1 = vpop.f32.mrb[43].mxu1  ;;  %v2402_v2 = vadd.f32 %v2401_v25, %v2400_v32 }
 0x173   : > { %v2314_v3 = vadd.f32 %v2313_v1, %v2312_v36 }
 0x174   : > { %v2403_v28 = vpop.f32.mrb[44].mxu0 }
 0x175   : > { %v4033_v12 = vadd.f32 %v2314_v3, %v2202_v0  ;;  %v2315_v29 = vpop.f32.mrb[44].mxu1  ;;  %v2404_v50 = vpop.f32.mrb[45].mxu0 }
 0x176   : > { %v2316_v21 = vpop.f32.mrb[45].mxu1  ;;  %v2405_v57 = vadd.f32 %v2404_v50, %v2403_v28 }
 0x177   : > { %v2317_v53 = vadd.f32 %v2316_v21, %v2315_v29  ;;  %v1725_v29 = vlaneseq }
 0x178   : > { %v2406_v8 = vpop.f32.mrb[46].mxu0 }
 0x179   : > { %v4035_v52 = vadd.f32 %v2317_v53, %v2205_v51  ;;  %v2318_v27 = vpop.f32.mrb[46].mxu1  ;;  %v2407_v35 = vpop.f32.mrb[47].mxu0 }
 0x17a   : > { %v2319_v6 = vpop.f32.mrb[47].mxu1  ;;  %v2408_v17 = vadd.f32 %v2407_v35, %v2406_v8 }
 0x17b   : > { %v2320_v41 = vadd.f32 %v2319_v6, %v2318_v27  ;;  %v4077_v6 = vstv %s2117_s19 }
 0x17c   : > { %v2409_v39 = vpop.f32.mrb[48].mxu0 }
 0x17d   : > { %v4037_v33 = vadd.f32 %v2320_v41, %v2208_v4  ;;  %v2555_v42 = vpop.f32.mrb[0].mxu1  ;;  %v2410_v13 = vpop.f32.mrb[49].mxu0 }
 0x17e   : > { %v2842_v0 = vadd.f32 %v4011_v59, %v2555_v42  ;;  %v1232_v22 = vpop.f32.mrb[1].mxu1  ;;  %v2411_v26 = vadd.f32 %v2410_v13, %v2409_v39 }
 0x17f   : > { %v2846_v23 = vadd.f32 %v4009_v14, %v1232_v22 }
 0x180   : > { %v2412_v45 = vpop.f32.mrb[50].mxu0  ;;  %v2843_v60 = vadd.f32 %v2842_v0, %v2390_v5  ;;  %v4041_v51 = vadd.f32 %v2876_v7, %v2411_v26 }
 0x181   : > { %v2558_v38 = vpop.f32.mrb[2].mxu1  ;;  %v2413_v10 = vpop.f32.mrb[51].mxu0  ;;  %v2847_v24 = vadd.f32 %v2846_v23, %v4025_v34 }
 0x182   : > { %v2850_v49 = vadd.f32 %v4015_v20, %v2558_v38  ;;  %v1242_v4 = vpop.f32.mrb[3].mxu1  ;;  %v2414_v16 = vadd.f32 %v2413_v10, %v2412_v45 }
 0x183   : > { %v2854_v63 = vadd.f32 %v4013_v54, %v1242_v4 }
 0x184   : > { %v2415_v18 = vpop.f32.mrb[52].mxu0  ;;  %v2874_v59 = vadd.f32 %v2873_v37, %v2414_v16  ;;  %v4046_v19 = vadd.f32 %v2850_v49, %v2396_v47 }
 0x185   : > { %v2561_v55 = vpop.f32.mrb[4].mxu1  ;;  %v2416_v14 = vpop.f32.mrb[53].mxu0  ;;  %v4048_v58 = vadd.f32 %v2854_v63, %v2393_v62 }
 0x186   : > { %v2858_v7 = vadd.f32 %v4019_v46, %v2561_v55  ;;  %v1252_v5 = vpop.f32.mrb[5].mxu1  ;;  %v2417_v61 = vadd.f32 %v2416_v14, %v2415_v18 }
 0x187   : > { %v2862_v34 = vadd.f32 %v4017_v56, %v1252_v5 }
 0x188   : > { %v2418_v11 = vpop.f32.mrb[54].mxu0  ;;  %v4053_v20 = vadd.f32 %v4027_v43, %v2417_v61  ;;  %v4055_v40 = vadd.f32 %v2858_v7, %v2402_v2 }
 0x189   : > { %v2564_v54 = vpop.f32.mrb[6].mxu1  ;;  %v2419_v37 = vpop.f32.mrb[55].mxu0  ;;  %v4057_v47 = vadd.f32 %v2862_v34, %v2399_v44 }
 0x18a   : > { %v2866_v31 = vadd.f32 %v4023_v15, %v2564_v54  ;;  %v1262_v62 = vpop.f32.mrb[7].mxu1  ;;  %v2420_v32 = vadd.f32 %v2419_v37, %v2418_v11 }
 0x18b   : > { %v2870_v46 = vadd.f32 %v4021_v48, %v1262_v62 }
 0x18c   : > { %v2421_v36 = vpop.f32.mrb[56].mxu0  ;;  %v2880_v56 = vadd.f32 %v4029_v30, %v2420_v32  ;;  %v4062_v25 = vadd.f32 %v2866_v31, %v2408_v17  ;;  %v4071_v30 = vshrl.u32 %v1725_v29, 7 }
 0x18d   : > { %v2422_v43 = vpop.f32.mrb[57].mxu0  ;;  %v4064_v1 = vadd.f32 %v2870_v46, %v2405_v57 }
 0x18e   : > { %v2423_v2 = vadd.f32 %v2422_v43, %v2421_v36  ;;  %vm1743_vm3 = vcmp.lt.s32.totalorder %v4071_v30, %v4077_v6  ;;  %v1728_v10 = vadd.s32 16, %v4071_v30  ;;  %v1730_v32 = vadd.s32 32, %v4071_v30 }
 0x18f   : > { %v4128_v43 = vadd.s32 72, %v4071_v30 }
 0x190   : > { %v2424_v3 = vpop.f32.mrb[58].mxu0  ;;  %v4067_v44 = vadd.f32 %v4031_v9, %v2423_v2  ;;  %v1727_v9 = vadd.s32 8, %v4071_v30  ;;  %vm1745_vm5 = vcmp.lt.s32.totalorder %v1728_v10, %v4077_v6  ;;  %vm1747_vm6 = vcmp.lt.s32.totalorder %v1730_v32, %v4077_v6 }
 0x191   : > { %v2425_v28 = vpop.f32.mrb[59].mxu0  ;;  %vm1752_vm11 = vcmp.lt.s32.totalorder %v4128_v43, %v4077_v6  ;;  %v1739_v32 = vadd.s32 104, %v4071_v30 }
 0x192   : > { %v2426_v15 = vadd.f32 %v2425_v28, %v2424_v3  ;;  %vm1744_vm2 = vcmp.lt.s32.totalorder %v1727_v9, %v4077_v6 }
 0x193   : > { %vm1756_vm15 = vcmp.lt.s32.totalorder %v1739_v32, %v4077_v6 }
 0x194   : > { %v2427_v50 = vpop.f32.mrb[60].mxu0  ;;  %v2886_v21 = vadd.f32 %v4033_v12, %v2426_v15  ;;  %v4082_v12 = vld [vmem:[%s4215_s3] ss:$0 sm:$0xff] }
 0x195   : > { %v2428_v48 = vpop.f32.mrb[61].mxu0 }
 0x196   : > { %v2429_v53 = vadd.f32 %v2428_v48, %v2427_v50  ;;  %v1734_v48 = vadd.s32 64, %v4071_v30 }
 0x198   : > { %v2430_v8 = vpop.f32.mrb[62].mxu0  ;;  %v4074_v57 = vadd.f32 %v4035_v52, %v2429_v53  ;;  %vm1751_vm10 = vcmp.lt.s32.totalorder %v1734_v48, %v4077_v6 }
 0x199   : > { %v2431_v27 = vpop.f32.mrb[63].mxu0 }
 0x19a   : > { %v2432_v35 = vadd.f32 %v2431_v27, %v2430_v8 }
 0x19c   : > { %v2611_v17 = vpop.f32.mrb[64].mxu0  ;;  %v4085_v41 = vadd.f32 %v4037_v33, %v2432_v35  ;;  %v1729_v33 = vadd.s32 24, %v4071_v30 }
 0x19d   : > { %v2844_v39 = vadd.f32 %v2843_v60, %v2611_v17  ;;  %v2623_v42 = vpop.f32.mrb[8].mxu1  ;;  %v1588_v52 = vpop.f32.mrb[65].mxu0 }
 0x19e   : > { %v2875_v13 = vadd.f32 %v2874_v59, %v2623_v42  ;;  %v2848_v0 = vadd.f32 %v2847_v24, %v1588_v52  ;;  %v1628_v22 = vpop.f32.mrb[9].mxu1  ;;  %vm1746_vm4 = vcmp.lt.s32.totalorder %v1729_v33, %v4077_v6 }
 0x19f   : > { %v1691_v26 = vadd.f32 %v2844_v39, %v4082_v12  ;;  %v2878_v23 = vadd.f32 %v4041_v51, %v1628_v22 }
 0x1a0   : > { %v4094_v45 = vadd.f32 %v2875_v13, %v4082_v12  ;;  %v1690_v60 = vadd.f32 %v2848_v0, %v4082_v12  ;;  %v2614_v38 = vpop.f32.mrb[66].mxu0 }
 0x1a1   : > { %1707 = vst [vmem:[%s3113_s23 + $0x8] sm:$0xff] %v1691_v26  ;;  %v1760_v24 = vsel %vm1744_vm2, %v1691_v26, 0.0  ;;  %v4100_v49 = vadd.f32 %v2878_v23, %v4082_v12  ;;  %v2852_v4 = vadd.f32 %v4046_v19, %v2614_v38  ;;  %v2626_v16 = vpop.f32.mrb[10].mxu1  ;;  %v1598_v51 = vpop.f32.mrb[67].mxu0 }
 0x1a2   : > { %v1801_v63 = vmul.f32 %v1760_v24, %v1760_v24  ;;  %1715 = vst [vmem:[%s3113_s23 + $0x48] sm:$0xff] %v4094_v45  ;;  %1706 = vst [vmem:[%s3113_s23] sm:$0xff] %v1690_v60  ;;  %v1759_v18 = vsel %vm1743_vm3, %v1690_v60, 0.0  ;;  %v2881_v59 = vadd.f32 %v2880_v56, %v2626_v16  ;;  %v1638_v55 = vpop.f32.mrb[11].mxu1  ;;  %v2856_v61 = vadd.f32 %v4048_v58, %v1598_v51 }
 0x1a3   : > { %v1776_v14 = vadd.f32 %v1760_v24, %v1759_v18  ;;  %v1800_v7 = vmul.f32 %v1759_v18, %v1759_v18  ;;  %1714 = vst [vmem:[%s3113_s23 + $0x40] sm:$0xff] %v4100_v49  ;;  %v1693_v19 = vadd.f32 %v2852_v4, %v4082_v12  ;;  %v2884_v54 = vadd.f32 %v4053_v20, %v1638_v55 }
 0x1a4   : > { %v4114_v5 = vadd.f32 %v2881_v59, %v4082_v12  ;;  %v2617_v34 = vpop.f32.mrb[68].mxu0  ;;  %v1692_v46 = vadd.f32 %v2856_v61, %v4082_v12  ;;  %v1731_v58 = vadd.s32 40, %v4071_v30  ;;  %v1732_v20 = vadd.s32 48, %v4071_v30 }
 0x1a5   : > { %v1816_v11 = vadd.f32 %v1801_v63, %v1800_v7  ;;  %v2860_v37 = vadd.f32 %v4055_v40, %v2617_v34  ;;  %v2629_v31 = vpop.f32.mrb[12].mxu1  ;;  %v1608_v62 = vpop.f32.mrb[69].mxu0  ;;  %1709 = vst [vmem:[%s3113_s23 + $0x18] sm:$0xff] %v1693_v19  ;;  %v1762_v40 = vsel %vm1746_vm4, %v1693_v19, 0.0  ;;  %v4133_v2 = vadd.f32 %v2884_v54, %v4082_v12 }
 0x1a6   : > { %1717 = vst [vmem:[%s3113_s23 + $0x58] sm:$0xff] %v4114_v5  ;;  %v2887_v36 = vadd.f32 %v2886_v21, %v2629_v31  ;;  %v1648_v56 = vpop.f32.mrb[13].mxu1  ;;  %1708 = vst [vmem:[%s3113_s23 + $0x10] sm:$0xff] %v1692_v46  ;;  %v1761_v28 = vsel %vm1745_vm5, %v1692_v46, 0.0  ;;  %v2864_v29 = vadd.f32 %v4057_v47, %v1608_v62  ;;  %vm1748_vm7 = vcmp.lt.s32.totalorder %v1731_v58, %v4077_v6 }
 0x1a7   : > { %v1695_v3 = vadd.f32 %v2860_v37, %v4082_v12  ;;  %v2890_v50 = vadd.f32 %v4067_v44, %v1648_v56  ;;  %v1777_v53 = vadd.f32 %v1776_v14, %v1761_v28  ;;  %v1802_v8 = vmul.f32 %v1761_v28, %v1761_v28  ;;  %1716 = vst [vmem:[%s3113_s23 + $0x50] sm:$0xff] %v4133_v2 }
 0x1a8   : > { %v4140_v15 = vadd.f32 %v2887_v36, %v4082_v12  ;;  %v2620_v21 = vpop.f32.mrb[70].mxu0  ;;  %v1694_v47 = vadd.f32 %v2864_v29, %v4082_v12  ;;  %v1733_v44 = vadd.s32 56, %v4071_v30  ;;  %vm1749_vm8 = vcmp.lt.s32.totalorder %v1732_v20, %v4077_v6 }
 0x1a9   : > { %1711 = vst [vmem:[%s3113_s23 + $0x28] sm:$0xff] %v1695_v3  ;;  %v2632_v27 = vpop.f32.mrb[14].mxu1  ;;  %v1618_v35 = vpop.f32.mrb[71].mxu0  ;;  %v1803_v17 = vmul.f32 %v1762_v40, %v1762_v40  ;;  %v1817_v39 = vadd.f32 %v1816_v11, %v1802_v8  ;;  %v1778_v42 = vadd.f32 %v1777_v53, %v1762_v40  ;;  %v1702_v52 = vadd.f32 %v2890_v50, %v4082_v12 }
 0x1aa   : > { %1719 = vst [vmem:[%s3113_s23 + $0x68] sm:$0xff] %v4140_v15  ;;  %v1658_v9 = vpop.f32.mrb[15].mxu1  ;;  %1710 = vst [vmem:[%s3113_s23 + $0x20] sm:$0xff] %v1694_v47  ;;  %v1763_v13 = vsel %vm1747_vm6, %v1694_v47, 0.0  ;;  %v2868_v0 = vadd.f32 %v4062_v25, %v2620_v21  ;;  %v2893_v22 = vadd.f32 %v4085_v41, %v2632_v27  ;;  %v2872_v26 = vadd.f32 %v4064_v1, %v1618_v35 }
 0x1ab   : > { %v1764_v23 = vsel %vm1748_vm7, %v1695_v3, 0.0  ;;  %v1779_v33 = vadd.f32 %v1778_v42, %v1763_v13  ;;  %v1804_v60 = vmul.f32 %v1763_v13, %v1763_v13  ;;  %v1818_v38 = vadd.f32 %v1817_v39, %v1803_v17  ;;  %1718 = vst [vmem:[%s3113_s23 + $0x60] sm:$0xff] %v1702_v52 }
 0x1ac   : > { %v1697_v10 = vadd.f32 %v2868_v0, %v4082_v12  ;;  %vm1750_vm9 = vcmp.lt.s32.totalorder %v1733_v44, %v4077_v6  ;;  %v1705_v24 = vadd.f32 %v2893_v22, %v4082_v12  ;;  %v1696_v25 = vadd.f32 %v2872_v26, %v4082_v12 }
 0x1ad   : > { %v1819_v4 = vadd.f32 %v1818_v38, %v1804_v60  ;;  %v1780_v41 = vadd.f32 %v1779_v33, %v1764_v23  ;;  %v2896_v1 = vadd.f32 %v4074_v57, %v1658_v9  ;;  %v1736_v16 = vadd.s32 80, %v4071_v30  ;;  %v1775_v38 = vld [vmem:[%s3098_s25] sm:$0x1] }
 0x1ae   : > { %v1805_v51 = vmul.f32 %v1764_v23, %v1764_v23  ;;  %1713 = vst [vmem:[%s3113_s23 + $0x38] sm:$0xff] %v1697_v10  ;;  %1721 = vst [vmem:[%s3113_s23 + $0x78] sm:$0xff] %v1705_v24  ;;  %v1765_v63 = vsel %vm1749_vm8, %v1696_v25, 0.0  ;;  %v1766_v18 = vsel %vm1750_vm9, %v1697_v10, 0.0  ;;  %v1737_v57 = vadd.s32 88, %v4071_v30 }
 0x1af   : > { %1712 = vst [vmem:[%s3113_s23 + $0x30] sm:$0xff] %v1696_v25  ;;  %v1781_v59 = vadd.f32 %v1780_v41, %v1765_v63  ;;  %v1806_v55 = vmul.f32 %v1765_v63, %v1765_v63  ;;  %v1704_v7 = vadd.f32 %v2896_v1, %v4082_v12  ;;  %v1767_v19 = vsel %vm1751_vm10, %v4100_v49, 0.0  ;;  %v1799_v41 = vld [vmem:[%s3103_s5] sm:$0x1] }
 0x1b0   : > { %v1820_v14 = vadd.f32 %v1819_v4, %v1805_v51  ;;  %vm1753_vm12 = vcmp.lt.s32.totalorder %v1736_v16, %v4077_v6  ;;  %v1738_v34 = vadd.s32 96, %v4071_v30  ;;  %v1807_v11 = vmul.f32 %v1766_v18, %v1766_v18 }
 0x1b1   : > { %v1782_v61 = vadd.f32 %v1781_v59, %v1766_v18  ;;  %1720 = vst [vmem:[%s3113_s23 + $0x70] sm:$0xff] %v1704_v7  ;;  %v1768_v37 = vsel %vm1752_vm11, %v4094_v45, 0.0  ;;  %v1808_v62 = vmul.f32 %v1767_v19, %v1767_v19  ;;  %vm1754_vm13 = vcmp.lt.s32.totalorder %v1737_v57, %v4077_v6 }
 0x1b2   : > { %v1821_v54 = vadd.f32 %v1820_v14, %v1806_v55  ;;  %v1769_v12 = vsel %vm1753_vm12, %v4133_v2, 0.0  ;;  %v1809_v58 = vmul.f32 %v1768_v37, %v1768_v37  ;;  %vm1755_vm14 = vcmp.lt.s32.totalorder %v1738_v34, %v4077_v6 }
 0x1b3   : > { %v1783_v31 = vadd.f32 %v1782_v61, %v1767_v19  ;;  %v1740_v56 = vadd.s32 112, %v4071_v30  ;;  %v1770_v20 = vsel %vm1754_vm13, %v4114_v5, 0.0  ;;  %v1810_v45 = vmul.f32 %v1769_v12, %v1769_v12 }
 0x1b4   : > { %v1822_v46 = vadd.f32 %v1821_v54, %v1807_v11  ;;  %v1741_v40 = vadd.s32 120, %v4071_v30  ;;  %v1771_v28 = vsel %vm1755_vm14, %v1702_v52, 0.0  ;;  %v1811_v50 = vmul.f32 %v1770_v20, %v1770_v20 }
 0x1b5   : > { %v1784_v49 = vadd.f32 %v1783_v31, %v1768_v37  ;;  %vm1757_vm0 = vcmp.lt.s32.totalorder %v1740_v56, %v4077_v6  ;;  %v1772_v21 = vsel %vm1756_vm15, %v4140_v15, 0.0  ;;  %v1812_v53 = vmul.f32 %v1771_v28, %v1771_v28 }
 0x1b6   : > { %v1823_v36 = vadd.f32 %v1822_v46, %v1808_v62  ;;  %vm1758_vm1 = vcmp.lt.s32.totalorder %v1741_v40, %v4077_v6  ;;  %v1773_v8 = vsel %vm1757_vm0, %v1704_v7, 0.0  ;;  %v1813_v35 = vmul.f32 %v1772_v21, %v1772_v21 }
 0x1b7   : > { %v1785_v43 = vadd.f32 %v1784_v49, %v1769_v12  ;;  %v1774_v44 = vsel %vm1758_vm1, %v1705_v24, 0.0  ;;  %v1814_v9 = vmul.f32 %v1773_v8, %v1773_v8 }
 0x1b8   : > { %v1824_v3 = vadd.f32 %v1823_v36, %v1809_v58  ;;  %v1815_v42 = vmul.f32 %v1774_v44, %v1774_v44 }
 0x1b9   : > { %v1786_v29 = vadd.f32 %v1785_v43, %v1770_v20 }
 0x1ba   : > { %v1825_v2 = vadd.f32 %v1824_v3, %v1810_v45 }
 0x1bb   : > { %v1787_v48 = vadd.f32 %v1786_v29, %v1771_v28 }
 0x1bc   : > { %v1826_v5 = vadd.f32 %v1825_v2, %v1811_v50 }
 0x1bd   : > { %v1788_v27 = vadd.f32 %v1787_v48, %v1772_v21 }
 0x1be   : > { %v1827_v47 = vadd.f32 %v1826_v5, %v1812_v53 }
 0x1bf   : > { %v1789_v30 = vadd.f32 %v1788_v27, %v1773_v8 }
 0x1c0   : > { %v1828_v17 = vadd.f32 %v1827_v47, %v1813_v35 }
 0x1c1   : > { %v1790_v39 = vadd.f32 %v1789_v30, %v1774_v44 }
 0x1c2   : > { %v1829_v52 = vadd.f32 %v1828_v17, %v1814_v9 }
 0x1c3   : > { %v1791_v13 = vrot.slane %v1790_v39, 4 }
 0x1c4   : > { %v1830_v15 = vadd.f32 %v1829_v52, %v1815_v42 }
 0x1c5   : > { %v1792_v0 = vadd.f32 %v1791_v13, %v1790_v39 }
 0x1c6   : > { %v1831_v6 = vrot.slane %v1830_v15, 4 }
 0x1c7   : > { %v1793_v22 = vrot.slane %v1792_v0, 2 }
 0x1c8   : > { %v1832_v26 = vadd.f32 %v1831_v6, %v1830_v15 }
 0x1c9   : > { %v1794_v23 = vadd.f32 %v1793_v22, %v1792_v0 }
 0x1ca   : > { %v1833_v33 = vrot.slane %v1832_v26, 2 }
 0x1cb   : > { %v1795_v60 = vrot.slane %v1794_v23, 1 }
 0x1cc   : > { %v1834_v10 = vadd.f32 %v1833_v33, %v1832_v26 }
 0x1cd   : > { %v1796_v24 = vadd.f32 %v1795_v60, %v1794_v23 }
 0x1ce   : > { %v1835_v25 = vrot.slane %v1834_v10, 1 }
 0x1cf   : > { %v1797_v4 = vadd.f32 %v1796_v24, %v1775_v38 }
 0x1d0   : > { %v1836_v1 = vadd.f32 %v1835_v25, %v1834_v10 }
 0x1d1   : > { %1798 = vst [vmem:[%s3098_s25] sm:$0x1] %v1797_v4 }
 0x1d2   : > { %v1837_v16 = vadd.f32 %v1836_v1, %v1799_v41 }
 0x1d4   : > { %1838 = vst [vmem:[%s3103_s5] sm:$0x1] %v1837_v16 }
 0x1d5 PF: > { %s19_s4 = sadd.s32 1, %s3003_s4   ;;  %s4263_s10 = sld [smem:[#allocation2_spill]] }
 0x1d6   : > { %p16_p10 = scmp.ge.s32.totalorder %s19_s4, 6   ;;  %s4264_s23 = sld [smem:[#allocation3_spill]] }
 0x1d7   : > { %s4265_s27 = smov %s2995_s29  ;;  %s4266_s28 = smov %s2999_s30 }
 0x1d8   :  { %18 = sbr.rel (!%p16_p10) target bundleno = 3 (0x3), region = 107 }
 0x1db   : > { %s4267_s29 = smov %s4263_s10 }
 0x1dc   : > { %s4268_s30 = smov %s4264_s23 }

// kernel: _lambda_.5
= control target key start
LH: loop header
LB: loop body
LE: loop exit
PB: predicated region body
PF: predicated region fallthrough
CT: control target
= control target key end

     0   :  { %v284_v0 = vlaneseq  ;;  %s3206_s0 = inlined_call_operand.vmem [shape: f32[512,128], index: 0, kind: input, shape index: {}]   ;;  %s3207_s1 = inlined_call_operand.vmem [shape: f32[1,128], index: 1, kind: input, shape index: {}]   ;;  %s3208_s2 = inlined_call_operand.vmem [shape: f32[1,128], index: 2, kind: input, shape index: {}]   ;;  %s3209_s3 = inlined_call_operand.vmem [shape: f32[512,128], index: 3, kind: output, shape index: {}]  }
   0x1   :  { %v14_v1 = vld [vmem:[%s3206_s0] sm:$0xff]  ;;  %v16_v6 = vld [vmem:[%s3206_s0 + $0x10] sm:$0xff]  ;;  %v15_v7 = vld [vmem:[%s3206_s0 + $0x8] sm:$0xff] }
   0x2   :  { %v1471_v2 = vld [vmem:[%s3207_s1] ss:$0 sm:$0xff]  ;;  %v1479_v5 = vand.u32 127, %v284_v0  ;;  %v17_v8 = vld [vmem:[%s3206_s0 + $0x18] sm:$0xff]  ;;  %v19_v13 = vld [vmem:[%s3206_s0 + $0x28] sm:$0xff] }
   0x3   :  { %v1476_v3 = vld [vmem:[%s3208_s2] ss:$0 sm:$0xff]  ;;  %v85_v4 = vmul.f32 %v1471_v2, %v14_v1  ;;  %v87_v9 = vmul.f32 %v1471_v2, %v16_v6  ;;  %v86_v10 = vmul.f32 %v1471_v2, %v15_v7  ;;  %v88_v11 = vmul.f32 %v1471_v2, %v17_v8  ;;  %v20_v14 = vld [vmem:[%s3206_s0 + $0x30] sm:$0xff]  ;;  %v21_v18 = vld [vmem:[%s3206_s0 + $0x38] sm:$0xff] }
   0x4   :  { %v18_v12 = vld [vmem:[%s3206_s0 + $0x20] sm:$0xff]  ;;  %v90_v17 = vmul.f32 %v1471_v2, %v19_v13  ;;  %vm286_vm0 = vcmp.lt.s32.totalorder %v1479_v5, 8  ;;  %v91_v25 = vmul.f32 %v1471_v2, %v20_v14  ;;  %v92_v29 = vmul.f32 %v1471_v2, %v21_v18  ;;  %v23_v32 = vld [vmem:[%s3206_s0 + $0x48] sm:$0xff]  ;;  %v24_v38 = vld [vmem:[%s3206_s0 + $0x50] sm:$0xff] }
   0x5   :  { %v1503_v15 = vadd.f32 %v1476_v3, %v85_v4  ;;  %v89_v16 = vmul.f32 %v1471_v2, %v18_v12  ;;  %v1512_v19 = vadd.f32 %v1476_v3, %v87_v9  ;;  %v1515_v20 = vadd.f32 %v1476_v3, %v86_v10  ;;  %v22_v30 = vld [vmem:[%s3206_s0 + $0x40] sm:$0xff]  ;;  %v25_v43 = vld [vmem:[%s3206_s0 + $0x58] sm:$0xff]  ;;  %v27_v53 = vld [vmem:[%s3206_s0 + $0x68] sm:$0xff] }
   0x6   :  { %v1518_v21 = vadd.f32 %v1476_v3, %v88_v11  ;;  %v1525_v24 = vadd.f32 %v1476_v3, %v90_v17  ;;  %v1560_v36 = vadd.f32 %v1476_v3, %v91_v25  ;;  %v93_v37 = vmul.f32 %v1471_v2, %v22_v30  ;;  %v26_v48 = vld [vmem:[%s3206_s0 + $0x60] sm:$0xff]  ;;  %v28_v56 = vld [vmem:[%s3206_s0 + $0x70] sm:$0xff]  ;;  %v29_v59 = vld [vmem:[%s3206_s0 + $0x78] sm:$0xff] }
   0x7   :  { %3358 = vst [vmem:[#allocation2_spill] sm:$0xff] %v1503_v15  ;;  %3359 = vst [vmem:[#allocation3_spill] sm:$0xff] %v1512_v19  ;;  %v3226_v22 = vmax.f32 %v1503_v15, 0.0  ;;  %v1522_v23 = vadd.f32 %v1476_v3, %v89_v16  ;;  %v3224_v26 = vmax.f32 %v1512_v19, 0.0  ;;  %v3225_v27 = vmax.f32 %v1515_v20, 0.0  ;;  %v30_v60 = vld [vmem:[%s3206_s0 + $0x80] sm:$0xff] }
   0x8   :  { %3360 = vst [vmem:[#allocation4_spill] sm:$0xff] %v1515_v20  ;;  %3361 = vst [vmem:[#allocation5_spill] sm:$0xff] %v1518_v21  ;;  %v3223_v28 = vmax.f32 %v1518_v21, 0.0  ;;  %v3221_v40 = vmax.f32 %v1525_v24, 0.0  ;;  %v1574_v41 = vadd.f32 %v1476_v3, %v92_v29  ;;  %v94_v42 = vmul.f32 %v1471_v2, %v23_v32  ;;  %v31_v10 = vld [vmem:[%s3206_s0 + $0x88] sm:$0xff]  ;;  %v32_v14 = vld [vmem:[%s3206_s0 + $0x90] sm:$0xff] }
   0x9   :  { %3362 = vst [vmem:[#allocation6_spill] sm:$0xff] %v1522_v23  ;;  %3363 = vst [vmem:[#allocation7_spill] sm:$0xff] %v1525_v24  ;;  %v1539_v31 = vsel %vm286_vm0, %v3226_v22, -1e+30  ;;  %v1549_v33 = vsel %vm286_vm0, %v3224_v26, -1e+30  ;;  %v95_v44 = vmul.f32 %v1471_v2, %v24_v38  ;;  %v1591_v47 = vadd.f32 %v1476_v3, %v93_v37 }
   0xa   :  { %351 = vmax.xlane.f32.xlu0 %v1539_v31  ;;  %355 = vmax.xlane.f32.xlu1 %v1549_v33  ;;  %v1556_v34 = vsel %vm286_vm0, %v3225_v27, -1e+30  ;;  %v3222_v35 = vmax.f32 %v1522_v23, 0.0  ;;  %3364 = vst [vmem:[#allocation8_spill] sm:$0xff] %v1560_v36  ;;  %v1570_v39 = vsel %vm286_vm0, %v3223_v28, -1e+30  ;;  %v1604_v51 = vadd.f32 %v1476_v3, %v94_v42 }
   0xb   :  { %3365 = vst [vmem:[#allocation9_spill] sm:$0xff] %v1574_v41  ;;  %v3220_v46 = vmax.f32 %v1560_v36, 0.0  ;;  %3366 = vst [vmem:[#allocation10_spill] sm:$0xff] %v1591_v47  ;;  %v1600_v49 = vsel %vm286_vm0, %v3221_v40, -1e+30  ;;  %v3219_v50 = vmax.f32 %v1574_v41, 0.0  ;;  %v96_v52 = vmul.f32 %v1471_v2, %v25_v43 }
   0xc   :  { %v1587_v45 = vsel %vm286_vm0, %v3222_v35, -1e+30  ;;  %3367 = vst [vmem:[#allocation11_spill] sm:$0xff] %v1604_v51  ;;  %v1612_v54 = vadd.f32 %v1476_v3, %v95_v44  ;;  %v97_v55 = vmul.f32 %v1471_v2, %v26_v48  ;;  %v3218_v58 = vmax.f32 %v1591_v47, 0.0  ;;  %v33_v16 = vld [vmem:[%s3206_s0 + $0x98] sm:$0xff]  ;;  %v34_v17 = vld [vmem:[%s3206_s0 + $0xa0] sm:$0xff] }
   0xd   :  { %v1623_v57 = vsel %vm286_vm0, %v3220_v46, -1e+30  ;;  %v1636_v61 = vsel %vm286_vm0, %v3219_v50, -1e+30  ;;  %v3217_v62 = vmax.f32 %v1604_v51, 0.0  ;;  %v1640_v63 = vadd.f32 %v1476_v3, %v96_v52  ;;  %v35_v44 = vld [vmem:[%s3206_s0 + $0xa8] sm:$0xff] }
   0xe   :  { %353 = vmax.xlane.f32.xlu0 %v1556_v34  ;;  %357 = vmax.xlane.f32.xlu1 %v1570_v39  ;;  %3368 = vst [vmem:[#allocation12_spill] sm:$0xff] %v1612_v54  ;;  %v98_v0 = vmul.f32 %v1471_v2, %v27_v53  ;;  %v99_v1 = vmul.f32 %v1471_v2, %v28_v56  ;;  %v3215_v4 = vmax.f32 %v1612_v54, 0.0  ;;  %v1656_v9 = vsel %vm286_vm0, %v3218_v58, -1e+30  ;;  %v52_v35 = vld [vmem:[%s3206_s0 + $0x130] sm:$0xff]  ;;  %v53_v28 = vld [vmem:[%s3206_s0 + $0x138] sm:$0xff] }
   0xf   :  { %3369 = vst [vmem:[#allocation13_spill] sm:$0xff] %v1640_v63  ;;  %v1647_v6 = vadd.f32 %v1476_v3, %v97_v55  ;;  %v100_v7 = vmul.f32 %v1471_v2, %v29_v59  ;;  %v101_v8 = vmul.f32 %v1471_v2, %v30_v60  ;;  %v1665_v11 = vsel %vm286_vm0, %v3217_v62, -1e+30  ;;  %v64_v36 = vld [vmem:[%s3206_s0 + $0x190] sm:$0xff]  ;;  %v66_v21 = vld [vmem:[%s3206_s0 + $0x1a0] sm:$0xff] }
  0x10   :  { %v3213_v12 = vmax.f32 %v1640_v63, 0.0  ;;  %v1669_v13 = vadd.f32 %v1476_v3, %v98_v0  ;;  %v1681_v18 = vadd.f32 %v1476_v3, %v99_v1  ;;  %v1688_v25 = vsel %vm286_vm0, %v3215_v4, -1e+30  ;;  %v36_v0 = vld [vmem:[%s3206_s0 + $0xb0] sm:$0xff]  ;;  %v37_v1 = vld [vmem:[%s3206_s0 + $0xb8] sm:$0xff] }
  0x11   :  { %3370 = vst [vmem:[#allocation14_spill] sm:$0xff] %v1647_v6  ;;  %v3212_v29 = vmax.f32 %v1647_v6, 0.0  ;;  %v1692_v30 = vadd.f32 %v1476_v3, %v100_v7  ;;  %v1695_v32 = vadd.f32 %v1476_v3, %v101_v8  ;;  %v102_v37 = vmul.f32 %v1471_v2, %v31_v10 }
  0x12   :  { %359 = vmax.xlane.f32.xlu0 %v1587_v45  ;;  %361 = vmax.xlane.f32.xlu1 %v1600_v49  ;;  %3371 = vst [vmem:[#allocation15_spill] sm:$0xff] %v1669_v13  ;;  %3372 = vst [vmem:[#allocation16_spill] sm:$0xff] %v1681_v18  ;;  %v103_v38 = vmul.f32 %v1471_v2, %v32_v14  ;;  %v104_v42 = vmul.f32 %v1471_v2, %v33_v16  ;;  %v1709_v48 = vsel %vm286_vm0, %v3213_v12, -1e+30  ;;  %v46_v16 = vld [vmem:[%s3206_s0 + $0x100] sm:$0xff] }
  0x13   :  { %3373 = vst [vmem:[#allocation17_spill] sm:$0xff] %v1692_v30  ;;  %3374 = vst [vmem:[#allocation18_spill] sm:$0xff] %v1695_v32  ;;  %v105_v43 = vmul.f32 %v1471_v2, %v34_v17  ;;  %v3210_v52 = vmax.f32 %v1669_v13, 0.0  ;;  %v3211_v53 = vmax.f32 %v1681_v18, 0.0  ;;  %v1718_v55 = vsel %vm286_vm0, %v3212_v29, -1e+30 }
  0x14   :  { %v3214_v56 = vmax.f32 %v1692_v30, 0.0  ;;  %v3216_v59 = vmax.f32 %v1695_v32, 0.0  ;;  %v106_v60 = vmul.f32 %v1471_v2, %v35_v44  ;;  %v1731_v7 = vadd.f32 %v1476_v3, %v102_v37  ;;  %v48_v44 = vld [vmem:[%s3206_s0 + $0x110] sm:$0xff]  ;;  %v50_v12 = vld [vmem:[%s3206_s0 + $0x120] sm:$0xff]  ;;  %v43_v30 = vld [vmem:[%s3206_s0 + $0xe8] sm:$0xff] }
  0x15   :  { %v1734_v8 = vadd.f32 %v1476_v3, %v103_v38  ;;  %v1737_v10 = vadd.f32 %v1476_v3, %v104_v42  ;;  %v1740_v14 = vadd.f32 %v1476_v3, %v105_v43  ;;  %v1749_v17 = vsel %vm286_vm0, %v3210_v52, -1e+30  ;;  %v47_v43 = vld [vmem:[%s3206_s0 + $0x108] sm:$0xff]  ;;  %v49_v52 = vld [vmem:[%s3206_s0 + $0x118] sm:$0xff]  ;;  %v58_v13 = vld [vmem:[%s3206_s0 + $0x160] sm:$0xff] }
  0x16   :  { %363 = vmax.xlane.f32.xlu0 %v1623_v57  ;;  %365 = vmax.xlane.f32.xlu1 %v1636_v61  ;;  %3375 = vst [vmem:[#allocation19_spill] sm:$0xff] %v1731_v7  ;;  %v1755_v37 = vsel %vm286_vm0, %v3211_v53, -1e+30  ;;  %v107_v38 = vmul.f32 %v1471_v2, %v36_v0  ;;  %v108_v42 = vmul.f32 %v1471_v2, %v37_v1  ;;  %v1773_v0 = vsel %vm286_vm0, %v3214_v56, -1e+30  ;;  %v51_v56 = vld [vmem:[%s3206_s0 + $0x128] sm:$0xff] }
  0x17   :  { %3376 = vst [vmem:[#allocation20_spill] sm:$0xff] %v1734_v8  ;;  %3377 = vst [vmem:[#allocation21_spill] sm:$0xff] %v1737_v10  ;;  %v1779_v1 = vsel %vm286_vm0, %v3216_v59, -1e+30  ;;  %v1782_v53 = vadd.f32 %v1476_v3, %v106_v60  ;;  %v117_v29 = vmul.f32 %v1471_v2, %v46_v16  ;;  %v3227_v4 = vmax.f32 %v1731_v7, 0.0  ;;  %v38_v16 = vld [vmem:[%s3206_s0 + $0xc0] sm:$0xff] }
  0x18   :  { %3378 = vst [vmem:[#allocation22_spill] sm:$0xff] %v1740_v14  ;;  %3379 = vst [vmem:[#allocation23_spill] sm:$0xff] %v1779_v1  ;;  %v3231_v59 = vmax.f32 %v1734_v8, 0.0  ;;  %v3233_v62 = vmax.f32 %v1737_v10, 0.0  ;;  %v118_v50 = vmul.f32 %v1471_v2, %v47_v43  ;;  %v119_v46 = vmul.f32 %v1471_v2, %v48_v44  ;;  %v56_v8 = vld [vmem:[%s3206_s0 + $0x150] sm:$0xff] }
  0x19   :  { %3380 = vst [vmem:[#allocation24_spill] sm:$0xff] %v1782_v53  ;;  %v1800_v58 = vadd.f32 %v1476_v3, %v117_v29  ;;  %v120_v40 = vmul.f32 %v1471_v2, %v49_v52  ;;  %v1812_v26 = vadd.f32 %v1476_v3, %v107_v38  ;;  %v1815_v29 = vadd.f32 %v1476_v3, %v108_v42 }
  0x1a   :  { %367 = vmax.xlane.f32.xlu0 %v1656_v9  ;;  %369 = vmax.xlane.f32.xlu1 %v1665_v11  ;;  %v121_v43 = vmul.f32 %v1471_v2, %v50_v12  ;;  %v122_v44 = vmul.f32 %v1471_v2, %v51_v56  ;;  %v109_v52 = vmul.f32 %v1471_v2, %v38_v16  ;;  %v39_v12 = vld [vmem:[%s3206_s0 + $0xc8] sm:$0xff]  ;;  %v40_v56 = vld [vmem:[%s3206_s0 + $0xd0] sm:$0xff]  ;;  %v54_v16 = vld [vmem:[%s3206_s0 + $0x140] sm:$0xff]  ;;  %v1852_v60 = vsel %vm286_vm0, %v3227_v4, -1e+30 }
  0x1b   :  { %3381 = vst [vmem:[#allocation25_spill] sm:$0xff] %v1800_v58  ;;  %3382 = vst [vmem:[#allocation26_spill] sm:$0xff] %v1812_v26  ;;  %v1822_v27 = vadd.f32 %v1476_v3, %v118_v50  ;;  %v1825_v22 = vadd.f32 %v1476_v3, %v119_v46  ;;  %v1828_v38 = vadd.f32 %v1476_v3, %v120_v40  ;;  %v1868_v4 = vsel %vm286_vm0, %v3231_v59, -1e+30  ;;  %v57_v59 = vld [vmem:[%s3206_s0 + $0x158] sm:$0xff] }
  0x1c   :  { %3383 = vst [vmem:[#allocation27_spill] sm:$0xff] %v1815_v29  ;;  %v1838_v42 = vadd.f32 %v1476_v3, %v121_v43  ;;  %v1841_v50 = vadd.f32 %v1476_v3, %v122_v44  ;;  %v123_v46 = vmul.f32 %v1471_v2, %v52_v35  ;;  %v124_v40 = vmul.f32 %v1471_v2, %v53_v28  ;;  %v41_v44 = vld [vmem:[%s3206_s0 + $0xd8] sm:$0xff]  ;;  %v42_v28 = vld [vmem:[%s3206_s0 + $0xe0] sm:$0xff]  ;;  %v55_v35 = vld [vmem:[%s3206_s0 + $0x148] sm:$0xff] }
  0x1d   :  { %3384 = vst [vmem:[#allocation28_spill] sm:$0xff] %v1822_v27  ;;  %3385 = vst [vmem:[#allocation29_spill] sm:$0xff] %v1825_v22  ;;  %v1874_v43 = vsel %vm286_vm0, %v3233_v62, -1e+30  ;;  %v3394_v10 = vmax.f32 %v1740_v14, 0.0  ;;  %v125_v18 = vmul.f32 %v1471_v2, %v54_v16  ;;  %v59_v14 = vld [vmem:[%s3206_s0 + $0x168] sm:$0xff]  ;;  %v112_v6 = vmul.f32 %v1471_v2, %v41_v44 }
  0x1e   :  { %371 = vmax.xlane.f32.xlu0 %v1688_v25  ;;  %373 = vmax.xlane.f32.xlu1 %v1709_v48  ;;  %3386 = vst [vmem:[#allocation30_spill] sm:$0xff] %v1828_v38  ;;  %3387 = vst [vmem:[#allocation31_spill] sm:$0xff] %v1838_v42  ;;  %v1877_v7 = vadd.f32 %v1476_v3, %v123_v46  ;;  %v1880_v32 = vadd.f32 %v1476_v3, %v124_v40 }
  0x1f   :  { %3388 = vst [vmem:[#allocation32_spill] sm:$0xff] %v1841_v50  ;;  %3389 = vst [vmem:[#allocation33_spill] sm:$0xff] %v1852_v60  ;;  %v1893_v62 = vsel %vm286_vm0, %v3394_v10, -1e+30  ;;  %v110_v40 = vmul.f32 %v1471_v2, %v39_v12  ;;  %v1910_v12 = vadd.f32 %v1476_v3, %v109_v52  ;;  %v111_v46 = vmul.f32 %v1471_v2, %v40_v56  ;;  %v60_v10 = vld [vmem:[%s3206_s0 + $0x170] sm:$0xff]  ;;  %v61_v52 = vld [vmem:[%s3206_s0 + $0x178] sm:$0xff] }
  0x20   :  { %3390 = vst [vmem:[#allocation34_spill] sm:$0xff] %v1868_v4  ;;  %3391 = vst [vmem:[#allocation35_spill] sm:$0xff] %v1874_v43  ;;  %v1915_v16 = vadd.f32 %v1476_v3, %v125_v18  ;;  %v126_v63 = vmul.f32 %v1471_v2, %v55_v35  ;;  %v127_v54 = vmul.f32 %v1471_v2, %v56_v8 }
  0x21   :  { %3392 = vst [vmem:[#allocation36_spill] sm:$0xff] %v1877_v7  ;;  %3393 = vst [vmem:[#allocation37_spill] sm:$0xff] %v1880_v32  ;;  %v128_v51 = vmul.f32 %v1471_v2, %v57_v59  ;;  %v113_v56 = vmul.f32 %v1471_v2, %v42_v28  ;;  %v114_v44 = vmul.f32 %v1471_v2, %v43_v30 }
  0x22   :  { %375 = vmax.xlane.f32.xlu0 %v1718_v55  ;;  %377 = vmax.xlane.f32.xlu1 %v1749_v17  ;;  %3395 = vst [vmem:[#allocation38_spill] sm:$0xff] %v1893_v62  ;;  %3396 = vst [vmem:[#allocation39_spill] sm:$0xff] %v1910_v12  ;;  %v129_v18 = vmul.f32 %v1471_v2, %v58_v13  ;;  %v130_v35 = vmul.f32 %v1471_v2, %v59_v14 }
  0x23   :  { %3397 = vst [vmem:[#allocation40_spill] sm:$0xff] %v1915_v16  ;;  %v1932_v59 = vadd.f32 %v1476_v3, %v110_v40  ;;  %v1935_v8 = vadd.f32 %v1476_v3, %v126_v63  ;;  %v1938_v47 = vadd.f32 %v1476_v3, %v127_v54  ;;  %v1941_v41 = vadd.f32 %v1476_v3, %v128_v51  ;;  %v62_v54 = vld [vmem:[%s3206_s0 + $0x180] sm:$0xff] }
  0x24   :  { %v1945_v13 = vadd.f32 %v1476_v3, %v129_v18  ;;  %v1948_v30 = vadd.f32 %v1476_v3, %v130_v35  ;;  %v131_v14 = vmul.f32 %v1471_v2, %v60_v10  ;;  %v132_v28 = vmul.f32 %v1471_v2, %v61_v52  ;;  %v44_v10 = vld [vmem:[%s3206_s0 + $0xf0] sm:$0xff]  ;;  %v45_v52 = vld [vmem:[%s3206_s0 + $0xf8] sm:$0xff] }
  0x25   :  { %3398 = vst [vmem:[#allocation41_spill] sm:$0xff] %v1932_v59  ;;  %3399 = vst [vmem:[#allocation42_spill] sm:$0xff] %v1935_v8  ;;  %v3404_v63 = vmax.f32 %v1782_v53, 0.0  ;;  %v3406_v40 = vmax.f32 %v1812_v26, 0.0  ;;  %v1975_v53 = vadd.f32 %v1476_v3, %v111_v46  ;;  %v65_v35 = vld [vmem:[%s3206_s0 + $0x198] sm:$0xff]  ;;  %v3411_v46 = vmax.f32 %v1815_v29, 0.0 }
  0x26   :  { %379 = vmax.xlane.f32.xlu0 %v1755_v37  ;;  %381 = vmax.xlane.f32.xlu1 %v1773_v0  ;;  %3400 = vst [vmem:[#allocation43_spill] sm:$0xff] %v1938_v47  ;;  %3401 = vst [vmem:[#allocation44_spill] sm:$0xff] %v1941_v41  ;;  %v1981_v26 = vadd.f32 %v1476_v3, %v132_v28  ;;  %v2000_v28 = vadd.f32 %v1476_v3, %v112_v6  ;;  %v67_v29 = vld [vmem:[%s3206_s0 + $0x1a8] sm:$0xff] }
  0x27   :  { %3402 = vst [vmem:[#allocation45_spill] sm:$0xff] %v1945_v13  ;;  %3403 = vst [vmem:[#allocation46_spill] sm:$0xff] %v1948_v30  ;;  %v1959_v51 = vsel %vm286_vm0, %v3404_v63, -1e+30  ;;  %v1965_v18 = vsel %vm286_vm0, %v3406_v40, -1e+30  ;;  %v1978_v63 = vadd.f32 %v1476_v3, %v131_v14  ;;  %v2003_v24 = vadd.f32 %v1476_v3, %v113_v56 }
  0x28   :  { %3405 = vst [vmem:[#allocation47_spill] sm:$0xff] %v1959_v51  ;;  %3407 = vst [vmem:[#allocation48_spill] sm:$0xff] %v1965_v18  ;;  %v63_v40 = vld [vmem:[%s3206_s0 + $0x188] sm:$0xff]  ;;  %v1997_v14 = vsel %vm286_vm0, %v3411_v46, -1e+30  ;;  %v133_v23 = vmul.f32 %v1471_v2, %v62_v54  ;;  %v2015_v6 = vadd.f32 %v1476_v3, %v114_v44  ;;  %v115_v56 = vmul.f32 %v1471_v2, %v44_v10  ;;  %v68_v46 = vld [vmem:[%s3206_s0 + $0x1b0] sm:$0xff] }
  0x29   :  { %3408 = vst [vmem:[#allocation49_spill] sm:$0xff] %v1975_v53  ;;  %3409 = vst [vmem:[#allocation50_spill] sm:$0xff] %v1978_v63  ;;  %v116_v19 = vmul.f32 %v1471_v2, %v45_v52  ;;  %v134_v20 = vmul.f32 %v1471_v2, %v63_v40  ;;  %v135_v15 = vmul.f32 %v1471_v2, %v64_v36  ;;  %v69_v44 = vld [vmem:[%s3206_s0 + $0x1b8] sm:$0xff]  ;;  %v3417_v10 = vmax.f32 %v1910_v12, 0.0 }
  0x2a   :  { %383 = vmax.xlane.f32.xlu0 %v1779_v1  ;;  %385 = vmax.xlane.f32.xlu1 %v1852_v60  ;;  %3410 = vst [vmem:[#allocation51_spill] sm:$0xff] %v1981_v26  ;;  %3412 = vst [vmem:[#allocation52_spill] sm:$0xff] %v1997_v14  ;;  %v2020_v54 = vadd.f32 %v1476_v3, %v133_v23  ;;  %v137_v36 = vmul.f32 %v1471_v2, %v66_v21 }
  0x2b   :  { %3413 = vst [vmem:[#allocation53_spill] sm:$0xff] %v2000_v28  ;;  %3414 = vst [vmem:[#allocation54_spill] sm:$0xff] %v2003_v24  ;;  %v2035_v23 = vsel %vm286_vm0, %v3417_v10, -1e+30  ;;  %v140_v40 = vmul.f32 %v1471_v2, %v69_v44  ;;  %v72_v44 = vld [vmem:[%s3206_s0 + $0x1d0] sm:$0xff] }
  0x2c   :  { %3415 = vst [vmem:[#allocation55_spill] sm:$0xff] %v2015_v6  ;;  %3416 = vst [vmem:[#allocation56_spill] sm:$0xff] %v2020_v54  ;;  %v2053_v10 = vadd.f32 %v1476_v3, %v137_v36  ;;  %v74_v36 = vld [vmem:[%s3206_s0 + $0x1e0] sm:$0xff] }
  0x2d   :  { %3418 = vst [vmem:[#allocation57_spill] sm:$0xff] %v2035_v23 }
  0x2e   :  { %387 = vmax.xlane.f32.xlu0 %v1868_v4  ;;  %389 = vmax.xlane.f32.xlu1 %v1874_v43  ;;  %v2046_v43 = vadd.f32 %v1476_v3, %v135_v15  ;;  %3422 = vst [vmem:[#allocation61_spill] sm:$0xff] %v2053_v10  ;;  %v70_v15 = vld [vmem:[%s3206_s0 + $0x1c0] sm:$0xff]  ;;  %v2111_v4 = vadd.f32 %v1476_v3, %v116_v19  ;;  %v3434_v19 = vmax.f32 %v2003_v24, 0.0 }
  0x30   :  { %3420 = vst [vmem:[#allocation59_spill] sm:$0xff] %v2046_v43  ;;  %3432 = vst [vmem:[#allocation68_spill] sm:$0xff] %v2111_v4 }
  0x32   :  { %391 = vmax.xlane.f32.xlu0 %v1893_v62  ;;  %393 = vmax.xlane.f32.xlu1 %v1959_v51  ;;  %v136_v62 = vmul.f32 %v1471_v2, %v65_v35  ;;  %v138_v35 = vmul.f32 %v1471_v2, %v67_v29  ;;  %v2043_v51 = vadd.f32 %v1476_v3, %v134_v20  ;;  %v3424_v20 = vmax.f32 %v1932_v59, 0.0  ;;  %v75_v59 = vld [vmem:[%s3206_s0 + $0x1e8] sm:$0xff] }
  0x33   :  { %v139_v29 = vmul.f32 %v1471_v2, %v68_v46  ;;  %v71_v46 = vld [vmem:[%s3206_s0 + $0x1c8] sm:$0xff] }
  0x34   :  { %3419 = vst [vmem:[#allocation58_spill] sm:$0xff] %v2043_v51  ;;  %v2049_v12 = vadd.f32 %v1476_v3, %v136_v62  ;;  %v2056_v21 = vadd.f32 %v1476_v3, %v138_v35  ;;  %v2067_v62 = vsel %vm286_vm0, %v3424_v20, -1e+30  ;;  %v2074_v35 = vadd.f32 %v1476_v3, %v140_v40  ;;  %v73_v20 = vld [vmem:[%s3206_s0 + $0x1d8] sm:$0xff] }
  0x35   :  { %3425 = vst [vmem:[#allocation63_spill] sm:$0xff] %v2067_v62  ;;  %v2071_v52 = vadd.f32 %v1476_v3, %v139_v29  ;;  %v2087_v29 = vadd.f32 %v1476_v3, %v115_v56  ;;  %v141_v40 = vmul.f32 %v1471_v2, %v70_v15  ;;  %v3430_v56 = vmax.f32 %v2000_v28, 0.0  ;;  %v76_v28 = vld [vmem:[%s3206_s0 + $0x1f0] sm:$0xff] }
  0x36   :  { %395 = vmax.xlane.f32.xlu0 %v1965_v18  ;;  %3421 = vst [vmem:[#allocation60_spill] sm:$0xff] %v2049_v12  ;;  %397 = vmax.xlane.f32.xlu1 %v1997_v14  ;;  %3423 = vst [vmem:[#allocation62_spill] sm:$0xff] %v2056_v21  ;;  %v3429_v14 = vmax.f32 %v1975_v53, 0.0  ;;  %v142_v53 = vmul.f32 %v1471_v2, %v71_v46  ;;  %v145_v46 = vmul.f32 %v1471_v2, %v74_v36 }
  0x37   :  { %3426 = vst [vmem:[#allocation64_spill] sm:$0xff] %v2071_v52  ;;  %3427 = vst [vmem:[#allocation65_spill] sm:$0xff] %v2074_v35  ;;  %v2107_v15 = vsel %vm286_vm0, %v3430_v56, -1e+30  ;;  %v2114_v60 = vadd.f32 %v1476_v3, %v141_v40  ;;  %v77_v56 = vld [vmem:[%s3206_s0 + $0x1f8] sm:$0xff]  ;;  %v147_v36 = vmul.f32 %v1471_v2, %v76_v28 }
  0x38   :  { %3428 = vst [vmem:[#allocation66_spill] sm:$0xff] %v2087_v29  ;;  %3431 = vst [vmem:[#allocation67_spill] sm:$0xff] %v2107_v15  ;;  %v2129_v40 = vsel %vm286_vm0, %v3434_v19, -1e+30  ;;  %v2136_v18 = vadd.f32 %v1476_v3, %v142_v53  ;;  %v2146_v19 = vadd.f32 %v1476_v3, %v145_v46  ;;  %v3440_v53 = vmax.f32 %v2015_v6, 0.0 }
  0x39   :  { %3433 = vst [vmem:[#allocation69_spill] sm:$0xff] %v2114_v60 }
  0x3a   :  { %399 = vmax.xlane.f32.xlu0 %v2035_v23  ;;  %401 = vmax.xlane.f32.xlu1 %v2067_v62  ;;  %v2101_v23 = vsel %vm286_vm0, %v3429_v14, -1e+30  ;;  %v143_v62 = vmul.f32 %v1471_v2, %v72_v44  ;;  %v144_v14 = vmul.f32 %v1471_v2, %v73_v20  ;;  %v146_v44 = vmul.f32 %v1471_v2, %v75_v59 }
  0x3b   :  { %3435 = vst [vmem:[#allocation70_spill] sm:$0xff] %v2136_v18  ;;  %3438 = vst [vmem:[#allocation73_spill] sm:$0xff] %v2146_v19  ;;  %v148_v20 = vmul.f32 %v1471_v2, %v77_v56  ;;  %v3443_v2 = vmax.f32 %v2087_v29, 0.0  ;;  %v3270_v56 = vmax.f32 %v1800_v58, 0.0 }
  0x3c   :  { %v2139_v1 = vadd.f32 %v1476_v3, %v143_v62  ;;  %v2142_v24 = vadd.f32 %v1476_v3, %v144_v14  ;;  %v2149_v59 = vadd.f32 %v1476_v3, %v146_v44  ;;  %v2157_v62 = vsel %vm286_vm0, %v3440_v53, -1e+30 }
  0x3d   :  { %v3271_v14 = vmax.f32 %v2111_v4, 0.0  ;;  %v2164_v46 = vadd.f32 %v1476_v3, %v148_v20  ;;  %v2172_v28 = vsel %vm286_vm0, %v3443_v2, -1e+30  ;;  %v2188_v20 = vsel %vm286_vm0, %v3270_v56, -1e+30 }
  0x3e   :  { %403 = vmax.xlane.f32.xlu0 %v2101_v23  ;;  %3436 = vst [vmem:[#allocation71_spill] sm:$0xff] %v2139_v1  ;;  %3437 = vst [vmem:[#allocation72_spill] sm:$0xff] %v2142_v24  ;;  %405 = vmax.xlane.f32.xlu1 %v2107_v15  ;;  %v2161_v15 = vadd.f32 %v1476_v3, %v147_v36  ;;  %v3272_v3 = vmax.f32 %v1822_v27, 0.0  ;;  %v3274_v36 = vmax.f32 %v1825_v22, 0.0  ;;  %v3276_v2 = vmax.f32 %v1828_v38, 0.0 }
  0x3f   :  { %3439 = vst [vmem:[#allocation74_spill] sm:$0xff] %v2149_v59  ;;  %3442 = vst [vmem:[#allocation76_spill] sm:$0xff] %v2164_v46  ;;  %v2179_v44 = vsel %vm286_vm0, %v3271_v14, -1e+30  ;;  %v3278_v14 = vmax.f32 %v1838_v42, 0.0  ;;  %v3280_v27 = vmax.f32 %v1841_v50, 0.0 }
  0x40   :  { %3441 = vst [vmem:[#allocation75_spill] sm:$0xff] %v2161_v15  ;;  %v2195_v53 = vsel %vm286_vm0, %v3272_v3, -1e+30  ;;  %v2204_v56 = vsel %vm286_vm0, %v3274_v36, -1e+30  ;;  %v3282_v22 = vmax.f32 %v1877_v7, 0.0 }
  0x41   :  { %v2211_v3 = vsel %vm286_vm0, %v3276_v2, -1e+30  ;;  %v2220_v36 = vsel %vm286_vm0, %v3278_v14, -1e+30  ;;  %v2227_v2 = vsel %vm286_vm0, %v3280_v27, -1e+30 }
  0x42   :  { %407 = vmax.xlane.f32.xlu0 %v2129_v40  ;;  %409 = vmax.xlane.f32.xlu1 %v2157_v62  ;;  %v3284_v38 = vmax.f32 %v1880_v32, 0.0  ;;  %v2236_v14 = vsel %vm286_vm0, %v3282_v22, -1e+30  ;;  %v3286_v42 = vmax.f32 %v1915_v16, 0.0  ;;  %v3288_v50 = vmax.f32 %v1935_v8, 0.0 }
  0x43   :  { %v3290_v7 = vmax.f32 %v1938_v47, 0.0  ;;  %v3292_v32 = vmax.f32 %v1941_v41, 0.0  ;;  %v3294_v16 = vmax.f32 %v1945_v13, 0.0  ;;  %v3296_v8 = vmax.f32 %v1948_v30, 0.0 }
  0x44   :  { %v2243_v27 = vsel %vm286_vm0, %v3284_v38, -1e+30  ;;  %v2252_v22 = vsel %vm286_vm0, %v3286_v42, -1e+30  ;;  %v2259_v38 = vsel %vm286_vm0, %v3288_v50, -1e+30 }
  0x45   :  { %v2268_v42 = vsel %vm286_vm0, %v3290_v7, -1e+30  ;;  %v2275_v50 = vsel %vm286_vm0, %v3292_v32, -1e+30  ;;  %v2284_v7 = vsel %vm286_vm0, %v3294_v16, -1e+30 }
  0x46   :  { %411 = vmax.xlane.f32.xlu0 %v2172_v28  ;;  %413 = vmax.xlane.f32.xlu1 %v2179_v44  ;;  %v3298_v47 = vmax.f32 %v1978_v63, 0.0  ;;  %v2291_v32 = vsel %vm286_vm0, %v3296_v8, -1e+30  ;;  %v3300_v41 = vmax.f32 %v1981_v26, 0.0  ;;  %v3302_v13 = vmax.f32 %v2020_v54, 0.0 }
  0x47   :  { %v3304_v30 = vmax.f32 %v2043_v51, 0.0  ;;  %v3306_v63 = vmax.f32 %v2046_v43, 0.0  ;;  %v3308_v26 = vmax.f32 %v2049_v12, 0.0  ;;  %v3310_v54 = vmax.f32 %v2053_v10, 0.0 }
  0x48   :  { %v2300_v16 = vsel %vm286_vm0, %v3298_v47, -1e+30  ;;  %v2307_v8 = vsel %vm286_vm0, %v3300_v41, -1e+30  ;;  %v2316_v47 = vsel %vm286_vm0, %v3302_v13, -1e+30 }
  0x49   :  { %v2323_v41 = vsel %vm286_vm0, %v3304_v30, -1e+30  ;;  %v2332_v13 = vsel %vm286_vm0, %v3306_v63, -1e+30  ;;  %v2339_v30 = vsel %vm286_vm0, %v3308_v26, -1e+30 }
  0x4a   :  { %415 = vmax.xlane.f32.xlu0 %v2188_v20  ;;  %417 = vmax.xlane.f32.xlu1 %v2195_v53  ;;  %v3312_v51 = vmax.f32 %v2056_v21, 0.0  ;;  %v2348_v63 = vsel %vm286_vm0, %v3310_v54, -1e+30  ;;  %v3314_v43 = vmax.f32 %v2071_v52, 0.0  ;;  %v3316_v12 = vmax.f32 %v2074_v35, 0.0 }
  0x4b   :  { %v3318_v10 = vmax.f32 %v2114_v60, 0.0  ;;  %v3320_v21 = vmax.f32 %v2136_v18, 0.0  ;;  %v3322_v52 = vmax.f32 %v2139_v1, 0.0  ;;  %v3324_v35 = vmax.f32 %v2142_v24, 0.0 }
  0x4c   :  { %v2355_v26 = vsel %vm286_vm0, %v3312_v51, -1e+30  ;;  %v2364_v54 = vsel %vm286_vm0, %v3314_v43, -1e+30  ;;  %v2371_v51 = vsel %vm286_vm0, %v3316_v12, -1e+30 }
  0x4d   :  { %v2380_v43 = vsel %vm286_vm0, %v3318_v10, -1e+30  ;;  %v2387_v12 = vsel %vm286_vm0, %v3320_v21, -1e+30  ;;  %v2396_v10 = vsel %vm286_vm0, %v3322_v52, -1e+30 }
  0x4e   :  { %419 = vmax.xlane.f32.xlu0 %v2204_v56  ;;  %421 = vmax.xlane.f32.xlu1 %v2211_v3  ;;  %v3326_v60 = vmax.f32 %v2146_v19, 0.0  ;;  %v2403_v21 = vsel %vm286_vm0, %v3324_v35, -1e+30  ;;  %v3328_v18 = vmax.f32 %v2149_v59, 0.0  ;;  %v3331_v1 = vmax.f32 %v2161_v15, 0.0 }
  0x4f   :  { %v3335_v24 = vmax.f32 %v2164_v46, 0.0 }
  0x50   :  { %v2412_v52 = vsel %vm286_vm0, %v3326_v60, -1e+30  ;;  %v2419_v35 = vsel %vm286_vm0, %v3328_v18, -1e+30  ;;  %v2428_v60 = vsel %vm286_vm0, %v3331_v1, -1e+30 }
  0x51   :  { %v2434_v59 = vsel %vm286_vm0, %v3335_v24, -1e+30 }
  0x52   :  { %423 = vmax.xlane.f32.xlu0 %v2220_v36  ;;  %425 = vmax.xlane.f32.xlu1 %v2227_v2  ;;  %3444 = vst [vmem:[#allocation77_spill] sm:$0xff] %v2434_v59 }
  0x56   :  { %427 = vmax.xlane.f32.xlu0 %v2236_v14  ;;  %429 = vmax.xlane.f32.xlu1 %v2243_v27 }
  0x5a   :  { %431 = vmax.xlane.f32.xlu0 %v2252_v22  ;;  %433 = vmax.xlane.f32.xlu1 %v2259_v38 }
  0x5e   :  { %435 = vmax.xlane.f32.xlu0 %v2268_v42  ;;  %437 = vmax.xlane.f32.xlu1 %v2275_v50 }
  0x62   :  { %439 = vmax.xlane.f32.xlu0 %v2284_v7  ;;  %441 = vmax.xlane.f32.xlu1 %v2291_v32 }
  0x66   :  { %443 = vmax.xlane.f32.xlu0 %v2300_v16  ;;  %445 = vmax.xlane.f32.xlu1 %v2307_v8 }
  0x6a   :  { %447 = vmax.xlane.f32.xlu0 %v2316_v47  ;;  %449 = vmax.xlane.f32.xlu1 %v2323_v41 }
  0x6e   :  { %451 = vmax.xlane.f32.xlu0 %v2332_v13  ;;  %453 = vmax.xlane.f32.xlu1 %v2339_v30 }
  0x72   :  { %455 = vmax.xlane.f32.xlu0 %v2348_v63  ;;  %457 = vmax.xlane.f32.xlu1 %v2355_v26 }
  0x76   :  { %459 = vmax.xlane.f32.xlu0 %v2364_v54  ;;  %461 = vmax.xlane.f32.xlu1 %v2371_v51 }
  0x7a   :  { %463 = vmax.xlane.f32.xlu0 %v2380_v43  ;;  %465 = vmax.xlane.f32.xlu1 %v2387_v12 }
  0x7e   :  { %467 = vmax.xlane.f32.xlu0 %v2396_v10  ;;  %469 = vmax.xlane.f32.xlu1 %v2403_v21 }
  0x82   :  { %471 = vmax.xlane.f32.xlu0 %v2412_v52  ;;  %473 = vmax.xlane.f32.xlu1 %v2419_v35 }
  0x86   :  { %475 = vmax.xlane.f32.xlu0 %v2428_v60  ;;  %477 = vmax.xlane.f32.xlu1 %v2434_v59 }
  0x97   :  { %v2438_v18 = vpop.xlane.xlu0 %351  ;;  %v2442_v15 = vpop.xlane.xlu1 %355 }
  0x98   :  { %3445 = vst [vmem:[#allocation78_spill] sm:$0xff] %v2438_v18  ;;  %v479_v19 = vsub.f32 %v1539_v31, %v2438_v18  ;;  %v481_v1 = vsub.f32 %v1549_v33, %v2442_v15 }
  0x9a   :  { %v543_v58 = vmul.f32 1.442695, %v479_v19  ;;  %v547_v46 = vmul.f32 1.442695, %v481_v1 }
  0x9b   :  { %v2446_v4 = vpop.xlane.xlu0 %353  ;;  %v2450_v29 = vpop.xlane.xlu1 %357 }
  0x9c   :  { %1189 = vpow2.f32 %v543_v58  ;;  %v480_v24 = vsub.f32 %v1556_v34, %v2446_v4  ;;  %3446 = vst [vmem:[#allocation79_spill] sm:$0xff] %v2450_v29  ;;  %v482_v6 = vsub.f32 %v1570_v39, %v2450_v29 }
  0x9d   :  { %1191 = vpow2.f32 %v547_v46 }
  0x9e   :  { %v545_v31 = vmul.f32 1.442695, %v480_v24  ;;  %v549_v18 = vmul.f32 1.442695, %v482_v6 }
  0x9f   :  { %v2454_v59 = vpop.xlane.xlu0 %359  ;;  %v2458_v1 = vpop.xlane.xlu1 %361 }
  0xa0   :  { %3447 = vst [vmem:[#allocation80_spill] sm:$0xff] %v2454_v59  ;;  %1193 = vpow2.f32 %v545_v31  ;;  %v483_v33 = vsub.f32 %v1587_v45, %v2454_v59  ;;  %v484_v34 = vsub.f32 %v1600_v49, %v2458_v1 }
  0xa1   :  { %1195 = vpow2.f32 %v549_v18 }
  0xa2   :  { %v551_v58 = vmul.f32 1.442695, %v483_v33  ;;  %v553_v19 = vmul.f32 1.442695, %v484_v34 }
  0xa3   :  { %v2462_v46 = vpop.xlane.xlu0 %363  ;;  %v2466_v39 = vpop.xlane.xlu1 %365 }
  0xa4   :  { %1197 = vpow2.f32 %v551_v58  ;;  %v485_v24 = vsub.f32 %v1623_v57, %v2462_v46  ;;  %3448 = vst [vmem:[#allocation81_spill] sm:$0xff] %v2466_v39  ;;  %v486_v45 = vsub.f32 %v1636_v61, %v2466_v39 }
  0xa5   :  { %1199 = vpow2.f32 %v553_v19 }
  0xa6   :  { %v1190_v6 = vpop.eup %1189  ;;  %v555_v31 = vmul.f32 1.442695, %v485_v24  ;;  %v557_v59 = vmul.f32 1.442695, %v486_v45 }
  0xa7   :  { %v1192_v18 = vpop.eup %1191  ;;  %v2470_v29 = vpop.xlane.xlu0 %367  ;;  %v671_v49 = vsel %vm286_vm0, %v1190_v6, 0.0 }
  0xa8   :  { %1201 = vpow2.f32 %v555_v31  ;;  %v487_v33 = vsub.f32 %v1656_v9, %v2470_v29  ;;  %735 = vadd.xlane.f32.xlu0 %v671_v49  ;;  %v2476_v57 = vpop.xlane.xlu1 %369  ;;  %v673_v34 = vsel %vm286_vm0, %v1192_v18, 0.0 }
  0xa9   :  { %1203 = vpow2.f32 %v557_v59  ;;  %v488_v61 = vsub.f32 %v1665_v11, %v2476_v57 }
  0xaa   :  { %v1194_v58 = vpop.eup %1193  ;;  %v559_v19 = vmul.f32 1.442695, %v487_v33 }
  0xab   :  { %v1196_v24 = vpop.eup %1195  ;;  %v561_v45 = vmul.f32 1.442695, %v488_v61  ;;  %v2482_v39 = vpop.xlane.xlu0 %371  ;;  %v672_v6 = vsel %vm286_vm0, %v1194_v58, 0.0 }
  0xac   :  { %1205 = vpow2.f32 %v559_v19  ;;  %v489_v9 = vsub.f32 %v1688_v25, %v2482_v39  ;;  %739 = vadd.xlane.f32.xlu0 %v673_v34  ;;  %737 = vadd.xlane.f32.xlu1 %v672_v6  ;;  %v2488_v59 = vpop.xlane.xlu1 %373  ;;  %v674_v31 = vsel %vm286_vm0, %v1196_v24, 0.0 }
  0xad   :  { %1207 = vpow2.f32 %v561_v45  ;;  %v490_v11 = vsub.f32 %v1709_v48, %v2488_v59 }
  0xae   :  { %v1198_v18 = vpop.eup %1197  ;;  %v563_v49 = vmul.f32 1.442695, %v489_v9 }
  0xaf   :  { %v1200_v33 = vpop.eup %1199  ;;  %v565_v61 = vmul.f32 1.442695, %v490_v11  ;;  %v2494_v58 = vpop.xlane.xlu0 %375  ;;  %v675_v25 = vsel %vm286_vm0, %v1198_v18, 0.0 }
  0xb0   :  { %1209 = vpow2.f32 %v563_v49  ;;  %v491_v34 = vsub.f32 %v1718_v55, %v2494_v58  ;;  %741 = vadd.xlane.f32.xlu1 %v674_v31  ;;  %743 = vadd.xlane.f32.xlu0 %v675_v25  ;;  %v2500_v19 = vpop.xlane.xlu1 %377  ;;  %v676_v24 = vsel %vm286_vm0, %v1200_v33, 0.0 }
  0xb1   :  { %1211 = vpow2.f32 %v565_v61  ;;  %v492_v48 = vsub.f32 %v1749_v17, %v2500_v19 }
  0xb2   :  { %v1202_v45 = vpop.eup %1201  ;;  %v567_v6 = vmul.f32 1.442695, %v491_v34 }
  0xb3   :  { %v1204_v9 = vpop.eup %1203  ;;  %v569_v11 = vmul.f32 1.442695, %v492_v48  ;;  %v2506_v18 = vpop.xlane.xlu0 %379  ;;  %v677_v55 = vsel %vm286_vm0, %v1202_v45, 0.0 }
  0xb4   :  { %3449 = vst [vmem:[#allocation82_spill] sm:$0xff] %v2506_v18  ;;  %1213 = vpow2.f32 %v567_v6  ;;  %v493_v31 = vsub.f32 %v1755_v37, %v2506_v18  ;;  %745 = vadd.xlane.f32.xlu1 %v676_v24  ;;  %747 = vadd.xlane.f32.xlu0 %v677_v55  ;;  %v2512_v49 = vpop.xlane.xlu1 %381  ;;  %v678_v33 = vsel %vm286_vm0, %v1204_v9, 0.0  ;;  %v3452_v24 = vld [vmem:[#allocation23_spill] sm:$0xff] }
  0xb5   :  { %3450 = vst [vmem:[#allocation83_spill] sm:$0xff] %v2512_v49  ;;  %1215 = vpow2.f32 %v569_v11  ;;  %v494_v17 = vsub.f32 %v1773_v0, %v2512_v49  ;;  %v3454_v0 = vld [vmem:[#allocation33_spill] sm:$0xff] }
  0xb6   :  { %v1206_v61 = vpop.eup %1205  ;;  %v571_v25 = vmul.f32 1.442695, %v493_v31 }
  0xb7   :  { %v1208_v34 = vpop.eup %1207  ;;  %v573_v48 = vmul.f32 1.442695, %v494_v17  ;;  %v2518_v45 = vpop.xlane.xlu0 %383  ;;  %v679_v37 = vsel %vm286_vm0, %v1206_v61, 0.0 }
  0xb8   :  { %3451 = vst [vmem:[#allocation84_spill] sm:$0xff] %v2518_v45  ;;  %1217 = vpow2.f32 %v571_v25  ;;  %v495_v6 = vsub.f32 %v3452_v24, %v2518_v45  ;;  %749 = vadd.xlane.f32.xlu1 %v678_v33  ;;  %751 = vadd.xlane.f32.xlu0 %v679_v37  ;;  %v2524_v11 = vpop.xlane.xlu1 %385  ;;  %v680_v55 = vsel %vm286_vm0, %v1208_v34, 0.0  ;;  %v3456_v33 = vld [vmem:[#allocation34_spill] sm:$0xff]  ;;  %v3458_v34 = vld [vmem:[#allocation35_spill] sm:$0xff] }
  0xb9   :  { %3453 = vst [vmem:[#allocation23_spill] sm:$0xff] %v2524_v11  ;;  %1219 = vpow2.f32 %v573_v48  ;;  %v496_v9 = vsub.f32 %v3454_v0, %v2524_v11 }
  0xba   :  { %v1210_v31 = vpop.eup %1209  ;;  %v575_v17 = vmul.f32 1.442695, %v495_v6 }
  0xbb   :  { %v1212_v49 = vpop.eup %1211  ;;  %v577_v18 = vmul.f32 1.442695, %v496_v9  ;;  %v2530_v61 = vpop.xlane.xlu0 %387  ;;  %v681_v25 = vsel %vm286_vm0, %v1210_v31, 0.0 }
  0xbc   :  { %3455 = vst [vmem:[#allocation33_spill] sm:$0xff] %v2530_v61  ;;  %1221 = vpow2.f32 %v575_v17  ;;  %v497_v37 = vsub.f32 %v3456_v33, %v2530_v61  ;;  %753 = vadd.xlane.f32.xlu1 %v680_v55  ;;  %755 = vadd.xlane.f32.xlu0 %v681_v25  ;;  %v2536_v48 = vpop.xlane.xlu1 %389  ;;  %v682_v6 = vsel %vm286_vm0, %v1212_v49, 0.0  ;;  %v3460_v55 = vld [vmem:[#allocation38_spill] sm:$0xff]  ;;  %v3462_v49 = vld [vmem:[#allocation47_spill] sm:$0xff] }
  0xbd   :  { %3457 = vst [vmem:[#allocation34_spill] sm:$0xff] %v2536_v48  ;;  %1223 = vpow2.f32 %v577_v18  ;;  %v498_v24 = vsub.f32 %v3458_v34, %v2536_v48 }
  0xbe   :  { %v1214_v0 = vpop.eup %1213  ;;  %v579_v9 = vmul.f32 1.442695, %v497_v37 }
  0xbf   :  { %v1216_v11 = vpop.eup %1215  ;;  %v581_v45 = vmul.f32 1.442695, %v498_v24  ;;  %v2542_v31 = vpop.xlane.xlu0 %391  ;;  %v683_v17 = vsel %vm286_vm0, %v1214_v0, 0.0 }
  0xc0   :  { %3459 = vst [vmem:[#allocation35_spill] sm:$0xff] %v2542_v31  ;;  %1225 = vpow2.f32 %v579_v9  ;;  %v499_v25 = vsub.f32 %v3460_v55, %v2542_v31  ;;  %757 = vadd.xlane.f32.xlu1 %v682_v6  ;;  %759 = vadd.xlane.f32.xlu0 %v683_v17  ;;  %v2548_v18 = vpop.xlane.xlu1 %393  ;;  %v684_v37 = vsel %vm286_vm0, %v1216_v11, 0.0  ;;  %v3464_v6 = vld [vmem:[#allocation48_spill] sm:$0xff] }
  0xc1   :  { %3461 = vst [vmem:[#allocation38_spill] sm:$0xff] %v2548_v18  ;;  %1227 = vpow2.f32 %v581_v45  ;;  %v500_v33 = vsub.f32 %v3462_v49, %v2548_v18  ;;  %v3466_v11 = vld [vmem:[#allocation52_spill] sm:$0xff] }
  0xc2   :  { %v1218_v34 = vpop.eup %1217  ;;  %v583_v24 = vmul.f32 1.442695, %v499_v25 }
  0xc3   :  { %v1220_v48 = vpop.eup %1219  ;;  %v585_v61 = vmul.f32 1.442695, %v500_v33  ;;  %v2554_v0 = vpop.xlane.xlu0 %395  ;;  %v685_v9 = vsel %vm286_vm0, %v1218_v34, 0.0 }
  0xc4   :  { %3463 = vst [vmem:[#allocation47_spill] sm:$0xff] %v2554_v0  ;;  %1229 = vpow2.f32 %v583_v24  ;;  %v501_v17 = vsub.f32 %v3464_v6, %v2554_v0  ;;  %761 = vadd.xlane.f32.xlu1 %v684_v37  ;;  %763 = vadd.xlane.f32.xlu0 %v685_v9  ;;  %v2560_v45 = vpop.xlane.xlu1 %397  ;;  %v686_v25 = vsel %vm286_vm0, %v1220_v48, 0.0  ;;  %v3467_v37 = vld [vmem:[#allocation57_spill] sm:$0xff]  ;;  %v3469_v48 = vld [vmem:[#allocation63_spill] sm:$0xff] }
  0xc5   :  { %3465 = vst [vmem:[#allocation48_spill] sm:$0xff] %v2560_v45  ;;  %1231 = vpow2.f32 %v585_v61  ;;  %v502_v55 = vsub.f32 %v3466_v11, %v2560_v45 }
  0xc6   :  { %v1222_v49 = vpop.eup %1221  ;;  %v587_v33 = vmul.f32 1.442695, %v501_v17 }
  0xc7   :  { %v1224_v18 = vpop.eup %1223  ;;  %v589_v31 = vmul.f32 1.442695, %v502_v55  ;;  %v2566_v34 = vpop.xlane.xlu0 %399  ;;  %v687_v24 = vsel %vm286_vm0, %v1222_v49, 0.0 }
  0xc8   :  { %1233 = vpow2.f32 %v587_v33  ;;  %v503_v9 = vsub.f32 %v3467_v37, %v2566_v34  ;;  %765 = vadd.xlane.f32.xlu1 %v686_v25  ;;  %767 = vadd.xlane.f32.xlu0 %v687_v24  ;;  %v2572_v61 = vpop.xlane.xlu1 %401  ;;  %v688_v17 = vsel %vm286_vm0, %v1224_v18, 0.0  ;;  %v3470_v18 = vld [vmem:[#allocation67_spill] sm:$0xff] }
  0xc9   :  { %3468 = vst [vmem:[#allocation52_spill] sm:$0xff] %v2572_v61  ;;  %1235 = vpow2.f32 %v589_v31  ;;  %v504_v6 = vsub.f32 %v3469_v48, %v2572_v61 }
  0xca   :  { %v1226_v11 = vpop.eup %1225  ;;  %v591_v55 = vmul.f32 1.442695, %v503_v9 }
  0xcb   :  { %v1228_v45 = vpop.eup %1227  ;;  %v593_v0 = vmul.f32 1.442695, %v504_v6  ;;  %v2578_v49 = vpop.xlane.xlu0 %403  ;;  %v689_v33 = vsel %vm286_vm0, %v1226_v11, 0.0 }
  0xcc   :  { %1237 = vpow2.f32 %v591_v55  ;;  %v505_v25 = vsub.f32 %v2101_v23, %v2578_v49  ;;  %769 = vadd.xlane.f32.xlu1 %v688_v17  ;;  %771 = vadd.xlane.f32.xlu0 %v689_v33  ;;  %v2584_v31 = vpop.xlane.xlu1 %405  ;;  %v690_v37 = vsel %vm286_vm0, %v1228_v45, 0.0 }
  0xcd   :  { %1239 = vpow2.f32 %v593_v0  ;;  %v506_v24 = vsub.f32 %v3470_v18, %v2584_v31 }
  0xce   :  { %v1230_v9 = vpop.eup %1229  ;;  %v595_v48 = vmul.f32 1.442695, %v505_v25 }
  0xcf   :  { %v1232_v6 = vpop.eup %1231  ;;  %v597_v61 = vmul.f32 1.442695, %v506_v24  ;;  %v2590_v11 = vpop.xlane.xlu0 %407  ;;  %v691_v23 = vsel %vm286_vm0, %v1230_v9, 0.0 }
  0xd0   :  { %1241 = vpow2.f32 %v595_v48  ;;  %v507_v17 = vsub.f32 %v2129_v40, %v2590_v11  ;;  %773 = vadd.xlane.f32.xlu1 %v690_v37  ;;  %775 = vadd.xlane.f32.xlu0 %v691_v23  ;;  %v2596_v0 = vpop.xlane.xlu1 %409  ;;  %v692_v55 = vsel %vm286_vm0, %v1232_v6, 0.0 }
  0xd1   :  { %1243 = vpow2.f32 %v597_v61  ;;  %v508_v45 = vsub.f32 %v2157_v62, %v2596_v0 }
  0xd2   :  { %v1234_v33 = vpop.eup %1233  ;;  %v599_v25 = vmul.f32 1.442695, %v507_v17 }
  0xd3   :  { %v1236_v18 = vpop.eup %1235  ;;  %v601_v24 = vmul.f32 1.442695, %v508_v45  ;;  %v2602_v9 = vpop.xlane.xlu0 %411  ;;  %v693_v40 = vsel %vm286_vm0, %v1234_v33, 0.0 }
  0xd4   :  { %1245 = vpow2.f32 %v599_v25  ;;  %v509_v37 = vsub.f32 %v2172_v28, %v2602_v9  ;;  %777 = vadd.xlane.f32.xlu1 %v692_v55  ;;  %779 = vadd.xlane.f32.xlu0 %v693_v40  ;;  %v2608_v61 = vpop.xlane.xlu1 %413  ;;  %v694_v48 = vsel %vm286_vm0, %v1236_v18, 0.0 }
  0xd5   :  { %1247 = vpow2.f32 %v601_v24  ;;  %v510_v62 = vsub.f32 %v2179_v44, %v2608_v61 }
  0xd6   :  { %v1238_v6 = vpop.eup %1237  ;;  %v603_v23 = vmul.f32 1.442695, %v509_v37 }
  0xd7   :  { %v1240_v17 = vpop.eup %1239  ;;  %v605_v45 = vmul.f32 1.442695, %v510_v62  ;;  %v2614_v33 = vpop.xlane.xlu0 %415  ;;  %v695_v28 = vsel %vm286_vm0, %v1238_v6, 0.0 }
  0xd8   :  { %1249 = vpow2.f32 %v603_v23  ;;  %v511_v55 = vsub.f32 %v2188_v20, %v2614_v33  ;;  %781 = vadd.xlane.f32.xlu1 %v694_v48  ;;  %783 = vadd.xlane.f32.xlu0 %v695_v28  ;;  %v2620_v25 = vpop.xlane.xlu1 %417  ;;  %v696_v18 = vsel %vm286_vm0, %v1240_v17, 0.0 }
  0xd9   :  { %1251 = vpow2.f32 %v605_v45  ;;  %v512_v44 = vsub.f32 %v2195_v53, %v2620_v25 }
  0xda   :  { %v1242_v24 = vpop.eup %1241  ;;  %v607_v40 = vmul.f32 1.442695, %v511_v55 }
  0xdb   :  { %v1244_v37 = vpop.eup %1243  ;;  %v609_v62 = vmul.f32 1.442695, %v512_v44  ;;  %v2626_v6 = vpop.xlane.xlu0 %419  ;;  %v697_v20 = vsel %vm286_vm0, %v1242_v24, 0.0 }
  0xdc   :  { %1253 = vpow2.f32 %v607_v40  ;;  %v513_v48 = vsub.f32 %v2204_v56, %v2626_v6  ;;  %785 = vadd.xlane.f32.xlu1 %v696_v18  ;;  %787 = vadd.xlane.f32.xlu0 %v697_v20  ;;  %v2632_v23 = vpop.xlane.xlu1 %421  ;;  %v698_v17 = vsel %vm286_vm0, %v1244_v37, 0.0 }
  0xdd   :  { %1255 = vpow2.f32 %v609_v62  ;;  %v514_v53 = vsub.f32 %v2211_v3, %v2632_v23 }
  0xde   :  { %v1246_v45 = vpop.eup %1245  ;;  %v611_v28 = vmul.f32 1.442695, %v513_v48 }
  0xdf   :  { %v1248_v55 = vpop.eup %1247  ;;  %v613_v44 = vmul.f32 1.442695, %v514_v53  ;;  %v2638_v24 = vpop.xlane.xlu0 %423  ;;  %v699_v56 = vsel %vm286_vm0, %v1246_v45, 0.0 }
  0xe0   :  { %1257 = vpow2.f32 %v611_v28  ;;  %v515_v18 = vsub.f32 %v2220_v36, %v2638_v24  ;;  %789 = vadd.xlane.f32.xlu1 %v698_v17  ;;  %791 = vadd.xlane.f32.xlu0 %v699_v56  ;;  %v2644_v40 = vpop.xlane.xlu1 %425  ;;  %v700_v37 = vsel %vm286_vm0, %v1248_v55, 0.0 }
  0xe1   :  { %1259 = vpow2.f32 %v613_v44  ;;  %v516_v3 = vsub.f32 %v2227_v2, %v2644_v40 }
  0xe2   :  { %v1250_v62 = vpop.eup %1249  ;;  %v615_v20 = vmul.f32 1.442695, %v515_v18 }
  0xe3   :  { %v1252_v48 = vpop.eup %1251  ;;  %v617_v53 = vmul.f32 1.442695, %v516_v3  ;;  %v2650_v45 = vpop.xlane.xlu0 %427  ;;  %v701_v36 = vsel %vm286_vm0, %v1250_v62, 0.0 }
  0xe4   :  { %1261 = vpow2.f32 %v615_v20  ;;  %v517_v17 = vsub.f32 %v2236_v14, %v2650_v45  ;;  %793 = vadd.xlane.f32.xlu1 %v700_v37  ;;  %795 = vadd.xlane.f32.xlu0 %v701_v36  ;;  %v2656_v28 = vpop.xlane.xlu1 %429  ;;  %v702_v55 = vsel %vm286_vm0, %v1252_v48, 0.0 }
  0xe5   :  { %1263 = vpow2.f32 %v617_v53  ;;  %v518_v2 = vsub.f32 %v2243_v27, %v2656_v28 }
  0xe6   :  { %v1254_v44 = vpop.eup %1253  ;;  %v619_v56 = vmul.f32 1.442695, %v517_v17 }
  0xe7   :  { %v1256_v18 = vpop.eup %1255  ;;  %v621_v3 = vmul.f32 1.442695, %v518_v2  ;;  %v2662_v62 = vpop.xlane.xlu0 %431  ;;  %v703_v14 = vsel %vm286_vm0, %v1254_v44, 0.0 }
  0xe8   :  { %1265 = vpow2.f32 %v619_v56  ;;  %v519_v37 = vsub.f32 %v2252_v22, %v2662_v62  ;;  %797 = vadd.xlane.f32.xlu1 %v702_v55  ;;  %799 = vadd.xlane.f32.xlu0 %v703_v14  ;;  %v2668_v20 = vpop.xlane.xlu1 %433  ;;  %v704_v48 = vsel %vm286_vm0, %v1256_v18, 0.0 }
  0xe9   :  { %1267 = vpow2.f32 %v621_v3  ;;  %v520_v27 = vsub.f32 %v2259_v38, %v2668_v20 }
  0xea   :  { %v1258_v53 = vpop.eup %1257  ;;  %v623_v36 = vmul.f32 1.442695, %v519_v37 }
  0xeb   :  { %v1260_v17 = vpop.eup %1259  ;;  %v625_v2 = vmul.f32 1.442695, %v520_v27  ;;  %v2674_v44 = vpop.xlane.xlu0 %435  ;;  %v705_v22 = vsel %vm286_vm0, %v1258_v53, 0.0 }
  0xec   :  { %1269 = vpow2.f32 %v623_v36  ;;  %v521_v55 = vsub.f32 %v2268_v42, %v2674_v44  ;;  %801 = vadd.xlane.f32.xlu1 %v704_v48  ;;  %803 = vadd.xlane.f32.xlu0 %v705_v22  ;;  %v2680_v56 = vpop.xlane.xlu1 %437  ;;  %v706_v18 = vsel %vm286_vm0, %v1260_v17, 0.0 }
  0xed   :  { %1271 = vpow2.f32 %v625_v2  ;;  %v522_v38 = vsub.f32 %v2275_v50, %v2680_v56 }
  0xee   :  { %v1262_v3 = vpop.eup %1261  ;;  %v627_v14 = vmul.f32 1.442695, %v521_v55 }
  0xef   :  { %v1264_v37 = vpop.eup %1263  ;;  %v629_v27 = vmul.f32 1.442695, %v522_v38  ;;  %v2686_v53 = vpop.xlane.xlu0 %439  ;;  %v707_v42 = vsel %vm286_vm0, %v1262_v3, 0.0 }
  0xf0   :  { %1273 = vpow2.f32 %v627_v14  ;;  %v523_v48 = vsub.f32 %v2284_v7, %v2686_v53  ;;  %805 = vadd.xlane.f32.xlu1 %v706_v18  ;;  %807 = vadd.xlane.f32.xlu0 %v707_v42  ;;  %v2692_v36 = vpop.xlane.xlu1 %441  ;;  %v708_v17 = vsel %vm286_vm0, %v1264_v37, 0.0 }
  0xf1   :  { %1275 = vpow2.f32 %v629_v27  ;;  %v524_v50 = vsub.f32 %v2291_v32, %v2692_v36 }
  0xf2   :  { %v1266_v2 = vpop.eup %1265  ;;  %v631_v22 = vmul.f32 1.442695, %v523_v48 }
  0xf3   :  { %v1268_v55 = vpop.eup %1267  ;;  %v633_v38 = vmul.f32 1.442695, %v524_v50  ;;  %v2698_v3 = vpop.xlane.xlu0 %443  ;;  %v709_v7 = vsel %vm286_vm0, %v1266_v2, 0.0 }
  0xf4   :  { %1277 = vpow2.f32 %v631_v22  ;;  %v525_v18 = vsub.f32 %v2300_v16, %v2698_v3  ;;  %809 = vadd.xlane.f32.xlu1 %v708_v17  ;;  %811 = vadd.xlane.f32.xlu0 %v709_v7  ;;  %v2704_v14 = vpop.xlane.xlu1 %445  ;;  %v710_v37 = vsel %vm286_vm0, %v1268_v55, 0.0 }
  0xf5   :  { %1279 = vpow2.f32 %v633_v38  ;;  %v526_v32 = vsub.f32 %v2307_v8, %v2704_v14 }
  0xf6   :  { %v1270_v27 = vpop.eup %1269  ;;  %v635_v42 = vmul.f32 1.442695, %v525_v18 }
  0xf7   :  { %v1272_v48 = vpop.eup %1271  ;;  %v637_v50 = vmul.f32 1.442695, %v526_v32  ;;  %v2710_v2 = vpop.xlane.xlu0 %447  ;;  %v711_v16 = vsel %vm286_vm0, %v1270_v27, 0.0 }
  0xf8   :  { %1281 = vpow2.f32 %v635_v42  ;;  %v527_v17 = vsub.f32 %v2316_v47, %v2710_v2  ;;  %813 = vadd.xlane.f32.xlu1 %v710_v37  ;;  %815 = vadd.xlane.f32.xlu0 %v711_v16  ;;  %v2716_v22 = vpop.xlane.xlu1 %449  ;;  %v712_v55 = vsel %vm286_vm0, %v1272_v48, 0.0 }
  0xf9   :  { %1283 = vpow2.f32 %v637_v50  ;;  %v528_v8 = vsub.f32 %v2323_v41, %v2716_v22 }
  0xfa   :  { %v1274_v38 = vpop.eup %1273  ;;  %v639_v7 = vmul.f32 1.442695, %v527_v17 }
  0xfb   :  { %v1276_v18 = vpop.eup %1275  ;;  %v641_v32 = vmul.f32 1.442695, %v528_v8  ;;  %v2722_v27 = vpop.xlane.xlu0 %451  ;;  %v713_v47 = vsel %vm286_vm0, %v1274_v38, 0.0 }
  0xfc   :  { %1285 = vpow2.f32 %v639_v7  ;;  %v529_v37 = vsub.f32 %v2332_v13, %v2722_v27  ;;  %817 = vadd.xlane.f32.xlu1 %v712_v55  ;;  %819 = vadd.xlane.f32.xlu0 %v713_v47  ;;  %v2728_v42 = vpop.xlane.xlu1 %453  ;;  %v714_v48 = vsel %vm286_vm0, %v1276_v18, 0.0 }
  0xfd   :  { %1287 = vpow2.f32 %v641_v32  ;;  %v530_v41 = vsub.f32 %v2339_v30, %v2728_v42 }
  0xfe   :  { %v1278_v50 = vpop.eup %1277  ;;  %v643_v16 = vmul.f32 1.442695, %v529_v37 }
  0xff   :  { %v1280_v17 = vpop.eup %1279  ;;  %v645_v8 = vmul.f32 1.442695, %v530_v41  ;;  %v2734_v38 = vpop.xlane.xlu0 %455  ;;  %v715_v13 = vsel %vm286_vm0, %v1278_v50, 0.0 }
 0x100   :  { %1289 = vpow2.f32 %v643_v16  ;;  %v531_v55 = vsub.f32 %v2348_v63, %v2734_v38  ;;  %821 = vadd.xlane.f32.xlu1 %v714_v48  ;;  %823 = vadd.xlane.f32.xlu0 %v715_v13  ;;  %v2740_v7 = vpop.xlane.xlu1 %457  ;;  %v716_v18 = vsel %vm286_vm0, %v1280_v17, 0.0 }
 0x101   :  { %1291 = vpow2.f32 %v645_v8  ;;  %v532_v30 = vsub.f32 %v2355_v26, %v2740_v7 }
 0x102   :  { %v1282_v32 = vpop.eup %1281  ;;  %v647_v47 = vmul.f32 1.442695, %v531_v55 }
 0x103   :  { %v1284_v37 = vpop.eup %1283  ;;  %v649_v41 = vmul.f32 1.442695, %v532_v30  ;;  %v2746_v50 = vpop.xlane.xlu0 %459  ;;  %v717_v63 = vsel %vm286_vm0, %v1282_v32, 0.0 }
 0x104   :  { %1293 = vpow2.f32 %v647_v47  ;;  %v533_v48 = vsub.f32 %v2364_v54, %v2746_v50  ;;  %825 = vadd.xlane.f32.xlu1 %v716_v18  ;;  %827 = vadd.xlane.f32.xlu0 %v717_v63  ;;  %v2752_v16 = vpop.xlane.xlu1 %461  ;;  %v718_v17 = vsel %vm286_vm0, %v1284_v37, 0.0 }
 0x105   :  { %1295 = vpow2.f32 %v649_v41  ;;  %v534_v26 = vsub.f32 %v2371_v51, %v2752_v16 }
 0x106   :  { %v1286_v8 = vpop.eup %1285  ;;  %v651_v13 = vmul.f32 1.442695, %v533_v48 }
 0x107   :  { %v1288_v55 = vpop.eup %1287  ;;  %v653_v30 = vmul.f32 1.442695, %v534_v26  ;;  %v2758_v32 = vpop.xlane.xlu0 %463  ;;  %v719_v54 = vsel %vm286_vm0, %v1286_v8, 0.0 }
 0x108   :  { %1297 = vpow2.f32 %v651_v13  ;;  %v535_v18 = vsub.f32 %v2380_v43, %v2758_v32  ;;  %829 = vadd.xlane.f32.xlu1 %v718_v17  ;;  %831 = vadd.xlane.f32.xlu0 %v719_v54  ;;  %v2764_v47 = vpop.xlane.xlu1 %465  ;;  %v720_v37 = vsel %vm286_vm0, %v1288_v55, 0.0 }
 0x109   :  { %1299 = vpow2.f32 %v653_v30  ;;  %v536_v51 = vsub.f32 %v2387_v12, %v2764_v47 }
 0x10a   :  { %v1290_v41 = vpop.eup %1289  ;;  %v655_v63 = vmul.f32 1.442695, %v535_v18 }
 0x10b   :  { %v1292_v48 = vpop.eup %1291  ;;  %v657_v26 = vmul.f32 1.442695, %v536_v51  ;;  %v2770_v8 = vpop.xlane.xlu0 %467  ;;  %v721_v43 = vsel %vm286_vm0, %v1290_v41, 0.0 }
 0x10c   :  { %1301 = vpow2.f32 %v655_v63  ;;  %v537_v17 = vsub.f32 %v2396_v10, %v2770_v8  ;;  %833 = vadd.xlane.f32.xlu1 %v720_v37  ;;  %835 = vadd.xlane.f32.xlu0 %v721_v43  ;;  %v2776_v13 = vpop.xlane.xlu1 %469  ;;  %v722_v55 = vsel %vm286_vm0, %v1292_v48, 0.0 }
 0x10d   :  { %1303 = vpow2.f32 %v657_v26  ;;  %v538_v12 = vsub.f32 %v2403_v21, %v2776_v13 }
 0x10e   :  { %v1294_v30 = vpop.eup %1293  ;;  %v659_v54 = vmul.f32 1.442695, %v537_v17 }
 0x10f   :  { %v1296_v18 = vpop.eup %1295  ;;  %v661_v51 = vmul.f32 1.442695, %v538_v12  ;;  %v2782_v41 = vpop.xlane.xlu0 %471  ;;  %v723_v10 = vsel %vm286_vm0, %v1294_v30, 0.0 }
 0x110   :  { %3471 = vst [vmem:[#allocation57_spill] sm:$0xff] %v2782_v41  ;;  %1305 = vpow2.f32 %v659_v54  ;;  %v539_v37 = vsub.f32 %v2412_v52, %v2782_v41  ;;  %837 = vadd.xlane.f32.xlu1 %v722_v55  ;;  %839 = vadd.xlane.f32.xlu0 %v723_v10  ;;  %v2788_v63 = vpop.xlane.xlu1 %473  ;;  %v724_v48 = vsel %vm286_vm0, %v1296_v18, 0.0 }
 0x111   :  { %3472 = vst [vmem:[#allocation63_spill] sm:$0xff] %v2788_v63  ;;  %1307 = vpow2.f32 %v661_v51  ;;  %v540_v21 = vsub.f32 %v2419_v35, %v2788_v63  ;;  %v3475_v35 = vld [vmem:[#allocation77_spill] sm:$0xff] }
 0x112   :  { %v1298_v26 = vpop.eup %1297  ;;  %v663_v43 = vmul.f32 1.442695, %v539_v37 }
 0x113   :  { %v1300_v17 = vpop.eup %1299  ;;  %v665_v12 = vmul.f32 1.442695, %v540_v21  ;;  %v2794_v30 = vpop.xlane.xlu0 %475  ;;  %v725_v52 = vsel %vm286_vm0, %v1298_v26, 0.0 }
 0x114   :  { %3473 = vst [vmem:[#allocation67_spill] sm:$0xff] %v2794_v30  ;;  %1309 = vpow2.f32 %v663_v43  ;;  %v541_v55 = vsub.f32 %v2428_v60, %v2794_v30  ;;  %841 = vadd.xlane.f32.xlu1 %v724_v48  ;;  %843 = vadd.xlane.f32.xlu0 %v725_v52  ;;  %v2800_v54 = vpop.xlane.xlu1 %477  ;;  %v726_v51 = vsel %vm286_vm0, %v1300_v17, 0.0 }
 0x115   :  { %3474 = vst [vmem:[#allocation85_spill] sm:$0xff] %v2800_v54  ;;  %1311 = vpow2.f32 %v665_v12  ;;  %v542_v18 = vsub.f32 %v3475_v35, %v2800_v54 }
 0x116   :  { %v1302_v10 = vpop.eup %1301  ;;  %v667_v37 = vmul.f32 1.442695, %v541_v55 }
 0x117   :  { %v1304_v21 = vpop.eup %1303  ;;  %v669_v63 = vmul.f32 1.442695, %v542_v18  ;;  %v727_v26 = vsel %vm286_vm0, %v1302_v10, 0.0 }
 0x118   :  { %1313 = vpow2.f32 %v667_v37  ;;  %845 = vadd.xlane.f32.xlu1 %v726_v51  ;;  %847 = vadd.xlane.f32.xlu0 %v727_v26  ;;  %v728_v60 = vsel %vm286_vm0, %v1304_v21, 0.0 }
 0x119   :  { %1315 = vpow2.f32 %v669_v63 }
 0x11a   :  { %v1306_v48 = vpop.eup %1305 }
 0x11b   :  { %v1308_v43 = vpop.eup %1307  ;;  %v729_v12 = vsel %vm286_vm0, %v1306_v48, 0.0 }
 0x11c   :  { %849 = vadd.xlane.f32.xlu1 %v728_v60  ;;  %851 = vadd.xlane.f32.xlu0 %v729_v12  ;;  %v730_v17 = vsel %vm286_vm0, %v1308_v43, 0.0 }
 0x11e   :  { %v1310_v52 = vpop.eup %1309 }
 0x11f   :  { %v1312_v55 = vpop.eup %1311  ;;  %v731_v35 = vsel %vm286_vm0, %v1310_v52, 0.0  ;;  %v3477_v52 = vld [vmem:[#allocation2_spill] sm:$0xff] }
 0x120   :  { %853 = vadd.xlane.f32.xlu1 %v730_v17  ;;  %855 = vadd.xlane.f32.xlu0 %v731_v35  ;;  %v732_v63 = vsel %vm286_vm0, %v1312_v55, 0.0  ;;  %v3476_v17 = vld [vmem:[#allocation78_spill] sm:$0xff]  ;;  %v3478_v55 = vmax.f32 %v3477_v52, 0.0 }
 0x122   :  { %v1314_v18 = vpop.eup %1313  ;;  %v863_v35 = vsub.f32 %v3478_v55, %v3476_v17 }
 0x123   :  { %v1316_v51 = vpop.eup %1315  ;;  %v733_v10 = vsel %vm286_vm0, %v1314_v18, 0.0 }
 0x124   :  { %857 = vadd.xlane.f32.xlu1 %v732_v63  ;;  %859 = vadd.xlane.f32.xlu0 %v733_v10  ;;  %v734_v37 = vsel %vm286_vm0, %v1316_v51, 0.0 }
 0x128   :  { %861 = vadd.xlane.f32.xlu1 %v734_v37 }
 0x135   :  { %v736_v21 = vpop.xlane.xlu0 %735 }
 0x136   :  { %1317 = vlog2.f32 %v736_v21  ;;  %v3479_v21 = vld [vmem:[#allocation4_spill] sm:$0xff] }
 0x139   :  { %v738_v26 = vpop.xlane.xlu1 %737  ;;  %v740_v60 = vpop.xlane.xlu0 %739 }
 0x13a   :  { %1319 = vlog2.f32 %v738_v26  ;;  %v3480_v26 = vmax.f32 %v3479_v21, 0.0  ;;  %v3483_v21 = vld [vmem:[#allocation79_spill] sm:$0xff] }
 0x13b   :  { %1321 = vlog2.f32 %v740_v60 }
 0x13c   :  { %v864_v60 = vsub.f32 %v3480_v26, %v2446_v4  ;;  %v3484_v4 = vld [vmem:[#allocation5_spill] sm:$0xff] }
 0x13d   :  { %v742_v48 = vpop.xlane.xlu1 %741  ;;  %v744_v43 = vpop.xlane.xlu0 %743  ;;  %v3485_v26 = vmax.f32 %v3484_v4, 0.0 }
 0x13e   :  { %1323 = vlog2.f32 %v742_v48 }
 0x13f   :  { %1325 = vlog2.f32 %v744_v43  ;;  %v866_v30 = vsub.f32 %v3485_v26, %v3483_v21 }
 0x140   :  { %v1318_v12 = vpop.eup %1317 }
 0x141   :  { %v928_v63 = vmul.f32 0.6931472, %v1318_v12  ;;  %v746_v18 = vpop.xlane.xlu1 %745  ;;  %v748_v5 = vpop.xlane.xlu0 %747  ;;  %v3481_v12 = vld [vmem:[#allocation3_spill] sm:$0xff] }
 0x142   :  { %1327 = vlog2.f32 %v746_v18  ;;  %v3482_v17 = vmax.f32 %v3481_v12, 0.0  ;;  %v3486_v12 = vld [vmem:[#allocation80_spill] sm:$0xff] }
 0x143   :  { %v1055_v51 = vsub.f32 %v863_v35, %v928_v63  ;;  %1329 = vlog2.f32 %v748_v5 }
 0x144   :  { %v1320_v10 = vpop.eup %1319  ;;  %v865_v55 = vsub.f32 %v3482_v17, %v2442_v15  ;;  %v3487_v15 = vld [vmem:[#allocation6_spill] sm:$0xff] }
 0x145   :  { %v1322_v37 = vpop.eup %1321  ;;  %1119 = vst [vmem:[%s3209_s3] sm:$0xff] %v1055_v51  ;;  %v930_v48 = vmul.f32 0.6931472, %v1320_v10  ;;  %v750_v43 = vpop.xlane.xlu1 %749 }
 0x146   :  { %v752_v52 = vpop.xlane.xlu0 %751  ;;  %v932_v18 = vmul.f32 0.6931472, %v1322_v37  ;;  %1331 = vlog2.f32 %v750_v43  ;;  %v3488_v37 = vmax.f32 %v3487_v15, 0.0  ;;  %v3493_v15 = vld [vmem:[#allocation81_spill] sm:$0xff] }
 0x147   :  { %v1056_v35 = vsub.f32 %v864_v60, %v930_v48  ;;  %1333 = vlog2.f32 %v752_v52 }
 0x148   :  { %v1324_v63 = vpop.eup %1323  ;;  %v1057_v5 = vsub.f32 %v865_v55, %v932_v18  ;;  %v867_v43 = vsub.f32 %v3488_v37, %v3486_v12  ;;  %v3489_v18 = vld [vmem:[#allocation7_spill] sm:$0xff]  ;;  %v3494_v37 = vld [vmem:[#allocation9_spill] sm:$0xff] }
 0x149   :  { %v1326_v54 = vpop.eup %1325  ;;  %1120 = vst [vmem:[%s3209_s3 + $0x8] sm:$0xff] %v1056_v35  ;;  %v934_v51 = vmul.f32 0.6931472, %v1324_v63  ;;  %v754_v10 = vpop.xlane.xlu1 %753  ;;  %v3490_v35 = vmax.f32 %v3489_v18, 0.0 }
 0x14a   :  { %v756_v41 = vpop.xlane.xlu0 %755  ;;  %1121 = vst [vmem:[%s3209_s3 + $0x10] sm:$0xff] %v1057_v5  ;;  %v936_v60 = vmul.f32 0.6931472, %v1326_v54  ;;  %1335 = vlog2.f32 %v754_v10  ;;  %v3491_v5 = vld [vmem:[#allocation8_spill] sm:$0xff] }
 0x14b   :  { %v1058_v48 = vsub.f32 %v866_v30, %v934_v51  ;;  %1337 = vlog2.f32 %v756_v41  ;;  %v868_v63 = vsub.f32 %v3490_v35, %v2458_v1  ;;  %v3492_v54 = vmax.f32 %v3491_v5, 0.0  ;;  %v3498_v5 = vld [vmem:[#allocation11_spill] sm:$0xff] }
 0x14c   :  { %v1328_v52 = vpop.eup %1327  ;;  %v1059_v17 = vsub.f32 %v867_v43, %v936_v60  ;;  %v3495_v43 = vmax.f32 %v3494_v37, 0.0 }
 0x14d   :  { %v1330_v55 = vpop.eup %1329  ;;  %1122 = vst [vmem:[%s3209_s3 + $0x18] sm:$0xff] %v1058_v48  ;;  %v938_v21 = vmul.f32 0.6931472, %v1328_v52  ;;  %v758_v4 = vpop.xlane.xlu1 %757  ;;  %v869_v10 = vsub.f32 %v3492_v54, %v2462_v46  ;;  %v3499_v54 = vmax.f32 %v3498_v5, 0.0 }
 0x14e   :  { %v760_v26 = vpop.xlane.xlu0 %759  ;;  %1123 = vst [vmem:[%s3209_s3 + $0x20] sm:$0xff] %v1059_v17  ;;  %v940_v41 = vmul.f32 0.6931472, %v1330_v55  ;;  %1339 = vlog2.f32 %v758_v4  ;;  %v870_v60 = vsub.f32 %v3495_v43, %v3493_v15  ;;  %v3496_v17 = vld [vmem:[#allocation10_spill] sm:$0xff] }
 0x14f   :  { %v1060_v30 = vsub.f32 %v868_v63, %v938_v21  ;;  %1341 = vlog2.f32 %v760_v26  ;;  %v3497_v55 = vmax.f32 %v3496_v17, 0.0 }
 0x150   :  { %v1332_v1 = vpop.eup %1331  ;;  %v1061_v51 = vsub.f32 %v869_v10, %v940_v41  ;;  %v872_v10 = vsub.f32 %v3499_v54, %v2476_v57  ;;  %v3506_v54 = vld [vmem:[#allocation15_spill] sm:$0xff] }
 0x151   :  { %v1334_v12 = vpop.eup %1333  ;;  %1124 = vst [vmem:[%s3209_s3 + $0x28] sm:$0xff] %v1060_v30  ;;  %v942_v46 = vmul.f32 0.6931472, %v1332_v1  ;;  %v762_v48 = vpop.xlane.xlu1 %761  ;;  %v871_v18 = vsub.f32 %v3497_v55, %v2470_v29  ;;  %v3500_v1 = vld [vmem:[#allocation12_spill] sm:$0xff] }
 0x152   :  { %v764_v52 = vpop.xlane.xlu0 %763  ;;  %1125 = vst [vmem:[%s3209_s3 + $0x30] sm:$0xff] %v1061_v51  ;;  %v944_v35 = vmul.f32 0.6931472, %v1334_v12  ;;  %1343 = vlog2.f32 %v762_v48  ;;  %v3501_v51 = vmax.f32 %v3500_v1, 0.0  ;;  %v3508_v1 = vld [vmem:[#allocation82_spill] sm:$0xff] }
 0x153   :  { %v1062_v63 = vsub.f32 %v870_v60, %v942_v46  ;;  %1345 = vlog2.f32 %v764_v52  ;;  %v3502_v46 = vld [vmem:[#allocation13_spill] sm:$0xff] }
 0x154   :  { %v1336_v21 = vpop.eup %1335  ;;  %v1063_v4 = vsub.f32 %v871_v18, %v944_v35  ;;  %v873_v12 = vsub.f32 %v3501_v51, %v2482_v39  ;;  %v3503_v48 = vmax.f32 %v3502_v46, 0.0  ;;  %v3504_v18 = vld [vmem:[#allocation14_spill] sm:$0xff]  ;;  %v3509_v51 = vld [vmem:[#allocation16_spill] sm:$0xff]  ;;  %v3511_v46 = vld [vmem:[#allocation83_spill] sm:$0xff] }
 0x155   :  { %v1338_v26 = vpop.eup %1337  ;;  %1126 = vst [vmem:[%s3209_s3 + $0x38] sm:$0xff] %v1062_v63  ;;  %v946_v29 = vmul.f32 0.6931472, %v1336_v21  ;;  %v766_v41 = vpop.xlane.xlu1 %765  ;;  %v3505_v35 = vmax.f32 %v3504_v18, 0.0 }
 0x156   :  { %v768_v30 = vpop.xlane.xlu0 %767  ;;  %1127 = vst [vmem:[%s3209_s3 + $0x40] sm:$0xff] %v1063_v4  ;;  %v948_v15 = vmul.f32 0.6931472, %v1338_v26  ;;  %1347 = vlog2.f32 %v766_v41  ;;  %v874_v52 = vsub.f32 %v3503_v48, %v2488_v59  ;;  %v3512_v48 = vld [vmem:[#allocation17_spill] sm:$0xff] }
 0x157   :  { %v1064_v37 = vsub.f32 %v872_v10, %v946_v29  ;;  %1349 = vlog2.f32 %v768_v30  ;;  %v875_v63 = vsub.f32 %v3505_v35, %v2494_v58  ;;  %v3507_v10 = vmax.f32 %v3506_v54, 0.0  ;;  %v3514_v35 = vld [vmem:[#allocation84_spill] sm:$0xff] }
 0x158   :  { %v1340_v57 = vpop.eup %1339  ;;  %v1065_v43 = vsub.f32 %v873_v12, %v948_v15  ;;  %v3510_v12 = vmax.f32 %v3509_v51, 0.0 }
 0x159   :  { %v1342_v60 = vpop.eup %1341  ;;  %1128 = vst [vmem:[%s3209_s3 + $0x48] sm:$0xff] %v1064_v37  ;;  %v950_v39 = vmul.f32 0.6931472, %v1340_v57  ;;  %v770_v17 = vpop.xlane.xlu1 %769  ;;  %v876_v29 = vsub.f32 %v3507_v10, %v2500_v19 }
 0x15a   :  { %v772_v55 = vpop.xlane.xlu0 %771  ;;  %1129 = vst [vmem:[%s3209_s3 + $0x50] sm:$0xff] %v1065_v43  ;;  %v952_v21 = vmul.f32 0.6931472, %v1342_v60  ;;  %1351 = vlog2.f32 %v770_v17  ;;  %v877_v15 = vsub.f32 %v3510_v12, %v3508_v1 }
 0x15b   :  { %v1066_v4 = vsub.f32 %v874_v52, %v950_v39  ;;  %1353 = vlog2.f32 %v772_v55  ;;  %v3513_v52 = vmax.f32 %v3512_v48, 0.0 }
 0x15c   :  { %v1344_v59 = vpop.eup %1343  ;;  %v1067_v26 = vsub.f32 %v875_v63, %v952_v21  ;;  %v3515_v63 = vld [vmem:[#allocation18_spill] sm:$0xff] }
 0x15d   :  { %v1346_v5 = vpop.eup %1345  ;;  %1130 = vst [vmem:[%s3209_s3 + $0x58] sm:$0xff] %v1066_v4  ;;  %v954_v58 = vmul.f32 0.6931472, %v1344_v59  ;;  %v774_v41 = vpop.xlane.xlu1 %773  ;;  %v878_v39 = vsub.f32 %v3513_v52, %v3511_v46  ;;  %v3516_v21 = vmax.f32 %v3515_v63, 0.0 }
 0x15e   :  { %v776_v30 = vpop.xlane.xlu0 %775  ;;  %1131 = vst [vmem:[%s3209_s3 + $0x60] sm:$0xff] %v1067_v26  ;;  %v956_v37 = vmul.f32 0.6931472, %v1346_v5  ;;  %1355 = vlog2.f32 %v774_v41 }
 0x15f   :  { %v1068_v57 = vsub.f32 %v876_v29, %v954_v58  ;;  %1357 = vlog2.f32 %v776_v30  ;;  %v879_v4 = vsub.f32 %v3516_v21, %v3514_v35  ;;  %v3517_v29 = vld [vmem:[#allocation23_spill] sm:$0xff] }
 0x160   :  { %v1348_v19 = vpop.eup %1347  ;;  %v1069_v43 = vsub.f32 %v877_v15, %v956_v37  ;;  %v3518_v58 = vld [vmem:[#allocation19_spill] sm:$0xff]  ;;  %v3520_v15 = vld [vmem:[#allocation33_spill] sm:$0xff]  ;;  %v3521_v37 = vld [vmem:[#allocation20_spill] sm:$0xff] }
 0x161   :  { %v1350_v60 = vpop.eup %1349  ;;  %1132 = vst [vmem:[%s3209_s3 + $0x68] sm:$0xff] %v1068_v57  ;;  %v958_v17 = vmul.f32 0.6931472, %v1348_v19  ;;  %v778_v55 = vpop.xlane.xlu1 %777  ;;  %v3519_v41 = vmax.f32 %v3518_v58, 0.0  ;;  %v3522_v57 = vmax.f32 %v3521_v37, 0.0 }
 0x162   :  { %v780_v18 = vpop.xlane.xlu0 %779  ;;  %1133 = vst [vmem:[%s3209_s3 + $0x70] sm:$0xff] %v1069_v43  ;;  %v960_v59 = vmul.f32 0.6931472, %v1350_v60  ;;  %1359 = vlog2.f32 %v778_v55 }
 0x163   :  { %v1070_v26 = vsub.f32 %v878_v39, %v958_v17  ;;  %1361 = vlog2.f32 %v780_v18  ;;  %v880_v30 = vsub.f32 %v3519_v41, %v3517_v29  ;;  %v881_v19 = vsub.f32 %v3522_v57, %v3520_v15  ;;  %v3523_v39 = vld [vmem:[#allocation34_spill] sm:$0xff]  ;;  %v3524_v17 = vld [vmem:[#allocation21_spill] sm:$0xff] }
 0x164   :  { %v1352_v5 = vpop.eup %1351  ;;  %v1071_v54 = vsub.f32 %v879_v4, %v960_v59  ;;  %v3525_v55 = vmax.f32 %v3524_v17, 0.0  ;;  %v3526_v4 = vld [vmem:[#allocation35_spill] sm:$0xff]  ;;  %v3527_v59 = vld [vmem:[#allocation22_spill] sm:$0xff] }
 0x165   :  { %v1354_v10 = vpop.eup %1353  ;;  %1134 = vst [vmem:[%s3209_s3 + $0x78] sm:$0xff] %v1070_v26  ;;  %v962_v1 = vmul.f32 0.6931472, %v1352_v5  ;;  %v782_v51 = vpop.xlane.xlu1 %781  ;;  %v3528_v26 = vmax.f32 %v3527_v59, 0.0 }
 0x166   :  { %v784_v12 = vpop.xlane.xlu0 %783  ;;  %1135 = vst [vmem:[%s3209_s3 + $0x80] sm:$0xff] %v1071_v54  ;;  %v964_v43 = vmul.f32 0.6931472, %v1354_v10  ;;  %1363 = vlog2.f32 %v782_v51  ;;  %v882_v18 = vsub.f32 %v3525_v55, %v3523_v39 }
 0x167   :  { %v1072_v60 = vsub.f32 %v880_v30, %v962_v1  ;;  %1365 = vlog2.f32 %v784_v12  ;;  %v883_v5 = vsub.f32 %v3528_v26, %v3526_v4  ;;  %v3529_v30 = vld [vmem:[#allocation38_spill] sm:$0xff]  ;;  %v3530_v1 = vld [vmem:[#allocation24_spill] sm:$0xff] }
 0x168   :  { %v1356_v46 = vpop.eup %1355  ;;  %v1073_v48 = vsub.f32 %v881_v19, %v964_v43  ;;  %v3531_v51 = vmax.f32 %v3530_v1, 0.0  ;;  %v3532_v19 = vld [vmem:[#allocation47_spill] sm:$0xff]  ;;  %v3533_v43 = vld [vmem:[#allocation26_spill] sm:$0xff] }
 0x169   :  { %v1358_v52 = vpop.eup %1357  ;;  %1136 = vst [vmem:[%s3209_s3 + $0x88] sm:$0xff] %v1072_v60  ;;  %v966_v35 = vmul.f32 0.6931472, %v1356_v46  ;;  %v786_v63 = vpop.xlane.xlu1 %785  ;;  %v3534_v60 = vmax.f32 %v3533_v43, 0.0  ;;  %v3543_v43 = vld [vmem:[#allocation49_spill] sm:$0xff] }
 0x16a   :  { %v788_v21 = vpop.xlane.xlu0 %787  ;;  %1137 = vst [vmem:[%s3209_s3 + $0x90] sm:$0xff] %v1073_v48  ;;  %v968_v54 = vmul.f32 0.6931472, %v1358_v52  ;;  %1367 = vlog2.f32 %v786_v63  ;;  %v884_v12 = vsub.f32 %v3531_v51, %v3529_v30  ;;  %v3540_v51 = vld [vmem:[#allocation52_spill] sm:$0xff] }
 0x16b   :  { %v1074_v10 = vsub.f32 %v882_v18, %v966_v35  ;;  %1369 = vlog2.f32 %v788_v21  ;;  %v885_v46 = vsub.f32 %v3534_v60, %v3532_v19  ;;  %v3535_v18 = vld [vmem:[#allocation48_spill] sm:$0xff]  ;;  %v3536_v35 = vld [vmem:[#allocation27_spill] sm:$0xff]  ;;  %v3544_v60 = vmax.f32 %v3543_v43, 0.0 }
 0x16c   :  { %v1360_v29 = vpop.eup %1359  ;;  %v1075_v58 = vsub.f32 %v883_v5, %v968_v54  ;;  %v3537_v63 = vmax.f32 %v3536_v35, 0.0  ;;  %v3538_v5 = vld [vmem:[#allocation39_spill] sm:$0xff] }
 0x16d   :  { %v1362_v41 = vpop.eup %1361  ;;  %1138 = vst [vmem:[%s3209_s3 + $0x98] sm:$0xff] %v1074_v10  ;;  %v970_v15 = vmul.f32 0.6931472, %v1360_v29  ;;  %v790_v37 = vpop.xlane.xlu1 %789  ;;  %v3539_v54 = vmax.f32 %v3538_v5, 0.0 }
 0x16e   :  { %v792_v57 = vpop.xlane.xlu0 %791  ;;  %1139 = vst [vmem:[%s3209_s3 + $0xa0] sm:$0xff] %v1075_v58  ;;  %v972_v48 = vmul.f32 0.6931472, %v1362_v41  ;;  %1371 = vlog2.f32 %v790_v37  ;;  %v886_v21 = vsub.f32 %v3537_v63, %v3535_v18  ;;  %v3545_v18 = vld [vmem:[#allocation53_spill] sm:$0xff] }
 0x16f   :  { %v1076_v52 = vsub.f32 %v884_v12, %v970_v15  ;;  %1373 = vlog2.f32 %v792_v57  ;;  %v887_v10 = vsub.f32 %v3539_v54, %v2566_v34  ;;  %v3541_v12 = vld [vmem:[#allocation41_spill] sm:$0xff]  ;;  %v3546_v35 = vmax.f32 %v3545_v18, 0.0 }
 0x170   :  { %v1364_v39 = vpop.eup %1363  ;;  %v1077_v17 = vsub.f32 %v885_v46, %v972_v48  ;;  %v3542_v15 = vmax.f32 %v3541_v12, 0.0  ;;  %v889_v46 = vsub.f32 %v3544_v60, %v2578_v49 }
 0x171   :  { %v1366_v55 = vpop.eup %1365  ;;  %1140 = vst [vmem:[%s3209_s3 + $0xa8] sm:$0xff] %v1076_v52  ;;  %v974_v4 = vmul.f32 0.6931472, %v1364_v39  ;;  %v794_v59 = vpop.xlane.xlu1 %793  ;;  %v890_v63 = vsub.f32 %v3546_v35, %v2584_v31 }
 0x172   :  { %v796_v26 = vpop.xlane.xlu0 %795  ;;  %1141 = vst [vmem:[%s3209_s3 + $0xb0] sm:$0xff] %v1077_v17  ;;  %v976_v29 = vmul.f32 0.6931472, %v1366_v55  ;;  %1375 = vlog2.f32 %v794_v59  ;;  %v888_v37 = vsub.f32 %v3542_v15, %v3540_v51  ;;  %v3547_v59 = vld [vmem:[#allocation54_spill] sm:$0xff] }
 0x173   :  { %v1078_v58 = vsub.f32 %v886_v21, %v974_v4  ;;  %1377 = vlog2.f32 %v796_v26  ;;  %v3548_v26 = vmax.f32 %v3547_v59, 0.0  ;;  %v3551_v15 = vld [vmem:[#allocation66_spill] sm:$0xff]  ;;  %v3557_v59 = vld [vmem:[#allocation28_spill] sm:$0xff] }
 0x174   :  { %v1368_v41 = vpop.eup %1367  ;;  %v1079_v30 = vsub.f32 %v887_v10, %v976_v29 }
 0x175   :  { %v1370_v1 = vpop.eup %1369  ;;  %1142 = vst [vmem:[%s3209_s3 + $0xb8] sm:$0xff] %v1078_v58  ;;  %v978_v34 = vmul.f32 0.6931472, %v1368_v41  ;;  %v798_v57 = vpop.xlane.xlu1 %797  ;;  %v891_v5 = vsub.f32 %v3548_v26, %v2590_v11  ;;  %v3549_v41 = vld [vmem:[#allocation55_spill] sm:$0xff]  ;;  %v3558_v26 = vmax.f32 %v3557_v59, 0.0  ;;  %v3569_v59 = vld [vmem:[#allocation37_spill] sm:$0xff] }
 0x176   :  { %v800_v19 = vpop.xlane.xlu0 %799  ;;  %1143 = vst [vmem:[%s3209_s3 + $0xc0] sm:$0xff] %v1079_v30  ;;  %v980_v48 = vmul.f32 0.6931472, %v1370_v1  ;;  %1379 = vlog2.f32 %v798_v57  ;;  %v3550_v30 = vmax.f32 %v3549_v41, 0.0 }
 0x177   :  { %v1080_v52 = vsub.f32 %v888_v37, %v978_v34  ;;  %1381 = vlog2.f32 %v800_v19  ;;  %v3552_v37 = vmax.f32 %v3551_v15, 0.0 }
 0x178   :  { %v1372_v39 = vpop.eup %1371  ;;  %v1081_v17 = vsub.f32 %v889_v46, %v980_v48  ;;  %v892_v1 = vsub.f32 %v3550_v30, %v2596_v0  ;;  %v3553_v46 = vld [vmem:[#allocation68_spill] sm:$0xff] }
 0x179   :  { %v1374_v55 = vpop.eup %1373  ;;  %1144 = vst [vmem:[%s3209_s3 + $0xc8] sm:$0xff] %v1080_v52  ;;  %v982_v49 = vmul.f32 0.6931472, %v1372_v39  ;;  %v802_v21 = vpop.xlane.xlu1 %801  ;;  %v893_v34 = vsub.f32 %v3552_v37, %v2602_v9  ;;  %v3554_v48 = vmax.f32 %v3553_v46, 0.0 }
 0x17a   :  { %v804_v4 = vpop.xlane.xlu0 %803  ;;  %1145 = vst [vmem:[%s3209_s3 + $0xd0] sm:$0xff] %v1081_v17  ;;  %v984_v54 = vmul.f32 0.6931472, %v1374_v55  ;;  %1383 = vlog2.f32 %v802_v21  ;;  %v3555_v55 = vld [vmem:[#allocation25_spill] sm:$0xff] }
 0x17b   :  { %v1082_v10 = vsub.f32 %v890_v63, %v982_v49  ;;  %1385 = vlog2.f32 %v804_v4  ;;  %v894_v52 = vsub.f32 %v3554_v48, %v2608_v61  ;;  %v3556_v18 = vmax.f32 %v3555_v55, 0.0 }
 0x17c   :  { %v1376_v31 = vpop.eup %1375  ;;  %v1083_v29 = vsub.f32 %v891_v5, %v984_v54  ;;  %v896_v5 = vsub.f32 %v3558_v26, %v2620_v25  ;;  %v3570_v26 = vmax.f32 %v3569_v59, 0.0 }
 0x17d   :  { %v1378_v58 = vpop.eup %1377  ;;  %1146 = vst [vmem:[%s3209_s3 + $0xd8] sm:$0xff] %v1082_v10  ;;  %v986_v11 = vmul.f32 0.6931472, %v1376_v31  ;;  %v806_v51 = vpop.xlane.xlu1 %805  ;;  %v895_v35 = vsub.f32 %v3556_v18, %v2614_v33  ;;  %v3559_v31 = vld [vmem:[#allocation29_spill] sm:$0xff]  ;;  %v3567_v18 = vld [vmem:[#allocation36_spill] sm:$0xff] }
 0x17e   :  { %v808_v12 = vpop.xlane.xlu0 %807  ;;  %1147 = vst [vmem:[%s3209_s3 + $0xe0] sm:$0xff] %v1083_v29  ;;  %v988_v57 = vmul.f32 0.6931472, %v1378_v58  ;;  %1387 = vlog2.f32 %v806_v51  ;;  %v3560_v29 = vmax.f32 %v3559_v31, 0.0  ;;  %v3561_v51 = vld [vmem:[#allocation30_spill] sm:$0xff] }
 0x17f   :  { %v1084_v19 = vsub.f32 %v892_v1, %v986_v11  ;;  %1389 = vlog2.f32 %v808_v12  ;;  %v3562_v12 = vmax.f32 %v3561_v51, 0.0 }
 0x180   :  { %v1380_v0 = vpop.eup %1379  ;;  %v1085_v43 = vsub.f32 %v893_v34, %v988_v57  ;;  %v897_v58 = vsub.f32 %v3560_v29, %v2626_v6  ;;  %v3563_v57 = vld [vmem:[#allocation31_spill] sm:$0xff] }
 0x181   :  { %v1382_v60 = vpop.eup %1381  ;;  %1148 = vst [vmem:[%s3209_s3 + $0xe8] sm:$0xff] %v1084_v19  ;;  %v990_v9 = vmul.f32 0.6931472, %v1380_v0  ;;  %v810_v39 = vpop.xlane.xlu1 %809  ;;  %v898_v15 = vsub.f32 %v3562_v12, %v2632_v23  ;;  %v3564_v19 = vmax.f32 %v3563_v57, 0.0 }
 0x182   :  { %v812_v17 = vpop.xlane.xlu0 %811  ;;  %1149 = vst [vmem:[%s3209_s3 + $0xf0] sm:$0xff] %v1085_v43  ;;  %v992_v63 = vmul.f32 0.6931472, %v1382_v60  ;;  %1391 = vlog2.f32 %v810_v39 }
 0x183   :  { %v1086_v49 = vsub.f32 %v894_v52, %v990_v9  ;;  %1393 = vlog2.f32 %v812_v17  ;;  %v899_v0 = vsub.f32 %v3564_v19, %v2638_v24  ;;  %v3565_v52 = vld [vmem:[#allocation32_spill] sm:$0xff] }
 0x184   :  { %v1384_v61 = vpop.eup %1383  ;;  %v1087_v21 = vsub.f32 %v895_v35, %v992_v63  ;;  %v3566_v9 = vmax.f32 %v3565_v52, 0.0  ;;  %v3568_v35 = vmax.f32 %v3567_v18, 0.0 }
 0x185   :  { %v1386_v4 = vpop.eup %1385  ;;  %1150 = vst [vmem:[%s3209_s3 + $0xf8] sm:$0xff] %v1086_v49  ;;  %v994_v33 = vmul.f32 0.6931472, %v1384_v61  ;;  %v814_v54 = vpop.xlane.xlu1 %813 }
 0x186   :  { %v816_v10 = vpop.xlane.xlu0 %815  ;;  %1151 = vst [vmem:[%s3209_s3 + $0x100] sm:$0xff] %v1087_v21  ;;  %v996_v41 = vmul.f32 0.6931472, %v1386_v4  ;;  %1395 = vlog2.f32 %v814_v54  ;;  %v900_v39 = vsub.f32 %v3566_v9, %v2644_v40  ;;  %v901_v63 = vsub.f32 %v3568_v35, %v2650_v45  ;;  %v3579_v9 = vld [vmem:[#allocation45_spill] sm:$0xff] }
 0x187   :  { %v1088_v30 = vsub.f32 %v896_v5, %v994_v33  ;;  %1397 = vlog2.f32 %v816_v10  ;;  %v902_v5 = vsub.f32 %v3570_v26, %v2656_v28  ;;  %v3571_v10 = vld [vmem:[#allocation40_spill] sm:$0xff] }
 0x188   :  { %v1388_v25 = vpop.eup %1387  ;;  %v1089_v1 = vsub.f32 %v897_v58, %v996_v41  ;;  %v3572_v31 = vmax.f32 %v3571_v10, 0.0  ;;  %v3585_v10 = vld [vmem:[#allocation51_spill] sm:$0xff] }
 0x189   :  { %v1390_v11 = vpop.eup %1389  ;;  %1152 = vst [vmem:[%s3209_s3 + $0x108] sm:$0xff] %v1088_v30  ;;  %v998_v6 = vmul.f32 0.6931472, %v1388_v25  ;;  %v818_v37 = vpop.xlane.xlu1 %817 }
 0x18a   :  { %v820_v34 = vpop.xlane.xlu0 %819  ;;  %1153 = vst [vmem:[%s3209_s3 + $0x110] sm:$0xff] %v1089_v1  ;;  %v1000_v43 = vmul.f32 0.6931472, %v1390_v11  ;;  %1399 = vlog2.f32 %v818_v37  ;;  %v903_v29 = vsub.f32 %v3572_v31, %v2662_v62  ;;  %v3573_v1 = vld [vmem:[#allocation42_spill] sm:$0xff]  ;;  %v3586_v31 = vmax.f32 %v3585_v10, 0.0 }
 0x18b   :  { %v1090_v60 = vsub.f32 %v898_v15, %v998_v6  ;;  %1401 = vlog2.f32 %v820_v34  ;;  %v3574_v11 = vmax.f32 %v3573_v1, 0.0  ;;  %v3575_v6 = vld [vmem:[#allocation43_spill] sm:$0xff] }
 0x18c   :  { %v1392_v23 = vpop.eup %1391  ;;  %v1091_v46 = vsub.f32 %v899_v0, %v1000_v43  ;;  %v3576_v37 = vmax.f32 %v3575_v6, 0.0 }
 0x18d   :  { %v1394_v48 = vpop.eup %1393  ;;  %1154 = vst [vmem:[%s3209_s3 + $0x118] sm:$0xff] %v1090_v60  ;;  %v1002_v24 = vmul.f32 0.6931472, %v1392_v23  ;;  %v822_v17 = vpop.xlane.xlu1 %821  ;;  %v904_v51 = vsub.f32 %v3574_v11, %v2668_v20  ;;  %v3577_v60 = vld [vmem:[#allocation44_spill] sm:$0xff] }
 0x18e   :  { %v824_v55 = vpop.xlane.xlu0 %823  ;;  %1155 = vst [vmem:[%s3209_s3 + $0x120] sm:$0xff] %v1091_v46  ;;  %v1004_v49 = vmul.f32 0.6931472, %v1394_v48  ;;  %1403 = vlog2.f32 %v822_v17  ;;  %v905_v34 = vsub.f32 %v3576_v37, %v2674_v44  ;;  %v3578_v23 = vmax.f32 %v3577_v60, 0.0 }
 0x18f   :  { %v1092_v61 = vsub.f32 %v900_v39, %v1002_v24  ;;  %1405 = vlog2.f32 %v824_v55  ;;  %v3580_v39 = vmax.f32 %v3579_v9, 0.0 }
 0x190   :  { %v1396_v40 = vpop.eup %1395  ;;  %v1093_v21 = vsub.f32 %v901_v63, %v1004_v49  ;;  %v906_v46 = vsub.f32 %v3578_v23, %v2680_v56  ;;  %v3581_v63 = vld [vmem:[#allocation46_spill] sm:$0xff] }
 0x191   :  { %v1398_v4 = vpop.eup %1397  ;;  %1156 = vst [vmem:[%s3209_s3 + $0x128] sm:$0xff] %v1092_v61  ;;  %v1006_v45 = vmul.f32 0.6931472, %v1396_v40  ;;  %v826_v33 = vpop.xlane.xlu1 %825  ;;  %v907_v24 = vsub.f32 %v3580_v39, %v2686_v53  ;;  %v3582_v49 = vmax.f32 %v3581_v63, 0.0  ;;  %v3595_v39 = vld [vmem:[#allocation61_spill] sm:$0xff]  ;;  %v3597_v63 = vld [vmem:[#allocation62_spill] sm:$0xff] }
 0x192   :  { %v828_v54 = vpop.xlane.xlu0 %827  ;;  %1157 = vst [vmem:[%s3209_s3 + $0x130] sm:$0xff] %v1093_v21  ;;  %v1008_v58 = vmul.f32 0.6931472, %v1398_v4  ;;  %1407 = vlog2.f32 %v826_v33  ;;  %v3583_v4 = vld [vmem:[#allocation50_spill] sm:$0xff] }
 0x193   :  { %v1094_v41 = vsub.f32 %v902_v5, %v1006_v45  ;;  %1409 = vlog2.f32 %v828_v54  ;;  %v908_v61 = vsub.f32 %v3582_v49, %v2692_v36  ;;  %v3584_v59 = vmax.f32 %v3583_v4, 0.0 }
 0x194   :  { %v1400_v28 = vpop.eup %1399  ;;  %v1095_v30 = vsub.f32 %v903_v29, %v1008_v58  ;;  %v910_v29 = vsub.f32 %v3586_v31, %v2704_v14  ;;  %v3598_v49 = vmax.f32 %v3597_v63, 0.0 }
 0x195   :  { %v1402_v25 = vpop.eup %1401  ;;  %1158 = vst [vmem:[%s3209_s3 + $0x138] sm:$0xff] %v1094_v41  ;;  %v1010_v62 = vmul.f32 0.6931472, %v1400_v28  ;;  %v830_v12 = vpop.xlane.xlu1 %829  ;;  %v909_v26 = vsub.f32 %v3584_v59, %v2698_v3  ;;  %v3587_v28 = vld [vmem:[#allocation56_spill] sm:$0xff] }
 0x196   :  { %v832_v15 = vpop.xlane.xlu0 %831  ;;  %1159 = vst [vmem:[%s3209_s3 + $0x140] sm:$0xff] %v1095_v30  ;;  %v1012_v57 = vmul.f32 0.6931472, %v1402_v25  ;;  %1411 = vlog2.f32 %v830_v12  ;;  %v3588_v30 = vmax.f32 %v3587_v28, 0.0  ;;  %v3589_v12 = vld [vmem:[#allocation58_spill] sm:$0xff] }
 0x197   :  { %v1096_v19 = vsub.f32 %v904_v51, %v1010_v62  ;;  %1413 = vlog2.f32 %v832_v15  ;;  %v3590_v15 = vmax.f32 %v3589_v12, 0.0  ;;  %v3607_v12 = vld [vmem:[#allocation71_spill] sm:$0xff] }
 0x198   :  { %v1404_v20 = vpop.eup %1403  ;;  %v1097_v0 = vsub.f32 %v905_v34, %v1012_v57  ;;  %v911_v25 = vsub.f32 %v3588_v30, %v2710_v2  ;;  %v3591_v57 = vld [vmem:[#allocation59_spill] sm:$0xff] }
 0x199   :  { %v1406_v43 = vpop.eup %1405  ;;  %1160 = vst [vmem:[%s3209_s3 + $0x148] sm:$0xff] %v1096_v19  ;;  %v1014_v44 = vmul.f32 0.6931472, %v1404_v20  ;;  %v834_v48 = vpop.xlane.xlu1 %833  ;;  %v912_v6 = vsub.f32 %v3590_v15, %v2716_v22  ;;  %v3592_v19 = vmax.f32 %v3591_v57, 0.0  ;;  %v3608_v15 = vmax.f32 %v3607_v12, 0.0 }
 0x19a   :  { %v836_v52 = vpop.xlane.xlu0 %835  ;;  %1161 = vst [vmem:[%s3209_s3 + $0x150] sm:$0xff] %v1097_v0  ;;  %v1016_v17 = vmul.f32 0.6931472, %v1406_v43  ;;  %1415 = vlog2.f32 %v834_v48 }
 0x19b   :  { %v1098_v55 = vsub.f32 %v906_v46, %v1014_v44  ;;  %1417 = vlog2.f32 %v836_v52  ;;  %v913_v20 = vsub.f32 %v3592_v19, %v2722_v27  ;;  %v3593_v46 = vld [vmem:[#allocation60_spill] sm:$0xff] }
 0x19c   :  { %v1408_v56 = vpop.eup %1407  ;;  %v1099_v18 = vsub.f32 %v907_v24, %v1016_v17  ;;  %v3594_v44 = vmax.f32 %v3593_v46, 0.0  ;;  %v3596_v24 = vmax.f32 %v3595_v39, 0.0  ;;  %v3609_v19 = vld [vmem:[#allocation72_spill] sm:$0xff] }
 0x19d   :  { %v1410_v35 = vpop.eup %1409  ;;  %1162 = vst [vmem:[%s3209_s3 + $0x158] sm:$0xff] %v1098_v55  ;;  %v1018_v53 = vmul.f32 0.6931472, %v1408_v56  ;;  %v838_v40 = vpop.xlane.xlu1 %837 }
 0x19e   :  { %v840_v21 = vpop.xlane.xlu0 %839  ;;  %1163 = vst [vmem:[%s3209_s3 + $0x160] sm:$0xff] %v1099_v18  ;;  %v1020_v5 = vmul.f32 0.6931472, %v1410_v35  ;;  %1419 = vlog2.f32 %v838_v40  ;;  %v914_v48 = vsub.f32 %v3594_v44, %v2728_v42  ;;  %v915_v17 = vsub.f32 %v3596_v24, %v2734_v38 }
 0x19f   :  { %v1100_v45 = vsub.f32 %v908_v61, %v1018_v53  ;;  %1421 = vlog2.f32 %v840_v21  ;;  %v916_v61 = vsub.f32 %v3598_v49, %v2740_v7  ;;  %v3599_v21 = vld [vmem:[#allocation64_spill] sm:$0xff] }
 0x1a0   :  { %v1412_v36 = vpop.eup %1411  ;;  %v1101_v33 = vsub.f32 %v909_v26, %v1020_v5  ;;  %v3600_v4 = vmax.f32 %v3599_v21, 0.0 }
 0x1a1   :  { %v1414_v54 = vpop.eup %1413  ;;  %1164 = vst [vmem:[%s3209_s3 + $0x168] sm:$0xff] %v1100_v45  ;;  %v1022_v3 = vmul.f32 0.6931472, %v1412_v36  ;;  %v842_v58 = vpop.xlane.xlu1 %841 }
 0x1a2   :  { %v844_v41 = vpop.xlane.xlu0 %843  ;;  %1165 = vst [vmem:[%s3209_s3 + $0x170] sm:$0xff] %v1101_v33  ;;  %v1024_v1 = vmul.f32 0.6931472, %v1414_v54  ;;  %1423 = vlog2.f32 %v842_v58  ;;  %v917_v59 = vsub.f32 %v3600_v4, %v2746_v50  ;;  %v3601_v33 = vld [vmem:[#allocation65_spill] sm:$0xff] }
 0x1a3   :  { %v1102_v11 = vsub.f32 %v910_v29, %v1022_v3  ;;  %1425 = vlog2.f32 %v844_v41  ;;  %v3602_v54 = vmax.f32 %v3601_v33, 0.0  ;;  %v3603_v3 = vld [vmem:[#allocation69_spill] sm:$0xff] }
 0x1a4   :  { %v1416_v14 = vpop.eup %1415  ;;  %v1103_v51 = vsub.f32 %v911_v25, %v1024_v1  ;;  %v3604_v58 = vmax.f32 %v3603_v3, 0.0 }
 0x1a5   :  { %v1418_v62 = vpop.eup %1417  ;;  %1166 = vst [vmem:[%s3209_s3 + $0x178] sm:$0xff] %v1102_v11  ;;  %v1026_v2 = vmul.f32 0.6931472, %v1416_v14  ;;  %v846_v37 = vpop.xlane.xlu1 %845  ;;  %v918_v10 = vsub.f32 %v3602_v54, %v2752_v16  ;;  %v3605_v11 = vld [vmem:[#allocation70_spill] sm:$0xff] }
 0x1a6   :  { %v848_v34 = vpop.xlane.xlu0 %847  ;;  %1167 = vst [vmem:[%s3209_s3 + $0x180] sm:$0xff] %v1103_v51  ;;  %v1028_v0 = vmul.f32 0.6931472, %v1418_v62  ;;  %1427 = vlog2.f32 %v846_v37  ;;  %v919_v41 = vsub.f32 %v3604_v58, %v2758_v32  ;;  %v3606_v14 = vmax.f32 %v3605_v11, 0.0 }
 0x1a7   :  { %v1104_v43 = vsub.f32 %v912_v6, %v1026_v2  ;;  %1429 = vlog2.f32 %v848_v34  ;;  %v921_v6 = vsub.f32 %v3608_v15, %v2770_v8  ;;  %v3611_v8 = vld [vmem:[#allocation57_spill] sm:$0xff] }
 0x1a8   :  { %v1420_v22 = vpop.eup %1419  ;;  %v1105_v60 = vsub.f32 %v913_v20, %v1028_v0  ;;  %v920_v51 = vsub.f32 %v3606_v14, %v2764_v47  ;;  %v3610_v20 = vmax.f32 %v3609_v19, 0.0 }
 0x1a9   :  { %v1422_v23 = vpop.eup %1421  ;;  %1168 = vst [vmem:[%s3209_s3 + $0x188] sm:$0xff] %v1104_v43  ;;  %v1030_v27 = vmul.f32 0.6931472, %v1420_v22  ;;  %v850_v52 = vpop.xlane.xlu1 %849  ;;  %v3612_v22 = vld [vmem:[#allocation73_spill] sm:$0xff] }
 0x1aa   :  { %v852_v9 = vpop.xlane.xlu0 %851  ;;  %1169 = vst [vmem:[%s3209_s3 + $0x190] sm:$0xff] %v1105_v60  ;;  %v1032_v55 = vmul.f32 0.6931472, %v1422_v23  ;;  %1431 = vlog2.f32 %v850_v52  ;;  %v922_v0 = vsub.f32 %v3610_v20, %v2776_v13  ;;  %v3613_v60 = vmax.f32 %v3612_v22, 0.0  ;;  %v3615_v13 = vld [vmem:[#allocation74_spill] sm:$0xff] }
 0x1ab   :  { %v1106_v56 = vsub.f32 %v914_v48, %v1030_v27  ;;  %1433 = vlog2.f32 %v852_v9  ;;  %v3614_v9 = vld [vmem:[#allocation63_spill] sm:$0xff]  ;;  %v3616_v39 = vmax.f32 %v3615_v13, 0.0 }
 0x1ac   :  { %v1424_v42 = vpop.eup %1423  ;;  %v1107_v18 = vsub.f32 %v915_v17, %v1032_v55  ;;  %v923_v23 = vsub.f32 %v3613_v60, %v3611_v8  ;;  %v3617_v55 = vld [vmem:[#allocation67_spill] sm:$0xff] }
 0x1ad   :  { %v1426_v35 = vpop.eup %1425  ;;  %1170 = vst [vmem:[%s3209_s3 + $0x198] sm:$0xff] %v1106_v56  ;;  %v1034_v38 = vmul.f32 0.6931472, %v1424_v42  ;;  %v854_v53 = vpop.xlane.xlu1 %853  ;;  %v924_v24 = vsub.f32 %v3616_v39, %v3614_v9  ;;  %v3618_v56 = vld [vmem:[#allocation75_spill] sm:$0xff] }
 0x1ae   :  { %v856_v40 = vpop.xlane.xlu0 %855  ;;  %1171 = vst [vmem:[%s3209_s3 + $0x1a0] sm:$0xff] %v1107_v18  ;;  %v1036_v26 = vmul.f32 0.6931472, %v1426_v35  ;;  %1435 = vlog2.f32 %v854_v53  ;;  %v3619_v42 = vmax.f32 %v3618_v56, 0.0  ;;  %v3621_v53 = vld [vmem:[#allocation76_spill] sm:$0xff] }
 0x1af   :  { %v1108_v5 = vsub.f32 %v916_v61, %v1034_v38  ;;  %1437 = vlog2.f32 %v856_v40  ;;  %v3620_v38 = vld [vmem:[#allocation85_spill] sm:$0xff]  ;;  %v3622_v40 = vmax.f32 %v3621_v53, 0.0 }
 0x1b0   :  { %v1428_v7 = vpop.eup %1427  ;;  %v1109_v45 = vsub.f32 %v917_v59, %v1036_v26  ;;  %v925_v18 = vsub.f32 %v3619_v42, %v3617_v55 }
 0x1b1   :  { %v1430_v36 = vpop.eup %1429  ;;  %1172 = vst [vmem:[%s3209_s3 + $0x1a8] sm:$0xff] %v1108_v5  ;;  %v1038_v50 = vmul.f32 0.6931472, %v1428_v7  ;;  %v858_v31 = vpop.xlane.xlu1 %857  ;;  %v926_v21 = vsub.f32 %v3622_v40, %v3620_v38 }
 0x1b2   :  { %v860_v29 = vpop.xlane.xlu0 %859  ;;  %1173 = vst [vmem:[%s3209_s3 + $0x1b0] sm:$0xff] %v1109_v45  ;;  %v1040_v28 = vmul.f32 0.6931472, %v1430_v36  ;;  %1439 = vlog2.f32 %v858_v31 }
 0x1b3   :  { %v1110_v30 = vsub.f32 %v918_v10, %v1038_v50  ;;  %1441 = vlog2.f32 %v860_v29 }
 0x1b4   :  { %v1432_v16 = vpop.eup %1431  ;;  %v1111_v25 = vsub.f32 %v919_v41, %v1040_v28 }
 0x1b5   :  { %v1434_v1 = vpop.eup %1433  ;;  %1174 = vst [vmem:[%s3209_s3 + $0x1b8] sm:$0xff] %v1110_v30  ;;  %v1042_v32 = vmul.f32 0.6931472, %v1432_v16  ;;  %v862_v62 = vpop.xlane.xlu1 %861 }
 0x1b6   :  { %1175 = vst [vmem:[%s3209_s3 + $0x1c0] sm:$0xff] %v1111_v25  ;;  %v1044_v2 = vmul.f32 0.6931472, %v1434_v1  ;;  %1443 = vlog2.f32 %v862_v62 }
 0x1b7   :  { %v1112_v37 = vsub.f32 %v920_v51, %v1042_v32 }
 0x1b8   :  { %v1436_v34 = vpop.eup %1435  ;;  %v1113_v57 = vsub.f32 %v921_v6, %v1044_v2 }
 0x1b9   :  { %v1438_v47 = vpop.eup %1437  ;;  %1176 = vst [vmem:[%s3209_s3 + $0x1c8] sm:$0xff] %v1112_v37  ;;  %v1046_v43 = vmul.f32 0.6931472, %v1436_v34 }
 0x1ba   :  { %1177 = vst [vmem:[%s3209_s3 + $0x1d0] sm:$0xff] %v1113_v57  ;;  %v1048_v46 = vmul.f32 0.6931472, %v1438_v47 }
 0x1bb   :  { %v1114_v44 = vsub.f32 %v922_v0, %v1046_v43 }
 0x1bc   :  { %v1440_v48 = vpop.eup %1439  ;;  %v1115_v27 = vsub.f32 %v923_v23, %v1048_v46 }
 0x1bd   :  { %v1442_v52 = vpop.eup %1441  ;;  %1178 = vst [vmem:[%s3209_s3 + $0x1d8] sm:$0xff] %v1114_v44  ;;  %v1050_v17 = vmul.f32 0.6931472, %v1440_v48 }
 0x1be   :  { %1179 = vst [vmem:[%s3209_s3 + $0x1e0] sm:$0xff] %v1115_v27  ;;  %v1052_v35 = vmul.f32 0.6931472, %v1442_v52 }
 0x1bf   :  { %v1116_v63 = vsub.f32 %v924_v24, %v1050_v17 }
 0x1c0   :  { %v1444_v49 = vpop.eup %1443  ;;  %v1117_v61 = vsub.f32 %v925_v18, %v1052_v35 }
 0x1c1   :  { %1180 = vst [vmem:[%s3209_s3 + $0x1e8] sm:$0xff] %v1116_v63  ;;  %v1054_v4 = vmul.f32 0.6931472, %v1444_v49 }
 0x1c2   :  { %1181 = vst [vmem:[%s3209_s3 + $0x1f0] sm:$0xff] %v1117_v61 }
 0x1c3   :  { %v1118_v59 = vsub.f32 %v926_v21, %v1054_v4 }
 0x1c5   :  { %1182 = vst [vmem:[%s3209_s3 + $0x1f8] sm:$0xff] %v1118_v59 }

</bundles_post_ra>
